<compile_context>
chip_gen: v7x
topology: tpu7x:2x2x1
jax: 0.10.0
libtpu: 0.0.40
codegen_flags: <defaults>
</compile_context>

<pallas_src>
import functools
import math

import jax
import jax.numpy as jnp
from jax.experimental import pallas as pl
from jax.experimental.pallas import tpu as pltpu


_CONV_TILE_M = 4096                    # max row tile for the conv matmuls
_HEAD_TILE_M = 1024                    # max row tile for the fused head
_CONV_VMEM = 32 * 1024 * 1024
_HEAD_VMEM = 48 * 1024 * 1024          # <= v7x physical (64 MiB/TC); ample on v5e/v6e


def _round_up(x, m):
    return -(-x // m) * m


def _pick_tm(m, max_tile):
    """Row tile: <= ~max_tile, a multiple of 8 (or == m), and chosen so the grid has
    >= 2 programs whenever m is large enough (v7x shards 'parallel' axes over 2 TCs)."""
    if m < 16:
        return m                                   # single full-size block (== dim: legal)
    progs = max(2, -(-m // max_tile))
    tm = -(-m // progs)
    return min(_round_up(tm, 8), m)


# -----------------------------------------------------------------------------
# Pallas kernels
# -----------------------------------------------------------------------------
def _mm_bias_act_kernel(x_ref, w_ref, b_ref, o_ref, *, relu):
    """o = [relu](x @ w + b).  x:(tm,K) bf16, w:(K,N) bf16, b:(1,N) f32."""
    acc = jnp.dot(x_ref[...], w_ref[...], preferred_element_type=jnp.float32)
    acc = acc + b_ref[...]
    if relu:
        acc = jnp.maximum(acc, 0.0)
    o_ref[...] = acc.astype(o_ref.dtype)


def pallas_matmul(x, w, b, *, relu=False, out_dtype=jnp.float32, max_tile=_CONV_TILE_M):
    """Row-tiled matmul+bias(+ReLU).  x:(M,K), w:(K,N) bf16, b:(N,) f32.

    The M axis is gridded ('parallel'); weights/bias use constant index maps so they
    stay resident in VMEM across row tiles.
    """
    M, K = x.shape
    N = w.shape[1]
    tm = _pick_tm(M, max_tile)
    grid = (pl.cdiv(M, tm),)
    kernel = functools.partial(_mm_bias_act_kernel, relu=relu)
    return pl.pallas_call(
        kernel,
        out_shape=jax.ShapeDtypeStruct((M, N), out_dtype),
        grid_spec=pltpu.PrefetchScalarGridSpec(
            num_scalar_prefetch=0,
            grid=grid,
            in_specs=[pl.BlockSpec((tm, K), lambda i: (i, 0)),
                      pl.BlockSpec((K, N), lambda i: (0, 0)),
                      pl.BlockSpec((1, N), lambda i: (0, 0))],
            out_specs=pl.BlockSpec((tm, N), lambda i: (i, 0)),
        ),
        compiler_params=pltpu.CompilerParams(
            dimension_semantics=("parallel",),
            vmem_limit_bytes=_CONV_VMEM),
    )(x.astype(jnp.bfloat16), w, b.reshape(1, N).astype(jnp.float32))


def _rainbow_head_kernel(feat_ref, w1_ref, b1_ref, w2v_ref, b2v_ref, w2a_ref, b2a_ref,
                         sup_ref, q_ref, *, hidden, n_actions, n_atoms, atom_pad):
    """Fused noisy value/advantage streams + dueling + distributional epilogue.

    feat:(tm,3136) bf16, w1:(3136, 2*hidden) bf16 (value columns first),
    w2v:(hidden, atom_pad) bf16, w2a:(hidden, n_actions*atom_pad) bf16 (128-lane
    padded per action), biases/support f32.  Everything after the first matmul stays
    in VMEM; only (tm, n_actions) Q-values are written out.
    """
    h = jnp.dot(feat_ref[...], w1_ref[...], preferred_element_type=jnp.float32)
    h = jnp.maximum(h + b1_ref[...], 0.0).astype(jnp.bfloat16)          # bias+ReLU in f32
    v = jnp.dot(h[:, :hidden], w2v_ref[...],
                preferred_element_type=jnp.float32) + b2v_ref[...]       # (tm, atom_pad)
    a = jnp.dot(h[:, hidden:], w2a_ref[...],
                preferred_element_type=jnp.float32) + b2a_ref[...]       # (tm, n_act*atom_pad)

    # Per-action, lane-aligned 128-wide slices (padded atom columns carry zeros).
    a_j = [a[:, j * atom_pad:(j + 1) * atom_pad] for j in range(n_actions)]
    a_mean = a_j[0]
    for j in range(1, n_actions):
        a_mean = a_mean + a_j[j]
    a_mean = a_mean * (1.0 / n_actions)

    atom = jax.lax.broadcasted_iota(jnp.int32, (1, atom_pad), 1)
    valid = atom < n_atoms                                               # mask padded atoms
    act = jax.lax.broadcasted_iota(jnp.int32, (1, n_actions), 1)
    sup = sup_ref[...]                                                   # (1, atom_pad) f32

    q = None
    for j in range(n_actions):
        lg = jnp.where(valid, v + a_j[j] - a_mean, -1e30)                # masked logits
        m = jnp.max(lg, axis=-1, keepdims=True)
        p = jnp.exp(lg - m)                                              # padded lanes -> 0
        qj = (jnp.sum(p * sup, axis=-1, keepdims=True)
              / jnp.sum(p, axis=-1, keepdims=True))                      # (tm, 1)
        term = jnp.where(act == j, qj, 0.0)                              # place in column j
        q = term if q is None else q + term
    q_ref[...] = q.astype(q_ref.dtype)


def pallas_rainbow_head(feat, params, n_actions, n_atoms, atom_pad, max_tile=_HEAD_TILE_M):
    B, K = feat.shape
    H2 = params["w1"].shape[1]
    hidden = H2 // 2
    na_pad = n_actions * atom_pad
    tm = _pick_tm(B, max_tile)
    grid = (pl.cdiv(B, tm),)
    kernel = functools.partial(_rainbow_head_kernel, hidden=hidden, n_actions=n_actions,
                               n_atoms=n_atoms, atom_pad=atom_pad)
    row = lambda i: (i, 0)
    const = lambda i: (0, 0)
    return pl.pallas_call(
        kernel,
        out_shape=jax.ShapeDtypeStruct((B, n_actions), jnp.float32),
        grid_spec=pltpu.PrefetchScalarGridSpec(
            num_scalar_prefetch=0,
            grid=grid,
            in_specs=[pl.BlockSpec((tm, K), row),
                      pl.BlockSpec((K, H2), const),
                      pl.BlockSpec((1, H2), const),
                      pl.BlockSpec((hidden, atom_pad), const),
                      pl.BlockSpec((1, atom_pad), const),
                      pl.BlockSpec((hidden, na_pad), const),
                      pl.BlockSpec((1, na_pad), const),
                      pl.BlockSpec((1, atom_pad), const)],
            out_specs=pl.BlockSpec((tm, n_actions), row),
        ),
        compiler_params=pltpu.CompilerParams(
            dimension_semantics=("parallel",),
            vmem_limit_bytes=_HEAD_VMEM),
    )(feat.astype(jnp.bfloat16),
      params["w1"], params["b1"].reshape(1, H2),
      params["w2v"], params["b2v"].reshape(1, atom_pad),
      params["w2a"], params["b2a"].reshape(1, na_pad),
      params["support"].reshape(1, atom_pad))


# -----------------------------------------------------------------------------
# Conv layer = NHWC im2col (jitted XLA glue, lane-dense) + Pallas matmul kernel
# -----------------------------------------------------------------------------
def conv2d_relu_nhwc(x, w_flat, b, kh, kw, stride):
    """x:(B,H,W,Cin) NHWC bf16, w_flat:(KH*KW*Cin, Cout) with (kh,kw,ci) row order."""
    B, H, W, C = x.shape
    OH = (H - kh) // stride + 1
    OW = (W - kw) // stride + 1
    patches = []
    for i in range(kh):
        for j in range(kw):
            patches.append(x[:, i:i + stride * OH:stride, j:j + stride * OW:stride, :])
    # Lane-dense: concat along channels -> (B, OH, OW, KH*KW*Cin), cols order (kh,kw,ci).
    cols = jnp.concatenate(patches, axis=-1)
    cols = cols.reshape(B * OH * OW, kh * kw * C)            # leading-dim reshape: free
    out = pallas_matmul(cols, w_flat, b, relu=True, out_dtype=jnp.bfloat16)
    return out.reshape(B, OH, OW, w_flat.shape[1])           # stays NHWC, no transpose


# -----------------------------------------------------------------------------
# Deterministic parameter construction (mirrors module __init__ shapes)
# -----------------------------------------------------------------------------
def _scale_noise(e):
    return jnp.sign(e) * jnp.sqrt(jnp.abs(e))


def _noisy_linear_params(key, in_f, out_f, std_init=0.5):
    """Effective training-mode (w:(in_f,out_f), b:(out_f,)): mu + sigma * eps."""
    mu_range = 1.0 / math.sqrt(in_f)
    k1, k2, k3, k4 = jax.random.split(key, 4)
    weight_mu = jax.random.uniform(k1, (out_f, in_f), jnp.float32, -mu_range, mu_range)
    weight_sigma = jnp.full((out_f, in_f), std_init * mu_range, jnp.float32)
    bias_mu = jax.random.uniform(k2, (out_f,), jnp.float32, -mu_range, mu_range)
    bias_sigma = jnp.full((out_f,), std_init * mu_range, jnp.float32)
    eps_in = _scale_noise(jax.random.normal(k3, (in_f,), jnp.float32))
    eps_out = _scale_noise(jax.random.normal(k4, (out_f,), jnp.float32))
    w = weight_mu + weight_sigma * jnp.outer(eps_out, eps_in)
    b = bias_mu + bias_sigma * eps_out
    return w.T, b                                            # (in_f, out_f), (out_f,)


def _conv_params(key, cout, cin, k):
    fan_in = cin * k * k
    bound = 1.0 / math.sqrt(fan_in)
    k1, k2 = jax.random.split(key)
    w = jax.random.uniform(k1, (cout, cin, k, k), jnp.float32, -bound, bound)
    b = jax.random.uniform(k2, (cout,), jnp.float32, -bound, bound)
    # Pre-flatten for the NHWC im2col layout (rows ordered kh, kw, cin); pre-cast bf16.
    w_flat = w.transpose(2, 3, 1, 0).reshape(cin * k * k, cout)
    return w_flat.astype(jnp.bfloat16), b.astype(jnp.float32)


def make_params(key, n_actions, n_atoms, v_min=-10.0, v_max=10.0,
                hidden=512, feat_hw=7, feat_c=64):
    keys = jax.random.split(key, 7)
    p = {}
    p["conv1_w"], p["conv1_b"] = _conv_params(keys[0], 32, 4, 8)
    p["conv2_w"], p["conv2_b"] = _conv_params(keys[1], 64, 32, 4)
    p["conv3_w"], p["conv3_b"] = _conv_params(keys[2], 64, 64, 3)

    feat_dim = feat_hw * feat_hw * feat_c                    # 3136
    vw1, vb1 = _noisy_linear_params(keys[3], feat_dim, hidden)
    vw2, vb2 = _noisy_linear_params(keys[4], hidden, n_atoms)
    aw1, ab1 = _noisy_linear_params(keys[5], feat_dim, hidden)
    aw2, ab2 = _noisy_linear_params(keys[6], hidden, n_actions * n_atoms)

    # One-time row permutation of the first FC layer so the NHWC (h,w,c) flatten
    # matches PyTorch's NCHW (c,h,w) flatten.
    perm = (jnp.arange(feat_dim).reshape(feat_c, feat_hw, feat_hw)
            .transpose(1, 2, 0).reshape(-1))
    vw1 = vw1[perm]
    aw1 = aw1[perm]

    # Fuse value/advantage first layers along N (value columns first); pre-cast bf16.
    p["w1"] = jnp.concatenate([vw1, aw1], axis=1).astype(jnp.bfloat16)   # (3136, 1024)
    p["b1"] = jnp.concatenate([vb1, ab1], axis=0).astype(jnp.float32)    # (1024,)

    # Pad the atom axis of the second layers to a lane-aligned width (zeros beyond
    # n_atoms); padded atoms are masked out of the softmax inside the head kernel.
    atom_pad = _round_up(n_atoms, 128)
    p["w2v"] = (jnp.zeros((hidden, atom_pad), jnp.float32)
                .at[:, :n_atoms].set(vw2)).astype(jnp.bfloat16)          # (512, 128)
    p["b2v"] = jnp.zeros((atom_pad,), jnp.float32).at[:n_atoms].set(vb2)
    aw2 = aw2.reshape(hidden, n_actions, n_atoms)
    ab2 = ab2.reshape(n_actions, n_atoms)
    p["w2a"] = (jnp.zeros((hidden, n_actions, atom_pad), jnp.float32)
                .at[:, :, :n_atoms].set(aw2)
                .reshape(hidden, n_actions * atom_pad)).astype(jnp.bfloat16)
    p["b2a"] = (jnp.zeros((n_actions, atom_pad), jnp.float32)
                .at[:, :n_atoms].set(ab2).reshape(n_actions * atom_pad))
    p["support"] = (jnp.zeros((atom_pad,), jnp.float32)
                    .at[:n_atoms].set(jnp.linspace(v_min, v_max, n_atoms)))
    return p


# -----------------------------------------------------------------------------
# Full forward pass (Q-values, shape (B, n_actions))
# -----------------------------------------------------------------------------
def rainbow_forward(x, params, n_actions, n_atoms):
    """x: (B, 4, 84, 84) NCHW float32 -> Q-values (B, n_actions) float32."""
    B = x.shape[0]
    atom_pad = _round_up(n_atoms, 128)
    x = x.astype(jnp.bfloat16).transpose(0, 2, 3, 1)                        # NHWC once
    x = conv2d_relu_nhwc(x, params["conv1_w"], params["conv1_b"], 8, 8, 4)  # (B,20,20,32)
    x = conv2d_relu_nhwc(x, params["conv2_w"], params["conv2_b"], 4, 4, 2)  # (B,9,9,64)
    x = conv2d_relu_nhwc(x, params["conv3_w"], params["conv3_b"], 3, 3, 1)  # (B,7,7,64)
    feat = x.reshape(B, -1)                                                 # (B,3136) hwc
    # Fused noisy FC streams + dueling + distributional epilogue, one Pallas call.
    return pallas_rainbow_head(feat, params, n_actions, n_atoms, atom_pad)  # (B, n_actions)


if __name__ == "__main__":
    n_actions, n_atoms = 6, 51
    B = 2  # spatial must be 84x84 to match the 7*7*64 flatten in the module
    key = jax.random.PRNGKey(0)
    k_params, k_x = jax.random.split(key)
    params = make_params(k_params, n_actions, n_atoms)
    x = jax.random.normal(k_x, (B, 4, 84, 84), jnp.float32)

    fwd = jax.jit(functools.partial(rainbow_forward, n_actions=n_actions, n_atoms=n_atoms))
    q = jax.block_until_ready(fwd(x, params))
    assert q.shape == (B, n_actions) and q.dtype == jnp.float32
    assert bool(jnp.all(jnp.isfinite(q)))
    print("KERNEL_OK")
</pallas_src>

<mosaic_0001>
module attributes {stable_mosaic.version = 11 : i64} {
  func.func @_mm_bias_act_kernel(%arg0: i32, %arg1: memref<400x256xbf16, #tpu.memory_space<vmem>>, %arg2: memref<256x32xbf16, #tpu.memory_space<vmem>>, %arg3: memref<1x32xf32, #tpu.memory_space<vmem>>, %arg4: memref<400x32xbf16, #tpu.memory_space<vmem>>) attributes {dimension_semantics = [#tpu.dimension_semantics<parallel>], iteration_bounds = array<i64: 2>, scalar_prefetch = 0 : i64, scratch_operands = 0 : i64, tpu.core_type = #tpu.core_type<tc>, window_params = [{transform_indices = @transform_0, window_bounds = array<i64: 400, 256>}, {pipeline_mode = #tpu.pipeline_mode<synchronous>, transform_indices = @transform_1, window_bounds = array<i64: 256, 32>}, {pipeline_mode = #tpu.pipeline_mode<synchronous>, transform_indices = @transform_2, window_bounds = array<i64: 1, 32>}, {transform_indices = @transform_3, window_bounds = array<i64: 400, 32>}]} {
    %c0 = arith.constant 0 : index
    %c0_0 = arith.constant 0 : index
    %0 = vector.load %arg1[%c0, %c0_0] : memref<400x256xbf16, #tpu.memory_space<vmem>>, vector<400x256xbf16>
    %c0_1 = arith.constant 0 : index
    %c0_2 = arith.constant 0 : index
    %1 = vector.load %arg2[%c0_1, %c0_2] : memref<256x32xbf16, #tpu.memory_space<vmem>>, vector<256x32xbf16>
    %cst = arith.constant dense<0.000000e+00> : vector<400x32xf32>
    %2 = tpu.matmul %0, %1, %cst {dimension_numbers = #tpu.dot_dimension_numbers<[1], [0], [0], [1], [0, 0, 1, 1], [], []>} : vector<400x256xbf16>, vector<256x32xbf16>, vector<400x32xf32> -> vector<400x32xf32>
    %c0_3 = arith.constant 0 : index
    %c0_4 = arith.constant 0 : index
    %3 = vector.load %arg3[%c0_3, %c0_4] : memref<1x32xf32, #tpu.memory_space<vmem>>, vector<1x32xf32>
    %4 = vector.broadcast %3 : vector<1x32xf32> to vector<400x32xf32>
    %5 = arith.addf %2, %4 : vector<400x32xf32>
    %cst_5 = arith.constant 0.000000e+00 : f32
    %6 = vector.broadcast %cst_5 : f32 to vector<400x32xf32>
    %7 = arith.maximumf %5, %6 : vector<400x32xf32>
    %8 = arith.truncf %7 : vector<400x32xf32> to vector<400x32xbf16>
    %c0_6 = arith.constant 0 : index
    %c0_7 = arith.constant 0 : index
    %9 = vector.load %arg4[%c0_6, %c0_7] : memref<400x32xbf16, #tpu.memory_space<vmem>>, vector<400x32xbf16>
    tpu.vector_store %arg4[%c0_6, %c0_7], %8 {strides = array<i32>} : memref<400x32xbf16, #tpu.memory_space<vmem>>, vector<400x32xbf16>,
    return
  }
  func.func @transform_0(%arg0: i32) -> (i32, i32) {
    %c0_i32 = arith.constant 0 : i32
    %c0_i32_0 = arith.constant 0 : i32
    return %arg0, %c0_i32 : i32, i32
  }
  func.func @transform_1(%arg0: i32) -> (i32, i32) {
    %c0_i32 = arith.constant 0 : i32
    %c0_i32_0 = arith.constant 0 : i32
    %c0_i32_1 = arith.constant 0 : i32
    return %c0_i32, %c0_i32_0 : i32, i32
  }
  func.func @transform_2(%arg0: i32) -> (i32, i32) {
    %c0_i32 = arith.constant 0 : i32
    %c0_i32_0 = arith.constant 0 : i32
    %c0_i32_1 = arith.constant 0 : i32
    return %c0_i32, %c0_i32_0 : i32, i32
  }
  func.func @transform_3(%arg0: i32) -> (i32, i32) {
    %c0_i32 = arith.constant 0 : i32
    %c0_i32_0 = arith.constant 0 : i32
    return %arg0, %c0_i32 : i32, i32
  }
}

module attributes {stable_mosaic.version = 11 : i64} {
  func.func @_mm_bias_act_kernel(%arg0: i32, %arg1: memref<88x512xbf16, #tpu.memory_space<vmem>>, %arg2: memref<512x64xbf16, #tpu.memory_space<vmem>>, %arg3: memref<1x64xf32, #tpu.memory_space<vmem>>, %arg4: memref<88x64xbf16, #tpu.memory_space<vmem>>) attributes {dimension_semantics = [#tpu.dimension_semantics<parallel>], iteration_bounds = array<i64: 2>, scalar_prefetch = 0 : i64, scratch_operands = 0 : i64, tpu.core_type = #tpu.core_type<tc>, window_params = [{transform_indices = @transform_0, window_bounds = array<i64: 88, 512>}, {pipeline_mode = #tpu.pipeline_mode<synchronous>, transform_indices = @transform_1, window_bounds = array<i64: 512, 64>}, {pipeline_mode = #tpu.pipeline_mode<synchronous>, transform_indices = @transform_2, window_bounds = array<i64: 1, 64>}, {transform_indices = @transform_3, window_bounds = array<i64: 88, 64>}]} {
    %c0 = arith.constant 0 : index
    %c0_0 = arith.constant 0 : index
    %0 = vector.load %arg1[%c0, %c0_0] : memref<88x512xbf16, #tpu.memory_space<vmem>>, vector<88x512xbf16>
    %c0_1 = arith.constant 0 : index
    %c0_2 = arith.constant 0 : index
    %1 = vector.load %arg2[%c0_1, %c0_2] : memref<512x64xbf16, #tpu.memory_space<vmem>>, vector<512x64xbf16>
    %cst = arith.constant dense<0.000000e+00> : vector<88x64xf32>
    %2 = tpu.matmul %0, %1, %cst {dimension_numbers = #tpu.dot_dimension_numbers<[1], [0], [0], [1], [0, 0, 1, 1], [], []>} : vector<88x512xbf16>, vector<512x64xbf16>, vector<88x64xf32> -> vector<88x64xf32>
    %c0_3 = arith.constant 0 : index
    %c0_4 = arith.constant 0 : index
    %3 = vector.load %arg3[%c0_3, %c0_4] : memref<1x64xf32, #tpu.memory_space<vmem>>, vector<1x64xf32>
    %4 = vector.broadcast %3 : vector<1x64xf32> to vector<88x64xf32>
    %5 = arith.addf %2, %4 : vector<88x64xf32>
    %cst_5 = arith.constant 0.000000e+00 : f32
    %6 = vector.broadcast %cst_5 : f32 to vector<88x64xf32>
    %7 = arith.maximumf %5, %6 : vector<88x64xf32>
    %8 = arith.truncf %7 : vector<88x64xf32> to vector<88x64xbf16>
    %c0_6 = arith.constant 0 : index
    %c0_7 = arith.constant 0 : index
    %9 = vector.load %arg4[%c0_6, %c0_7] : memref<88x64xbf16, #tpu.memory_space<vmem>>, vector<88x64xbf16>
    tpu.vector_store %arg4[%c0_6, %c0_7], %8 {strides = array<i32>} : memref<88x64xbf16, #tpu.memory_space<vmem>>, vector<88x64xbf16>,
    return
  }
  func.func @transform_0(%arg0: i32) -> (i32, i32) {
    %c0_i32 = arith.constant 0 : i32
    %c0_i32_0 = arith.constant 0 : i32
    return %arg0, %c0_i32 : i32, i32
  }
  func.func @transform_1(%arg0: i32) -> (i32, i32) {
    %c0_i32 = arith.constant 0 : i32
    %c0_i32_0 = arith.constant 0 : i32
    %c0_i32_1 = arith.constant 0 : i32
    return %c0_i32, %c0_i32_0 : i32, i32
  }
  func.func @transform_2(%arg0: i32) -> (i32, i32) {
    %c0_i32 = arith.constant 0 : i32
    %c0_i32_0 = arith.constant 0 : i32
    %c0_i32_1 = arith.constant 0 : i32
    return %c0_i32, %c0_i32_0 : i32, i32
  }
  func.func @transform_3(%arg0: i32) -> (i32, i32) {
    %c0_i32 = arith.constant 0 : i32
    %c0_i32_0 = arith.constant 0 : i32
    return %arg0, %c0_i32 : i32, i32
  }
}

module attributes {stable_mosaic.version = 11 : i64} {
  func.func @_mm_bias_act_kernel(%arg0: i32, %arg1: memref<56x576xbf16, #tpu.memory_space<vmem>>, %arg2: memref<576x64xbf16, #tpu.memory_space<vmem>>, %arg3: memref<1x64xf32, #tpu.memory_space<vmem>>, %arg4: memref<56x64xbf16, #tpu.memory_space<vmem>>) attributes {dimension_semantics = [#tpu.dimension_semantics<parallel>], iteration_bounds = array<i64: 2>, scalar_prefetch = 0 : i64, scratch_operands = 0 : i64, tpu.core_type = #tpu.core_type<tc>, window_params = [{transform_indices = @transform_0, window_bounds = array<i64: 56, 576>}, {pipeline_mode = #tpu.pipeline_mode<synchronous>, transform_indices = @transform_1, window_bounds = array<i64: 576, 64>}, {pipeline_mode = #tpu.pipeline_mode<synchronous>, transform_indices = @transform_2, window_bounds = array<i64: 1, 64>}, {transform_indices = @transform_3, window_bounds = array<i64: 56, 64>}]} {
    %c0 = arith.constant 0 : index
    %c0_0 = arith.constant 0 : index
    %0 = vector.load %arg1[%c0, %c0_0] : memref<56x576xbf16, #tpu.memory_space<vmem>>, vector<56x576xbf16>
    %c0_1 = arith.constant 0 : index
    %c0_2 = arith.constant 0 : index
    %1 = vector.load %arg2[%c0_1, %c0_2] : memref<576x64xbf16, #tpu.memory_space<vmem>>, vector<576x64xbf16>
    %cst = arith.constant dense<0.000000e+00> : vector<56x64xf32>
    %2 = tpu.matmul %0, %1, %cst {dimension_numbers = #tpu.dot_dimension_numbers<[1], [0], [0], [1], [0, 0, 1, 1], [], []>} : vector<56x576xbf16>, vector<576x64xbf16>, vector<56x64xf32> -> vector<56x64xf32>
    %c0_3 = arith.constant 0 : index
    %c0_4 = arith.constant 0 : index
    %3 = vector.load %arg3[%c0_3, %c0_4] : memref<1x64xf32, #tpu.memory_space<vmem>>, vector<1x64xf32>
    %4 = vector.broadcast %3 : vector<1x64xf32> to vector<56x64xf32>
    %5 = arith.addf %2, %4 : vector<56x64xf32>
    %cst_5 = arith.constant 0.000000e+00 : f32
    %6 = vector.broadcast %cst_5 : f32 to vector<56x64xf32>
    %7 = arith.maximumf %5, %6 : vector<56x64xf32>
    %8 = arith.truncf %7 : vector<56x64xf32> to vector<56x64xbf16>
    %c0_6 = arith.constant 0 : index
    %c0_7 = arith.constant 0 : index
    %9 = vector.load %arg4[%c0_6, %c0_7] : memref<56x64xbf16, #tpu.memory_space<vmem>>, vector<56x64xbf16>
    tpu.vector_store %arg4[%c0_6, %c0_7], %8 {strides = array<i32>} : memref<56x64xbf16, #tpu.memory_space<vmem>>, vector<56x64xbf16>,
    return
  }
  func.func @transform_0(%arg0: i32) -> (i32, i32) {
    %c0_i32 = arith.constant 0 : i32
    %c0_i32_0 = arith.constant 0 : i32
    return %arg0, %c0_i32 : i32, i32
  }
  func.func @transform_1(%arg0: i32) -> (i32, i32) {
    %c0_i32 = arith.constant 0 : i32
    %c0_i32_0 = arith.constant 0 : i32
    %c0_i32_1 = arith.constant 0 : i32
    return %c0_i32, %c0_i32_0 : i32, i32
  }
  func.func @transform_2(%arg0: i32) -> (i32, i32) {
    %c0_i32 = arith.constant 0 : i32
    %c0_i32_0 = arith.constant 0 : i32
    %c0_i32_1 = arith.constant 0 : i32
    return %c0_i32, %c0_i32_0 : i32, i32
  }
  func.func @transform_3(%arg0: i32) -> (i32, i32) {
    %c0_i32 = arith.constant 0 : i32
    %c0_i32_0 = arith.constant 0 : i32
    return %arg0, %c0_i32 : i32, i32
  }
}

module attributes {stable_mosaic.version = 11 : i64} {
  func.func @_rainbow_head_kernel(%arg0: i32, %arg1: memref<2x3136xbf16, #tpu.memory_space<vmem>>, %arg2: memref<3136x1024xbf16, #tpu.memory_space<vmem>>, %arg3: memref<1x1024xf32, #tpu.memory_space<vmem>>, %arg4: memref<512x128xbf16, #tpu.memory_space<vmem>>, %arg5: memref<1x128xf32, #tpu.memory_space<vmem>>, %arg6: memref<512x768xbf16, #tpu.memory_space<vmem>>, %arg7: memref<1x768xf32, #tpu.memory_space<vmem>>, %arg8: memref<1x128xf32, #tpu.memory_space<vmem>>, %arg9: memref<2x6xf32, #tpu.memory_space<vmem>>) attributes {dimension_semantics = [#tpu.dimension_semantics<parallel>], iteration_bounds = array<i64: 1>, scalar_prefetch = 0 : i64, scratch_operands = 0 : i64, tpu.core_type = #tpu.core_type<tc>, window_params = [{transform_indices = @transform_0, window_bounds = array<i64: 2, 3136>}, {pipeline_mode = #tpu.pipeline_mode<synchronous>, transform_indices = @transform_1, window_bounds = array<i64: 3136, 1024>}, {pipeline_mode = #tpu.pipeline_mode<synchronous>, transform_indices = @transform_2, window_bounds = array<i64: 1, 1024>}, {pipeline_mode = #tpu.pipeline_mode<synchronous>, transform_indices = @transform_3, window_bounds = array<i64: 512, 128>}, {pipeline_mode = #tpu.pipeline_mode<synchronous>, transform_indices = @transform_4, window_bounds = array<i64: 1, 128>}, {pipeline_mode = #tpu.pipeline_mode<synchronous>, transform_indices = @transform_5, window_bounds = array<i64: 512, 768>}, {pipeline_mode = #tpu.pipeline_mode<synchronous>, transform_indices = @transform_6, window_bounds = array<i64: 1, 768>}, {pipeline_mode = #tpu.pipeline_mode<synchronous>, transform_indices = @transform_7, window_bounds = array<i64: 1, 128>}, {transform_indices = @transform_8, window_bounds = array<i64: 2, 6>}]} {
    %c0 = arith.constant 0 : index
    %c0_0 = arith.constant 0 : index
    %0 = vector.load %arg1[%c0, %c0_0] : memref<2x3136xbf16, #tpu.memory_space<vmem>>, vector<2x3136xbf16>
    %c0_1 = arith.constant 0 : index
    %c0_2 = arith.constant 0 : index
    %1 = vector.load %arg2[%c0_1, %c0_2] : memref<3136x1024xbf16, #tpu.memory_space<vmem>>, vector<3136x1024xbf16>
    %cst = arith.constant dense<0.000000e+00> : vector<2x1024xf32>
    %2 = tpu.matmul %0, %1, %cst {dimension_numbers = #tpu.dot_dimension_numbers<[1], [0], [0], [1], [0, 0, 1, 1], [], []>} : vector<2x3136xbf16>, vector<3136x1024xbf16>, vector<2x1024xf32> -> vector<2x1024xf32>
    %c0_3 = arith.constant 0 : index
    %c0_4 = arith.constant 0 : index
    %3 = vector.load %arg3[%c0_3, %c0_4] : memref<1x1024xf32, #tpu.memory_space<vmem>>, vector<1x1024xf32>
    %4 = vector.broadcast %3 : vector<1x1024xf32> to vector<2x1024xf32>
    %5 = arith.addf %2, %4 : vector<2x1024xf32>
    %cst_5 = arith.constant 0.000000e+00 : f32
    %6 = vector.broadcast %cst_5 : f32 to vector<2x1024xf32>
    %7 = arith.maximumf %5, %6 : vector<2x1024xf32>
    %8 = arith.truncf %7 : vector<2x1024xf32> to vector<2x1024xbf16>
    %9 = vector.extract_strided_slice %8 {offsets = [0, 0], sizes = [2, 512], strides = [1, 1]} : vector<2x1024xbf16> to vector<2x512xbf16>
    %c0_6 = arith.constant 0 : index
    %c0_7 = arith.constant 0 : index
    %10 = vector.load %arg4[%c0_6, %c0_7] : memref<512x128xbf16, #tpu.memory_space<vmem>>, vector<512x128xbf16>
    %cst_8 = arith.constant dense<0.000000e+00> : vector<2x128xf32>
    %11 = tpu.matmul %9, %10, %cst_8 {dimension_numbers = #tpu.dot_dimension_numbers<[1], [0], [0], [1], [0, 0, 1, 1], [], []>} : vector<2x512xbf16>, vector<512x128xbf16>, vector<2x128xf32> -> vector<2x128xf32>
    %c0_9 = arith.constant 0 : index
    %c0_10 = arith.constant 0 : index
    %12 = vector.load %arg5[%c0_9, %c0_10] : memref<1x128xf32, #tpu.memory_space<vmem>>, vector<1x128xf32>
    %13 = vector.broadcast %12 : vector<1x128xf32> to vector<2x128xf32>
    %14 = arith.addf %11, %13 : vector<2x128xf32>
    %15 = vector.extract_strided_slice %8 {offsets = [0, 512], sizes = [2, 512], strides = [1, 1]} : vector<2x1024xbf16> to vector<2x512xbf16>
    %c0_11 = arith.constant 0 : index
    %c0_12 = arith.constant 0 : index
    %16 = vector.load %arg6[%c0_11, %c0_12] : memref<512x768xbf16, #tpu.memory_space<vmem>>, vector<512x768xbf16>
    %cst_13 = arith.constant dense<0.000000e+00> : vector<2x768xf32>
    %17 = tpu.matmul %15, %16, %cst_13 {dimension_numbers = #tpu.dot_dimension_numbers<[1], [0], [0], [1], [0, 0, 1, 1], [], []>} : vector<2x512xbf16>, vector<512x768xbf16>, vector<2x768xf32> -> vector<2x768xf32>
    %c0_14 = arith.constant 0 : index
    %c0_15 = arith.constant 0 : index
    %18 = vector.load %arg7[%c0_14, %c0_15] : memref<1x768xf32, #tpu.memory_space<vmem>>, vector<1x768xf32>
    %19 = vector.broadcast %18 : vector<1x768xf32> to vector<2x768xf32>
    %20 = arith.addf %17, %19 : vector<2x768xf32>
    %21 = vector.extract_strided_slice %20 {offsets = [0, 0], sizes = [2, 128], strides = [1, 1]} : vector<2x768xf32> to vector<2x128xf32>
    %22 = vector.extract_strided_slice %20 {offsets = [0, 128], sizes = [2, 128], strides = [1, 1]} : vector<2x768xf32> to vector<2x128xf32>
    %23 = vector.extract_strided_slice %20 {offsets = [0, 256], sizes = [2, 128], strides = [1, 1]} : vector<2x768xf32> to vector<2x128xf32>
    %24 = vector.extract_strided_slice %20 {offsets = [0, 384], sizes = [2, 128], strides = [1, 1]} : vector<2x768xf32> to vector<2x128xf32>
    %25 = vector.extract_strided_slice %20 {offsets = [0, 512], sizes = [2, 128], strides = [1, 1]} : vector<2x768xf32> to vector<2x128xf32>
    %26 = vector.extract_strided_slice %20 {offsets = [0, 640], sizes = [2, 128], strides = [1, 1]} : vector<2x768xf32> to vector<2x128xf32>
    %27 = arith.addf %21, %22 : vector<2x128xf32>
    %28 = arith.addf %27, %23 : vector<2x128xf32>
    %29 = arith.addf %28, %24 : vector<2x128xf32>
    %30 = arith.addf %29, %25 : vector<2x128xf32>
    %31 = arith.addf %30, %26 : vector<2x128xf32>
    %cst_16 = arith.constant 0.166666672 : f32
    %32 = vector.broadcast %cst_16 : f32 to vector<2x128xf32>
    %33 = arith.mulf %31, %32 : vector<2x128xf32>
    %34 = tpu.iota {dimensions = array<i32: 1>} : vector<1x128xi32>
    %c51_i32 = arith.constant 51 : i32
    %35 = vector.broadcast %c51_i32 : i32 to vector<1x128xi32>
    %36 = arith.cmpi slt, %34, %35 : vector<1x128xi32>
    %37 = tpu.iota {dimensions = array<i32: 1>} : vector<1x6xi32>
    %c0_17 = arith.constant 0 : index
    %c0_18 = arith.constant 0 : index
    %38 = vector.load %arg8[%c0_17, %c0_18] : memref<1x128xf32, #tpu.memory_space<vmem>>, vector<1x128xf32>
    %39 = arith.addf %14, %21 : vector<2x128xf32>
    %40 = arith.subf %39, %33 : vector<2x128xf32>
    %cst_19 = arith.constant -1.000000e+30 : f32
    %41 = vector.shape_cast %36 : vector<1x128xi1> to vector<1x128xi1>
    %42 = vector.broadcast %41 : vector<1x128xi1> to vector<2x128xi1>
    %43 = vector.broadcast %cst_19 : f32 to vector<2x128xf32>
    %44 = arith.select %42, %40, %43 : vector<2x128xi1>, vector<2x128xf32>
    %cst_20 = arith.constant dense<0xFF800000> : vector<2xf32>
    %45 = vector.multi_reduction <maximumf>, %44, %cst_20 [1] : vector<2x128xf32> to vector<2xf32>
    %46 = vector.shape_cast %45 : vector<2xf32> to vector<2x1xf32>
    %47 = vector.broadcast %46 : vector<2x1xf32> to vector<2x128xf32>
    %48 = arith.subf %44, %47 : vector<2x128xf32>
    %49 = math.exp %48 : vector<2x128xf32>
    %50 = vector.broadcast %38 : vector<1x128xf32> to vector<2x128xf32>
    %51 = arith.mulf %49, %50 : vector<2x128xf32>
    %cst_21 = arith.constant dense<0.000000e+00> : vector<2xf32>
    %52 = vector.multi_reduction <add>, %51, %cst_21 [1] : vector<2x128xf32> to vector<2xf32>
    %53 = vector.shape_cast %52 : vector<2xf32> to vector<2x1xf32>
    %cst_22 = arith.constant dense<0.000000e+00> : vector<2xf32>
    %54 = vector.multi_reduction <add>, %49, %cst_22 [1] : vector<2x128xf32> to vector<2xf32>
    %55 = vector.shape_cast %54 : vector<2xf32> to vector<2x1xf32>
    %56 = arith.divf %53, %55 : vector<2x1xf32>
    %c0_i32 = arith.constant 0 : i32
    %57 = vector.broadcast %c0_i32 : i32 to vector<1x6xi32>
    %58 = arith.cmpi eq, %37, %57 : vector<1x6xi32>
    %cst_23 = arith.constant 0.000000e+00 : f32
    %59 = vector.shape_cast %58 : vector<1x6xi1> to vector<1x6xi1>
    %60 = vector.broadcast %59 : vector<1x6xi1> to vector<2x6xi1>
    %61 = vector.shape_cast %56 : vector<2x1xf32> to vector<2x1xf32>
    %62 = vector.broadcast %61 : vector<2x1xf32> to vector<2x6xf32>
    %63 = vector.broadcast %cst_23 : f32 to vector<2x6xf32>
    %64 = arith.select %60, %62, %63 : vector<2x6xi1>, vector<2x6xf32>
    %65 = arith.addf %14, %22 : vector<2x128xf32>
    %66 = arith.subf %65, %33 : vector<2x128xf32>
    %cst_24 = arith.constant -1.000000e+30 : f32
    %67 = vector.shape_cast %36 : vector<1x128xi1> to vector<1x128xi1>
    %68 = vector.broadcast %67 : vector<1x128xi1> to vector<2x128xi1>
    %69 = vector.broadcast %cst_24 : f32 to vector<2x128xf32>
    %70 = arith.select %68, %66, %69 : vector<2x128xi1>, vector<2x128xf32>
    %cst_25 = arith.constant dense<0xFF800000> : vector<2xf32>
    %71 = vector.multi_reduction <maximumf>, %70, %cst_25 [1] : vector<2x128xf32> to vector<2xf32>
    %72 = vector.shape_cast %71 : vector<2xf32> to vector<2x1xf32>
    %73 = vector.broadcast %72 : vector<2x1xf32> to vector<2x128xf32>
    %74 = arith.subf %70, %73 : vector<2x128xf32>
    %75 = math.exp %74 : vector<2x128xf32>
    %76 = vector.broadcast %38 : vector<1x128xf32> to vector<2x128xf32>
    %77 = arith.mulf %75, %76 : vector<2x128xf32>
    %cst_26 = arith.constant dense<0.000000e+00> : vector<2xf32>
    %78 = vector.multi_reduction <add>, %77, %cst_26 [1] : vector<2x128xf32> to vector<2xf32>
    %79 = vector.shape_cast %78 : vector<2xf32> to vector<2x1xf32>
    %cst_27 = arith.constant dense<0.000000e+00> : vector<2xf32>
    %80 = vector.multi_reduction <add>, %75, %cst_27 [1] : vector<2x128xf32> to vector<2xf32>
    %81 = vector.shape_cast %80 : vector<2xf32> to vector<2x1xf32>
    %82 = arith.divf %79, %81 : vector<2x1xf32>
    %c1_i32 = arith.constant 1 : i32
    %83 = vector.broadcast %c1_i32 : i32 to vector<1x6xi32>
    %84 = arith.cmpi eq, %37, %83 : vector<1x6xi32>
    %cst_28 = arith.constant 0.000000e+00 : f32
    %85 = vector.shape_cast %84 : vector<1x6xi1> to vector<1x6xi1>
    %86 = vector.broadcast %85 : vector<1x6xi1> to vector<2x6xi1>
    %87 = vector.shape_cast %82 : vector<2x1xf32> to vector<2x1xf32>
    %88 = vector.broadcast %87 : vector<2x1xf32> to vector<2x6xf32>
    %89 = vector.broadcast %cst_28 : f32 to vector<2x6xf32>
    %90 = arith.select %86, %88, %89 : vector<2x6xi1>, vector<2x6xf32>
    %91 = arith.addf %64, %90 : vector<2x6xf32>
    %92 = arith.addf %14, %23 : vector<2x128xf32>
    %93 = arith.subf %92, %33 : vector<2x128xf32>
    %cst_29 = arith.constant -1.000000e+30 : f32
    %94 = vector.shape_cast %36 : vector<1x128xi1> to vector<1x128xi1>
    %95 = vector.broadcast %94 : vector<1x128xi1> to vector<2x128xi1>
    %96 = vector.broadcast %cst_29 : f32 to vector<2x128xf32>
    %97 = arith.select %95, %93, %96 : vector<2x128xi1>, vector<2x128xf32>
    %cst_30 = arith.constant dense<0xFF800000> : vector<2xf32>
    %98 = vector.multi_reduction <maximumf>, %97, %cst_30 [1] : vector<2x128xf32> to vector<2xf32>
    %99 = vector.shape_cast %98 : vector<2xf32> to vector<2x1xf32>
    %100 = vector.broadcast %99 : vector<2x1xf32> to vector<2x128xf32>
    %101 = arith.subf %97, %100 : vector<2x128xf32>
    %102 = math.exp %101 : vector<2x128xf32>
    %103 = vector.broadcast %38 : vector<1x128xf32> to vector<2x128xf32>
    %104 = arith.mulf %102, %103 : vector<2x128xf32>
    %cst_31 = arith.constant dense<0.000000e+00> : vector<2xf32>
    %105 = vector.multi_reduction <add>, %104, %cst_31 [1] : vector<2x128xf32> to vector<2xf32>
    %106 = vector.shape_cast %105 : vector<2xf32> to vector<2x1xf32>
    %cst_32 = arith.constant dense<0.000000e+00> : vector<2xf32>
    %107 = vector.multi_reduction <add>, %102, %cst_32 [1] : vector<2x128xf32> to vector<2xf32>
    %108 = vector.shape_cast %107 : vector<2xf32> to vector<2x1xf32>
    %109 = arith.divf %106, %108 : vector<2x1xf32>
    %c2_i32 = arith.constant 2 : i32
    %110 = vector.broadcast %c2_i32 : i32 to vector<1x6xi32>
    %111 = arith.cmpi eq, %37, %110 : vector<1x6xi32>
    %cst_33 = arith.constant 0.000000e+00 : f32
    %112 = vector.shape_cast %111 : vector<1x6xi1> to vector<1x6xi1>
    %113 = vector.broadcast %112 : vector<1x6xi1> to vector<2x6xi1>
    %114 = vector.shape_cast %109 : vector<2x1xf32> to vector<2x1xf32>
    %115 = vector.broadcast %114 : vector<2x1xf32> to vector<2x6xf32>
    %116 = vector.broadcast %cst_33 : f32 to vector<2x6xf32>
    %117 = arith.select %113, %115, %116 : vector<2x6xi1>, vector<2x6xf32>
    %118 = arith.addf %91, %117 : vector<2x6xf32>
    %119 = arith.addf %14, %24 : vector<2x128xf32>
    %120 = arith.subf %119, %33 : vector<2x128xf32>
    %cst_34 = arith.constant -1.000000e+30 : f32
    %121 = vector.shape_cast %36 : vector<1x128xi1> to vector<1x128xi1>
    %122 = vector.broadcast %121 : vector<1x128xi1> to vector<2x128xi1>
    %123 = vector.broadcast %cst_34 : f32 to vector<2x128xf32>
    %124 = arith.select %122, %120, %123 : vector<2x128xi1>, vector<2x128xf32>
    %cst_35 = arith.constant dense<0xFF800000> : vector<2xf32>
    %125 = vector.multi_reduction <maximumf>, %124, %cst_35 [1] : vector<2x128xf32> to vector<2xf32>
    %126 = vector.shape_cast %125 : vector<2xf32> to vector<2x1xf32>
    %127 = vector.broadcast %126 : vector<2x1xf32> to vector<2x128xf32>
    %128 = arith.subf %124, %127 : vector<2x128xf32>
    %129 = math.exp %128 : vector<2x128xf32>
    %130 = vector.broadcast %38 : vector<1x128xf32> to vector<2x128xf32>
    %131 = arith.mulf %129, %130 : vector<2x128xf32>
    %cst_36 = arith.constant dense<0.000000e+00> : vector<2xf32>
    %132 = vector.multi_reduction <add>, %131, %cst_36 [1] : vector<2x128xf32> to vector<2xf32>
    %133 = vector.shape_cast %132 : vector<2xf32> to vector<2x1xf32>
    %cst_37 = arith.constant dense<0.000000e+00> : vector<2xf32>
    %134 = vector.multi_reduction <add>, %129, %cst_37 [1] : vector<2x128xf32> to vector<2xf32>
    %135 = vector.shape_cast %134 : vector<2xf32> to vector<2x1xf32>
    %136 = arith.divf %133, %135 : vector<2x1xf32>
    %c3_i32 = arith.constant 3 : i32
    %137 = vector.broadcast %c3_i32 : i32 to vector<1x6xi32>
    %138 = arith.cmpi eq, %37, %137 : vector<1x6xi32>
    %cst_38 = arith.constant 0.000000e+00 : f32
    %139 = vector.shape_cast %138 : vector<1x6xi1> to vector<1x6xi1>
    %140 = vector.broadcast %139 : vector<1x6xi1> to vector<2x6xi1>
    %141 = vector.shape_cast %136 : vector<2x1xf32> to vector<2x1xf32>
    %142 = vector.broadcast %141 : vector<2x1xf32> to vector<2x6xf32>
    %143 = vector.broadcast %cst_38 : f32 to vector<2x6xf32>
    %144 = arith.select %140, %142, %143 : vector<2x6xi1>, vector<2x6xf32>
    %145 = arith.addf %118, %144 : vector<2x6xf32>
    %146 = arith.addf %14, %25 : vector<2x128xf32>
    %147 = arith.subf %146, %33 : vector<2x128xf32>
    %cst_39 = arith.constant -1.000000e+30 : f32
    %148 = vector.shape_cast %36 : vector<1x128xi1> to vector<1x128xi1>
    %149 = vector.broadcast %148 : vector<1x128xi1> to vector<2x128xi1>
    %150 = vector.broadcast %cst_39 : f32 to vector<2x128xf32>
    %151 = arith.select %149, %147, %150 : vector<2x128xi1>, vector<2x128xf32>
    %cst_40 = arith.constant dense<0xFF800000> : vector<2xf32>
    %152 = vector.multi_reduction <maximumf>, %151, %cst_40 [1] : vector<2x128xf32> to vector<2xf32>
    %153 = vector.shape_cast %152 : vector<2xf32> to vector<2x1xf32>
    %154 = vector.broadcast %153 : vector<2x1xf32> to vector<2x128xf32>
    %155 = arith.subf %151, %154 : vector<2x128xf32>
    %156 = math.exp %155 : vector<2x128xf32>
    %157 = vector.broadcast %38 : vector<1x128xf32> to vector<2x128xf32>
    %158 = arith.mulf %156, %157 : vector<2x128xf32>
    %cst_41 = arith.constant dense<0.000000e+00> : vector<2xf32>
    %159 = vector.multi_reduction <add>, %158, %cst_41 [1] : vector<2x128xf32> to vector<2xf32>
    %160 = vector.shape_cast %159 : vector<2xf32> to vector<2x1xf32>
    %cst_42 = arith.constant dense<0.000000e+00> : vector<2xf32>
    %161 = vector.multi_reduction <add>, %156, %cst_42 [1] : vector<2x128xf32> to vector<2xf32>
    %162 = vector.shape_cast %161 : vector<2xf32> to vector<2x1xf32>
    %163 = arith.divf %160, %162 : vector<2x1xf32>
    %c4_i32 = arith.constant 4 : i32
    %164 = vector.broadcast %c4_i32 : i32 to vector<1x6xi32>
    %165 = arith.cmpi eq, %37, %164 : vector<1x6xi32>
    %cst_43 = arith.constant 0.000000e+00 : f32
    %166 = vector.shape_cast %165 : vector<1x6xi1> to vector<1x6xi1>
    %167 = vector.broadcast %166 : vector<1x6xi1> to vector<2x6xi1>
    %168 = vector.shape_cast %163 : vector<2x1xf32> to vector<2x1xf32>
    %169 = vector.broadcast %168 : vector<2x1xf32> to vector<2x6xf32>
    %170 = vector.broadcast %cst_43 : f32 to vector<2x6xf32>
    %171 = arith.select %167, %169, %170 : vector<2x6xi1>, vector<2x6xf32>
    %172 = arith.addf %145, %171 : vector<2x6xf32>
    %173 = arith.addf %14, %26 : vector<2x128xf32>
    %174 = arith.subf %173, %33 : vector<2x128xf32>
    %cst_44 = arith.constant -1.000000e+30 : f32
    %175 = vector.shape_cast %36 : vector<1x128xi1> to vector<1x128xi1>
    %176 = vector.broadcast %175 : vector<1x128xi1> to vector<2x128xi1>
    %177 = vector.broadcast %cst_44 : f32 to vector<2x128xf32>
    %178 = arith.select %176, %174, %177 : vector<2x128xi1>, vector<2x128xf32>
    %cst_45 = arith.constant dense<0xFF800000> : vector<2xf32>
    %179 = vector.multi_reduction <maximumf>, %178, %cst_45 [1] : vector<2x128xf32> to vector<2xf32>
    %180 = vector.shape_cast %179 : vector<2xf32> to vector<2x1xf32>
    %181 = vector.broadcast %180 : vector<2x1xf32> to vector<2x128xf32>
    %182 = arith.subf %178, %181 : vector<2x128xf32>
    %183 = math.exp %182 : vector<2x128xf32>
    %184 = vector.broadcast %38 : vector<1x128xf32> to vector<2x128xf32>
    %185 = arith.mulf %183, %184 : vector<2x128xf32>
    %cst_46 = arith.constant dense<0.000000e+00> : vector<2xf32>
    %186 = vector.multi_reduction <add>, %185, %cst_46 [1] : vector<2x128xf32> to vector<2xf32>
    %187 = vector.shape_cast %186 : vector<2xf32> to vector<2x1xf32>
    %cst_47 = arith.constant dense<0.000000e+00> : vector<2xf32>
    %188 = vector.multi_reduction <add>, %183, %cst_47 [1] : vector<2x128xf32> to vector<2xf32>
    %189 = vector.shape_cast %188 : vector<2xf32> to vector<2x1xf32>
    %190 = arith.divf %187, %189 : vector<2x1xf32>
    %c5_i32 = arith.constant 5 : i32
    %191 = vector.broadcast %c5_i32 : i32 to vector<1x6xi32>
    %192 = arith.cmpi eq, %37, %191 : vector<1x6xi32>
    %cst_48 = arith.constant 0.000000e+00 : f32
    %193 = vector.shape_cast %192 : vector<1x6xi1> to vector<1x6xi1>
    %194 = vector.broadcast %193 : vector<1x6xi1> to vector<2x6xi1>
    %195 = vector.shape_cast %190 : vector<2x1xf32> to vector<2x1xf32>
    %196 = vector.broadcast %195 : vector<2x1xf32> to vector<2x6xf32>
    %197 = vector.broadcast %cst_48 : f32 to vector<2x6xf32>
    %198 = arith.select %194, %196, %197 : vector<2x6xi1>, vector<2x6xf32>
    %199 = arith.addf %172, %198 : vector<2x6xf32>
    %c0_49 = arith.constant 0 : index
    %c0_50 = arith.constant 0 : index
    %200 = vector.load %arg9[%c0_49, %c0_50] : memref<2x6xf32, #tpu.memory_space<vmem>>, vector<2x6xf32>
    tpu.vector_store %arg9[%c0_49, %c0_50], %199 {strides = array<i32>} : memref<2x6xf32, #tpu.memory_space<vmem>>, vector<2x6xf32>,
    return
  }
  func.func @transform_0(%arg0: i32) -> (i32, i32) {
    %c0_i32 = arith.constant 0 : i32
    %c0_i32_0 = arith.constant 0 : i32
    return %arg0, %c0_i32 : i32, i32
  }
  func.func @transform_1(%arg0: i32) -> (i32, i32) {
    %c0_i32 = arith.constant 0 : i32
    %c0_i32_0 = arith.constant 0 : i32
    %c0_i32_1 = arith.constant 0 : i32
    return %c0_i32, %c0_i32_0 : i32, i32
  }
  func.func @transform_2(%arg0: i32) -> (i32, i32) {
    %c0_i32 = arith.constant 0 : i32
    %c0_i32_0 = arith.constant 0 : i32
    %c0_i32_1 = arith.constant 0 : i32
    return %c0_i32, %c0_i32_0 : i32, i32
  }
  func.func @transform_3(%arg0: i32) -> (i32, i32) {
    %c0_i32 = arith.constant 0 : i32
    %c0_i32_0 = arith.constant 0 : i32
    %c0_i32_1 = arith.constant 0 : i32
    return %c0_i32, %c0_i32_0 : i32, i32
  }
  func.func @transform_4(%arg0: i32) -> (i32, i32) {
    %c0_i32 = arith.constant 0 : i32
    %c0_i32_0 = arith.constant 0 : i32
    %c0_i32_1 = arith.constant 0 : i32
    return %c0_i32, %c0_i32_0 : i32, i32
  }
  func.func @transform_5(%arg0: i32) -> (i32, i32) {
    %c0_i32 = arith.constant 0 : i32
    %c0_i32_0 = arith.constant 0 : i32
    %c0_i32_1 = arith.constant 0 : i32
    return %c0_i32, %c0_i32_0 : i32, i32
  }
  func.func @transform_6(%arg0: i32) -> (i32, i32) {
    %c0_i32 = arith.constant 0 : i32
    %c0_i32_0 = arith.constant 0 : i32
    %c0_i32_1 = arith.constant 0 : i32
    return %c0_i32, %c0_i32_0 : i32, i32
  }
  func.func @transform_7(%arg0: i32) -> (i32, i32) {
    %c0_i32 = arith.constant 0 : i32
    %c0_i32_0 = arith.constant 0 : i32
    %c0_i32_1 = arith.constant 0 : i32
    return %c0_i32, %c0_i32_0 : i32, i32
  }
  func.func @transform_8(%arg0: i32) -> (i32, i32) {
    %c0_i32 = arith.constant 0 : i32
    %c0_i32_0 = arith.constant 0 : i32
    return %arg0, %c0_i32 : i32, i32
  }
}

</mosaic_0001>

<bundles_post_ra>
// kernel: rainbow_forward.4
= control target key start
LH: loop header
LB: loop body
LE: loop exit
PB: predicated region body
PF: predicated region fallthrough
CT: control target
= control target key end

     0   :  { %s1542_s12 = smov 0   ;;  %s1852_s0 = inlined_call_operand.vmem [shape: bf16[800,256], index: 0, kind: input, shape index: {}]   ;;  %s1853_s1 = inlined_call_operand.vmem [shape: bf16[256,32], index: 1, kind: input, shape index: {}]   ;;  %s1854_s2 = inlined_call_operand.vmem [shape: f32[1,32], index: 2, kind: input, shape index: {}]   ;;  %s1855_s3 = inlined_call_operand.vmem [shape: bf16[800,32], index: 3, kind: output, shape index: {}]  }
   0x1 LB: > { %s1203_s13 = sadd.s32 4294967295, %s1519_s12   ;;  %p1207_p0 = scmp.ge.s32.totalorder %s1519_s12, 1  ;;  %s1519_s12 = sphi %s1542_s12, %s13_s12  }
   0x2   : > { %p139_p1 = scmp.lt.s32.totalorder %s1519_s12, 3 }
   0x4   : > { %p140_p2 = pnand %p1207_p0, %p139_p1 }
   0x5   : > { %v1422_v0 = vld [vmem:[%s1853_s1] sm:$0xff] (!%p140_p2)   ;;  %v1521_v1 = vmov (!%p140_p2), 0   ;;  %s164_s16 = smul.u32 (!%p140_p2), 50, %s1203_s13  ;;  %v1423_v2 = vld [vmem:[%s1853_s1 + $0x8] sm:$0xff] (!%p140_p2)   ;;  %v1424_v3 = vld [vmem:[%s1853_s1 + $0x10] sm:$0xff] (!%p140_p2)   ;;  %vm1096_vm0 = vcmask (!%p140_p2), 257024  }
   0x6   : > { %143 = sbr.rel (%p140_p2) target bundleno = 387 (0x183), region = 32  ;;  %613 = vmatprep.subr.bf16.mxu0 (!%p140_p2), %v1521_v1  ;;  %1381 = vmatprep.subr.bf16.mxu1 (!%p140_p2), %v1521_v1  ;;  %v1425_v4 = vld [vmem:[%s1853_s1 + $0x18] sm:$0xff] (!%p140_p2)   ;;  %v1426_v5 = vld [vmem:[%s1853_s1 + $0x20] sm:$0xff] (!%p140_p2)   ;;  %v1427_v7 = vld [vmem:[%s1853_s1 + $0x28] sm:$0xff] (!%p140_p2)  }
   0x7   : > { %614 = vmatpush1.bf16.msra.mxu0 (!%p140_p2), %v1422_v0  ;;  %1397 = vmatpush1.bf16.msra.mxu1 (!%p140_p2), %v1422_v0  ;;  %p165_p3 = scmp.lt.s32.totalorder (!%p140_p2), %s164_s16, 99  ;;  %v1428_v9 = vld [vmem:[%s1853_s1 + $0x30] sm:$0xff] (!%p140_p2)   ;;  %v1429_v10 = vld [vmem:[%s1853_s1 + $0x38] sm:$0xff] (!%p140_p2)   ;;  %v1430_v11 = vld [vmem:[%s1853_s1 + $0x40] sm:$0xff] (!%p140_p2)  }
   0x8   : > { %615 = vmatprep.subr.bf16.mxu0 (!%p140_p2), %v1521_v1  ;;  %1382 = vmatprep.subr.bf16.mxu1 (!%p140_p2), %v1521_v1  ;;  %v1431_v12 = vld [vmem:[%s1853_s1 + $0x48] sm:$0xff] (!%p140_p2)   ;;  %v1432_v13 = vld [vmem:[%s1853_s1 + $0x50] sm:$0xff] (!%p140_p2)   ;;  %v1433_v14 = vld [vmem:[%s1853_s1 + $0x58] sm:$0xff] (!%p140_p2)  }
   0x9   : > { %v1434_v15 = vld [vmem:[%s1853_s1 + $0x60] sm:$0xff] (!%p140_p2)   ;;  %v1435_v16 = vld [vmem:[%s1853_s1 + $0x68] sm:$0xff] (!%p140_p2)   ;;  %v1436_v17 = vld [vmem:[%s1853_s1 + $0x70] sm:$0xff] (!%p140_p2)  }
   0xa   : > { %v1437_v18 = vld [vmem:[%s1853_s1 + $0x78] sm:$0xff] (!%p140_p2)  }
   0xb   : > { %616 = vmatpush1.bf16.msra.mxu0 (!%p140_p2), %v1423_v2  ;;  %1398 = vmatpush1.bf16.msra.mxu1 (!%p140_p2), %v1423_v2 }
   0xc   : > { %617 = vmatprep.subr.bf16.mxu0 (!%p140_p2), %v1521_v1  ;;  %1383 = vmatprep.subr.bf16.mxu1 (!%p140_p2), %v1521_v1 }
   0xd   : > { %s1857_s16 = smov (!%p165_p3, %s164_s16), 99 }
   0xe   : > { %s1330_s23 = sshll.u32 %s1857_s16, 3  ;;  %s1210_s29 = sshll.u32 %s1857_s16, 2 }
   0xf   : > { %618 = vmatpush1.bf16.msra.mxu0 %v1424_v3  ;;  %1399 = vmatpush1.bf16.msra.mxu1 %v1424_v3  ;;  %s1579_s28 = scalar_lea.vmem %s1852_s0, %s1330_s23  ;;  %v1691_v3 = vld [vmem:[%s1854_s2] ss:$0 sm:$0xff]  ;;  %s1701_s16 = scalar_lea.vmem %s1855_s3, %s1210_s29 }
  0x10   : > { %619 = vmatprep.subr.bf16.mxu0 %v1521_v1  ;;  %1384 = vmatprep.subr.bf16.mxu1 %v1521_v1  ;;  %v1440_v6 = vld [vmem:[%s1579_s28 + $0x4] ss:$8 sps:$4 sm:$0xff]   ;;  %v1443_v8 = vld [vmem:[%s1579_s28 + $0xd4] ss:$8 sps:$4 sm:$0xff]   ;;  %v1438_v19 = vld [vmem:[%s1579_s28] ss:$8 sps:$4 sm:$0xff]  }
  0x11   : > { %645 = vmatprep.mubr.bf16.mxu0 %v1440_v6  ;;  %749 = vmatprep.mubr.bf16.mxu1 %v1443_v8  ;;  %v1441_v20 = vld [vmem:[%s1579_s28 + $0xd0] ss:$8 sps:$4 sm:$0xff]   ;;  %v1444_v21 = vld [vmem:[%s1579_s28 + $0x14] ss:$8 sps:$4 sm:$0xff]   ;;  %v1447_v22 = vld [vmem:[%s1579_s28 + $0xe4] ss:$8 sps:$4 sm:$0xff]  }
  0x12   : > { %v1446_v23 = vld [vmem:[%s1579_s28 + $0x10] ss:$8 sps:$4 sm:$0xff]   ;;  %v1449_v24 = vld [vmem:[%s1579_s28 + $0xe0] ss:$8 sps:$4 sm:$0xff]   ;;  %v1450_v25 = vld [vmem:[%s1579_s28 + $0x24] ss:$8 sps:$4 sm:$0xff]  }
  0x13   : > { %620 = vmatpush1.bf16.msra.mxu0 %v1425_v4  ;;  %1400 = vmatpush1.bf16.msra.mxu1 %v1425_v4  ;;  %v1453_v26 = vld [vmem:[%s1579_s28 + $0xf4] ss:$8 sps:$4 sm:$0xff]   ;;  %v1452_v27 = vld [vmem:[%s1579_s28 + $0x20] ss:$8 sps:$4 sm:$0xff]   ;;  %v1455_v28 = vld [vmem:[%s1579_s28 + $0xf0] ss:$8 sps:$4 sm:$0xff]  }
  0x14   : > { %621 = vmatprep.subr.bf16.mxu0 %v1521_v1  ;;  %1385 = vmatprep.subr.bf16.mxu1 %v1521_v1  ;;  %v1456_v29 = vld [vmem:[%s1579_s28 + $0x34] ss:$8 sps:$4 sm:$0xff]   ;;  %v1459_v30 = vld [vmem:[%s1579_s28 + $0x104] ss:$8 sps:$4 sm:$0xff]   ;;  %v1458_v31 = vld [vmem:[%s1579_s28 + $0x30] ss:$8 sps:$4 sm:$0xff]  }
  0x15   : > { %v1461_v32 = vld [vmem:[%s1579_s28 + $0x100] ss:$8 sps:$4 sm:$0xff]   ;;  %v1462_v33 = vld [vmem:[%s1579_s28 + $0x44] ss:$8 sps:$4 sm:$0xff]   ;;  %v1465_v34 = vld [vmem:[%s1579_s28 + $0x114] ss:$8 sps:$4 sm:$0xff]  }
  0x16   : > { %v1464_v35 = vld [vmem:[%s1579_s28 + $0x40] ss:$8 sps:$4 sm:$0xff]   ;;  %v1467_v36 = vld [vmem:[%s1579_s28 + $0x110] ss:$8 sps:$4 sm:$0xff]   ;;  %v1468_v37 = vld [vmem:[%s1579_s28 + $0x54] ss:$8 sps:$4 sm:$0xff]  }
  0x17   : > { %622 = vmatpush1.bf16.msra.mxu0 %v1426_v5  ;;  %1401 = vmatpush1.bf16.msra.mxu1 %v1426_v5  ;;  %v1471_v38 = vld [vmem:[%s1579_s28 + $0x124] ss:$8 sps:$4 sm:$0xff]   ;;  %v1470_v39 = vld [vmem:[%s1579_s28 + $0x50] ss:$8 sps:$4 sm:$0xff]   ;;  %v1473_v40 = vld [vmem:[%s1579_s28 + $0x120] ss:$8 sps:$4 sm:$0xff]  }
  0x18   : > { %623 = vmatprep.subr.bf16.mxu0 %v1521_v1  ;;  %1386 = vmatprep.subr.bf16.mxu1 %v1521_v1  ;;  %v1474_v41 = vld [vmem:[%s1579_s28 + $0x64] ss:$8 sps:$4 sm:$0xff]   ;;  %v1477_v42 = vld [vmem:[%s1579_s28 + $0x134] ss:$8 sps:$4 sm:$0xff]   ;;  %v1476_v43 = vld [vmem:[%s1579_s28 + $0x60] ss:$8 sps:$4 sm:$0xff]  }
  0x19   : > { %v1479_v44 = vld [vmem:[%s1579_s28 + $0x130] ss:$8 sps:$4 sm:$0xff]   ;;  %v1480_v45 = vld [vmem:[%s1579_s28 + $0x74] ss:$8 sps:$4 sm:$0xff]   ;;  %v1483_v46 = vld [vmem:[%s1579_s28 + $0x144] ss:$8 sps:$4 sm:$0xff]  }
  0x1a   : > { %v1482_v47 = vld [vmem:[%s1579_s28 + $0x70] ss:$8 sps:$4 sm:$0xff]   ;;  %v1485_v48 = vld [vmem:[%s1579_s28 + $0x140] ss:$8 sps:$4 sm:$0xff]   ;;  %v1486_v49 = vld [vmem:[%s1579_s28 + $0x84] ss:$8 sps:$4 sm:$0xff]  }
  0x1b   : > { %624 = vmatpush1.bf16.msra.mxu0 %v1427_v7  ;;  %1402 = vmatpush1.bf16.msra.mxu1 %v1427_v7  ;;  %v1489_v50 = vld [vmem:[%s1579_s28 + $0x154] ss:$8 sps:$4 sm:$0xff]   ;;  %v1488_v51 = vld [vmem:[%s1579_s28 + $0x80] ss:$8 sps:$4 sm:$0xff]   ;;  %v1491_v52 = vld [vmem:[%s1579_s28 + $0x150] ss:$8 sps:$4 sm:$0xff]  }
  0x1c   : > { %625 = vmatprep.subr.bf16.mxu0 %v1521_v1  ;;  %1387 = vmatprep.subr.bf16.mxu1 %v1521_v1  ;;  %v1492_v53 = vld [vmem:[%s1579_s28 + $0x94] ss:$8 sps:$4 sm:$0xff]   ;;  %v1495_v54 = vld [vmem:[%s1579_s28 + $0x164] ss:$8 sps:$4 sm:$0xff]   ;;  %v1494_v55 = vld [vmem:[%s1579_s28 + $0x90] ss:$8 sps:$4 sm:$0xff]  }
  0x1d   : > { %v1497_v56 = vld [vmem:[%s1579_s28 + $0x160] ss:$8 sps:$4 sm:$0xff]   ;;  %v1498_v57 = vld [vmem:[%s1579_s28 + $0xa4] ss:$8 sps:$4 sm:$0xff]   ;;  %v1501_v58 = vld [vmem:[%s1579_s28 + $0x174] ss:$8 sps:$4 sm:$0xff]  }
  0x1e   : > { %v1500_v59 = vld [vmem:[%s1579_s28 + $0xa0] ss:$8 sps:$4 sm:$0xff]   ;;  %v1503_v60 = vld [vmem:[%s1579_s28 + $0x170] ss:$8 sps:$4 sm:$0xff]   ;;  %v1504_v61 = vld [vmem:[%s1579_s28 + $0xb4] ss:$8 sps:$4 sm:$0xff]  }
  0x1f   : > { %626 = vmatpush1.bf16.msra.mxu0 %v1428_v9  ;;  %1403 = vmatpush1.bf16.msra.mxu1 %v1428_v9  ;;  %v1507_v62 = vld [vmem:[%s1579_s28 + $0x184] ss:$8 sps:$4 sm:$0xff]   ;;  %v1506_v63 = vld [vmem:[%s1579_s28 + $0xb0] ss:$8 sps:$4 sm:$0xff]   ;;  %v1509_v0 = vld [vmem:[%s1579_s28 + $0x180] ss:$8 sps:$4 sm:$0xff]  }
  0x20   : > { %627 = vmatprep.subr.bf16.mxu0 %v1521_v1  ;;  %1388 = vmatprep.subr.bf16.mxu1 %v1521_v1  ;;  %v1512_v2 = vld [vmem:[%s1579_s28 + $0xc0] ss:$8 sps:$4 sm:$0xff]  }
  0x23   : > { %628 = vmatpush1.bf16.msra.mxu0 %v1429_v10  ;;  %1404 = vmatpush1.bf16.msra.mxu1 %v1429_v10 }
  0x24   : > { %629 = vmatprep.subr.bf16.mxu0 %v1521_v1  ;;  %1389 = vmatprep.subr.bf16.mxu1 %v1521_v1 }
  0x27   : > { %630 = vmatpush1.bf16.msra.mxu0 %v1430_v11  ;;  %1405 = vmatpush1.bf16.msra.mxu1 %v1430_v11 }
  0x28   : > { %631 = vmatprep.subr.bf16.mxu0 %v1521_v1  ;;  %1390 = vmatprep.subr.bf16.mxu1 %v1521_v1 }
  0x2b   : > { %632 = vmatpush1.bf16.msra.mxu0 %v1431_v12  ;;  %1406 = vmatpush1.bf16.msra.mxu1 %v1431_v12 }
  0x2c   : > { %633 = vmatprep.subr.bf16.mxu0 %v1521_v1  ;;  %1391 = vmatprep.subr.bf16.mxu1 %v1521_v1 }
  0x2f   : > { %634 = vmatpush1.bf16.msra.mxu0 %v1432_v13  ;;  %1407 = vmatpush1.bf16.msra.mxu1 %v1432_v13 }
  0x30   : > { %635 = vmatprep.subr.bf16.mxu0 %v1521_v1  ;;  %1392 = vmatprep.subr.bf16.mxu1 %v1521_v1 }
  0x33   : > { %636 = vmatpush1.bf16.msra.mxu0 %v1433_v14  ;;  %1408 = vmatpush1.bf16.msra.mxu1 %v1433_v14 }
  0x34   : > { %637 = vmatprep.subr.bf16.mxu0 %v1521_v1  ;;  %1393 = vmatprep.subr.bf16.mxu1 %v1521_v1 }
  0x37   : > { %638 = vmatpush1.bf16.msra.mxu0 %v1434_v15  ;;  %1409 = vmatpush1.bf16.msra.mxu1 %v1434_v15 }
  0x38   : > { %639 = vmatprep.subr.bf16.mxu0 %v1521_v1  ;;  %1394 = vmatprep.subr.bf16.mxu1 %v1521_v1 }
  0x3b   : > { %640 = vmatpush1.bf16.msra.mxu0 %v1435_v16  ;;  %1410 = vmatpush1.bf16.msra.mxu1 %v1435_v16 }
  0x3c   : > { %641 = vmatprep.subr.bf16.mxu0 %v1521_v1  ;;  %1395 = vmatprep.subr.bf16.mxu1 %v1521_v1 }
  0x3f   : > { %642 = vmatpush1.bf16.msra.mxu0 %v1436_v17  ;;  %1411 = vmatpush1.bf16.msra.mxu1 %v1436_v17 }
  0x40   : > { %643 = vmatprep.subr.bf16.mxu0 %v1521_v1  ;;  %1396 = vmatprep.subr.bf16.mxu1 %v1521_v1  ;;  %v1510_v1 = vld [vmem:[%s1579_s28 + $0xc4] ss:$8 sps:$4 sm:$0xff]  }
  0x43   : > { %644 = vmatpush1.bf16.msra.mxu0 %v1437_v18  ;;  %1412 = vmatpush1.bf16.msra.mxu1 %v1437_v18 }
  0x46   : > { %646 = vmatmul.mubr.bf16.vlgmr.msra.gmra.mrb[0].mxu0 %v1438_v19  ;;  %750 = vmatmul.mubr.bf16.vlgmr.msra.gmra.mrb[0].mxu1 %v1441_v20 }
  0x47   : > { %653 = vmatprep.mubr.bf16.mxu0 %v1444_v21  ;;  %757 = vmatprep.mubr.bf16.mxu1 %v1447_v22 }
  0x4e   : > { %654 = vmatmul.mubr.bf16.gmra.mrb[4].mxu0 %v1446_v23  ;;  %758 = vmatmul.mubr.bf16.gmra.mrb[4].mxu1 %v1449_v24 }
  0x4f   : > { %661 = vmatprep.mubr.bf16.mxu0 %v1450_v25  ;;  %765 = vmatprep.mubr.bf16.mxu1 %v1453_v26 }
  0x56   : > { %662 = vmatmul.mubr.bf16.gmra.mrb[8].mxu0 %v1452_v27  ;;  %766 = vmatmul.mubr.bf16.gmra.mrb[8].mxu1 %v1455_v28 }
  0x57   : > { %669 = vmatprep.mubr.bf16.mxu0 %v1456_v29  ;;  %773 = vmatprep.mubr.bf16.mxu1 %v1459_v30 }
  0x5e   : > { %670 = vmatmul.mubr.bf16.gmra.mrb[12].mxu0 %v1458_v31  ;;  %774 = vmatmul.mubr.bf16.gmra.mrb[12].mxu1 %v1461_v32 }
  0x5f   : > { %677 = vmatprep.mubr.bf16.mxu0 %v1462_v33  ;;  %781 = vmatprep.mubr.bf16.mxu1 %v1465_v34 }
  0x66   : > { %678 = vmatmul.mubr.bf16.gmra.mrb[16].mxu0 %v1464_v35  ;;  %782 = vmatmul.mubr.bf16.gmra.mrb[16].mxu1 %v1467_v36 }
  0x67   : > { %685 = vmatprep.mubr.bf16.mxu0 %v1468_v37  ;;  %789 = vmatprep.mubr.bf16.mxu1 %v1471_v38 }
  0x6e   : > { %686 = vmatmul.mubr.bf16.gmra.mrb[20].mxu0 %v1470_v39  ;;  %790 = vmatmul.mubr.bf16.gmra.mrb[20].mxu1 %v1473_v40 }
  0x6f   : > { %693 = vmatprep.mubr.bf16.mxu0 %v1474_v41  ;;  %797 = vmatprep.mubr.bf16.mxu1 %v1477_v42 }
  0x76   : > { %694 = vmatmul.mubr.bf16.gmra.mrb[24].mxu0 %v1476_v43  ;;  %798 = vmatmul.mubr.bf16.gmra.mrb[24].mxu1 %v1479_v44 }
  0x77   : > { %701 = vmatprep.mubr.bf16.mxu0 %v1480_v45  ;;  %805 = vmatprep.mubr.bf16.mxu1 %v1483_v46 }
  0x7e   : > { %702 = vmatmul.mubr.bf16.gmra.mrb[28].mxu0 %v1482_v47  ;;  %806 = vmatmul.mubr.bf16.gmra.mrb[28].mxu1 %v1485_v48 }
  0x7f   : > { %709 = vmatprep.mubr.bf16.mxu0 %v1486_v49  ;;  %813 = vmatprep.mubr.bf16.mxu1 %v1489_v50 }
  0x86   : > { %710 = vmatmul.mubr.bf16.gmra.mrb[32].mxu0 %v1488_v51  ;;  %814 = vmatmul.mubr.bf16.gmra.mrb[32].mxu1 %v1491_v52 }
  0x87   : > { %717 = vmatprep.mubr.bf16.mxu0 %v1492_v53  ;;  %821 = vmatprep.mubr.bf16.mxu1 %v1495_v54 }
  0x8e   : > { %718 = vmatmul.mubr.bf16.gmra.mrb[36].mxu0 %v1494_v55  ;;  %822 = vmatmul.mubr.bf16.gmra.mrb[36].mxu1 %v1497_v56 }
  0x8f   : > { %725 = vmatprep.mubr.bf16.mxu0 %v1498_v57  ;;  %829 = vmatprep.mubr.bf16.mxu1 %v1501_v58 }
  0x96   : > { %726 = vmatmul.mubr.bf16.gmra.mrb[40].mxu0 %v1500_v59  ;;  %830 = vmatmul.mubr.bf16.gmra.mrb[40].mxu1 %v1503_v60 }
  0x97   : > { %733 = vmatprep.mubr.bf16.mxu0 %v1504_v61  ;;  %837 = vmatprep.mubr.bf16.mxu1 %v1507_v62 }
  0x9e   : > { %734 = vmatmul.mubr.bf16.gmra.mrb[44].mxu0 %v1506_v63  ;;  %838 = vmatmul.mubr.bf16.gmra.mrb[44].mxu1 %v1509_v0 }
  0x9f   : > { %741 = vmatprep.mubr.bf16.mxu0 %v1510_v1 }
  0xa6   : > { %742 = vmatmul.mubr.bf16.gmra.mrb[48].mxu0 %v1512_v2 }
 0x119   : > { %v647_v4 = vpop.f32.mrb[0].mxu0  ;;  %v751_v5 = vpop.f32.mrb[0].mxu1 }
 0x11a   : > { %v648_v6 = vadd.f32 %v1691_v3, %v647_v4  ;;  %v649_v7 = vpop.f32.mrb[1].mxu0  ;;  %v752_v8 = vadd.f32 %v1691_v3, %v751_v5  ;;  %v753_v9 = vpop.f32.mrb[1].mxu1 }
 0x11b   : > { %v650_v10 = vpop.f32.mrb[2].mxu0  ;;  %v754_v11 = vpop.f32.mrb[2].mxu1 }
 0x11c   : > { %v846_v12 = vmax.f32 %v648_v6, 0.0  ;;  %v651_v13 = vadd.f32 %v1691_v3, %v650_v10  ;;  %v652_v14 = vpop.f32.mrb[3].mxu0  ;;  %v872_v15 = vmax.f32 %v752_v8, 0.0  ;;  %v755_v16 = vadd.f32 %v1691_v3, %v754_v11  ;;  %v756_v17 = vpop.f32.mrb[3].mxu1 }
 0x11e   : > { %v1331_v18 = vpack.c.bf16 %v846_v12, %v846_v12  ;;  %v847_v19 = vmax.f32 %v651_v13, 0.0  ;;  %v1357_v20 = vpack.c.bf16 %v872_v15, %v872_v15  ;;  %v873_v21 = vmax.f32 %v755_v16, 0.0 }
 0x120   : > { %1097 = vst.msk [vmem:[%s1701_s16] sm:$0xf] %vm1096_vm0, %v1331_v18  ;;  %v1332_v22 = vpack.c.bf16 %v847_v19, %v847_v19  ;;  %1123 = vst.msk [vmem:[%s1701_s16 + $0x68] sm:$0xf] %vm1096_vm0, %v1357_v20  ;;  %v1358_v23 = vpack.c.bf16 %v873_v21, %v873_v21 }
 0x121   : > { %v655_v24 = vpop.f32.mrb[4].mxu0  ;;  %v759_v25 = vpop.f32.mrb[4].mxu1 }
 0x122   : > { %1098 = vst.msk [vmem:[%s1701_s16 + $0x4] sm:$0xf] %vm1096_vm0, %v1332_v22  ;;  %1124 = vst.msk [vmem:[%s1701_s16 + $0x6c] sm:$0xf] %vm1096_vm0, %v1358_v23  ;;  %v656_v26 = vadd.f32 %v1691_v3, %v655_v24  ;;  %v657_v27 = vpop.f32.mrb[5].mxu0  ;;  %v760_v28 = vadd.f32 %v1691_v3, %v759_v25  ;;  %v761_v29 = vpop.f32.mrb[5].mxu1 }
 0x123   : > { %v658_v30 = vpop.f32.mrb[6].mxu0  ;;  %v762_v31 = vpop.f32.mrb[6].mxu1 }
 0x124   : > { %v848_v32 = vmax.f32 %v656_v26, 0.0  ;;  %v659_v33 = vadd.f32 %v1691_v3, %v658_v30  ;;  %v660_v34 = vpop.f32.mrb[7].mxu0  ;;  %v874_v35 = vmax.f32 %v760_v28, 0.0  ;;  %v763_v36 = vadd.f32 %v1691_v3, %v762_v31  ;;  %v764_v37 = vpop.f32.mrb[7].mxu1 }
 0x126   : > { %v1333_v38 = vpack.c.bf16 %v848_v32, %v848_v32  ;;  %v849_v39 = vmax.f32 %v659_v33, 0.0  ;;  %v1359_v40 = vpack.c.bf16 %v874_v35, %v874_v35  ;;  %v875_v41 = vmax.f32 %v763_v36, 0.0 }
 0x128   : > { %1099 = vst.msk [vmem:[%s1701_s16 + $0x8] sm:$0xf] %vm1096_vm0, %v1333_v38  ;;  %v1334_v42 = vpack.c.bf16 %v849_v39, %v849_v39  ;;  %1125 = vst.msk [vmem:[%s1701_s16 + $0x70] sm:$0xf] %vm1096_vm0, %v1359_v40  ;;  %v1360_v43 = vpack.c.bf16 %v875_v41, %v875_v41 }
 0x129   : > { %v663_v44 = vpop.f32.mrb[8].mxu0  ;;  %v767_v45 = vpop.f32.mrb[8].mxu1 }
 0x12a   : > { %1100 = vst.msk [vmem:[%s1701_s16 + $0xc] sm:$0xf] %vm1096_vm0, %v1334_v42  ;;  %1126 = vst.msk [vmem:[%s1701_s16 + $0x74] sm:$0xf] %vm1096_vm0, %v1360_v43  ;;  %v664_v46 = vadd.f32 %v1691_v3, %v663_v44  ;;  %v665_v47 = vpop.f32.mrb[9].mxu0  ;;  %v768_v48 = vadd.f32 %v1691_v3, %v767_v45  ;;  %v769_v49 = vpop.f32.mrb[9].mxu1 }
 0x12b   : > { %v666_v50 = vpop.f32.mrb[10].mxu0  ;;  %v770_v51 = vpop.f32.mrb[10].mxu1 }
 0x12c   : > { %v850_v52 = vmax.f32 %v664_v46, 0.0  ;;  %v667_v53 = vadd.f32 %v1691_v3, %v666_v50  ;;  %v668_v54 = vpop.f32.mrb[11].mxu0  ;;  %v876_v55 = vmax.f32 %v768_v48, 0.0  ;;  %v771_v56 = vadd.f32 %v1691_v3, %v770_v51  ;;  %v772_v57 = vpop.f32.mrb[11].mxu1 }
 0x12e   : > { %v1335_v58 = vpack.c.bf16 %v850_v52, %v850_v52  ;;  %v851_v59 = vmax.f32 %v667_v53, 0.0  ;;  %v1361_v60 = vpack.c.bf16 %v876_v55, %v876_v55  ;;  %v877_v61 = vmax.f32 %v771_v56, 0.0 }
 0x130   : > { %1101 = vst.msk [vmem:[%s1701_s16 + $0x10] sm:$0xf] %vm1096_vm0, %v1335_v58  ;;  %v1336_v62 = vpack.c.bf16 %v851_v59, %v851_v59  ;;  %1127 = vst.msk [vmem:[%s1701_s16 + $0x78] sm:$0xf] %vm1096_vm0, %v1361_v60  ;;  %v1362_v63 = vpack.c.bf16 %v877_v61, %v877_v61 }
 0x131   : > { %v671_v0 = vpop.f32.mrb[12].mxu0  ;;  %v775_v1 = vpop.f32.mrb[12].mxu1 }
 0x132   : > { %1102 = vst.msk [vmem:[%s1701_s16 + $0x14] sm:$0xf] %vm1096_vm0, %v1336_v62  ;;  %1128 = vst.msk [vmem:[%s1701_s16 + $0x7c] sm:$0xf] %vm1096_vm0, %v1362_v63  ;;  %v672_v2 = vadd.f32 %v1691_v3, %v671_v0  ;;  %v673_v4 = vpop.f32.mrb[13].mxu0  ;;  %v776_v5 = vadd.f32 %v1691_v3, %v775_v1  ;;  %v777_v6 = vpop.f32.mrb[13].mxu1 }
 0x133   : > { %v674_v7 = vpop.f32.mrb[14].mxu0  ;;  %v778_v8 = vpop.f32.mrb[14].mxu1 }
 0x134   : > { %v852_v9 = vmax.f32 %v672_v2, 0.0  ;;  %v675_v10 = vadd.f32 %v1691_v3, %v674_v7  ;;  %v676_v11 = vpop.f32.mrb[15].mxu0  ;;  %v878_v12 = vmax.f32 %v776_v5, 0.0  ;;  %v779_v13 = vadd.f32 %v1691_v3, %v778_v8  ;;  %v780_v14 = vpop.f32.mrb[15].mxu1 }
 0x136   : > { %v1337_v15 = vpack.c.bf16 %v852_v9, %v852_v9  ;;  %v853_v16 = vmax.f32 %v675_v10, 0.0  ;;  %v1363_v17 = vpack.c.bf16 %v878_v12, %v878_v12  ;;  %v879_v18 = vmax.f32 %v779_v13, 0.0 }
 0x138   : > { %1103 = vst.msk [vmem:[%s1701_s16 + $0x18] sm:$0xf] %vm1096_vm0, %v1337_v15  ;;  %v1338_v19 = vpack.c.bf16 %v853_v16, %v853_v16  ;;  %1129 = vst.msk [vmem:[%s1701_s16 + $0x80] sm:$0xf] %vm1096_vm0, %v1363_v17  ;;  %v1364_v20 = vpack.c.bf16 %v879_v18, %v879_v18 }
 0x139   : > { %v679_v21 = vpop.f32.mrb[16].mxu0  ;;  %v783_v22 = vpop.f32.mrb[16].mxu1 }
 0x13a   : > { %1104 = vst.msk [vmem:[%s1701_s16 + $0x1c] sm:$0xf] %vm1096_vm0, %v1338_v19  ;;  %1130 = vst.msk [vmem:[%s1701_s16 + $0x84] sm:$0xf] %vm1096_vm0, %v1364_v20  ;;  %v680_v23 = vadd.f32 %v1691_v3, %v679_v21  ;;  %v681_v24 = vpop.f32.mrb[17].mxu0  ;;  %v784_v25 = vadd.f32 %v1691_v3, %v783_v22  ;;  %v785_v26 = vpop.f32.mrb[17].mxu1 }
 0x13b   : > { %v682_v27 = vpop.f32.mrb[18].mxu0  ;;  %v786_v28 = vpop.f32.mrb[18].mxu1 }
 0x13c   : > { %v854_v29 = vmax.f32 %v680_v23, 0.0  ;;  %v683_v30 = vadd.f32 %v1691_v3, %v682_v27  ;;  %v684_v31 = vpop.f32.mrb[19].mxu0  ;;  %v880_v32 = vmax.f32 %v784_v25, 0.0  ;;  %v787_v33 = vadd.f32 %v1691_v3, %v786_v28  ;;  %v788_v34 = vpop.f32.mrb[19].mxu1 }
 0x13e   : > { %v1339_v35 = vpack.c.bf16 %v854_v29, %v854_v29  ;;  %v855_v36 = vmax.f32 %v683_v30, 0.0  ;;  %v1365_v37 = vpack.c.bf16 %v880_v32, %v880_v32  ;;  %v881_v38 = vmax.f32 %v787_v33, 0.0 }
 0x140   : > { %1105 = vst.msk [vmem:[%s1701_s16 + $0x20] sm:$0xf] %vm1096_vm0, %v1339_v35  ;;  %v1340_v39 = vpack.c.bf16 %v855_v36, %v855_v36  ;;  %1131 = vst.msk [vmem:[%s1701_s16 + $0x88] sm:$0xf] %vm1096_vm0, %v1365_v37  ;;  %v1366_v40 = vpack.c.bf16 %v881_v38, %v881_v38 }
 0x141   : > { %v687_v41 = vpop.f32.mrb[20].mxu0  ;;  %v791_v42 = vpop.f32.mrb[20].mxu1 }
 0x142   : > { %1106 = vst.msk [vmem:[%s1701_s16 + $0x24] sm:$0xf] %vm1096_vm0, %v1340_v39  ;;  %1132 = vst.msk [vmem:[%s1701_s16 + $0x8c] sm:$0xf] %vm1096_vm0, %v1366_v40  ;;  %v688_v43 = vadd.f32 %v1691_v3, %v687_v41  ;;  %v689_v44 = vpop.f32.mrb[21].mxu0  ;;  %v792_v45 = vadd.f32 %v1691_v3, %v791_v42  ;;  %v793_v46 = vpop.f32.mrb[21].mxu1 }
 0x143   : > { %v690_v47 = vpop.f32.mrb[22].mxu0  ;;  %v794_v48 = vpop.f32.mrb[22].mxu1 }
 0x144   : > { %v856_v49 = vmax.f32 %v688_v43, 0.0  ;;  %v691_v50 = vadd.f32 %v1691_v3, %v690_v47  ;;  %v692_v51 = vpop.f32.mrb[23].mxu0  ;;  %v882_v52 = vmax.f32 %v792_v45, 0.0  ;;  %v795_v53 = vadd.f32 %v1691_v3, %v794_v48  ;;  %v796_v54 = vpop.f32.mrb[23].mxu1 }
 0x146   : > { %v1341_v55 = vpack.c.bf16 %v856_v49, %v856_v49  ;;  %v857_v56 = vmax.f32 %v691_v50, 0.0  ;;  %v1367_v57 = vpack.c.bf16 %v882_v52, %v882_v52  ;;  %v883_v58 = vmax.f32 %v795_v53, 0.0 }
 0x148   : > { %1107 = vst.msk [vmem:[%s1701_s16 + $0x28] sm:$0xf] %vm1096_vm0, %v1341_v55  ;;  %v1342_v59 = vpack.c.bf16 %v857_v56, %v857_v56  ;;  %1133 = vst.msk [vmem:[%s1701_s16 + $0x90] sm:$0xf] %vm1096_vm0, %v1367_v57  ;;  %v1368_v60 = vpack.c.bf16 %v883_v58, %v883_v58 }
 0x149   : > { %v695_v61 = vpop.f32.mrb[24].mxu0  ;;  %v799_v62 = vpop.f32.mrb[24].mxu1 }
 0x14a   : > { %1108 = vst.msk [vmem:[%s1701_s16 + $0x2c] sm:$0xf] %vm1096_vm0, %v1342_v59  ;;  %1134 = vst.msk [vmem:[%s1701_s16 + $0x94] sm:$0xf] %vm1096_vm0, %v1368_v60  ;;  %v696_v63 = vadd.f32 %v1691_v3, %v695_v61  ;;  %v697_v0 = vpop.f32.mrb[25].mxu0  ;;  %v800_v1 = vadd.f32 %v1691_v3, %v799_v62  ;;  %v801_v2 = vpop.f32.mrb[25].mxu1 }
 0x14b   : > { %v698_v4 = vpop.f32.mrb[26].mxu0  ;;  %v802_v5 = vpop.f32.mrb[26].mxu1 }
 0x14c   : > { %v858_v6 = vmax.f32 %v696_v63, 0.0  ;;  %v699_v7 = vadd.f32 %v1691_v3, %v698_v4  ;;  %v700_v8 = vpop.f32.mrb[27].mxu0  ;;  %v884_v9 = vmax.f32 %v800_v1, 0.0  ;;  %v803_v10 = vadd.f32 %v1691_v3, %v802_v5  ;;  %v804_v11 = vpop.f32.mrb[27].mxu1 }
 0x14e   : > { %v1343_v12 = vpack.c.bf16 %v858_v6, %v858_v6  ;;  %v859_v13 = vmax.f32 %v699_v7, 0.0  ;;  %v1369_v14 = vpack.c.bf16 %v884_v9, %v884_v9  ;;  %v885_v15 = vmax.f32 %v803_v10, 0.0 }
 0x150   : > { %1109 = vst.msk [vmem:[%s1701_s16 + $0x30] sm:$0xf] %vm1096_vm0, %v1343_v12  ;;  %v1344_v16 = vpack.c.bf16 %v859_v13, %v859_v13  ;;  %1135 = vst.msk [vmem:[%s1701_s16 + $0x98] sm:$0xf] %vm1096_vm0, %v1369_v14  ;;  %v1370_v17 = vpack.c.bf16 %v885_v15, %v885_v15 }
 0x151   : > { %v703_v18 = vpop.f32.mrb[28].mxu0  ;;  %v807_v19 = vpop.f32.mrb[28].mxu1 }
 0x152   : > { %1110 = vst.msk [vmem:[%s1701_s16 + $0x34] sm:$0xf] %vm1096_vm0, %v1344_v16  ;;  %1136 = vst.msk [vmem:[%s1701_s16 + $0x9c] sm:$0xf] %vm1096_vm0, %v1370_v17  ;;  %v704_v20 = vadd.f32 %v1691_v3, %v703_v18  ;;  %v705_v21 = vpop.f32.mrb[29].mxu0  ;;  %v808_v22 = vadd.f32 %v1691_v3, %v807_v19  ;;  %v809_v23 = vpop.f32.mrb[29].mxu1 }
 0x153   : > { %v706_v24 = vpop.f32.mrb[30].mxu0  ;;  %v810_v25 = vpop.f32.mrb[30].mxu1 }
 0x154   : > { %v860_v26 = vmax.f32 %v704_v20, 0.0  ;;  %v707_v27 = vadd.f32 %v1691_v3, %v706_v24  ;;  %v708_v28 = vpop.f32.mrb[31].mxu0  ;;  %v886_v29 = vmax.f32 %v808_v22, 0.0  ;;  %v811_v30 = vadd.f32 %v1691_v3, %v810_v25  ;;  %v812_v31 = vpop.f32.mrb[31].mxu1 }
 0x156   : > { %v1345_v32 = vpack.c.bf16 %v860_v26, %v860_v26  ;;  %v861_v33 = vmax.f32 %v707_v27, 0.0  ;;  %v1371_v34 = vpack.c.bf16 %v886_v29, %v886_v29  ;;  %v887_v35 = vmax.f32 %v811_v30, 0.0 }
 0x158   : > { %1111 = vst.msk [vmem:[%s1701_s16 + $0x38] sm:$0xf] %vm1096_vm0, %v1345_v32  ;;  %v1346_v36 = vpack.c.bf16 %v861_v33, %v861_v33  ;;  %1137 = vst.msk [vmem:[%s1701_s16 + $0xa0] sm:$0xf] %vm1096_vm0, %v1371_v34  ;;  %v1372_v37 = vpack.c.bf16 %v887_v35, %v887_v35 }
 0x159   : > { %v711_v38 = vpop.f32.mrb[32].mxu0  ;;  %v815_v39 = vpop.f32.mrb[32].mxu1 }
 0x15a   : > { %1112 = vst.msk [vmem:[%s1701_s16 + $0x3c] sm:$0xf] %vm1096_vm0, %v1346_v36  ;;  %1138 = vst.msk [vmem:[%s1701_s16 + $0xa4] sm:$0xf] %vm1096_vm0, %v1372_v37  ;;  %v712_v40 = vadd.f32 %v1691_v3, %v711_v38  ;;  %v713_v41 = vpop.f32.mrb[33].mxu0  ;;  %v816_v42 = vadd.f32 %v1691_v3, %v815_v39  ;;  %v817_v43 = vpop.f32.mrb[33].mxu1 }
 0x15b   : > { %v714_v44 = vpop.f32.mrb[34].mxu0  ;;  %v818_v45 = vpop.f32.mrb[34].mxu1 }
 0x15c   : > { %v862_v46 = vmax.f32 %v712_v40, 0.0  ;;  %v715_v47 = vadd.f32 %v1691_v3, %v714_v44  ;;  %v716_v48 = vpop.f32.mrb[35].mxu0  ;;  %v888_v49 = vmax.f32 %v816_v42, 0.0  ;;  %v819_v50 = vadd.f32 %v1691_v3, %v818_v45  ;;  %v820_v51 = vpop.f32.mrb[35].mxu1 }
 0x15e   : > { %v1347_v52 = vpack.c.bf16 %v862_v46, %v862_v46  ;;  %v863_v53 = vmax.f32 %v715_v47, 0.0  ;;  %v1373_v54 = vpack.c.bf16 %v888_v49, %v888_v49  ;;  %v889_v55 = vmax.f32 %v819_v50, 0.0 }
 0x160   : > { %1113 = vst.msk [vmem:[%s1701_s16 + $0x40] sm:$0xf] %vm1096_vm0, %v1347_v52  ;;  %v1348_v56 = vpack.c.bf16 %v863_v53, %v863_v53  ;;  %1139 = vst.msk [vmem:[%s1701_s16 + $0xa8] sm:$0xf] %vm1096_vm0, %v1373_v54  ;;  %v1374_v57 = vpack.c.bf16 %v889_v55, %v889_v55 }
 0x161   : > { %v719_v58 = vpop.f32.mrb[36].mxu0  ;;  %v823_v59 = vpop.f32.mrb[36].mxu1 }
 0x162   : > { %1114 = vst.msk [vmem:[%s1701_s16 + $0x44] sm:$0xf] %vm1096_vm0, %v1348_v56  ;;  %1140 = vst.msk [vmem:[%s1701_s16 + $0xac] sm:$0xf] %vm1096_vm0, %v1374_v57  ;;  %v720_v60 = vadd.f32 %v1691_v3, %v719_v58  ;;  %v721_v61 = vpop.f32.mrb[37].mxu0  ;;  %v824_v62 = vadd.f32 %v1691_v3, %v823_v59  ;;  %v825_v63 = vpop.f32.mrb[37].mxu1 }
 0x163   : > { %v722_v0 = vpop.f32.mrb[38].mxu0  ;;  %v826_v1 = vpop.f32.mrb[38].mxu1 }
 0x164   : > { %v864_v2 = vmax.f32 %v720_v60, 0.0  ;;  %v723_v4 = vadd.f32 %v1691_v3, %v722_v0  ;;  %v724_v5 = vpop.f32.mrb[39].mxu0  ;;  %v890_v6 = vmax.f32 %v824_v62, 0.0  ;;  %v827_v7 = vadd.f32 %v1691_v3, %v826_v1  ;;  %v828_v8 = vpop.f32.mrb[39].mxu1 }
 0x166   : > { %v1349_v9 = vpack.c.bf16 %v864_v2, %v864_v2  ;;  %v865_v10 = vmax.f32 %v723_v4, 0.0  ;;  %v1375_v11 = vpack.c.bf16 %v890_v6, %v890_v6  ;;  %v891_v12 = vmax.f32 %v827_v7, 0.0 }
 0x168   : > { %1115 = vst.msk [vmem:[%s1701_s16 + $0x48] sm:$0xf] %vm1096_vm0, %v1349_v9  ;;  %v1350_v13 = vpack.c.bf16 %v865_v10, %v865_v10  ;;  %1141 = vst.msk [vmem:[%s1701_s16 + $0xb0] sm:$0xf] %vm1096_vm0, %v1375_v11  ;;  %v1376_v14 = vpack.c.bf16 %v891_v12, %v891_v12 }
 0x169   : > { %v727_v15 = vpop.f32.mrb[40].mxu0  ;;  %v831_v16 = vpop.f32.mrb[40].mxu1 }
 0x16a   : > { %1116 = vst.msk [vmem:[%s1701_s16 + $0x4c] sm:$0xf] %vm1096_vm0, %v1350_v13  ;;  %1142 = vst.msk [vmem:[%s1701_s16 + $0xb4] sm:$0xf] %vm1096_vm0, %v1376_v14  ;;  %v728_v17 = vadd.f32 %v1691_v3, %v727_v15  ;;  %v729_v18 = vpop.f32.mrb[41].mxu0  ;;  %v832_v19 = vadd.f32 %v1691_v3, %v831_v16  ;;  %v833_v20 = vpop.f32.mrb[41].mxu1 }
 0x16b   : > { %v730_v21 = vpop.f32.mrb[42].mxu0  ;;  %v834_v22 = vpop.f32.mrb[42].mxu1 }
 0x16c   : > { %v866_v23 = vmax.f32 %v728_v17, 0.0  ;;  %v731_v24 = vadd.f32 %v1691_v3, %v730_v21  ;;  %v732_v25 = vpop.f32.mrb[43].mxu0  ;;  %v892_v26 = vmax.f32 %v832_v19, 0.0  ;;  %v835_v27 = vadd.f32 %v1691_v3, %v834_v22  ;;  %v836_v28 = vpop.f32.mrb[43].mxu1 }
 0x16e   : > { %v1351_v29 = vpack.c.bf16 %v866_v23, %v866_v23  ;;  %v867_v30 = vmax.f32 %v731_v24, 0.0  ;;  %v1377_v31 = vpack.c.bf16 %v892_v26, %v892_v26  ;;  %v893_v32 = vmax.f32 %v835_v27, 0.0 }
 0x170   : > { %1117 = vst.msk [vmem:[%s1701_s16 + $0x50] sm:$0xf] %vm1096_vm0, %v1351_v29  ;;  %v1352_v33 = vpack.c.bf16 %v867_v30, %v867_v30  ;;  %1143 = vst.msk [vmem:[%s1701_s16 + $0xb8] sm:$0xf] %vm1096_vm0, %v1377_v31  ;;  %v1378_v34 = vpack.c.bf16 %v893_v32, %v893_v32 }
 0x171   : > { %v735_v35 = vpop.f32.mrb[44].mxu0  ;;  %v839_v36 = vpop.f32.mrb[44].mxu1 }
 0x172   : > { %1118 = vst.msk [vmem:[%s1701_s16 + $0x54] sm:$0xf] %vm1096_vm0, %v1352_v33  ;;  %1144 = vst.msk [vmem:[%s1701_s16 + $0xbc] sm:$0xf] %vm1096_vm0, %v1378_v34  ;;  %v736_v37 = vadd.f32 %v1691_v3, %v735_v35  ;;  %v737_v38 = vpop.f32.mrb[45].mxu0  ;;  %v840_v39 = vadd.f32 %v1691_v3, %v839_v36  ;;  %v841_v40 = vpop.f32.mrb[45].mxu1 }
 0x173   : > { %v738_v41 = vpop.f32.mrb[46].mxu0  ;;  %v842_v42 = vpop.f32.mrb[46].mxu1 }
 0x174   : > { %v868_v43 = vmax.f32 %v736_v37, 0.0  ;;  %v739_v44 = vadd.f32 %v1691_v3, %v738_v41  ;;  %v740_v45 = vpop.f32.mrb[47].mxu0  ;;  %v894_v46 = vmax.f32 %v840_v39, 0.0  ;;  %v843_v47 = vadd.f32 %v1691_v3, %v842_v42  ;;  %v844_v48 = vpop.f32.mrb[47].mxu1 }
 0x176   : > { %v1353_v49 = vpack.c.bf16 %v868_v43, %v868_v43  ;;  %v869_v50 = vmax.f32 %v739_v44, 0.0  ;;  %v1379_v51 = vpack.c.bf16 %v894_v46, %v894_v46  ;;  %v895_v52 = vmax.f32 %v843_v47, 0.0 }
 0x178   : > { %1119 = vst.msk [vmem:[%s1701_s16 + $0x58] sm:$0xf] %vm1096_vm0, %v1353_v49  ;;  %v1354_v53 = vpack.c.bf16 %v869_v50, %v869_v50  ;;  %1145 = vst.msk [vmem:[%s1701_s16 + $0xc0] sm:$0xf] %vm1096_vm0, %v1379_v51  ;;  %v1380_v54 = vpack.c.bf16 %v895_v52, %v895_v52 }
 0x179   : > { %v743_v55 = vpop.f32.mrb[48].mxu0 }
 0x17a   : > { %1120 = vst.msk [vmem:[%s1701_s16 + $0x5c] sm:$0xf] %vm1096_vm0, %v1354_v53  ;;  %1146 = vst.msk [vmem:[%s1701_s16 + $0xc4] sm:$0xf] %vm1096_vm0, %v1380_v54  ;;  %v744_v56 = vadd.f32 %v1691_v3, %v743_v55  ;;  %v745_v57 = vpop.f32.mrb[49].mxu0 }
 0x17b   : > { %v746_v58 = vpop.f32.mrb[50].mxu0 }
 0x17c   : > { %v870_v59 = vmax.f32 %v744_v56, 0.0  ;;  %v747_v60 = vadd.f32 %v1691_v3, %v746_v58  ;;  %v748_v61 = vpop.f32.mrb[51].mxu0 }
 0x17e   : > { %v1355_v62 = vpack.c.bf16 %v870_v59, %v870_v59  ;;  %v871_v63 = vmax.f32 %v747_v60, 0.0 }
 0x180   : > { %1121 = vst.msk [vmem:[%s1701_s16 + $0x60] sm:$0xf] %vm1096_vm0, %v1355_v62  ;;  %v1356_v0 = vpack.c.bf16 %v871_v63, %v871_v63 }
 0x182   : > { %1122 = vst.msk [vmem:[%s1701_s16 + $0x64] sm:$0xf] %vm1096_vm0, %v1356_v0 }
 0x183 PF: > { %s13_s12 = sadd.s32 1, %s1519_s12  }
 0x184   : > { %p10_p4 = scmp.ge.s32.totalorder %s13_s12, 4  }
 0x186   :  { %12 = sbr.rel (!%p10_p4) target bundleno = 1 (0x1), region = 62 }

// kernel: rainbow_forward.5
= control target key start
LH: loop header
LB: loop body
LE: loop exit
PB: predicated region body
PF: predicated region fallthrough
CT: control target
= control target key end

     0   :  { %s1555_s12 = smov 0   ;;  %s1557_s13 = smov 0   ;;  %s1812_s0 = inlined_call_operand.vmem [shape: bf16[162,512], index: 0, kind: input, shape index: {}]   ;;  %s1813_s1 = inlined_call_operand.vmem [shape: bf16[512,64], index: 1, kind: input, shape index: {}]   ;;  %s1814_s2 = inlined_call_operand.vmem [shape: f32[1,64], index: 2, kind: input, shape index: {}]   ;;  %s1815_s3 = inlined_call_operand.vmem [shape: bf16[162,64], index: 3, kind: output, shape index: {}]  }
   0x1   :  { %s1559_s14 = smov 0  }
   0x2 LB: > { %s1568_s15 = sadd.s32 4294967295, %s1501_s14   ;;  %s1570_s16 = sadd.s32 1, %s1501_s14   ;;  %s1501_s14 = sphi %s1559_s14, %s1822_s14   ;;  %s1497_s13 = sphi %s1557_s13, %s1821_s13   ;;  %s1493_s12 = sphi %s1555_s12, %s1820_s12  }
   0x3   : > { %s85_s17 = ssub.s32 %s1501_s14, %s1570_s16  ;;  %s88_s18 = sadd.s32 1, %s1497_s13 }
   0x4   : > { %p86_p0 = scmp.eq.s32.totalorder %s85_s17, 0  ;;  %p98_p1 = scmp.ne.s32.totalorder %s1497_s13, %s1493_s12 }
   0x5   : > { %p99_p2 = scmp.eq.s32.totalorder %s1568_s15, 1  ;;  %p1087_p3 = scmp.ge.s32.totalorder %s1501_s14, 1 }
   0x6   : > { %s1578_s19 = scalar_select %p86_p0, %s1497_s13, %s88_s18  }
   0x7   : > { %p1580_p4 = por %p99_p2, %p98_p1  ;;  %p149_p5 = scmp.lt.s32.totalorder %s1501_s14, 3 }
   0x9   : > { %p150_p6 = pnand %p1087_p3, %p149_p5 }
   0xa   : > { %v1377_v0 = vld [vmem:[%s1813_s1 + $0x40] sm:$0xff] (!%p150_p6)   ;;  %v1381_v4 = vld [vmem:[%s1813_s1 + $0x48] sm:$0xff] (!%p150_p6)   ;;  %v1385_v8 = vld [vmem:[%s1813_s1 + $0x50] sm:$0xff] (!%p150_p6)   ;;  %s1630_s30 = smul.u32 (!%p150_p6), 11, %s1568_s15  ;;  %s175_s5 = sand.u32 (!%p150_p6), 1, %s1493_s12   ;;  %vm816_vm0 = vcmask (!%p150_p6), 519168  }
   0xb   : > { %153 = sbr.rel (%p150_p6) target bundleno = 377 (0x179), region = 32  ;;  %v1378_v1 = vld [vmem:[%s1813_s1 + $0xc0] sm:$0xff] (!%p150_p6)   ;;  %1183 = vmatprep.subr.bf16.mxu0 (!%p150_p6), %v1377_v0  ;;  %v1382_v5 = vld [vmem:[%s1813_s1 + $0xc8] sm:$0xff] (!%p150_p6)   ;;  %v1386_v9 = vld [vmem:[%s1813_s1 + $0xd0] sm:$0xff] (!%p150_p6)  }
   0xc   : > { %v1379_v2 = vld [vmem:[%s1813_s1] sm:$0xff] (!%p150_p6)   ;;  %1235 = vmatprep.subr.bf16.mxu1 (!%p150_p6), %v1378_v1  ;;  %v1383_v6 = vld [vmem:[%s1813_s1 + $0x8] sm:$0xff] (!%p150_p6)   ;;  %v1387_v10 = vld [vmem:[%s1813_s1 + $0x10] sm:$0xff] (!%p150_p6)   ;;  %p184_p7 = scmp.lt.s32.totalorder (!%p150_p6), %s1630_s30, 20  ;;  %s1287_s6 = smul.u32 (!%p150_p6), 44, %s175_s5 }
   0xd   : > { %v1380_v3 = vld [vmem:[%s1813_s1 + $0x80] sm:$0xff] (!%p150_p6)   ;;  %1184 = vmatpush3.bf16.msra.mxu0 (!%p150_p6), %v1379_v2  ;;  %v1384_v7 = vld [vmem:[%s1813_s1 + $0x88] sm:$0xff] (!%p150_p6)   ;;  %v1388_v11 = vld [vmem:[%s1813_s1 + $0x90] sm:$0xff] (!%p150_p6)  }
   0xe   : > { %1236 = vmatpush3.bf16.msra.mxu1 (!%p150_p6), %v1380_v3  ;;  %1185 = vmatprep.subr.bf16.mxu0 (!%p150_p6), %v1381_v4  ;;  %v1389_v12 = vld [vmem:[%s1813_s1 + $0x58] sm:$0xff] (!%p150_p6)   ;;  %v1393_v16 = vld [vmem:[%s1813_s1 + $0x60] sm:$0xff] (!%p150_p6)   ;;  %v1397_v20 = vld [vmem:[%s1813_s1 + $0x68] sm:$0xff] (!%p150_p6)   ;;  %s1720_s12 = scalar_lea.vmem (!%p150_p6), [#allocation2], %s1287_s6  }
   0xf   : > { %1237 = vmatprep.subr.bf16.mxu1 (!%p150_p6), %v1382_v5  ;;  %v1390_v13 = vld [vmem:[%s1813_s1 + $0xd8] sm:$0xff] (!%p150_p6)   ;;  %v1394_v17 = vld [vmem:[%s1813_s1 + $0xe0] sm:$0xff] (!%p150_p6)   ;;  %v1398_v21 = vld [vmem:[%s1813_s1 + $0xe8] sm:$0xff] (!%p150_p6)  }
  0x10   : > { %v1391_v14 = vld [vmem:[%s1813_s1 + $0x18] sm:$0xff] (!%p150_p6)   ;;  %v1395_v18 = vld [vmem:[%s1813_s1 + $0x20] sm:$0xff] (!%p150_p6)   ;;  %v1399_v22 = vld [vmem:[%s1813_s1 + $0x28] sm:$0xff] (!%p150_p6)  }
  0x11   : > { %1186 = vmatpush3.bf16.msra.mxu0 (!%p150_p6), %v1383_v6  ;;  %v1392_v15 = vld [vmem:[%s1813_s1 + $0x98] sm:$0xff] (!%p150_p6)   ;;  %v1396_v19 = vld [vmem:[%s1813_s1 + $0xa0] sm:$0xff] (!%p150_p6)   ;;  %v1400_v23 = vld [vmem:[%s1813_s1 + $0xa8] sm:$0xff] (!%p150_p6)  }
  0x12   : > { %1238 = vmatpush3.bf16.msra.mxu1 %v1384_v7  ;;  %1187 = vmatprep.subr.bf16.mxu0 %v1385_v8  ;;  %s185_s26 = scalar_select %p184_p7, %s1630_s30, 20  ;;  %v1401_v24 = vld [vmem:[%s1813_s1 + $0x70] sm:$0xff]   ;;  %v1405_v28 = vld [vmem:[%s1813_s1 + $0x78] sm:$0xff]   ;;  %v1715_v60 = vld [vmem:[%s1814_s2] ss:$0 sm:$0xff] }
  0x13   : > { %1239 = vmatprep.subr.bf16.mxu1 %v1386_v9  ;;  %v1402_v25 = vld [vmem:[%s1813_s1 + $0xf0] sm:$0xff]   ;;  %v1406_v29 = vld [vmem:[%s1813_s1 + $0xf8] sm:$0xff]   ;;  %s836_s7 = ssub.s32 (%p1580_p4), 21, %s1630_s30  ;;  %s1182_s8 = smul.u32 (%p1580_p4), 44, %s1568_s15 }
  0x14   : > { %v1403_v26 = vld [vmem:[%s1813_s1 + $0x30] sm:$0xff]   ;;  %s1170_s9 = sshll.u32 %s185_s26, 4  ;;  %v1407_v30 = vld [vmem:[%s1813_s1 + $0x38] sm:$0xff]   ;;  %p837_p8 = scmp.lt.s32.totalorder (%p1580_p4), %s836_s7, 11 }
  0x15   : > { %1188 = vmatpush3.bf16.msra.mxu0 %v1387_v10  ;;  %v1404_v27 = vld [vmem:[%s1813_s1 + $0xb0] sm:$0xff]   ;;  %s1682_s24 = scalar_lea.vmem %s1812_s0, %s1170_s9  ;;  %v1408_v31 = vld [vmem:[%s1813_s1 + $0xb8] sm:$0xff]   ;;  %s1760_s11 = scalar_lea.vmem (%p1580_p4), %s1815_s3, %s1182_s8  }
  0x16   : > { %1240 = vmatpush3.bf16.msra.mxu1 %v1388_v11  ;;  %1189 = vmatprep.subr.bf16.mxu0 %v1389_v12  ;;  %v1409_v32 = vld [vmem:[%s1682_s24] ss:$16 sps:$4 sm:$0xff]   ;;  %v1411_v33 = vld [vmem:[%s1682_s24 + $0x4] ss:$16 sps:$4 sm:$0xff]   ;;  %v1412_v34 = vld [vmem:[%s1682_s24 + $0x8] ss:$16 sps:$4 sm:$0xff]  }
  0x17   : > { %1241 = vmatprep.subr.bf16.mxu1 %v1390_v13  ;;  %v1414_v35 = vld [vmem:[%s1682_s24 + $0xc] ss:$16 sps:$4 sm:$0xff]   ;;  %632 = vmatprep.mubr.bf16.mxu0 %v1411_v33  ;;  %v1415_v36 = vld [vmem:[%s1682_s24 + $0x24] ss:$16 sps:$4 sm:$0xff]   ;;  %v1419_v38 = vld [vmem:[%s1682_s24 + $0x20] ss:$16 sps:$4 sm:$0xff]  }
  0x18   : > { %712 = vmatprep.mubr.bf16.mxu1 %v1414_v35  ;;  %v1417_v37 = vld [vmem:[%s1682_s24 + $0x2c] ss:$16 sps:$4 sm:$0xff]   ;;  %v1420_v39 = vld [vmem:[%s1682_s24 + $0x28] ss:$16 sps:$4 sm:$0xff]   ;;  %v1421_v40 = vld [vmem:[%s1682_s24 + $0x44] ss:$16 sps:$4 sm:$0xff]  }
  0x19   : > { %1190 = vmatpush3.bf16.msra.mxu0 %v1391_v14  ;;  %v1423_v41 = vld [vmem:[%s1682_s24 + $0x4c] ss:$16 sps:$4 sm:$0xff]   ;;  %v1425_v42 = vld [vmem:[%s1682_s24 + $0x40] ss:$16 sps:$4 sm:$0xff]   ;;  %v1426_v43 = vld [vmem:[%s1682_s24 + $0x48] ss:$16 sps:$4 sm:$0xff]  }
  0x1a   : > { %1242 = vmatpush3.bf16.msra.mxu1 %v1392_v15  ;;  %1191 = vmatprep.subr.bf16.mxu0 %v1393_v16  ;;  %v1427_v44 = vld [vmem:[%s1682_s24 + $0x64] ss:$16 sps:$4 sm:$0xff]   ;;  %v1429_v45 = vld [vmem:[%s1682_s24 + $0x6c] ss:$16 sps:$4 sm:$0xff]   ;;  %v1431_v46 = vld [vmem:[%s1682_s24 + $0x60] ss:$16 sps:$4 sm:$0xff]  }
  0x1b   : > { %1243 = vmatprep.subr.bf16.mxu1 %v1394_v17  ;;  %v1432_v47 = vld [vmem:[%s1682_s24 + $0x68] ss:$16 sps:$4 sm:$0xff]   ;;  %v1433_v48 = vld [vmem:[%s1682_s24 + $0x84] ss:$16 sps:$4 sm:$0xff]   ;;  %v1435_v49 = vld [vmem:[%s1682_s24 + $0x8c] ss:$16 sps:$4 sm:$0xff]  }
  0x1c   : > { %v221_v50 = vld [vmem:[%s1682_s24 + $0xa0] sm:$0xff]  ;;  %v222_v51 = vld [vmem:[%s1682_s24 + $0xa8] sm:$0xff] }
  0x1d   : > { %1192 = vmatpush3.bf16.msra.mxu0 %v1395_v18  ;;  %v1437_v52 = vld [vmem:[%s1682_s24 + $0x80] ss:$16 sps:$4 sm:$0xff]   ;;  %v1438_v53 = vld [vmem:[%s1682_s24 + $0x88] ss:$16 sps:$4 sm:$0xff]   ;;  %v1112_v54 = vcombine.high %v221_v50, %v221_v50  ;;  %v1114_v55 = vcombine.high %v222_v51, %v222_v51  ;;  %v1111_v56 = vcombine.low %v221_v50, %v221_v50  ;;  %v1113_v57 = vcombine.low %v222_v51, %v222_v51 }
  0x1e   : > { %1244 = vmatpush3.bf16.msra.mxu1 %v1396_v19  ;;  %1193 = vmatprep.subr.bf16.mxu0 %v1397_v20 }
  0x1f   : > { %1245 = vmatprep.subr.bf16.mxu1 %v1398_v21 }
  0x21   : > { %1194 = vmatpush3.bf16.msra.mxu0 %v1399_v22 }
  0x22   : > { %1246 = vmatpush3.bf16.msra.mxu1 %v1400_v23  ;;  %1195 = vmatprep.subr.bf16.mxu0 %v1401_v24 }
  0x23   : > { %1247 = vmatprep.subr.bf16.mxu1 %v1402_v25 }
  0x25   : > { %1196 = vmatpush3.bf16.msra.mxu0 %v1403_v26 }
  0x26   : > { %1248 = vmatpush3.bf16.msra.mxu1 %v1404_v27  ;;  %1197 = vmatprep.subr.bf16.mxu0 %v1405_v28 }
  0x27   : > { %1249 = vmatprep.subr.bf16.mxu1 %v1406_v29 }
  0x29   : > { %1198 = vmatpush3.bf16.msra.mxu0 %v1407_v30 }
  0x2a   : > { %1250 = vmatpush3.bf16.msra.mxu1 %v1408_v31 }
  0x2c   : > { %633 = vmatmul.mubr.bf16.vlgmr.msra.gmra.mrb[0].mxu0 %v1409_v32 }
  0x2d   : > { %713 = vmatmul.mubr.bf16.vlgmr.msra.gmra.mrb[0].mxu1 %v1412_v34  ;;  %640 = vmatprep.mubr.bf16.mxu0 %v1415_v36 }
  0x2e   : > { %720 = vmatprep.mubr.bf16.mxu1 %v1417_v37 }
  0x34   : > { %641 = vmatmul.mubr.bf16.gmra.mrb[4].mxu0 %v1419_v38 }
  0x35   : > { %721 = vmatmul.mubr.bf16.gmra.mrb[4].mxu1 %v1420_v39  ;;  %648 = vmatprep.mubr.bf16.mxu0 %v1421_v40 }
  0x36   : > { %728 = vmatprep.mubr.bf16.mxu1 %v1423_v41 }
  0x3c   : > { %649 = vmatmul.mubr.bf16.gmra.mrb[8].mxu0 %v1425_v42 }
  0x3d   : > { %729 = vmatmul.mubr.bf16.gmra.mrb[8].mxu1 %v1426_v43  ;;  %656 = vmatprep.mubr.bf16.mxu0 %v1427_v44 }
  0x3e   : > { %736 = vmatprep.mubr.bf16.mxu1 %v1429_v45 }
  0x44   : > { %657 = vmatmul.mubr.bf16.gmra.mrb[12].mxu0 %v1431_v46 }
  0x45   : > { %737 = vmatmul.mubr.bf16.gmra.mrb[12].mxu1 %v1432_v47  ;;  %664 = vmatprep.mubr.bf16.mxu0 %v1433_v48 }
  0x46   : > { %744 = vmatprep.mubr.bf16.mxu1 %v1435_v49 }
  0x4c   : > { %665 = vmatmul.mubr.bf16.gmra.mrb[16].mxu0 %v1437_v52 }
  0x4d   : > { %745 = vmatmul.mubr.bf16.gmra.mrb[16].mxu1 %v1438_v53  ;;  %672 = vmatprep.mubr.bf16.mxu0 %v1112_v54 }
  0x4e   : > { %752 = vmatprep.mubr.bf16.mxu1 %v1114_v55 }
  0x54   : > { %673 = vmatmul.mubr.bf16.gmra.mrb[20].mxu0 %v1111_v56 }
  0x55   : > { %753 = vmatmul.mubr.bf16.gmra.mrb[20].mxu1 %v1113_v57 }
  0xff   : > { %v1199_v58 = vpop.f32.mrb[0].mxu0 }
 0x100   : > { %v1251_v59 = vpop.f32.mrb[0].mxu1  ;;  %v1200_v61 = vpop.f32.mrb[1].mxu0 }
 0x101   : > { %v1201_v62 = vadd.f32 %v1200_v61, %v1199_v58  ;;  %v1252_v63 = vpop.f32.mrb[1].mxu1  ;;  %v1202_v0 = vpop.f32.mrb[2].mxu0 }
 0x102   : > { %v1253_v1 = vadd.f32 %v1252_v63, %v1251_v59  ;;  %v1254_v2 = vpop.f32.mrb[2].mxu1  ;;  %v1203_v3 = vpop.f32.mrb[3].mxu0 }
 0x103   : > { %v635_v4 = vadd.f32 %v1201_v62, %v1715_v60  ;;  %v1204_v5 = vadd.f32 %v1203_v3, %v1202_v0  ;;  %v1255_v6 = vpop.f32.mrb[3].mxu1 }
 0x104   : > { %v1256_v7 = vadd.f32 %v1255_v6, %v1254_v2 }
 0x105   : > { %v715_v8 = vadd.f32 %v1253_v1, %v635_v4  ;;  %v638_v9 = vadd.f32 %v1204_v5, %v1715_v60 }
 0x107   : > { %v760_v10 = vmax.f32 %v715_v8, 0.0  ;;  %v718_v11 = vadd.f32 %v1256_v7, %v638_v9  ;;  %v1205_v12 = vpop.f32.mrb[4].mxu0 }
 0x108   : > { %v1257_v13 = vpop.f32.mrb[4].mxu1  ;;  %v1206_v14 = vpop.f32.mrb[5].mxu0 }
 0x109   : > { %v1171_v15 = vpack.c.bf16 %v760_v10, %v760_v10  ;;  %v761_v16 = vmax.f32 %v718_v11, 0.0  ;;  %v1207_v17 = vadd.f32 %v1206_v14, %v1205_v12  ;;  %v1258_v18 = vpop.f32.mrb[5].mxu1  ;;  %v1208_v19 = vpop.f32.mrb[6].mxu0 }
 0x10a   : > { %v1259_v20 = vadd.f32 %v1258_v18, %v1257_v13  ;;  %v1260_v21 = vpop.f32.mrb[6].mxu1  ;;  %v1209_v22 = vpop.f32.mrb[7].mxu0 }
 0x10b   : > { %817 = vst.msk [vmem:[%s1720_s12] sm:$0xf] %vm816_vm0, %v1171_v15  ;;  %v1172_v23 = vpack.c.bf16 %v761_v16, %v761_v16  ;;  %v643_v24 = vadd.f32 %v1207_v17, %v1715_v60  ;;  %v1210_v25 = vadd.f32 %v1209_v22, %v1208_v19  ;;  %v1261_v26 = vpop.f32.mrb[7].mxu1 }
 0x10c   : > { %v1262_v27 = vadd.f32 %v1261_v26, %v1260_v21 }
 0x10d   : > { %818 = vst.msk [vmem:[%s1720_s12 + $0x4] sm:$0xf] %vm816_vm0, %v1172_v23  ;;  %v723_v28 = vadd.f32 %v1259_v20, %v643_v24  ;;  %v646_v29 = vadd.f32 %v1210_v25, %v1715_v60 }
 0x10f   : > { %v762_v30 = vmax.f32 %v723_v28, 0.0  ;;  %v726_v31 = vadd.f32 %v1262_v27, %v646_v29  ;;  %v1211_v32 = vpop.f32.mrb[8].mxu0 }
 0x110   : > { %v1263_v33 = vpop.f32.mrb[8].mxu1  ;;  %v1212_v34 = vpop.f32.mrb[9].mxu0 }
 0x111   : > { %v1173_v35 = vpack.c.bf16 %v762_v30, %v762_v30  ;;  %v763_v36 = vmax.f32 %v726_v31, 0.0  ;;  %v1213_v37 = vadd.f32 %v1212_v34, %v1211_v32  ;;  %v1264_v38 = vpop.f32.mrb[9].mxu1  ;;  %v1214_v39 = vpop.f32.mrb[10].mxu0 }
 0x112   : > { %v1265_v40 = vadd.f32 %v1264_v38, %v1263_v33  ;;  %v1266_v41 = vpop.f32.mrb[10].mxu1  ;;  %v1215_v42 = vpop.f32.mrb[11].mxu0 }
 0x113   : > { %819 = vst.msk [vmem:[%s1720_s12 + $0x8] sm:$0xf] %vm816_vm0, %v1173_v35  ;;  %v1174_v43 = vpack.c.bf16 %v763_v36, %v763_v36  ;;  %v651_v44 = vadd.f32 %v1213_v37, %v1715_v60  ;;  %v1216_v45 = vadd.f32 %v1215_v42, %v1214_v39  ;;  %v1267_v46 = vpop.f32.mrb[11].mxu1 }
 0x114   : > { %v1268_v47 = vadd.f32 %v1267_v46, %v1266_v41 }
 0x115   : > { %820 = vst.msk [vmem:[%s1720_s12 + $0xc] sm:$0xf] %vm816_vm0, %v1174_v43  ;;  %v731_v48 = vadd.f32 %v1265_v40, %v651_v44  ;;  %v654_v49 = vadd.f32 %v1216_v45, %v1715_v60 }
 0x117   : > { %v764_v50 = vmax.f32 %v731_v48, 0.0  ;;  %v734_v51 = vadd.f32 %v1268_v47, %v654_v49  ;;  %v1217_v52 = vpop.f32.mrb[12].mxu0 }
 0x118   : > { %v1269_v53 = vpop.f32.mrb[12].mxu1  ;;  %v1218_v54 = vpop.f32.mrb[13].mxu0 }
 0x119   : > { %v1175_v55 = vpack.c.bf16 %v764_v50, %v764_v50  ;;  %v765_v56 = vmax.f32 %v734_v51, 0.0  ;;  %v1219_v57 = vadd.f32 %v1218_v54, %v1217_v52  ;;  %v1270_v58 = vpop.f32.mrb[13].mxu1  ;;  %v1220_v59 = vpop.f32.mrb[14].mxu0 }
 0x11a   : > { %v1271_v61 = vadd.f32 %v1270_v58, %v1269_v53  ;;  %v1272_v62 = vpop.f32.mrb[14].mxu1  ;;  %v1221_v63 = vpop.f32.mrb[15].mxu0 }
 0x11b   : > { %821 = vst.msk [vmem:[%s1720_s12 + $0x10] sm:$0xf] %vm816_vm0, %v1175_v55  ;;  %v1176_v0 = vpack.c.bf16 %v765_v56, %v765_v56  ;;  %v659_v1 = vadd.f32 %v1219_v57, %v1715_v60  ;;  %v1222_v2 = vadd.f32 %v1221_v63, %v1220_v59  ;;  %v1273_v3 = vpop.f32.mrb[15].mxu1 }
 0x11c   : > { %v1274_v4 = vadd.f32 %v1273_v3, %v1272_v62 }
 0x11d   : > { %822 = vst.msk [vmem:[%s1720_s12 + $0x14] sm:$0xf] %vm816_vm0, %v1176_v0  ;;  %v739_v5 = vadd.f32 %v1271_v61, %v659_v1  ;;  %v662_v6 = vadd.f32 %v1222_v2, %v1715_v60 }
 0x11f   : > { %v766_v7 = vmax.f32 %v739_v5, 0.0  ;;  %v742_v8 = vadd.f32 %v1274_v4, %v662_v6  ;;  %v1223_v9 = vpop.f32.mrb[16].mxu0 }
 0x120   : > { %v1275_v10 = vpop.f32.mrb[16].mxu1  ;;  %v1224_v11 = vpop.f32.mrb[17].mxu0 }
 0x121   : > { %v1177_v12 = vpack.c.bf16 %v766_v7, %v766_v7  ;;  %v767_v13 = vmax.f32 %v742_v8, 0.0  ;;  %v1225_v14 = vadd.f32 %v1224_v11, %v1223_v9  ;;  %v1276_v15 = vpop.f32.mrb[17].mxu1  ;;  %v1226_v16 = vpop.f32.mrb[18].mxu0 }
 0x122   : > { %v1277_v17 = vadd.f32 %v1276_v15, %v1275_v10  ;;  %v1278_v18 = vpop.f32.mrb[18].mxu1  ;;  %v1227_v19 = vpop.f32.mrb[19].mxu0 }
 0x123   : > { %823 = vst.msk [vmem:[%s1720_s12 + $0x18] sm:$0xf] %vm816_vm0, %v1177_v12  ;;  %v1178_v20 = vpack.c.bf16 %v767_v13, %v767_v13  ;;  %v667_v21 = vadd.f32 %v1225_v14, %v1715_v60  ;;  %v1228_v22 = vadd.f32 %v1227_v19, %v1226_v16  ;;  %v1279_v23 = vpop.f32.mrb[19].mxu1 }
 0x124   : > { %v1280_v24 = vadd.f32 %v1279_v23, %v1278_v18 }
 0x125   : > { %824 = vst.msk [vmem:[%s1720_s12 + $0x1c] sm:$0xf] %vm816_vm0, %v1178_v20  ;;  %v747_v25 = vadd.f32 %v1277_v17, %v667_v21  ;;  %v670_v26 = vadd.f32 %v1228_v22, %v1715_v60 }
 0x127   : > { %v768_v27 = vmax.f32 %v747_v25, 0.0  ;;  %v750_v28 = vadd.f32 %v1280_v24, %v670_v26  ;;  %v1229_v29 = vpop.f32.mrb[20].mxu0 }
 0x128   : > { %v1281_v30 = vpop.f32.mrb[20].mxu1  ;;  %v1230_v31 = vpop.f32.mrb[21].mxu0 }
 0x129   : > { %v1179_v32 = vpack.c.bf16 %v768_v27, %v768_v27  ;;  %v769_v33 = vmax.f32 %v750_v28, 0.0  ;;  %v1231_v34 = vadd.f32 %v1230_v31, %v1229_v29  ;;  %v1282_v35 = vpop.f32.mrb[21].mxu1  ;;  %v1232_v36 = vpop.f32.mrb[22].mxu0 }
 0x12a   : > { %v1283_v37 = vadd.f32 %v1282_v35, %v1281_v30  ;;  %v1284_v38 = vpop.f32.mrb[22].mxu1  ;;  %v1233_v39 = vpop.f32.mrb[23].mxu0 }
 0x12b   : > { %825 = vst.msk [vmem:[%s1720_s12 + $0x20] sm:$0xf] %vm816_vm0, %v1179_v32  ;;  %v1180_v40 = vpack.c.bf16 %v769_v33, %v769_v33  ;;  %v675_v41 = vadd.f32 %v1231_v34, %v1715_v60  ;;  %v1285_v42 = vpop.f32.mrb[23].mxu1 }
 0x12d   : > { %826 = vst.msk [vmem:[%s1720_s12 + $0x24] sm:$0xf] %vm816_vm0, %v1180_v40  ;;  %v755_v43 = vadd.f32 %v1283_v37, %v675_v41  ;;  %834 = sbr.rel (!%p1580_p4) target bundleno = 377 (0x179), region = 36 }
 0x12f   : > { %v770_v44 = vmax.f32 %v755_v43, 0.0 }
 0x131   : > { %v1181_v45 = vpack.c.bf16 %v770_v44, %v770_v44 }
 0x133   : > { %827 = vst.msk [vmem:[%s1720_s12 + $0x28] sm:$0xf] %vm816_vm0, %v1181_v45 }
 0x134   : > { %s1824_s7 = smov (!%p837_p8, %s836_s7), 11 }
 0x135   : > { %s1158_s14 = sshll.u32 %s1824_s7, 6 }
 0x136   : > { %p1161_p9 = scmp.eq.s32.totalorder %s1158_s14, 0 }
 0x137   : > { %1443 = sdivrem.u32 (!%p1161_p9), %s1824_s7, 11 }
 0x138   : > { %845 = sbr.rel (%p1161_p9) target bundleno = 377 (0x179), region = 40 }
 0x140   : > { %s1766_s20 = spop.drf %1443 }
 0x141   : > { %p1162_p10 = scmp.le.s32.totalorder %s1766_s20, 0 }
 0x142   : > { %s1817_s15 = smov (!%p1162_p10), %s1760_s11  ;;  %s1818_s30 = smov (!%p1162_p10), %s1720_s12 }
 0x143   : > { %1040 = sbr.rel (%p1162_p10) target bundleno = 348 (0x15c), region = 112  ;;  %s1775_s17 = smov (!%p1162_p10), 0  }
 0x144   : > { %s1777_s18 = smov (!%p1162_p10), 0  }
 0x14a LB: >> { %v862_v60 = vld [vmem:[%s1509_s30] sm:$0xf]  ;;  %v864_v46 = vld [vmem:[%s1509_s30 + $0x4] sm:$0xf]  ;;  %v866_v47 = vld [vmem:[%s1509_s30 + $0x8] sm:$0xf]  ;;  %s1517_s18 = sphi %s1777_s18, %s856_s18   ;;  %s1513_s17 = sphi %s1775_s17, %s1819_s17   ;;  %s1509_s30 = sphi %s1818_s30, %s889_s30   ;;  %s1505_s15 = sphi %s1817_s15, %s890_s15  }
 0x14b   : >> { %863 = vst [vmem:[%s1505_s15] sm:$0xf] %v862_v60  ;;  %865 = vst [vmem:[%s1505_s15 + $0x4] sm:$0xf] %v864_v46  ;;  %v868_v48 = vld [vmem:[%s1509_s30 + $0xc] sm:$0xf]  ;;  %s884_s21 = sadd.s32 1, %s1513_s17 }
 0x14c   : >> { %867 = vst [vmem:[%s1505_s15 + $0x8] sm:$0xf] %v866_v47  ;;  %v870_v49 = vld [vmem:[%s1509_s30 + $0x10] sm:$0xf]  ;;  %v872_v50 = vld [vmem:[%s1509_s30 + $0x14] sm:$0xf]  ;;  %p885_p11 = scmp.ge.s32.totalorder %s884_s21, %s1766_s20 }
 0x14d   : >> { %869 = vst [vmem:[%s1505_s15 + $0xc] sm:$0xf] %v868_v48  ;;  %871 = vst [vmem:[%s1505_s15 + $0x10] sm:$0xf] %v870_v49  ;;  %v874_v51 = vld [vmem:[%s1509_s30 + $0x18] sm:$0xf] }
 0x14e   : >> { %873 = vst [vmem:[%s1505_s15 + $0x14] sm:$0xf] %v872_v50  ;;  %v876_v52 = vld [vmem:[%s1509_s30 + $0x1c] sm:$0xf]  ;;  %v878_v53 = vld [vmem:[%s1509_s30 + $0x20] sm:$0xf] }
 0x14f   : >> { %875 = vst [vmem:[%s1505_s15 + $0x18] sm:$0xf] %v874_v51  ;;  %877 = vst [vmem:[%s1505_s15 + $0x1c] sm:$0xf] %v876_v52  ;;  %v880_v54 = vld [vmem:[%s1509_s30 + $0x24] sm:$0xf] }
 0x150   : >> { %879 = vst [vmem:[%s1505_s15 + $0x20] sm:$0xf] %v878_v53  ;;  %v882_v55 = vld [vmem:[%s1509_s30 + $0x28] sm:$0xf]  ;;  %881 = vst [vmem:[%s1505_s15 + $0x24] sm:$0xf] %v880_v54 }
 0x151   : >> { %883 = vst [vmem:[%s1505_s15 + $0x28] sm:$0xf] %v882_v55  ;;  %s1826_s21 = smov (%p885_p11, %s884_s21), 0  ;;  %s856_s18 = sadd.s32 1, %s1517_s18  }
 0x152   : >> { %s887_s22 = smul.u32 44, %s1826_s21  ;;  %p855_p12 = scmp.ge.s32.totalorder %s856_s18, %s1766_s20 }
 0x153   : >> { %s1819_s17 = smov %s1826_s21 }
 0x154   : >> { %s889_s30 = scalar_lea.vmem %s1720_s12, %s887_s22 [#allocation2]   ;;  %s890_s15 = scalar_lea.vmem %s1760_s11, %s887_s22  }
 0x155   : > { %858 = sbr.rel (!%p855_p12) target bundleno = 330 (0x14a), region = 118 }
 0x15c PF: > { %1445 = sdivrem.u32 %s1824_s7, 11 }
 0x15d   : > { %s1163_s23 = smul.u32 44, %s1766_s20 }
 0x15f   : > { %s895_s24 = scalar_lea.vmem %s1720_s12, %s1163_s23 [#allocation2]   ;;  %s897_s25 = scalar_lea.vmem %s1760_s11, %s1163_s23  }
 0x165   : > { %s1446_s26 = spop.drf %1445 }
 0x166   : > { %p1165_p13 = scmp.le.s32.totalorder %s1446_s26, 0 }
 0x167   : > { %s1519_s27 = smov (!%p1165_p13), %s897_s25   ;;  %s1523_s28 = smov (!%p1165_p13), %s895_s24  }
 0x168   : > { %1054 = sbr.rel (%p1165_p13) target bundleno = 377 (0x179), region = 123  ;;  %s1527_s29 = smov (!%p1165_p13), 0  }
 0x169   : > { %s1531_s4 = smov (!%p1165_p13), 0  }
 0x16f LB: >> { %v907_v56 = vld [vmem:[%s1525_s28] sm:$0xf]  ;;  %s909_s5 = sadd.s32 1, %s1529_s29  ;;  %s901_s4 = sadd.s32 1, %s1533_s4   ;;  %s1533_s4 = sphi %s1531_s4, %s901_s4   ;;  %s1529_s29 = sphi %s1527_s29, %s1528_s29   ;;  %s1525_s28 = sphi %s1523_s28, %s914_s28   ;;  %s1521_s27 = sphi %s1519_s27, %s915_s27  }
 0x170   : >> { %908 = vst [vmem:[%s1521_s27] sm:$0xf] %v907_v56  ;;  %p910_p0 = scmp.ge.s32.totalorder %s909_s5, %s1446_s26  ;;  %p900_p1 = scmp.ge.s32.totalorder %s901_s4, %s1446_s26 }
 0x172   : >> { %s1828_s5 = smov (%p910_p0, %s909_s5), 0  ;;  %903 = sbr.rel (!%p900_p1) target bundleno = 367 (0x16f), region = 129 }
 0x173   : >> { %s1166_s6 = sshll.u32 %s1828_s5, 2  ;;  %s1528_s29 = smov %s1828_s5  }
 0x174   : >> { %s914_s28 = scalar_lea.vmem %s895_s24, %s1166_s6 [#allocation2]   ;;  %s915_s27 = scalar_lea.vmem %s897_s25, %s1166_s6  }
 0x179 PF: > { %p10_p2 = scmp.ge.s32.totalorder %s1570_s16, 4   ;;  %s1820_s12 = smov %s1497_s13 }
 0x17a   : > { %s1821_s13 = smov %s1578_s19  ;;  %s1822_s14 = smov %s1570_s16 }
 0x17b   :  { %12 = sbr.rel (!%p10_p2) target bundleno = 2 (0x2), region = 140 }

// kernel: rainbow_forward.6
= control target key start
LH: loop header
LB: loop body
LE: loop exit
PB: predicated region body
PF: predicated region fallthrough
CT: control target
= control target key end

     0   :  { %s1568_s12 = smov 0   ;;  %s1570_s13 = smov 0   ;;  %s1809_s0 = inlined_call_operand.vmem [shape: bf16[98,576], index: 0, kind: input, shape index: {}]   ;;  %s1810_s1 = inlined_call_operand.vmem [shape: bf16[576,64], index: 1, kind: input, shape index: {}]   ;;  %s1811_s2 = inlined_call_operand.vmem [shape: f32[1,64], index: 2, kind: input, shape index: {}]   ;;  %s1812_s3 = inlined_call_operand.vmem [shape: bf16[98,64], index: 3, kind: output, shape index: {}]  }
   0x1   :  { %s1572_s14 = smov 0  }
   0x2 LB: > { %s1581_s15 = sadd.s32 4294967295, %s1514_s14   ;;  %s1583_s16 = sadd.s32 1, %s1514_s14   ;;  %s1514_s14 = sphi %s1572_s14, %s1819_s14   ;;  %s1510_s13 = sphi %s1570_s13, %s1818_s13   ;;  %s1506_s12 = sphi %s1568_s12, %s1817_s12  }
   0x3   : > { %s85_s17 = ssub.s32 %s1514_s14, %s1583_s16  ;;  %s88_s18 = sadd.s32 1, %s1510_s13 }
   0x4   : > { %p86_p0 = scmp.eq.s32.totalorder %s85_s17, 0  ;;  %p98_p1 = scmp.ne.s32.totalorder %s1510_s13, %s1506_s12 }
   0x5   : > { %p99_p2 = scmp.eq.s32.totalorder %s1581_s15, 1  ;;  %p1101_p3 = scmp.ge.s32.totalorder %s1514_s14, 1 }
   0x6   : > { %s1591_s19 = scalar_select %p86_p0, %s1510_s13, %s88_s18  }
   0x7   : > { %p1593_p4 = por %p99_p2, %p98_p1  ;;  %p149_p5 = scmp.lt.s32.totalorder %s1514_s14, 3 }
   0x9   : > { %p150_p6 = pnand %p1101_p3, %p149_p5 }
   0xa   : > { %v1394_v0 = vld [vmem:[%s1810_s1 + $0x40] sm:$0xff] (!%p150_p6)   ;;  %v1398_v4 = vld [vmem:[%s1810_s1 + $0x48] sm:$0xff] (!%p150_p6)   ;;  %v1402_v8 = vld [vmem:[%s1810_s1 + $0x50] sm:$0xff] (!%p150_p6)   ;;  %s1640_s28 = smul.u32 (!%p150_p6), 7, %s1581_s15  ;;  %vm609_vm0 = vcmask (!%p150_p6), 523264   ;;  %s175_s17 = sand.u32 (!%p150_p6), 1, %s1506_s12  }
   0xb   : > { %153 = sbr.rel (%p150_p6) target bundleno = 365 (0x16d), region = 32  ;;  %v1395_v1 = vld [vmem:[%s1810_s1 + $0xc0] sm:$0xff] (!%p150_p6)   ;;  %1191 = vmatprep.subr.bf16.mxu0 (!%p150_p6), %v1394_v0  ;;  %v1399_v5 = vld [vmem:[%s1810_s1 + $0xc8] sm:$0xff] (!%p150_p6)   ;;  %v1403_v9 = vld [vmem:[%s1810_s1 + $0xd0] sm:$0xff] (!%p150_p6)   ;;  %vm850_vm1 = vcmask (!%p150_p6), 519168  }
   0xc   : > { %v1396_v2 = vld [vmem:[%s1810_s1] sm:$0xff] (!%p150_p6)   ;;  %1231 = vmatprep.subr.bf16.mxu1 (!%p150_p6), %v1395_v1  ;;  %v1400_v6 = vld [vmem:[%s1810_s1 + $0x8] sm:$0xff] (!%p150_p6)   ;;  %v1404_v10 = vld [vmem:[%s1810_s1 + $0x10] sm:$0xff] (!%p150_p6)   ;;  %p184_p7 = scmp.lt.s32.totalorder (!%p150_p6), %s1640_s28, 12  ;;  %s1303_s18 = smul.u32 (!%p150_p6), 28, %s175_s17 }
   0xd   : > { %v1397_v3 = vld [vmem:[%s1810_s1 + $0x80] sm:$0xff] (!%p150_p6)   ;;  %1192 = vmatpush3.bf16.msra.mxu0 (!%p150_p6), %v1396_v2  ;;  %v1401_v7 = vld [vmem:[%s1810_s1 + $0x88] sm:$0xff] (!%p150_p6)   ;;  %v1405_v11 = vld [vmem:[%s1810_s1 + $0x90] sm:$0xff] (!%p150_p6)  }
   0xe   : > { %1232 = vmatpush3.bf16.msra.mxu1 (!%p150_p6), %v1397_v3  ;;  %1193 = vmatprep.subr.bf16.mxu0 (!%p150_p6), %v1398_v4  ;;  %v1406_v12 = vld [vmem:[%s1810_s1 + $0x58] sm:$0xff] (!%p150_p6)   ;;  %v1410_v16 = vld [vmem:[%s1810_s1 + $0x60] sm:$0xff] (!%p150_p6)   ;;  %v1414_v20 = vld [vmem:[%s1810_s1 + $0x68] sm:$0xff] (!%p150_p6)   ;;  %s1737_s12 = scalar_lea.vmem (!%p150_p6), [#allocation2], %s1303_s18  }
   0xf   : > { %1233 = vmatprep.subr.bf16.mxu1 (!%p150_p6), %v1399_v5  ;;  %v1407_v13 = vld [vmem:[%s1810_s1 + $0xd8] sm:$0xff] (!%p150_p6)   ;;  %v1411_v17 = vld [vmem:[%s1810_s1 + $0xe0] sm:$0xff] (!%p150_p6)   ;;  %v1415_v21 = vld [vmem:[%s1810_s1 + $0xe8] sm:$0xff] (!%p150_p6)  }
  0x10   : > { %v1408_v14 = vld [vmem:[%s1810_s1 + $0x18] sm:$0xff] (!%p150_p6)   ;;  %v1412_v18 = vld [vmem:[%s1810_s1 + $0x20] sm:$0xff] (!%p150_p6)   ;;  %v1416_v22 = vld [vmem:[%s1810_s1 + $0x28] sm:$0xff] (!%p150_p6)  }
  0x11   : > { %1194 = vmatpush3.bf16.msra.mxu0 (!%p150_p6), %v1400_v6  ;;  %v1409_v15 = vld [vmem:[%s1810_s1 + $0x98] sm:$0xff] (!%p150_p6)   ;;  %v1413_v19 = vld [vmem:[%s1810_s1 + $0xa0] sm:$0xff] (!%p150_p6)   ;;  %v1417_v23 = vld [vmem:[%s1810_s1 + $0xa8] sm:$0xff] (!%p150_p6)  }
  0x12   : > { %1234 = vmatpush3.bf16.msra.mxu1 %v1401_v7  ;;  %1195 = vmatprep.subr.bf16.mxu0 %v1402_v8  ;;  %s185_s24 = scalar_select %p184_p7, %s1640_s28, 12  ;;  %v1418_v24 = vld [vmem:[%s1810_s1 + $0x70] sm:$0xff]   ;;  %v1422_v28 = vld [vmem:[%s1810_s1 + $0x78] sm:$0xff]   ;;  %v1432_v36 = vld [vmem:[%s1810_s1 + $0x100] sm:$0xff]  }
  0x13   : > { %1235 = vmatprep.subr.bf16.mxu1 %v1403_v9  ;;  %v1419_v25 = vld [vmem:[%s1810_s1 + $0xf0] sm:$0xff]   ;;  %v1423_v29 = vld [vmem:[%s1810_s1 + $0xf8] sm:$0xff]   ;;  %v1439_v39 = vld [vmem:[%s1810_s1 + $0x108] sm:$0xff]   ;;  %s866_s21 = ssub.s32 (%p1593_p4), 13, %s1640_s28  ;;  %s1190_s22 = smul.u32 (%p1593_p4), 28, %s1581_s15 }
  0x14   : > { %s1304_s7 = smul.u32 20, %s185_s24  ;;  %v1420_v26 = vld [vmem:[%s1810_s1 + $0x30] sm:$0xff]   ;;  %v1424_v30 = vld [vmem:[%s1810_s1 + $0x38] sm:$0xff]   ;;  %v1103_v60 = vld [vmem:[%s1811_s2] ss:$0 sm:$0xff]  ;;  %p867_p8 = scmp.lt.s32.totalorder (%p1593_p4), %s866_s21, 7 }
  0x15   : > { %1196 = vmatpush3.bf16.msra.mxu0 %v1404_v10  ;;  %v1421_v27 = vld [vmem:[%s1810_s1 + $0xb0] sm:$0xff]   ;;  %v1425_v31 = vld [vmem:[%s1810_s1 + $0xb8] sm:$0xff]   ;;  %s1760_s25 = scalar_lea.vmem (%p1593_p4), %s1812_s3, %s1190_s22  }
  0x16   : > { %1236 = vmatpush3.bf16.msra.mxu1 %v1405_v11  ;;  %1197 = vmatprep.subr.bf16.mxu0 %v1406_v12  ;;  %s1695_s24 = scalar_lea.vmem %s1809_s0, %s1304_s7  ;;  %v1446_v44 = vld [vmem:[%s1810_s1 + $0x110] sm:$0xff]   ;;  %v1451_v45 = vld [vmem:[%s1810_s1 + $0x118] sm:$0xff]  }
  0x17   : > { %1237 = vmatprep.subr.bf16.mxu1 %v1407_v13  ;;  %v1426_v32 = vld [vmem:[%s1695_s24] ss:$20 sps:$4 sm:$0xff]   ;;  %v1428_v33 = vld [vmem:[%s1695_s24 + $0x4] ss:$20 sps:$4 sm:$0xff]   ;;  %v1429_v34 = vld [vmem:[%s1695_s24 + $0x8] ss:$20 sps:$4 sm:$0xff]  }
  0x18   : > { %v1431_v35 = vld [vmem:[%s1695_s24 + $0xc] ss:$20 sps:$4 sm:$0xff]   ;;  %654 = vmatprep.mubr.bf16.mxu0 %v1428_v33  ;;  %v1435_v38 = vld [vmem:[%s1695_s24 + $0x34] ss:$20 sps:$4 sm:$0xff]   ;;  %v1438_v41 = vld [vmem:[%s1695_s24 + $0x30] ss:$20 sps:$4 sm:$0xff]  }
  0x19   : > { %1198 = vmatpush3.bf16.msra.mxu0 %v1408_v14  ;;  %718 = vmatprep.mubr.bf16.mxu1 %v1431_v35  ;;  %v1433_v37 = vld [vmem:[%s1695_s24 + $0x2c] ss:$20 sps:$4 sm:$0xff]   ;;  %v1437_v40 = vld [vmem:[%s1695_s24 + $0x28] ss:$20 sps:$4 sm:$0xff]   ;;  %v1444_v48 = vld [vmem:[%s1695_s24 + $0x50] ss:$20 sps:$4 sm:$0xff]  }
  0x1a   : > { %1238 = vmatpush3.bf16.msra.mxu1 %v1409_v15  ;;  %1199 = vmatprep.subr.bf16.mxu0 %v1410_v16  ;;  %v1440_v42 = vld [vmem:[%s1695_s24 + $0x54] ss:$20 sps:$4 sm:$0xff]   ;;  %v1442_v43 = vld [vmem:[%s1695_s24 + $0x5c] ss:$20 sps:$4 sm:$0xff]   ;;  %v220_v47 = vld [vmem:[%s1695_s24 + $0x80] sm:$0xff] }
  0x1b   : > { %1239 = vmatprep.subr.bf16.mxu1 %v1411_v17  ;;  %v219_v46 = vld [vmem:[%s1695_s24 + $0x78] sm:$0xff]  ;;  %v1122_v51 = vcombine.high %v220_v47, %v220_v47  ;;  %v1121_v53 = vcombine.low %v220_v47, %v220_v47  ;;  %v1452_v54 = vld [vmem:[%s1695_s24 + $0x10] ss:$20 sps:$4 sm:$0xff]   ;;  %v1453_v55 = vld [vmem:[%s1695_s24 + $0x60] ss:$20 sps:$4 sm:$0xff]  }
  0x1c   : > { %v1445_v49 = vld [vmem:[%s1695_s24 + $0x58] ss:$20 sps:$4 sm:$0xff]   ;;  %v1120_v50 = vcombine.high %v219_v46, %v219_v46  ;;  %v1119_v52 = vcombine.low %v219_v46, %v219_v46  ;;  %v1455_v57 = vld [vmem:[%s1695_s24 + $0x88] ss:$0 sps:$4 sm:$0xff]  }
  0x1d   : > { %1200 = vmatpush3.bf16.msra.mxu0 %v1412_v18  ;;  %v1454_v56 = vld [vmem:[%s1695_s24 + $0x38] ss:$20 sps:$4 sm:$0xff]  }
  0x1e   : > { %1240 = vmatpush3.bf16.msra.mxu1 %v1413_v19  ;;  %1201 = vmatprep.subr.bf16.mxu0 %v1414_v20 }
  0x1f   : > { %1241 = vmatprep.subr.bf16.mxu1 %v1415_v21 }
  0x21   : > { %1202 = vmatpush3.bf16.msra.mxu0 %v1416_v22 }
  0x22   : > { %1242 = vmatpush3.bf16.msra.mxu1 %v1417_v23  ;;  %1203 = vmatprep.subr.bf16.mxu0 %v1418_v24 }
  0x23   : > { %1243 = vmatprep.subr.bf16.mxu1 %v1419_v25 }
  0x25   : > { %1204 = vmatpush3.bf16.msra.mxu0 %v1420_v26 }
  0x26   : > { %1244 = vmatpush3.bf16.msra.mxu1 %v1421_v27  ;;  %1205 = vmatprep.subr.bf16.mxu0 %v1422_v28 }
  0x27   : > { %1245 = vmatprep.subr.bf16.mxu1 %v1423_v29 }
  0x29   : > { %1206 = vmatpush3.bf16.msra.mxu0 %v1424_v30 }
  0x2a   : > { %1246 = vmatpush3.bf16.msra.mxu1 %v1425_v31  ;;  %1279 = vmatprep.subr.bf16.mxu0 %v1432_v36 }
  0x2b   : > { %1295 = vmatprep.subr.bf16.mxu1 %v1432_v36 }
  0x2c   : > { %655 = vmatmul.mubr.bf16.vlgmr.msra.gmra.mrb[0].mxu0 %v1426_v32 }
  0x2d   : > { %719 = vmatmul.mubr.bf16.vlgmr.msra.gmra.mrb[0].mxu1 %v1429_v34  ;;  %1280 = vmatpush3.bf16.msra.mxu0 %v1432_v36 }
  0x2e   : > { %1299 = vmatpush3.bf16.msra.mxu1 %v1432_v36  ;;  %662 = vmatprep.mubr.bf16.mxu0 %v1433_v37 }
  0x2f   : > { %726 = vmatprep.mubr.bf16.mxu1 %v1435_v38  ;;  %1281 = vmatprep.subr.bf16.mxu0 %v1439_v39 }
  0x30   : > { %1296 = vmatprep.subr.bf16.mxu1 %v1439_v39 }
  0x31   : > { %1282 = vmatpush3.bf16.msra.mxu0 %v1439_v39 }
  0x32   : > { %1300 = vmatpush3.bf16.msra.mxu1 %v1439_v39  ;;  %1283 = vmatprep.subr.bf16.mxu0 %v1446_v44 }
  0x33   : > { %1297 = vmatprep.subr.bf16.mxu1 %v1446_v44 }
  0x34   : > { %663 = vmatmul.mubr.bf16.gmra.mrb[4].mxu0 %v1437_v40 }
  0x35   : > { %727 = vmatmul.mubr.bf16.gmra.mrb[4].mxu1 %v1438_v41  ;;  %670 = vmatprep.mubr.bf16.mxu0 %v1440_v42 }
  0x36   : > { %734 = vmatprep.mubr.bf16.mxu1 %v1442_v43  ;;  %1284 = vmatpush3.bf16.msra.mxu0 %v1446_v44 }
  0x37   : > { %1301 = vmatpush3.bf16.msra.mxu1 %v1446_v44  ;;  %1285 = vmatprep.subr.bf16.mxu0 %v1451_v45 }
  0x38   : > { %1298 = vmatprep.subr.bf16.mxu1 %v1451_v45 }
  0x3a   : > { %1286 = vmatpush3.bf16.msra.mxu0 %v1451_v45 }
  0x3b   : > { %1302 = vmatpush3.bf16.msra.mxu1 %v1451_v45 }
  0x3c   : > { %671 = vmatmul.mubr.bf16.gmra.mrb[8].mxu0 %v1444_v48 }
  0x3d   : > { %735 = vmatmul.mubr.bf16.gmra.mrb[8].mxu1 %v1445_v49  ;;  %678 = vmatprep.mubr.bf16.mxu0 %v1120_v50 }
  0x3e   : > { %742 = vmatprep.mubr.bf16.mxu1 %v1122_v51 }
  0x44   : > { %679 = vmatmul.mubr.bf16.gmra.mrb[12].mxu0 %v1119_v52 }
  0x45   : > { %743 = vmatmul.mubr.bf16.gmra.mrb[12].mxu1 %v1121_v53  ;;  %1287 = vmatprep.mubr.msk.bf16.mxu0 %vm609_vm0, %v1452_v54 }
  0x46   : > { %1291 = vmatprep.mubr.msk.bf16.mxu1 %vm609_vm0, %v1453_v55 }
  0x4c   : > { %1288 = vmatmul.mubr.msk.bf16.vlgmr.msra.gmra.mrb[16].mxu0 %vm609_vm0, %v1454_v56 }
  0x4d   : > { %1292 = vmatmul.mubr.msk.bf16.vlgmr.msra.gmra.mrb[16].mxu1 %vm609_vm0, %v1455_v57 }
  0xff   : > { %v1207_v58 = vpop.f32.mrb[0].mxu0 }
 0x100   : > { %v1247_v59 = vpop.f32.mrb[0].mxu1  ;;  %v1208_v61 = vpop.f32.mrb[1].mxu0 }
 0x101   : > { %v1209_v62 = vadd.f32 %v1208_v61, %v1207_v58  ;;  %v1248_v63 = vpop.f32.mrb[1].mxu1  ;;  %v1210_v0 = vpop.f32.mrb[2].mxu0 }
 0x102   : > { %v1249_v1 = vadd.f32 %v1248_v63, %v1247_v59  ;;  %v1250_v2 = vpop.f32.mrb[2].mxu1  ;;  %v1211_v3 = vpop.f32.mrb[3].mxu0 }
 0x103   : > { %v657_v4 = vadd.f32 %v1209_v62, %v1103_v60  ;;  %v1212_v5 = vadd.f32 %v1211_v3, %v1210_v0  ;;  %v1251_v6 = vpop.f32.mrb[3].mxu1 }
 0x104   : > { %v1252_v7 = vadd.f32 %v1251_v6, %v1250_v2 }
 0x105   : > { %v660_v8 = vadd.f32 %v1212_v5, %v1103_v60  ;;  %v721_v9 = vadd.f32 %v1249_v1, %v657_v4 }
 0x107   : > { %v1213_v10 = vpop.f32.mrb[4].mxu0  ;;  %v724_v11 = vadd.f32 %v1252_v7, %v660_v8 }
 0x108   : > { %v1253_v12 = vpop.f32.mrb[4].mxu1  ;;  %v1214_v13 = vpop.f32.mrb[5].mxu0 }
 0x109   : > { %v1215_v14 = vadd.f32 %v1214_v13, %v1213_v10  ;;  %v1254_v15 = vpop.f32.mrb[5].mxu1  ;;  %v1216_v16 = vpop.f32.mrb[6].mxu0 }
 0x10a   : > { %v1255_v17 = vadd.f32 %v1254_v15, %v1253_v12  ;;  %v1256_v18 = vpop.f32.mrb[6].mxu1  ;;  %v1217_v19 = vpop.f32.mrb[7].mxu0 }
 0x10b   : > { %v665_v20 = vadd.f32 %v1215_v14, %v1103_v60  ;;  %v1218_v21 = vadd.f32 %v1217_v19, %v1216_v16  ;;  %v1257_v22 = vpop.f32.mrb[7].mxu1 }
 0x10c   : > { %v1258_v23 = vadd.f32 %v1257_v22, %v1256_v18 }
 0x10d   : > { %v668_v24 = vadd.f32 %v1218_v21, %v1103_v60  ;;  %v729_v25 = vadd.f32 %v1255_v17, %v665_v20 }
 0x10f   : > { %v1219_v26 = vpop.f32.mrb[8].mxu0  ;;  %v732_v27 = vadd.f32 %v1258_v23, %v668_v24 }
 0x110   : > { %v1259_v28 = vpop.f32.mrb[8].mxu1  ;;  %v1220_v29 = vpop.f32.mrb[9].mxu0 }
 0x111   : > { %v1221_v30 = vadd.f32 %v1220_v29, %v1219_v26  ;;  %v1260_v31 = vpop.f32.mrb[9].mxu1  ;;  %v1222_v32 = vpop.f32.mrb[10].mxu0 }
 0x112   : > { %v1261_v33 = vadd.f32 %v1260_v31, %v1259_v28  ;;  %v1262_v34 = vpop.f32.mrb[10].mxu1  ;;  %v1223_v35 = vpop.f32.mrb[11].mxu0 }
 0x113   : > { %v673_v36 = vadd.f32 %v1221_v30, %v1103_v60  ;;  %v1224_v37 = vadd.f32 %v1223_v35, %v1222_v32  ;;  %v1263_v38 = vpop.f32.mrb[11].mxu1 }
 0x114   : > { %v1264_v39 = vadd.f32 %v1263_v38, %v1262_v34 }
 0x115   : > { %v676_v40 = vadd.f32 %v1224_v37, %v1103_v60  ;;  %v737_v41 = vadd.f32 %v1261_v33, %v673_v36 }
 0x117   : > { %v1225_v42 = vpop.f32.mrb[12].mxu0  ;;  %v740_v43 = vadd.f32 %v1264_v39, %v676_v40 }
 0x118   : > { %v1265_v44 = vpop.f32.mrb[12].mxu1  ;;  %v1226_v45 = vpop.f32.mrb[13].mxu0 }
 0x119   : > { %v1227_v46 = vadd.f32 %v1226_v45, %v1225_v42  ;;  %v1266_v47 = vpop.f32.mrb[13].mxu1  ;;  %v1228_v48 = vpop.f32.mrb[14].mxu0 }
 0x11a   : > { %v1267_v49 = vadd.f32 %v1266_v47, %v1265_v44  ;;  %v1268_v50 = vpop.f32.mrb[14].mxu1  ;;  %v1229_v51 = vpop.f32.mrb[15].mxu0 }
 0x11b   : > { %v681_v52 = vadd.f32 %v1227_v46, %v1103_v60  ;;  %v1269_v53 = vpop.f32.mrb[15].mxu1 }
 0x11d   : > { %v745_v54 = vadd.f32 %v1267_v49, %v681_v52 }
 0x11f   : > { %v1289_v55 = vpop.f32.mrb[16].mxu0 }
 0x120   : > { %v793_v56 = vadd.f32 %v1289_v55, %v729_v25  ;;  %v1293_v57 = vpop.f32.mrb[16].mxu1  ;;  %v784_v58 = vpop.f32.mrb[17].mxu0 }
 0x121   : > { %v809_v59 = vadd.f32 %v1293_v57, %v745_v54  ;;  %v785_v61 = vadd.f32 %v784_v58, %v721_v9  ;;  %v800_v62 = vpop.f32.mrb[17].mxu1  ;;  %v1290_v63 = vpop.f32.mrb[18].mxu0 }
 0x122   : > { %v816_v0 = vmax.f32 %v793_v56, 0.0  ;;  %v801_v1 = vadd.f32 %v800_v62, %v737_v41  ;;  %v796_v2 = vadd.f32 %v1290_v63, %v732_v27  ;;  %v1294_v3 = vpop.f32.mrb[18].mxu1  ;;  %v787_v4 = vpop.f32.mrb[19].mxu0 }
 0x123   : > { %v820_v5 = vmax.f32 %v809_v59, 0.0  ;;  %v814_v60 = vmax.f32 %v785_v61, 0.0  ;;  %v788_v6 = vadd.f32 %v787_v4, %v724_v11  ;;  %v803_v7 = vpop.f32.mrb[19].mxu1 }
 0x124   : > { %v1185_v8 = vpack.c.bf16 %v816_v0, %v816_v0  ;;  %v818_v10 = vmax.f32 %v801_v1, 0.0  ;;  %v817_v12 = vmax.f32 %v796_v2, 0.0  ;;  %v804_v13 = vadd.f32 %v803_v7, %v740_v43  ;;  %864 = sbr.rel (!%p1593_p4) target bundleno = 365 (0x16d), region = 36 }
 0x125   : > { %v1189_v14 = vpack.c.bf16 %v820_v5, %v820_v5  ;;  %v1183_v15 = vpack.c.bf16 %v814_v60, %v814_v60  ;;  %v815_v16 = vmax.f32 %v788_v6, 0.0 }
 0x126   : > { %853 = vst.msk [vmem:[%s1737_s12 + $0x8] sm:$0xf] %vm850_vm1, %v1185_v8  ;;  %v1187_v9 = vpack.c.bf16 %v818_v10, %v818_v10  ;;  %v1186_v11 = vpack.c.bf16 %v817_v12, %v817_v12  ;;  %v819_v17 = vmax.f32 %v804_v13, 0.0 }
 0x127   : > { %857 = vst.msk [vmem:[%s1737_s12 + $0x18] sm:$0xf] %vm850_vm1, %v1189_v14  ;;  %851 = vst.msk [vmem:[%s1737_s12] sm:$0xf] %vm850_vm1, %v1183_v15  ;;  %v1184_v18 = vpack.c.bf16 %v815_v16, %v815_v16 }
 0x128   : > { %855 = vst.msk [vmem:[%s1737_s12 + $0x10] sm:$0xf] %vm850_vm1, %v1187_v9  ;;  %854 = vst.msk [vmem:[%s1737_s12 + $0xc] sm:$0xf] %vm850_vm1, %v1186_v11  ;;  %v1188_v19 = vpack.c.bf16 %v819_v17, %v819_v17 }
 0x129   : > { %852 = vst.msk [vmem:[%s1737_s12 + $0x4] sm:$0xf] %vm850_vm1, %v1184_v18 }
 0x12a   : > { %856 = vst.msk [vmem:[%s1737_s12 + $0x14] sm:$0xf] %vm850_vm1, %v1188_v19 }
 0x12b   : > { %s1821_s21 = smov (!%p867_p8, %s866_s21), 7 }
 0x12c   : > { %s1171_s26 = sshll.u32 %s1821_s21, 6 }
 0x12d   : > { %p1174_p9 = scmp.eq.s32.totalorder %s1171_s26, 0 }
 0x12e   : > { %1456 = sdivrem.u32 (!%p1174_p9), %s1821_s21, 7 }
 0x12f   : > { %875 = sbr.rel (%p1174_p9) target bundleno = 365 (0x16d), region = 40 }
 0x137   : > { %s1766_s20 = spop.drf %1456 }
 0x138   : > { %p1175_p10 = scmp.le.s32.totalorder %s1766_s20, 0 }
 0x139   : > { %s1814_s15 = smov (!%p1175_p10), %s1760_s25  ;;  %s1815_s28 = smov (!%p1175_p10), %s1737_s12 }
 0x13a   : > { %1054 = sbr.rel (%p1175_p10) target bundleno = 336 (0x150), region = 112  ;;  %s1775_s27 = smov (!%p1175_p10), 0  }
 0x13b   : > { %s1777_s29 = smov (!%p1175_p10), 0  }
 0x141 LB: >> { %v892_v20 = vld [vmem:[%s1522_s28] sm:$0xf]  ;;  %v894_v21 = vld [vmem:[%s1522_s28 + $0x4] sm:$0xf]  ;;  %v896_v22 = vld [vmem:[%s1522_s28 + $0x8] sm:$0xf]  ;;  %s1530_s29 = sphi %s1777_s29, %s886_s29   ;;  %s1526_s27 = sphi %s1775_s27, %s1816_s27   ;;  %s1522_s28 = sphi %s1815_s28, %s911_s28   ;;  %s1518_s15 = sphi %s1814_s15, %s912_s15  }
 0x142   : >> { %893 = vst [vmem:[%s1518_s15] sm:$0xf] %v892_v20  ;;  %895 = vst [vmem:[%s1518_s15 + $0x4] sm:$0xf] %v894_v21  ;;  %v898_v23 = vld [vmem:[%s1522_s28 + $0xc] sm:$0xf]  ;;  %s906_s30 = sadd.s32 1, %s1526_s27 }
 0x143   : >> { %897 = vst [vmem:[%s1518_s15 + $0x8] sm:$0xf] %v896_v22  ;;  %v900_v24 = vld [vmem:[%s1522_s28 + $0x10] sm:$0xf]  ;;  %v902_v25 = vld [vmem:[%s1522_s28 + $0x14] sm:$0xf]  ;;  %p907_p11 = scmp.ge.s32.totalorder %s906_s30, %s1766_s20 }
 0x144   : >> { %899 = vst [vmem:[%s1518_s15 + $0xc] sm:$0xf] %v898_v23  ;;  %901 = vst [vmem:[%s1518_s15 + $0x10] sm:$0xf] %v900_v24  ;;  %v904_v26 = vld [vmem:[%s1522_s28 + $0x18] sm:$0xf] }
 0x145   : >> { %903 = vst [vmem:[%s1518_s15 + $0x14] sm:$0xf] %v902_v25  ;;  %905 = vst [vmem:[%s1518_s15 + $0x18] sm:$0xf] %v904_v26  ;;  %s1823_s30 = smov (%p907_p11, %s906_s30), 0  ;;  %s886_s29 = sadd.s32 1, %s1530_s29  }
 0x146   : >> { %s909_s4 = smul.u32 28, %s1823_s30  ;;  %p885_p12 = scmp.ge.s32.totalorder %s886_s29, %s1766_s20 }
 0x147   : >> { %s1816_s27 = smov %s1823_s30 }
 0x148   : >> { %s911_s28 = scalar_lea.vmem %s1737_s12, %s909_s4 [#allocation2]   ;;  %s912_s15 = scalar_lea.vmem %s1760_s25, %s909_s4  }
 0x149   : > { %888 = sbr.rel (!%p885_p12) target bundleno = 321 (0x141), region = 118 }
 0x150 PF: > { %1458 = sdivrem.u32 %s1821_s21, 7 }
 0x151   : > { %s1176_s5 = smul.u32 28, %s1766_s20 }
 0x153   : > { %s917_s6 = scalar_lea.vmem %s1737_s12, %s1176_s5 [#allocation2]   ;;  %s919_s7 = scalar_lea.vmem %s1760_s25, %s1176_s5  }
 0x159   : > { %s1459_s8 = spop.drf %1458 }
 0x15a   : > { %p1178_p13 = scmp.le.s32.totalorder %s1459_s8, 0 }
 0x15b   : > { %s1532_s9 = smov (!%p1178_p13), %s919_s7   ;;  %s1536_s10 = smov (!%p1178_p13), %s917_s6  }
 0x15c   : > { %1068 = sbr.rel (%p1178_p13) target bundleno = 365 (0x16d), region = 123  ;;  %s1540_s11 = smov (!%p1178_p13), 0  }
 0x15d   : > { %s1544_s14 = smov (!%p1178_p13), 0  }
 0x163 LB: >> { %v929_v27 = vld [vmem:[%s1538_s10] sm:$0xf]  ;;  %s931_s17 = sadd.s32 1, %s1542_s11  ;;  %s923_s14 = sadd.s32 1, %s1546_s14   ;;  %s1546_s14 = sphi %s1544_s14, %s923_s14   ;;  %s1542_s11 = sphi %s1540_s11, %s1541_s11   ;;  %s1538_s10 = sphi %s1536_s10, %s936_s10   ;;  %s1534_s9 = sphi %s1532_s9, %s937_s9  }
 0x164   : >> { %930 = vst [vmem:[%s1534_s9] sm:$0xf] %v929_v27  ;;  %p932_p0 = scmp.ge.s32.totalorder %s931_s17, %s1459_s8  ;;  %p922_p1 = scmp.ge.s32.totalorder %s923_s14, %s1459_s8 }
 0x166   : >> { %s1825_s17 = smov (%p932_p0, %s931_s17), 0  ;;  %925 = sbr.rel (!%p922_p1) target bundleno = 355 (0x163), region = 129 }
 0x167   : >> { %s1179_s18 = sshll.u32 %s1825_s17, 2  ;;  %s1541_s11 = smov %s1825_s17  }
 0x168   : >> { %s936_s10 = scalar_lea.vmem %s917_s6, %s1179_s18 [#allocation2]   ;;  %s937_s9 = scalar_lea.vmem %s919_s7, %s1179_s18  }
 0x16d PF: > { %p10_p2 = scmp.ge.s32.totalorder %s1583_s16, 4   ;;  %s1817_s12 = smov %s1510_s13 }
 0x16e   : > { %s1818_s13 = smov %s1591_s19  ;;  %s1819_s14 = smov %s1583_s16 }
 0x16f   :  { %12 = sbr.rel (!%p10_p2) target bundleno = 2 (0x2), region = 140 }

// kernel: rainbow_forward.7
= control target key start
LH: loop header
LB: loop body
LE: loop exit
PB: predicated region body
PF: predicated region fallthrough
CT: control target
= control target key end

     0   :  { %v1605_v32 = vlaneseq  ;;  %v16205_v33 = vmov 1966171168   ;;  %s22049_s0 = inlined_call_operand.vmem [shape: bf16[2,3136], index: 0, kind: input, shape index: {}]   ;;  %s22050_s1 = inlined_call_operand.vmem [shape: bf16[3136,1024], index: 1, kind: input, shape index: {}]   ;;  %s22051_s2 = inlined_call_operand.vmem [shape: f32[1,1024], index: 2, kind: input, shape index: {}]   ;;  %s22052_s3 = inlined_call_operand.vmem [shape: bf16[512,128], index: 3, kind: input, shape index: {}]   ;;  %s22053_s4 = inlined_call_operand.vmem [shape: f32[1,128], index: 4, kind: input, shape index: {}]   ;;  %s22054_s5 = inlined_call_operand.vmem [shape: bf16[512,768], index: 5, kind: input, shape index: {}]   ;;  %s22055_s6 = inlined_call_operand.vmem [shape: f32[1,768], index: 6, kind: input, shape index: {}]   ;;  %s22056_s7 = inlined_call_operand.vmem [shape: f32[1,128], index: 7, kind: input, shape index: {}]   ;;  %s22057_s8 = inlined_call_operand.hbm [shape: f32[2,6], index: 8, kind: output, shape index: {}]  }
   0x1   :  { %v35_v0 = vld [vmem:[%s22050_s1] sm:$0xff]  ;;  %v1651_v34 = vunpack.c.l.s4 %v16205_v33 }
   0x2   :  { %v39_v1 = vld [vmem:[%s22050_s1 + $0x20] sm:$0xff]  ;;  %v16320_v43 = vshrl.u32 %v1605_v32, 7 }
   0x3   :  { %v163_v2 = vld [vmem:[%s22050_s1 + $0x400] sm:$0xff]  ;;  %v13773_v3 = vcombine.high %v35_v0, %v39_v1  ;;  %v13772_v5 = vcombine.low %v35_v0, %v39_v1  ;;  %v1652_v44 = vunpack.c.0.s8 %v1651_v34 }
   0x4   :  { %v167_v4 = vld [vmem:[%s22050_s1 + $0x420] sm:$0xff] }
   0x5   :  { %v43_v6 = vld [vmem:[%s22050_s1 + $0x40] sm:$0xff]  ;;  %v13901_v8 = vcombine.high %v163_v2, %v167_v4  ;;  %v13900_v9 = vcombine.low %v163_v2, %v167_v4  ;;  %9678 = vmatprep.subr.bf16.mxu1 %v13773_v3  ;;  %v16335_v53 = vsub.s32 %v1652_v44, %v16320_v43 }
   0x6   :  { %v47_v7 = vld [vmem:[%s22050_s1 + $0x60] sm:$0xff]  ;;  %9679 = vmatpush1.bf16.msra.mxu1 %v13772_v5 }
   0x7   :  { %v13781_v10 = vcombine.high %v43_v6, %v47_v7  ;;  %v171_v11 = vld [vmem:[%s22050_s1 + $0x440] sm:$0xff]  ;;  %9719 = vmatprep.subr.bf16.mxu0 %v13901_v8  ;;  %v13780_v18 = vcombine.low %v43_v6, %v47_v7 }
   0x8   :  { %v175_v12 = vld [vmem:[%s22050_s1 + $0x460] sm:$0xff]  ;;  %9720 = vmatpush1.bf16.msra.mxu0 %v13900_v9 }
   0x9   :  { %v51_v13 = vld [vmem:[%s22050_s1 + $0x80] sm:$0xff]  ;;  %v13909_v14 = vcombine.high %v171_v11, %v175_v12  ;;  %9680 = vmatprep.subr.bf16.mxu1 %v13781_v10  ;;  %v13908_v19 = vcombine.low %v171_v11, %v175_v12 }
   0xa   :  { %v55_v15 = vld [vmem:[%s22050_s1 + $0xa0] sm:$0xff]  ;;  %9681 = vmatpush1.bf16.msra.mxu1 %v13780_v18 }
   0xb   :  { %v179_v16 = vld [vmem:[%s22050_s1 + $0x480] sm:$0xff]  ;;  %v13789_v20 = vcombine.high %v51_v13, %v55_v15  ;;  %9721 = vmatprep.subr.bf16.mxu0 %v13909_v14  ;;  %v13788_v26 = vcombine.low %v51_v13, %v55_v15 }
   0xc   :  { %v183_v17 = vld [vmem:[%s22050_s1 + $0x4a0] sm:$0xff]  ;;  %9722 = vmatpush1.bf16.msra.mxu0 %v13908_v19 }
   0xd   :  { %v13917_v21 = vcombine.high %v179_v16, %v183_v17  ;;  %v59_v22 = vld [vmem:[%s22050_s1 + $0xc0] sm:$0xff]  ;;  %9682 = vmatprep.subr.bf16.mxu1 %v13789_v20  ;;  %v13916_v27 = vcombine.low %v179_v16, %v183_v17 }
   0xe   :  { %v63_v23 = vld [vmem:[%s22050_s1 + $0xe0] sm:$0xff]  ;;  %9683 = vmatpush1.bf16.msra.mxu1 %v13788_v26 }
   0xf   :  { %v187_v24 = vld [vmem:[%s22050_s1 + $0x4c0] sm:$0xff]  ;;  %v13797_v28 = vcombine.high %v59_v22, %v63_v23  ;;  %9723 = vmatprep.subr.bf16.mxu0 %v13917_v21  ;;  %v13796_v37 = vcombine.low %v59_v22, %v63_v23 }
  0x10   :  { %v191_v25 = vld [vmem:[%s22050_s1 + $0x4e0] sm:$0xff]  ;;  %9724 = vmatpush1.bf16.msra.mxu0 %v13916_v27 }
  0x11   :  { %v13925_v29 = vcombine.high %v187_v24, %v191_v25  ;;  %v67_v30 = vld [vmem:[%s22050_s1 + $0x100] sm:$0xff]  ;;  %9684 = vmatprep.subr.bf16.mxu1 %v13797_v28  ;;  %v13924_v38 = vcombine.low %v187_v24, %v191_v25 }
  0x12   :  { %v71_v31 = vld [vmem:[%s22050_s1 + $0x120] sm:$0xff]  ;;  %9685 = vmatpush1.bf16.msra.mxu1 %v13796_v37 }
  0x13   :  { %v195_v35 = vld [vmem:[%s22050_s1 + $0x500] sm:$0xff]  ;;  %v13805_v39 = vcombine.high %v67_v30, %v71_v31  ;;  %9725 = vmatprep.subr.bf16.mxu0 %v13925_v29  ;;  %v13804_v47 = vcombine.low %v67_v30, %v71_v31 }
  0x14   :  { %v199_v36 = vld [vmem:[%s22050_s1 + $0x520] sm:$0xff]  ;;  %9726 = vmatpush1.bf16.msra.mxu0 %v13924_v38 }
  0x15   :  { %v13933_v40 = vcombine.high %v195_v35, %v199_v36  ;;  %v75_v41 = vld [vmem:[%s22050_s1 + $0x140] sm:$0xff]  ;;  %9686 = vmatprep.subr.bf16.mxu1 %v13805_v39  ;;  %v13932_v48 = vcombine.low %v195_v35, %v199_v36 }
  0x16   :  { %v79_v42 = vld [vmem:[%s22050_s1 + $0x160] sm:$0xff]  ;;  %9687 = vmatpush1.bf16.msra.mxu1 %v13804_v47 }
  0x17   :  { %v203_v45 = vld [vmem:[%s22050_s1 + $0x540] sm:$0xff]  ;;  %v13813_v49 = vcombine.high %v75_v41, %v79_v42  ;;  %9727 = vmatprep.subr.bf16.mxu0 %v13933_v40  ;;  %v13812_v56 = vcombine.low %v75_v41, %v79_v42 }
  0x18   :  { %v207_v46 = vld [vmem:[%s22050_s1 + $0x560] sm:$0xff]  ;;  %9728 = vmatpush1.bf16.msra.mxu0 %v13932_v48 }
  0x19   :  { %v13941_v50 = vcombine.high %v203_v45, %v207_v46  ;;  %v83_v51 = vld [vmem:[%s22050_s1 + $0x180] sm:$0xff]  ;;  %9688 = vmatprep.subr.bf16.mxu1 %v13813_v49  ;;  %v13940_v57 = vcombine.low %v203_v45, %v207_v46 }
  0x1a   :  { %v87_v52 = vld [vmem:[%s22050_s1 + $0x1a0] sm:$0xff]  ;;  %9689 = vmatpush1.bf16.msra.mxu1 %v13812_v56 }
  0x1b   :  { %v211_v54 = vld [vmem:[%s22050_s1 + $0x580] sm:$0xff]  ;;  %v13821_v58 = vcombine.high %v83_v51, %v87_v52  ;;  %9729 = vmatprep.subr.bf16.mxu0 %v13941_v50  ;;  %v13820_v2 = vcombine.low %v83_v51, %v87_v52 }
  0x1c   :  { %v215_v55 = vld [vmem:[%s22050_s1 + $0x5a0] sm:$0xff]  ;;  %9730 = vmatpush1.bf16.msra.mxu0 %v13940_v57 }
  0x1d   :  { %v16346_v59 = vld [vmem:[%s22049_s0] sm:$0xff]  ;;  %v13949_v60 = vcombine.high %v211_v54, %v215_v55  ;;  %9690 = vmatprep.subr.bf16.mxu1 %v13821_v58  ;;  %v13948_v4 = vcombine.low %v211_v54, %v215_v55 }
  0x1e   :  { %v91_v61 = vld [vmem:[%s22050_s1 + $0x1c0] sm:$0xff]  ;;  %v16356_v63 = vrot.slane %v16346_v59, %v16335_v53  ;;  %9691 = vmatpush1.bf16.msra.mxu1 %v13820_v2 }
  0x1f   :  { %v95_v62 = vld [vmem:[%s22050_s1 + $0x1e0] sm:$0xff]  ;;  %9731 = vmatprep.subr.bf16.mxu0 %v13949_v60 }
  0x20   :  { %v219_v0 = vld [vmem:[%s22050_s1 + $0x5c0] sm:$0xff]  ;;  %v1664_v3 = vcombine.high %v16356_v63, %v16356_v63  ;;  %v13829_v5 = vcombine.high %v91_v61, %v95_v62  ;;  %v13828_v12 = vcombine.low %v91_v61, %v95_v62  ;;  %9732 = vmatpush1.bf16.msra.mxu0 %v13948_v4 }
  0x21   :  { %v223_v1 = vld [vmem:[%s22050_s1 + $0x5e0] sm:$0xff] }
  0x22   :  { %v13957_v6 = vcombine.high %v219_v0, %v223_v1  ;;  %v99_v7 = vld [vmem:[%s22050_s1 + $0x200] sm:$0xff]  ;;  %v16373_v9 = vrot.slane %v1664_v3, %v16335_v53  ;;  %9692 = vmatprep.subr.bf16.mxu1 %v13829_v5  ;;  %v13956_v14 = vcombine.low %v219_v0, %v223_v1 }
  0x23   :  { %v103_v8 = vld [vmem:[%s22050_s1 + $0x220] sm:$0xff]  ;;  %9693 = vmatpush1.bf16.msra.mxu1 %v13828_v12 }
  0x24   :  { %v227_v10 = vld [vmem:[%s22050_s1 + $0x600] sm:$0xff]  ;;  %9710 = vmatprep.mubr.bf16.mxu1 %v16373_v9  ;;  %v16384_v13 = vcombine.high %v16373_v9, %v16373_v9  ;;  %v13837_v15 = vcombine.high %v99_v7, %v103_v8  ;;  %9733 = vmatprep.subr.bf16.mxu0 %v13957_v6  ;;  %v13836_v21 = vcombine.low %v99_v7, %v103_v8 }
  0x25   :  { %v231_v11 = vld [vmem:[%s22050_s1 + $0x620] sm:$0xff]  ;;  %9734 = vmatpush1.bf16.msra.mxu0 %v13956_v14  ;;  %v1649_v8 = vcombine.high %v16346_v59, %v16346_v59  ;;  %v36_v59 = vld [vmem:[%s22050_s1 + $0x8] sm:$0xff] }
  0x26   :  { %v13965_v16 = vcombine.high %v227_v10, %v231_v11  ;;  %v107_v17 = vld [vmem:[%s22050_s1 + $0x240] sm:$0xff]  ;;  %9751 = vmatprep.mubr.bf16.mxu0 %v16384_v13  ;;  %9694 = vmatprep.subr.bf16.mxu1 %v13837_v15  ;;  %v13964_v22 = vcombine.low %v227_v10, %v231_v11 }
  0x27   :  { %v111_v18 = vld [vmem:[%s22050_s1 + $0x260] sm:$0xff]  ;;  %9695 = vmatpush1.bf16.msra.mxu1 %v13836_v21 }
  0x28   :  { %v235_v19 = vld [vmem:[%s22050_s1 + $0x640] sm:$0xff]  ;;  %v13845_v23 = vcombine.high %v107_v17, %v111_v18  ;;  %9735 = vmatprep.subr.bf16.mxu0 %v13965_v16  ;;  %v13844_v29 = vcombine.low %v107_v17, %v111_v18  ;;  %v40_v17 = vld [vmem:[%s22050_s1 + $0x28] sm:$0xff]  ;;  %v16480_v18 = vrot.slane %v1649_v8, %v16335_v53 }
  0x29   :  { %v239_v20 = vld [vmem:[%s22050_s1 + $0x660] sm:$0xff]  ;;  %9736 = vmatpush1.bf16.msra.mxu0 %v13964_v22  ;;  %v16490_v22 = vrot.slane %v16356_v63, %v16335_v53 }
  0x2a   :  { %v13973_v24 = vcombine.high %v235_v19, %v239_v20  ;;  %v115_v25 = vld [vmem:[%s22050_s1 + $0x280] sm:$0xff]  ;;  %9696 = vmatprep.subr.bf16.mxu1 %v13845_v23  ;;  %v13972_v30 = vcombine.low %v235_v19, %v239_v20 }
  0x2b   :  { %v119_v26 = vld [vmem:[%s22050_s1 + $0x2a0] sm:$0xff]  ;;  %9697 = vmatpush1.bf16.msra.mxu1 %v13844_v29 }
  0x2c   :  { %v243_v27 = vld [vmem:[%s22050_s1 + $0x680] sm:$0xff]  ;;  %v13853_v31 = vcombine.high %v115_v25, %v119_v26  ;;  %9737 = vmatprep.subr.bf16.mxu0 %v13973_v24  ;;  %v13852_v38 = vcombine.low %v115_v25, %v119_v26  ;;  %v13775_v24 = vcombine.high %v36_v59, %v40_v17  ;;  %v44_v26 = vld [vmem:[%s22050_s1 + $0x48] sm:$0xff] }
  0x2d   :  { %v247_v28 = vld [vmem:[%s22050_s1 + $0x6a0] sm:$0xff]  ;;  %9738 = vmatpush1.bf16.msra.mxu0 %v13972_v30  ;;  %v13774_v30 = vcombine.low %v36_v59, %v40_v17 }
  0x2e   :  { %v13981_v33 = vcombine.high %v243_v27, %v247_v28  ;;  %v123_v34 = vld [vmem:[%s22050_s1 + $0x2c0] sm:$0xff]  ;;  %9698 = vmatprep.subr.bf16.mxu1 %v13853_v31  ;;  %v13980_v39 = vcombine.low %v243_v27, %v247_v28  ;;  %v48_v27 = vld [vmem:[%s22050_s1 + $0x68] sm:$0xff]  ;;  %v1665_v28 = vcombine.high %v16480_v18, %v16480_v18  ;;  %v16508_v31 = vcombine.high %v16490_v22, %v16490_v22 }
  0x2f   :  { %v127_v35 = vld [vmem:[%s22050_s1 + $0x2e0] sm:$0xff]  ;;  %9699 = vmatpush1.bf16.msra.mxu1 %v13852_v38 }
  0x30   :  { %v251_v36 = vld [vmem:[%s22050_s1 + $0x6c0] sm:$0xff]  ;;  %v13861_v40 = vcombine.high %v123_v34, %v127_v35  ;;  %9739 = vmatprep.subr.bf16.mxu0 %v13981_v33  ;;  %v13860_v47 = vcombine.low %v123_v34, %v127_v35  ;;  %v13783_v34 = vcombine.high %v44_v26, %v48_v27 }
  0x31   :  { %v255_v37 = vld [vmem:[%s22050_s1 + $0x6e0] sm:$0xff]  ;;  %9740 = vmatpush1.bf16.msra.mxu0 %v13980_v39  ;;  %v56_v39 = vld [vmem:[%s22050_s1 + $0xa8] sm:$0xff] }
  0x32   :  { %v13989_v41 = vcombine.high %v251_v36, %v255_v37  ;;  %v131_v42 = vld [vmem:[%s22050_s1 + $0x300] sm:$0xff]  ;;  %9700 = vmatprep.subr.bf16.mxu1 %v13861_v40  ;;  %v13988_v48 = vcombine.low %v251_v36, %v255_v37  ;;  %v52_v37 = vld [vmem:[%s22050_s1 + $0x88] sm:$0xff]  ;;  %v16523_v40 = vrot.slane %v1665_v28, %v16335_v53 }
  0x33   :  { %v135_v44 = vld [vmem:[%s22050_s1 + $0x320] sm:$0xff]  ;;  %9701 = vmatpush1.bf16.msra.mxu1 %v13860_v47  ;;  %v60_v47 = vld [vmem:[%s22050_s1 + $0xc8] sm:$0xff] }
  0x34   :  { %v259_v45 = vld [vmem:[%s22050_s1 + $0x700] sm:$0xff]  ;;  %v13869_v49 = vcombine.high %v131_v42, %v135_v44  ;;  %9741 = vmatprep.subr.bf16.mxu0 %v13989_v41  ;;  %v13868_v56 = vcombine.low %v131_v42, %v135_v44  ;;  %v13782_v41 = vcombine.low %v44_v26, %v48_v27  ;;  %v13791_v44 = vcombine.high %v52_v37, %v56_v39 }
  0x35   :  { %v263_v46 = vld [vmem:[%s22050_s1 + $0x720] sm:$0xff]  ;;  %9742 = vmatpush1.bf16.msra.mxu0 %v13988_v48 }
  0x36   :  { %v13997_v50 = vcombine.high %v259_v45, %v263_v46  ;;  %v139_v51 = vld [vmem:[%s22050_s1 + $0x340] sm:$0xff]  ;;  %9702 = vmatprep.subr.bf16.mxu1 %v13869_v49  ;;  %v13996_v57 = vcombine.low %v259_v45, %v263_v46  ;;  %v64_v49 = vld [vmem:[%s22050_s1 + $0xe8] sm:$0xff] }
  0x37   :  { %v143_v52 = vld [vmem:[%s22050_s1 + $0x360] sm:$0xff]  ;;  %9703 = vmatpush1.bf16.msra.mxu1 %v13868_v56  ;;  %v68_v56 = vld [vmem:[%s22050_s1 + $0x108] sm:$0xff] }
  0x38   :  { %v267_v54 = vld [vmem:[%s22050_s1 + $0x740] sm:$0xff]  ;;  %v13877_v58 = vcombine.high %v139_v51, %v143_v52  ;;  %9743 = vmatprep.subr.bf16.mxu0 %v13997_v50  ;;  %v13876_v2 = vcombine.low %v139_v51, %v143_v52  ;;  %v13790_v50 = vcombine.low %v52_v37, %v56_v39  ;;  %v13799_v52 = vcombine.high %v60_v47, %v64_v49 }
  0x39   :  { %v271_v55 = vld [vmem:[%s22050_s1 + $0x760] sm:$0xff]  ;;  %9744 = vmatpush1.bf16.msra.mxu0 %v13996_v57 }
  0x3a   :  { %v14005_v60 = vcombine.high %v267_v54, %v271_v55  ;;  %v147_v61 = vld [vmem:[%s22050_s1 + $0x380] sm:$0xff]  ;;  %9704 = vmatprep.subr.bf16.mxu1 %v13877_v58  ;;  %v14004_v3 = vcombine.low %v267_v54, %v271_v55  ;;  %v72_v58 = vld [vmem:[%s22050_s1 + $0x128] sm:$0xff] }
  0x3b   :  { %v151_v62 = vld [vmem:[%s22050_s1 + $0x3a0] sm:$0xff]  ;;  %9705 = vmatpush1.bf16.msra.mxu1 %v13876_v2  ;;  %v76_v2 = vld [vmem:[%s22050_s1 + $0x148] sm:$0xff] }
  0x3c   :  { %v275_v0 = vld [vmem:[%s22050_s1 + $0x780] sm:$0xff]  ;;  %v13885_v4 = vcombine.high %v147_v61, %v151_v62  ;;  %9745 = vmatprep.subr.bf16.mxu0 %v14005_v60  ;;  %v13884_v12 = vcombine.low %v147_v61, %v151_v62  ;;  %v13798_v60 = vcombine.low %v60_v47, %v64_v49  ;;  %v13807_v62 = vcombine.high %v68_v56, %v72_v58 }
  0x3d   :  { %v279_v1 = vld [vmem:[%s22050_s1 + $0x7a0] sm:$0xff]  ;;  %9746 = vmatpush1.bf16.msra.mxu0 %v14004_v3 }
  0x3e   :  { %v14013_v5 = vcombine.high %v275_v0, %v279_v1  ;;  %v155_v6 = vld [vmem:[%s22050_s1 + $0x3c0] sm:$0xff]  ;;  %9706 = vmatprep.subr.bf16.mxu1 %v13885_v4  ;;  %v14012_v14 = vcombine.low %v275_v0, %v279_v1  ;;  %v80_v4 = vld [vmem:[%s22050_s1 + $0x168] sm:$0xff] }
  0x3f   :  { %v159_v7 = vld [vmem:[%s22050_s1 + $0x3e0] sm:$0xff]  ;;  %9707 = vmatpush1.bf16.msra.mxu1 %v13884_v12 }
  0x40   :  { %v283_v10 = vld [vmem:[%s22050_s1 + $0x7c0] sm:$0xff]  ;;  %v13893_v15 = vcombine.high %v155_v6, %v159_v7  ;;  %9747 = vmatprep.subr.bf16.mxu0 %v14013_v5  ;;  %v13892_v21 = vcombine.low %v155_v6, %v159_v7  ;;  %v13806_v5 = vcombine.low %v68_v56, %v72_v58  ;;  %v13815_v7 = vcombine.high %v76_v2, %v80_v4 }
  0x41   :  { %v287_v11 = vld [vmem:[%s22050_s1 + $0x7e0] sm:$0xff]  ;;  %9748 = vmatpush1.bf16.msra.mxu0 %v14012_v14  ;;  %v88_v14 = vld [vmem:[%s22050_s1 + $0x1a8] sm:$0xff] }
  0x42   :  { %v14021_v16 = vcombine.high %v283_v10, %v287_v11  ;;  %v291_v19 = vld [vmem:[%s22050_s1 + $0x800] sm:$0xff]  ;;  %9708 = vmatprep.subr.bf16.mxu1 %v13893_v15  ;;  %v14020_v23 = vcombine.low %v283_v10, %v287_v11  ;;  %v84_v11 = vld [vmem:[%s22050_s1 + $0x188] sm:$0xff]  ;;  %v13814_v15 = vcombine.low %v76_v2, %v80_v4 }
  0x43   :  { %v295_v20 = vld [vmem:[%s22050_s1 + $0x820] sm:$0xff]  ;;  %9709 = vmatpush1.bf16.msra.mxu1 %v13892_v21  ;;  %v13823_v59 = vcombine.high %v84_v11, %v88_v14 }
  0x44   :  { %9749 = vmatprep.subr.bf16.mxu0 %v14021_v16  ;;  %v14029_v25 = vcombine.high %v291_v19, %v295_v20  ;;  %v299_v63 = vld [vmem:[%s22050_s1 + $0x840] sm:$0xff]  ;;  %v14028_v33 = vcombine.low %v291_v19, %v295_v20  ;;  %10211 = vmatprep.subr.bf16.mxu1 %v13775_v24  ;;  %v92_v20 = vld [vmem:[%s22050_s1 + $0x1c8] sm:$0xff]  ;;  %v13822_v24 = vcombine.low %v84_v11, %v88_v14 }
  0x45   :  { %v303_v29 = vld [vmem:[%s22050_s1 + $0x860] sm:$0xff]  ;;  %9750 = vmatpush1.bf16.msra.mxu0 %v14020_v23  ;;  %v96_v23 = vld [vmem:[%s22050_s1 + $0x1e8] sm:$0xff] }
  0x46   :  { %v307_v35 = vld [vmem:[%s22050_s1 + $0x880] sm:$0xff]  ;;  %9760 = vmatprep.subr.bf16.mxu0 %v14029_v25  ;;  %v14037_v38 = vcombine.high %v299_v63, %v303_v29  ;;  %9711 = vmatmul.mubr.bf16.vlgmr.msra.gmra.mrb[0].mxu1 %v16490_v22  ;;  %v14036_v42 = vcombine.low %v299_v63, %v303_v29  ;;  %v13831_v26 = vcombine.high %v92_v20, %v96_v23  ;;  %v100_v63 = vld [vmem:[%s22050_s1 + $0x208] sm:$0xff] }
  0x47   :  { %v311_v36 = vld [vmem:[%s22050_s1 + $0x8a0] sm:$0xff]  ;;  %10212 = vmatpush1.bf16.msra.mxu1 %v13774_v30  ;;  %10243 = vmatprep.mubr.bf16.mxu1 %v16373_v9  ;;  %v104_v30 = vld [vmem:[%s22050_s1 + $0x228] sm:$0xff] }
  0x48   :  { %9752 = vmatmul.mubr.bf16.vlgmr.msra.gmra.mrb[0].mxu0 %v16508_v31  ;;  %10213 = vmatprep.subr.bf16.mxu1 %v13783_v34  ;;  %v315_v45 = vld [vmem:[%s22050_s1 + $0x8c0] sm:$0xff]  ;;  %v14045_v48 = vcombine.high %v307_v35, %v311_v36  ;;  %v14044_v51 = vcombine.low %v307_v35, %v311_v36  ;;  %v13839_v35 = vcombine.high %v100_v63, %v104_v30 }
  0x49   :  { %9761 = vmatpush1.bf16.msra.mxu0 %v14028_v33  ;;  %v319_v46 = vld [vmem:[%s22050_s1 + $0x8e0] sm:$0xff]  ;;  %9792 = vmatprep.mubr.bf16.mxu0 %v16523_v40  ;;  %v13830_v33 = vcombine.low %v92_v20, %v96_v23 }
  0x4a   :  { %9762 = vmatprep.subr.bf16.mxu0 %v14037_v38  ;;  %v323_v54 = vld [vmem:[%s22050_s1 + $0x900] sm:$0xff]  ;;  %v14053_v57 = vcombine.high %v315_v45, %v319_v46  ;;  %v14052_v61 = vcombine.low %v315_v45, %v319_v46  ;;  %v108_v38 = vld [vmem:[%s22050_s1 + $0x248] sm:$0xff] }
  0x4b   :  { %10214 = vmatpush1.bf16.msra.mxu1 %v13782_v41  ;;  %v327_v55 = vld [vmem:[%s22050_s1 + $0x920] sm:$0xff]  ;;  %v112_v41 = vld [vmem:[%s22050_s1 + $0x268] sm:$0xff] }
  0x4c   :  { %10215 = vmatprep.subr.bf16.mxu1 %v13791_v44  ;;  %v331_v0 = vld [vmem:[%s22050_s1 + $0x940] sm:$0xff]  ;;  %v14061_v3 = vcombine.high %v323_v54, %v327_v55  ;;  %v14060_v6 = vcombine.low %v323_v54, %v327_v55  ;;  %v13847_v45 = vcombine.high %v108_v38, %v112_v41 }
  0x4d   :  { %9763 = vmatpush1.bf16.msra.mxu0 %v14036_v42  ;;  %v335_v1 = vld [vmem:[%s22050_s1 + $0x960] sm:$0xff]  ;;  %v13838_v42 = vcombine.low %v100_v63, %v104_v30 }
  0x4e   :  { %9764 = vmatprep.subr.bf16.mxu0 %v14045_v48  ;;  %v339_v8 = vld [vmem:[%s22050_s1 + $0x980] sm:$0xff]  ;;  %v14069_v12 = vcombine.high %v331_v0, %v335_v1  ;;  %v14068_v16 = vcombine.low %v331_v0, %v335_v1  ;;  %v116_v48 = vld [vmem:[%s22050_s1 + $0x288] sm:$0xff] }
  0x4f   :  { %10216 = vmatpush1.bf16.msra.mxu1 %v13790_v50  ;;  %v343_v10 = vld [vmem:[%s22050_s1 + $0x9a0] sm:$0xff]  ;;  %v120_v50 = vld [vmem:[%s22050_s1 + $0x2a8] sm:$0xff] }
  0x50   :  { %10217 = vmatprep.subr.bf16.mxu1 %v13799_v52  ;;  %v347_v17 = vld [vmem:[%s22050_s1 + $0x9c0] sm:$0xff]  ;;  %v14077_v21 = vcombine.high %v339_v8, %v343_v10  ;;  %v14076_v25 = vcombine.low %v339_v8, %v343_v10  ;;  %v13855_v54 = vcombine.high %v116_v48, %v120_v50 }
  0x51   :  { %9765 = vmatpush1.bf16.msra.mxu0 %v14044_v51  ;;  %v351_v19 = vld [vmem:[%s22050_s1 + $0x9e0] sm:$0xff]  ;;  %v13846_v51 = vcombine.low %v108_v38, %v112_v41 }
  0x52   :  { %9766 = vmatprep.subr.bf16.mxu0 %v14053_v57  ;;  %v355_v27 = vld [vmem:[%s22050_s1 + $0xa00] sm:$0xff]  ;;  %v14085_v29 = vcombine.high %v347_v17, %v351_v19  ;;  %v14084_v34 = vcombine.low %v347_v17, %v351_v19  ;;  %v124_v57 = vld [vmem:[%s22050_s1 + $0x2c8] sm:$0xff] }
  0x53   :  { %10218 = vmatpush1.bf16.msra.mxu1 %v13798_v60  ;;  %v359_v28 = vld [vmem:[%s22050_s1 + $0xa20] sm:$0xff]  ;;  %v128_v60 = vld [vmem:[%s22050_s1 + $0x2e8] sm:$0xff] }
  0x54   :  { %10219 = vmatprep.subr.bf16.mxu1 %v13807_v62  ;;  %v363_v36 = vld [vmem:[%s22050_s1 + $0xa40] sm:$0xff]  ;;  %v14093_v39 = vcombine.high %v355_v27, %v359_v28  ;;  %v14092_v44 = vcombine.low %v355_v27, %v359_v28  ;;  %v13863_v0 = vcombine.high %v124_v57, %v128_v60 }
  0x55   :  { %9767 = vmatpush1.bf16.msra.mxu0 %v14052_v61  ;;  %v367_v37 = vld [vmem:[%s22050_s1 + $0xa60] sm:$0xff]  ;;  %v13854_v61 = vcombine.low %v116_v48, %v120_v50  ;;  %v172_v50 = vld [vmem:[%s22050_s1 + $0x448] sm:$0xff] }
  0x56   :  { %9768 = vmatprep.subr.bf16.mxu0 %v14061_v3  ;;  %v371_v46 = vld [vmem:[%s22050_s1 + $0xa80] sm:$0xff]  ;;  %v14101_v49 = vcombine.high %v363_v36, %v367_v37  ;;  %v14100_v52 = vcombine.low %v363_v36, %v367_v37  ;;  %v132_v3 = vld [vmem:[%s22050_s1 + $0x308] sm:$0xff] }
  0x57   :  { %10220 = vmatpush1.bf16.msra.mxu1 %v13806_v5  ;;  %v375_v47 = vld [vmem:[%s22050_s1 + $0xaa0] sm:$0xff]  ;;  %v136_v5 = vld [vmem:[%s22050_s1 + $0x328] sm:$0xff] }
  0x58   :  { %10221 = vmatprep.subr.bf16.mxu1 %v13815_v7  ;;  %v379_v55 = vld [vmem:[%s22050_s1 + $0xac0] sm:$0xff]  ;;  %v14109_v58 = vcombine.high %v371_v46, %v375_v47  ;;  %v14108_v62 = vcombine.low %v371_v46, %v375_v47  ;;  %v13871_v8 = vcombine.high %v132_v3, %v136_v5 }
  0x59   :  { %9769 = vmatpush1.bf16.msra.mxu0 %v14060_v6  ;;  %v383_v56 = vld [vmem:[%s22050_s1 + $0xae0] sm:$0xff]  ;;  %v13862_v6 = vcombine.low %v124_v57, %v128_v60  ;;  %v180_v60 = vld [vmem:[%s22050_s1 + $0x488] sm:$0xff] }
  0x5a   :  { %9770 = vmatprep.subr.bf16.mxu0 %v14069_v12  ;;  %v387_v1 = vld [vmem:[%s22050_s1 + $0xb00] sm:$0xff]  ;;  %v14117_v4 = vcombine.high %v379_v55, %v383_v56  ;;  %v14116_v7 = vcombine.low %v379_v55, %v383_v56  ;;  %v140_v12 = vld [vmem:[%s22050_s1 + $0x348] sm:$0xff] }
  0x5b   :  { %10222 = vmatpush1.bf16.msra.mxu1 %v13814_v15  ;;  %v391_v2 = vld [vmem:[%s22050_s1 + $0xb20] sm:$0xff]  ;;  %v144_v15 = vld [vmem:[%s22050_s1 + $0x368] sm:$0xff] }
  0x5c   :  { %10223 = vmatprep.subr.bf16.mxu1 %v13823_v59  ;;  %v395_v10 = vld [vmem:[%s22050_s1 + $0xb40] sm:$0xff]  ;;  %v14125_v14 = vcombine.high %v387_v1, %v391_v2  ;;  %v14124_v59 = vcombine.low %v387_v1, %v391_v2  ;;  %v13879_v17 = vcombine.high %v140_v12, %v144_v15 }
  0x5d   :  { %9771 = vmatpush1.bf16.msra.mxu0 %v14068_v16  ;;  %v399_v11 = vld [vmem:[%s22050_s1 + $0xb60] sm:$0xff]  ;;  %v13870_v16 = vcombine.low %v132_v3, %v136_v5  ;;  %v188_v5 = vld [vmem:[%s22050_s1 + $0x4c8] sm:$0xff] }
  0x5e   :  { %9772 = vmatprep.subr.bf16.mxu0 %v14077_v21  ;;  %v403_v19 = vld [vmem:[%s22050_s1 + $0xb80] sm:$0xff]  ;;  %v148_v21 = vld [vmem:[%s22050_s1 + $0x388] sm:$0xff]  ;;  %v14133_v23 = vcombine.high %v395_v10, %v399_v11 }
  0x5f   :  { %10224 = vmatpush1.bf16.msra.mxu1 %v13822_v24  ;;  %v407_v20 = vld [vmem:[%s22050_s1 + $0xba0] sm:$0xff]  ;;  %v152_v24 = vld [vmem:[%s22050_s1 + $0x3a8] sm:$0xff] }
  0x60   :  { %10225 = vmatprep.subr.bf16.mxu1 %v13831_v26  ;;  %v14132_v26 = vcombine.low %v395_v10, %v399_v11  ;;  %v13887_v27 = vcombine.high %v148_v21, %v152_v24  ;;  %v411_v28 = vld [vmem:[%s22050_s1 + $0xbc0] sm:$0xff]  ;;  %v14141_v30 = vcombine.high %v403_v19, %v407_v20 }
  0x61   :  { %9773 = vmatpush1.bf16.msra.mxu0 %v14076_v25  ;;  %v13878_v25 = vcombine.low %v140_v12, %v144_v15  ;;  %v415_v63 = vld [vmem:[%s22050_s1 + $0xbe0] sm:$0xff]  ;;  %v196_v15 = vld [vmem:[%s22050_s1 + $0x508] sm:$0xff] }
  0x62   :  { %9774 = vmatprep.subr.bf16.mxu0 %v14085_v29  ;;  %v156_v29 = vld [vmem:[%s22050_s1 + $0x3c8] sm:$0xff]  ;;  %v419_v37 = vld [vmem:[%s22050_s1 + $0xc00] sm:$0xff]  ;;  %v14149_v41 = vcombine.high %v411_v28, %v415_v63 }
  0x63   :  { %10226 = vmatpush1.bf16.msra.mxu1 %v13830_v33  ;;  %v160_v33 = vld [vmem:[%s22050_s1 + $0x3e8] sm:$0xff]  ;;  %v423_v38 = vld [vmem:[%s22050_s1 + $0xc20] sm:$0xff] }
  0x64   :  { %10227 = vmatprep.subr.bf16.mxu1 %v13839_v35  ;;  %v14140_v35 = vcombine.low %v403_v19, %v407_v20  ;;  %v13895_v36 = vcombine.high %v156_v29, %v160_v33  ;;  %v427_v47 = vld [vmem:[%s22050_s1 + $0xc40] sm:$0xff]  ;;  %v14156_v55 = vcombine.low %v419_v37, %v423_v38 }
  0x65   :  { %9775 = vmatpush1.bf16.msra.mxu0 %v14084_v34  ;;  %v13886_v34 = vcombine.low %v148_v21, %v152_v24  ;;  %v431_v48 = vld [vmem:[%s22050_s1 + $0xc60] sm:$0xff]  ;;  %v204_v24 = vld [vmem:[%s22050_s1 + $0x548] sm:$0xff] }
  0x66   :  { %9776 = vmatprep.subr.bf16.mxu0 %v14093_v39  ;;  %v164_v39 = vld [vmem:[%s22050_s1 + $0x408] sm:$0xff]  ;;  %v435_v57 = vld [vmem:[%s22050_s1 + $0xc80] sm:$0xff]  ;;  %v14164_v1 = vcombine.low %v427_v47, %v431_v48 }
  0x67   :  { %10228 = vmatpush1.bf16.msra.mxu1 %v13838_v42  ;;  %v168_v42 = vld [vmem:[%s22050_s1 + $0x428] sm:$0xff]  ;;  %v443_v3 = vld [vmem:[%s22050_s1 + $0xcc0] sm:$0xff] }
  0x68   :  { %10229 = vmatprep.subr.bf16.mxu1 %v13847_v45  ;;  %v14148_v45 = vcombine.low %v411_v28, %v415_v63  ;;  %v13903_v46 = vcombine.high %v164_v39, %v168_v42  ;;  %v451_v12 = vld [vmem:[%s22050_s1 + $0xd00] sm:$0xff] }
  0x69   :  { %9777 = vmatpush1.bf16.msra.mxu0 %v14092_v44  ;;  %v13894_v44 = vcombine.low %v156_v29, %v160_v33  ;;  %v459_v21 = vld [vmem:[%s22050_s1 + $0xd40] sm:$0xff]  ;;  %v212_v33 = vld [vmem:[%s22050_s1 + $0x588] sm:$0xff] }
  0x6a   :  { %9778 = vmatprep.subr.bf16.mxu0 %v14101_v49  ;;  %v14157_v49 = vcombine.high %v419_v37, %v423_v38  ;;  %v467_v29 = vld [vmem:[%s22050_s1 + $0xd80] sm:$0xff] }
  0x6b   :  { %10230 = vmatpush1.bf16.msra.mxu1 %v13846_v51  ;;  %v176_v51 = vld [vmem:[%s22050_s1 + $0x468] sm:$0xff] }
  0x6c   :  { %10231 = vmatprep.subr.bf16.mxu1 %v13855_v54  ;;  %v16711_v54 = vrot.slane %v16480_v18, %v16335_v53  ;;  %v13911_v56 = vcombine.high %v172_v50, %v176_v51  ;;  %v184_v18 = vld [vmem:[%s22050_s1 + $0x4a8] sm:$0xff] }
  0x6d   :  { %9779 = vmatpush1.bf16.msra.mxu0 %v14100_v52  ;;  %v13902_v52 = vcombine.low %v164_v39, %v168_v42  ;;  %v13919_v2 = vcombine.high %v180_v60, %v184_v18  ;;  %v475_v39 = vld [vmem:[%s22050_s1 + $0xdc0] sm:$0xff] }
  0x6e   :  { %9780 = vmatprep.subr.bf16.mxu0 %v14109_v58  ;;  %v439_v58 = vld [vmem:[%s22050_s1 + $0xca0] sm:$0xff] }
  0x6f   :  { %10232 = vmatpush1.bf16.msra.mxu1 %v13854_v61  ;;  %v14165_v61 = vcombine.high %v427_v47, %v431_v48  ;;  %v14172_v10 = vcombine.low %v435_v57, %v439_v58 }
  0x70   :  { %10233 = vmatprep.subr.bf16.mxu1 %v13863_v0  ;;  %v13910_v0 = vcombine.low %v172_v50, %v176_v51  ;;  %v487_v50 = vld [vmem:[%s22050_s1 + $0xe20] sm:$0xff]  ;;  %v228_v51 = vld [vmem:[%s22050_s1 + $0x608] sm:$0xff] }
  0x71   :  { %9781 = vmatpush1.bf16.msra.mxu0 %v14108_v62  ;;  %v16727_v62 = vcombine.high %v16523_v40, %v16523_v40 }
  0x72   :  { %9782 = vmatprep.subr.bf16.mxu0 %v14117_v4  ;;  %v447_v4 = vld [vmem:[%s22050_s1 + $0xce0] sm:$0xff] }
  0x73   :  { %10234 = vmatpush1.bf16.msra.mxu1 %v13862_v6  ;;  %v14173_v6 = vcombine.high %v435_v57, %v439_v58  ;;  %v14180_v19 = vcombine.low %v443_v3, %v447_v4 }
  0x74   :  { %10235 = vmatprep.subr.bf16.mxu1 %v13871_v8  ;;  %v13918_v8 = vcombine.low %v180_v60, %v184_v18  ;;  %v491_v60 = vld [vmem:[%s22050_s1 + $0xe40] sm:$0xff]  ;;  %v236_v18 = vld [vmem:[%s22050_s1 + $0x648] sm:$0xff] }
  0x75   :  { %9783 = vmatpush1.bf16.msra.mxu0 %v14116_v7  ;;  %v192_v7 = vld [vmem:[%s22050_s1 + $0x4e8] sm:$0xff] }
  0x76   :  { %9784 = vmatprep.subr.bf16.mxu0 %v14125_v14  ;;  %v13927_v11 = vcombine.high %v188_v5, %v192_v7  ;;  %v455_v14 = vld [vmem:[%s22050_s1 + $0xd20] sm:$0xff] }
  0x77   :  { %10236 = vmatpush1.bf16.msra.mxu1 %v13870_v16  ;;  %v14181_v16 = vcombine.high %v443_v3, %v447_v4  ;;  %v14188_v28 = vcombine.low %v451_v12, %v455_v14 }
  0x78   :  { %10237 = vmatprep.subr.bf16.mxu1 %v13879_v17  ;;  %v13926_v17 = vcombine.low %v188_v5, %v192_v7  ;;  %v499_v5 = vld [vmem:[%s22050_s1 + $0xe80] sm:$0xff]  ;;  %v244_v7 = vld [vmem:[%s22050_s1 + $0x688] sm:$0xff] }
  0x79   :  { %9785 = vmatpush1.bf16.msra.mxu0 %v14124_v59  ;;  %v200_v59 = vld [vmem:[%s22050_s1 + $0x528] sm:$0xff] }
  0x7a   :  { %9786 = vmatprep.subr.bf16.mxu0 %v14133_v23  ;;  %v13935_v20 = vcombine.high %v196_v15, %v200_v59  ;;  %v463_v23 = vld [vmem:[%s22050_s1 + $0xd60] sm:$0xff] }
  0x7b   :  { %10238 = vmatpush1.bf16.msra.mxu1 %v13878_v25  ;;  %v14189_v25 = vcombine.high %v451_v12, %v455_v14  ;;  %v14196_v37 = vcombine.low %v459_v21, %v463_v23 }
  0x7c   :  { %10239 = vmatprep.subr.bf16.mxu1 %v13887_v27  ;;  %v13934_v27 = vcombine.low %v196_v15, %v200_v59  ;;  %v507_v15 = vld [vmem:[%s22050_s1 + $0xec0] sm:$0xff]  ;;  %v252_v59 = vld [vmem:[%s22050_s1 + $0x6c8] sm:$0xff] }
  0x7d   :  { %9787 = vmatpush1.bf16.msra.mxu0 %v14132_v26  ;;  %v208_v26 = vld [vmem:[%s22050_s1 + $0x568] sm:$0xff] }
  0x7e   :  { %9788 = vmatprep.subr.bf16.mxu0 %v14141_v30  ;;  %v13943_v63 = vcombine.high %v204_v24, %v208_v26  ;;  %v471_v30 = vld [vmem:[%s22050_s1 + $0xda0] sm:$0xff] }
  0x7f   :  { %10240 = vmatpush1.bf16.msra.mxu1 %v13886_v34  ;;  %v14197_v34 = vcombine.high %v459_v21, %v463_v23  ;;  %v14205_v42 = vcombine.high %v467_v29, %v471_v30  ;;  %v14204_v47 = vcombine.low %v467_v29, %v471_v30 }
  0x80   :  { %10241 = vmatprep.subr.bf16.mxu1 %v13895_v36  ;;  %v13942_v36 = vcombine.low %v204_v24, %v208_v26  ;;  %v515_v24 = vld [vmem:[%s22050_s1 + $0xf00] sm:$0xff]  ;;  %v260_v26 = vld [vmem:[%s22050_s1 + $0x708] sm:$0xff] }
  0x81   :  { %9789 = vmatpush1.bf16.msra.mxu0 %v14140_v35  ;;  %v216_v35 = vld [vmem:[%s22050_s1 + $0x5a8] sm:$0xff] }
  0x82   :  { %9790 = vmatprep.subr.bf16.mxu0 %v14149_v41  ;;  %v13951_v38 = vcombine.high %v212_v33, %v216_v35  ;;  %v479_v41 = vld [vmem:[%s22050_s1 + $0xde0] sm:$0xff] }
  0x83   :  { %10242 = vmatpush1.bf16.msra.mxu1 %v13894_v44  ;;  %v220_v44 = vld [vmem:[%s22050_s1 + $0x5c8] sm:$0xff]  ;;  %v14212_v57 = vcombine.low %v475_v39, %v479_v41 }
  0x84   :  { %10252 = vmatprep.subr.bf16.mxu1 %v13903_v46  ;;  %v13950_v46 = vcombine.low %v212_v33, %v216_v35  ;;  %v523_v33 = vld [vmem:[%s22050_s1 + $0xf40] sm:$0xff]  ;;  %v268_v35 = vld [vmem:[%s22050_s1 + $0x748] sm:$0xff] }
  0x85   :  { %9791 = vmatpush1.bf16.msra.mxu0 %v14148_v45  ;;  %v224_v45 = vld [vmem:[%s22050_s1 + $0x5e8] sm:$0xff] }
  0x86   :  { %9801 = vmatprep.subr.bf16.mxu0 %v14157_v49  ;;  %10244 = vmatmul.mubr.bf16.vlgmr.msra.gmra.mrb[4].mxu1 %v16490_v22  ;;  %v13959_v48 = vcombine.high %v220_v44, %v224_v45  ;;  %v483_v49 = vld [vmem:[%s22050_s1 + $0xe00] sm:$0xff] }
  0x87   :  { %10253 = vmatpush1.bf16.msra.mxu1 %v13902_v52  ;;  %10284 = vmatprep.mubr.bf16.mxu1 %v16384_v13  ;;  %v14213_v52 = vcombine.high %v475_v39, %v479_v41  ;;  %v14220_v3 = vcombine.low %v483_v49, %v487_v50 }
  0x88   :  { %9793 = vmatmul.mubr.bf16.vlgmr.msra.gmra.mrb[0].mxu0 %v16711_v54  ;;  %10254 = vmatprep.subr.bf16.mxu1 %v13911_v56  ;;  %v13958_v56 = vcombine.low %v220_v44, %v224_v45  ;;  %v535_v44 = vld [vmem:[%s22050_s1 + $0xfa0] sm:$0xff]  ;;  %v276_v45 = vld [vmem:[%s22050_s1 + $0x788] sm:$0xff] }
  0x89   :  { %9802 = vmatpush1.bf16.msra.mxu0 %v14156_v55  ;;  %9833 = vmatprep.mubr.bf16.mxu0 %v16727_v62  ;;  %v232_v55 = vld [vmem:[%s22050_s1 + $0x628] sm:$0xff] }
  0x8a   :  { %9803 = vmatprep.subr.bf16.mxu0 %v14165_v61  ;;  %v13967_v58 = vcombine.high %v228_v51, %v232_v55  ;;  %v495_v61 = vld [vmem:[%s22050_s1 + $0xe60] sm:$0xff] }
  0x8b   :  { %10255 = vmatpush1.bf16.msra.mxu1 %v13910_v0  ;;  %v14221_v0 = vcombine.high %v483_v49, %v487_v50  ;;  %v14228_v12 = vcombine.low %v491_v60, %v495_v61 }
  0x8c   :  { %10256 = vmatprep.subr.bf16.mxu1 %v13919_v2  ;;  %v13966_v2 = vcombine.low %v228_v51, %v232_v55  ;;  %v539_v51 = vld [vmem:[%s22050_s1 + $0xfc0] sm:$0xff]  ;;  %v284_v55 = vld [vmem:[%s22050_s1 + $0x7c8] sm:$0xff] }
  0x8d   :  { %9804 = vmatpush1.bf16.msra.mxu0 %v14164_v1  ;;  %v240_v1 = vld [vmem:[%s22050_s1 + $0x668] sm:$0xff] }
  0x8e   :  { %9805 = vmatprep.subr.bf16.mxu0 %v14173_v6  ;;  %v13975_v4 = vcombine.high %v236_v18, %v240_v1  ;;  %v503_v6 = vld [vmem:[%s22050_s1 + $0xea0] sm:$0xff] }
  0x8f   :  { %10257 = vmatpush1.bf16.msra.mxu1 %v13918_v8  ;;  %v14229_v8 = vcombine.high %v491_v60, %v495_v61  ;;  %v14236_v21 = vcombine.low %v499_v5, %v503_v6 }
  0x90   :  { %10258 = vmatprep.subr.bf16.mxu1 %v13927_v11  ;;  %v13974_v11 = vcombine.low %v236_v18, %v240_v1  ;;  %v551_v1 = vld [vmem:[%s22050_s1 + $0x1020] sm:$0xff] }
  0x91   :  { %9806 = vmatpush1.bf16.msra.mxu0 %v14172_v10  ;;  %v248_v10 = vld [vmem:[%s22050_s1 + $0x6a8] sm:$0xff] }
  0x92   :  { %9807 = vmatprep.subr.bf16.mxu0 %v14181_v16  ;;  %v13983_v14 = vcombine.high %v244_v7, %v248_v10  ;;  %v511_v16 = vld [vmem:[%s22050_s1 + $0xee0] sm:$0xff] }
  0x93   :  { %10259 = vmatpush1.bf16.msra.mxu1 %v13926_v17  ;;  %v14237_v17 = vcombine.high %v499_v5, %v503_v6  ;;  %v14244_v29 = vcombine.low %v507_v15, %v511_v16 }
  0x94   :  { %10260 = vmatprep.subr.bf16.mxu1 %v13935_v20  ;;  %v13982_v20 = vcombine.low %v244_v7, %v248_v10  ;;  %v555_v10 = vld [vmem:[%s22050_s1 + $0x1040] sm:$0xff] }
  0x95   :  { %9808 = vmatpush1.bf16.msra.mxu0 %v14180_v19  ;;  %v256_v19 = vld [vmem:[%s22050_s1 + $0x6e8] sm:$0xff] }
  0x96   :  { %9809 = vmatprep.subr.bf16.mxu0 %v14189_v25  ;;  %v13991_v23 = vcombine.high %v252_v59, %v256_v19  ;;  %v519_v25 = vld [vmem:[%s22050_s1 + $0xf20] sm:$0xff] }
  0x97   :  { %10261 = vmatpush1.bf16.msra.mxu1 %v13934_v27  ;;  %v14245_v27 = vcombine.high %v507_v15, %v511_v16  ;;  %v14252_v39 = vcombine.low %v515_v24, %v519_v25  ;;  %v304_v15 = vld [vmem:[%s22050_s1 + $0x868] sm:$0xff] }
  0x98   :  { %10262 = vmatprep.subr.bf16.mxu1 %v13943_v63  ;;  %v13990_v63 = vcombine.low %v252_v59, %v256_v19 }
  0x99   :  { %9810 = vmatpush1.bf16.msra.mxu0 %v14188_v28  ;;  %v264_v28 = vld [vmem:[%s22050_s1 + $0x728] sm:$0xff] }
  0x9a   :  { %9811 = vmatprep.subr.bf16.mxu0 %v14197_v34  ;;  %v13999_v30 = vcombine.high %v260_v26, %v264_v28  ;;  %v527_v34 = vld [vmem:[%s22050_s1 + $0xf60] sm:$0xff] }
  0x9b   :  { %10263 = vmatpush1.bf16.msra.mxu1 %v13942_v36  ;;  %v14253_v36 = vcombine.high %v515_v24, %v519_v25  ;;  %v14260_v49 = vcombine.low %v523_v33, %v527_v34  ;;  %v312_v24 = vld [vmem:[%s22050_s1 + $0x8a8] sm:$0xff] }
  0x9c   :  { %10264 = vmatprep.subr.bf16.mxu1 %v13951_v38  ;;  %v13998_v38 = vcombine.low %v260_v26, %v264_v28 }
  0x9d   :  { %9812 = vmatpush1.bf16.msra.mxu0 %v14196_v37  ;;  %v272_v37 = vld [vmem:[%s22050_s1 + $0x768] sm:$0xff] }
  0x9e   :  { %9813 = vmatprep.subr.bf16.mxu0 %v14205_v42  ;;  %v14007_v41 = vcombine.high %v268_v35, %v272_v37  ;;  %v531_v42 = vld [vmem:[%s22050_s1 + $0xf80] sm:$0xff] }
  0x9f   :  { %10265 = vmatpush1.bf16.msra.mxu1 %v13950_v46  ;;  %v14261_v46 = vcombine.high %v523_v33, %v527_v34  ;;  %v14268_v61 = vcombine.low %v531_v42, %v535_v44 }
  0xa0   :  { %10266 = vmatprep.subr.bf16.mxu1 %v13959_v48  ;;  %v14006_v48 = vcombine.low %v268_v35, %v272_v37 }
  0xa1   :  { %9814 = vmatpush1.bf16.msra.mxu0 %v14204_v47  ;;  %v280_v47 = vld [vmem:[%s22050_s1 + $0x7a8] sm:$0xff] }
  0xa2   :  { %9815 = vmatprep.subr.bf16.mxu0 %v14213_v52  ;;  %v14015_v50 = vcombine.high %v276_v45, %v280_v47  ;;  %v543_v52 = vld [vmem:[%s22050_s1 + $0xfe0] sm:$0xff]  ;;  %v14014_v60 = vcombine.low %v276_v45, %v280_v47 }
  0xa3   :  { %10267 = vmatpush1.bf16.msra.mxu1 %v13958_v56  ;;  %v288_v56 = vld [vmem:[%s22050_s1 + $0x7e8] sm:$0xff]  ;;  %v14276_v7 = vcombine.low %v539_v51, %v543_v52 }
  0xa4   :  { %10268 = vmatprep.subr.bf16.mxu1 %v13967_v58  ;;  %v16892_v58 = vld [vmem:[%s22049_s0 + $0x8] sm:$0xff]  ;;  %v14023_v18 = vcombine.high %v284_v55, %v288_v56  ;;  %v14022_v6 = vcombine.low %v284_v55, %v288_v56 }
  0xa5   :  { %9816 = vmatpush1.bf16.msra.mxu0 %v14212_v57  ;;  %v14269_v57 = vcombine.high %v531_v42, %v535_v44  ;;  %v16908_v5 = vrot.slane %v16892_v58, %v16335_v53 }
  0xa6   :  { %9817 = vmatprep.subr.bf16.mxu0 %v14221_v0  ;;  %v547_v0 = vld [vmem:[%s22050_s1 + $0x1000] sm:$0xff] }
  0xa7   :  { %10269 = vmatpush1.bf16.msra.mxu1 %v13966_v2  ;;  %v292_v2 = vld [vmem:[%s22050_s1 + $0x808] sm:$0xff]  ;;  %v1713_v16 = vcombine.high %v16908_v5, %v16908_v5  ;;  %v14284_v19 = vcombine.low %v547_v0, %v551_v1 }
  0xa8   :  { %10270 = vmatprep.subr.bf16.mxu1 %v13975_v4  ;;  %v296_v4 = vld [vmem:[%s22050_s1 + $0x828] sm:$0xff] }
  0xa9   :  { %9818 = vmatpush1.bf16.msra.mxu0 %v14220_v3  ;;  %v14277_v3 = vcombine.high %v539_v51, %v543_v52  ;;  %v14030_v59 = vcombine.low %v292_v2, %v296_v4  ;;  %v16935_v25 = vrot.slane %v1713_v16, %v16335_v53 }
  0xaa   :  { %9819 = vmatprep.subr.bf16.mxu0 %v14229_v8  ;;  %v14031_v8 = vcombine.high %v292_v2, %v296_v4 }
  0xab   :  { %10271 = vmatpush1.bf16.msra.mxu1 %v13974_v11  ;;  %v559_v11 = vld [vmem:[%s22050_s1 + $0x1060] sm:$0xff] }
  0xac   :  { %10272 = vmatprep.subr.bf16.mxu1 %v13983_v14  ;;  %v14285_v14 = vcombine.high %v547_v0, %v551_v1 }
  0xad   :  { %9820 = vmatpush1.bf16.msra.mxu0 %v14228_v12  ;;  %v300_v12 = vld [vmem:[%s22050_s1 + $0x848] sm:$0xff] }
  0xae   :  { %9821 = vmatprep.subr.bf16.mxu0 %v14237_v17  ;;  %v16926_v17 = vcombine.high %v16711_v54, %v16711_v54 }
  0xaf   :  { %10273 = vmatpush1.bf16.msra.mxu1 %v13982_v20  ;;  %v14039_v20 = vcombine.high %v300_v12, %v304_v15 }
  0xb0   :  { %10274 = vmatprep.subr.bf16.mxu1 %v13991_v23  ;;  %v308_v23 = vld [vmem:[%s22050_s1 + $0x888] sm:$0xff] }
  0xb1   :  { %9822 = vmatpush1.bf16.msra.mxu0 %v14236_v21  ;;  %v14293_v21 = vcombine.high %v555_v10, %v559_v11 }
  0xb2   :  { %9823 = vmatprep.subr.bf16.mxu0 %v14245_v27 }
  0xb3   :  { %10275 = vmatpush1.bf16.msra.mxu1 %v13990_v63 }
  0xb4   :  { %10276 = vmatprep.subr.bf16.mxu1 %v13999_v30 }
  0xb5   :  { %9824 = vmatpush1.bf16.msra.mxu0 %v14244_v29 }
  0xb6   :  { %9825 = vmatprep.subr.bf16.mxu0 %v14253_v36 }
  0xb7   :  { %10277 = vmatpush1.bf16.msra.mxu1 %v13998_v38 }
  0xb8   :  { %10278 = vmatprep.subr.bf16.mxu1 %v14007_v41 }
  0xb9   :  { %9826 = vmatpush1.bf16.msra.mxu0 %v14252_v39 }
  0xba   :  { %9827 = vmatprep.subr.bf16.mxu0 %v14261_v46 }
  0xbb   :  { %10279 = vmatpush1.bf16.msra.mxu1 %v14006_v48 }
  0xbc   :  { %10280 = vmatprep.subr.bf16.mxu1 %v14015_v50 }
  0xbd   :  { %9828 = vmatpush1.bf16.msra.mxu0 %v14260_v49 }
  0xbe   :  { %9829 = vmatprep.subr.bf16.mxu0 %v14269_v57 }
  0xbf   :  { %10281 = vmatpush1.bf16.msra.mxu1 %v14014_v60 }
  0xc0   :  { %10282 = vmatprep.subr.bf16.mxu1 %v14023_v18 }
  0xc1   :  { %9830 = vmatpush1.bf16.msra.mxu0 %v14268_v61 }
  0xc2   :  { %9831 = vmatprep.subr.bf16.mxu0 %v14277_v3 }
  0xc3   :  { %10283 = vmatpush1.bf16.msra.mxu1 %v14022_v6 }
  0xc4   :  { %10293 = vmatprep.subr.bf16.mxu1 %v14031_v8 }
  0xc5   :  { %9832 = vmatpush1.bf16.msra.mxu0 %v14276_v7 }
  0xc6   :  { %9842 = vmatprep.subr.bf16.mxu0 %v14285_v14 }
  0xc7   :  { %13 = vsyncpa [#allocation3], 0  ;;  %10285 = vmatmul.mubr.bf16.vlgmr.msra.gmra.mrb[4].mxu1 %v16508_v31  ;;  %v563_v26 = vld [vmem:[%s22050_s1 + $0x1080] sm:$0xff]  ;;  %v14038_v28 = vcombine.low %v300_v12, %v304_v15  ;;  %v14292_v63 = vcombine.low %v555_v10, %v559_v11  ;;  %v14047_v29 = vcombine.high %v308_v23, %v312_v24  ;;  %v316_v33 = vld [vmem:[%s22050_s1 + $0x8c8] sm:$0xff]  ;;  %v14046_v37 = vcombine.low %v308_v23, %v312_v24 }
  0xc8   :  { %v567_v27 = vld [vmem:[%s22050_s1 + $0x10a0] sm:$0xff]  ;;  %9834 = vmatmul.mubr.bf16.vlgmr.msra.gmra.mrb[0].mxu0 %v16926_v17  ;;  %10294 = vmatpush1.bf16.msra.mxu1 %v14030_v59  ;;  %v320_v34 = vld [vmem:[%s22050_s1 + $0x8e8] sm:$0xff]  ;;  %vm9674_vm0 = vcmask 523264   ;;  %vm13614_vm2 = vcmask 1041408   ;;  %vm13755_vm9 = vcmask 41984  }
  0xc9   :  { %9843 = vmatpush1.bf16.msra.mxu0 %v14284_v19  ;;  %10295 = vmatprep.subr.bf16.mxu1 %v14039_v20  ;;  %v14301_v30 = vcombine.high %v563_v26, %v567_v27  ;;  %v571_v35 = vld [vmem:[%s22050_s1 + $0x10c0] sm:$0xff]  ;;  %v14300_v38 = vcombine.low %v563_v26, %v567_v27  ;;  %v14055_v39 = vcombine.high %v316_v33, %v320_v34  ;;  %v324_v42 = vld [vmem:[%s22050_s1 + $0x908] sm:$0xff] }
  0xca   :  { %9844 = vmatprep.subr.bf16.mxu0 %v14293_v21  ;;  %9874 = vmatprep.mubr.bf16.mxu0 %v16935_v25  ;;  %v575_v36 = vld [vmem:[%s22050_s1 + $0x10e0] sm:$0xff]  ;;  %v328_v44 = vld [vmem:[%s22050_s1 + $0x928] sm:$0xff]  ;;  %v14054_v47 = vcombine.low %v316_v33, %v320_v34 }
  0xcb   :  { %10325 = vmatprep.mubr.bf16.mxu1 %v16523_v40  ;;  %v14309_v41 = vcombine.high %v571_v35, %v575_v36  ;;  %v579_v45 = vld [vmem:[%s22050_s1 + $0x1100] sm:$0xff]  ;;  %v14308_v48 = vcombine.low %v571_v35, %v575_v36  ;;  %v14063_v49 = vcombine.high %v324_v42, %v328_v44  ;;  %v332_v51 = vld [vmem:[%s22050_s1 + $0x948] sm:$0xff]  ;;  %v14062_v57 = vcombine.low %v324_v42, %v328_v44 }
  0xcc   :  { %10296 = vmatpush1.bf16.msra.mxu1 %v14038_v28  ;;  %v583_v46 = vld [vmem:[%s22050_s1 + $0x1120] sm:$0xff]  ;;  %v336_v52 = vld [vmem:[%s22050_s1 + $0x968] sm:$0xff] }
  0xcd   :  { %9845 = vmatpush1.bf16.msra.mxu0 %v14292_v63  ;;  %10297 = vmatprep.subr.bf16.mxu1 %v14047_v29  ;;  %v14317_v50 = vcombine.high %v579_v45, %v583_v46  ;;  %v587_v55 = vld [vmem:[%s22050_s1 + $0x1140] sm:$0xff]  ;;  %v14316_v60 = vcombine.low %v579_v45, %v583_v46  ;;  %v14071_v61 = vcombine.high %v332_v51, %v336_v52  ;;  %v340_v0 = vld [vmem:[%s22050_s1 + $0x988] sm:$0xff] }
  0xce   :  { %9846 = vmatprep.subr.bf16.mxu0 %v14301_v30  ;;  %v591_v56 = vld [vmem:[%s22050_s1 + $0x1160] sm:$0xff]  ;;  %v344_v1 = vld [vmem:[%s22050_s1 + $0x9a8] sm:$0xff]  ;;  %v14070_v4 = vcombine.low %v332_v51, %v336_v52 }
  0xcf   :  { %v14325_v18 = vcombine.high %v587_v55, %v591_v56  ;;  %v595_v2 = vld [vmem:[%s22050_s1 + $0x1180] sm:$0xff]  ;;  %v14324_v6 = vcombine.low %v587_v55, %v591_v56  ;;  %v14079_v7 = vcombine.high %v340_v0, %v344_v1  ;;  %v348_v10 = vld [vmem:[%s22050_s1 + $0x9c8] sm:$0xff]  ;;  %v14078_v15 = vcombine.low %v340_v0, %v344_v1 }
  0xd0   :  { %10298 = vmatpush1.bf16.msra.mxu1 %v14046_v37  ;;  %v599_v3 = vld [vmem:[%s22050_s1 + $0x11a0] sm:$0xff]  ;;  %v352_v11 = vld [vmem:[%s22050_s1 + $0x9e8] sm:$0xff] }
  0xd1   :  { %9847 = vmatpush1.bf16.msra.mxu0 %v14300_v38  ;;  %10299 = vmatprep.subr.bf16.mxu1 %v14055_v39  ;;  %v14333_v8 = vcombine.high %v595_v2, %v599_v3  ;;  %v603_v12 = vld [vmem:[%s22050_s1 + $0x11c0] sm:$0xff]  ;;  %v14332_v16 = vcombine.low %v595_v2, %v599_v3  ;;  %v14087_v59 = vcombine.high %v348_v10, %v352_v11  ;;  %v356_v20 = vld [vmem:[%s22050_s1 + $0xa08] sm:$0xff] }
  0xd2   :  { %9848 = vmatprep.subr.bf16.mxu0 %v14309_v41  ;;  %v607_v14 = vld [vmem:[%s22050_s1 + $0x11e0] sm:$0xff]  ;;  %v360_v21 = vld [vmem:[%s22050_s1 + $0xa28] sm:$0xff]  ;;  %v14086_v26 = vcombine.low %v348_v10, %v352_v11 }
  0xd3   :  { %v14341_v19 = vcombine.high %v603_v12, %v607_v14  ;;  %v611_v23 = vld [vmem:[%s22050_s1 + $0x1200] sm:$0xff]  ;;  %v14340_v27 = vcombine.low %v603_v12, %v607_v14  ;;  %v14095_v28 = vcombine.high %v356_v20, %v360_v21  ;;  %v364_v29 = vld [vmem:[%s22050_s1 + $0xa48] sm:$0xff]  ;;  %v14094_v35 = vcombine.low %v356_v20, %v360_v21 }
  0xd4   :  { %10300 = vmatpush1.bf16.msra.mxu1 %v14054_v47  ;;  %v615_v24 = vld [vmem:[%s22050_s1 + $0x1220] sm:$0xff]  ;;  %v368_v30 = vld [vmem:[%s22050_s1 + $0xa68] sm:$0xff] }
  0xd5   :  { %9849 = vmatpush1.bf16.msra.mxu0 %v14308_v48  ;;  %10301 = vmatprep.subr.bf16.mxu1 %v14063_v49  ;;  %v14349_v63 = vcombine.high %v611_v23, %v615_v24  ;;  %v619_v33 = vld [vmem:[%s22050_s1 + $0x1240] sm:$0xff]  ;;  %v14348_v36 = vcombine.low %v611_v23, %v615_v24  ;;  %v14103_v37 = vcombine.high %v364_v29, %v368_v30  ;;  %v372_v39 = vld [vmem:[%s22050_s1 + $0xa88] sm:$0xff] }
  0xd6   :  { %9850 = vmatprep.subr.bf16.mxu0 %v14317_v50  ;;  %v623_v34 = vld [vmem:[%s22050_s1 + $0x1260] sm:$0xff]  ;;  %v376_v41 = vld [vmem:[%s22050_s1 + $0xaa8] sm:$0xff]  ;;  %v14102_v45 = vcombine.low %v364_v29, %v368_v30 }
  0xd7   :  { %v14357_v38 = vcombine.high %v619_v33, %v623_v34  ;;  %v627_v42 = vld [vmem:[%s22050_s1 + $0x1280] sm:$0xff]  ;;  %v14356_v46 = vcombine.low %v619_v33, %v623_v34  ;;  %v14111_v47 = vcombine.high %v372_v39, %v376_v41  ;;  %v380_v49 = vld [vmem:[%s22050_s1 + $0xac8] sm:$0xff]  ;;  %v14110_v55 = vcombine.low %v372_v39, %v376_v41 }
  0xd8   :  { %10302 = vmatpush1.bf16.msra.mxu1 %v14062_v57  ;;  %v631_v44 = vld [vmem:[%s22050_s1 + $0x12a0] sm:$0xff]  ;;  %v384_v50 = vld [vmem:[%s22050_s1 + $0xae8] sm:$0xff] }
  0xd9   :  { %9851 = vmatpush1.bf16.msra.mxu0 %v14316_v60  ;;  %10303 = vmatprep.subr.bf16.mxu1 %v14071_v61  ;;  %v14365_v48 = vcombine.high %v627_v42, %v631_v44  ;;  %v635_v51 = vld [vmem:[%s22050_s1 + $0x12c0] sm:$0xff]  ;;  %v14364_v56 = vcombine.low %v627_v42, %v631_v44  ;;  %v14119_v57 = vcombine.high %v380_v49, %v384_v50  ;;  %v388_v61 = vld [vmem:[%s22050_s1 + $0xb08] sm:$0xff] }
  0xda   :  { %9852 = vmatprep.subr.bf16.mxu0 %v14325_v18  ;;  %v639_v52 = vld [vmem:[%s22050_s1 + $0x12e0] sm:$0xff]  ;;  %v392_v18 = vld [vmem:[%s22050_s1 + $0xb28] sm:$0xff]  ;;  %v14118_v2 = vcombine.low %v380_v49, %v384_v50 }
  0xdb   :  { %v14373_v60 = vcombine.high %v635_v51, %v639_v52  ;;  %v643_v0 = vld [vmem:[%s22050_s1 + $0x1300] sm:$0xff]  ;;  %v14372_v3 = vcombine.low %v635_v51, %v639_v52  ;;  %v14126_v12 = vcombine.low %v388_v61, %v392_v18  ;;  %v17129_v52 = vrot.slane %v16908_v5, %v16335_v53 }
  0xdc   :  { %10304 = vmatpush1.bf16.msra.mxu1 %v14070_v4  ;;  %v647_v1 = vld [vmem:[%s22050_s1 + $0x1320] sm:$0xff]  ;;  %v14127_v4 = vcombine.high %v388_v61, %v392_v18  ;;  %v440_v61 = vld [vmem:[%s22050_s1 + $0xca8] sm:$0xff]  ;;  %v17139_v18 = vcombine.high %v16935_v25, %v16935_v25 }
  0xdd   :  { %9853 = vmatpush1.bf16.msra.mxu0 %v14324_v6  ;;  %10305 = vmatprep.subr.bf16.mxu1 %v14079_v7  ;;  %v14381_v6 = vcombine.high %v643_v0, %v647_v1  ;;  %v396_v7 = vld [vmem:[%s22050_s1 + $0xb48] sm:$0xff]  ;;  %v651_v10 = vld [vmem:[%s22050_s1 + $0x1340] sm:$0xff]  ;;  %v14380_v14 = vcombine.low %v643_v0, %v647_v1 }
  0xde   :  { %9854 = vmatprep.subr.bf16.mxu0 %v14333_v8  ;;  %v400_v8 = vld [vmem:[%s22050_s1 + $0xb68] sm:$0xff]  ;;  %v655_v11 = vld [vmem:[%s22050_s1 + $0x1360] sm:$0xff] }
  0xdf   :  { %v659_v20 = vld [vmem:[%s22050_s1 + $0x1380] sm:$0xff]  ;;  %v14134_v23 = vcombine.low %v396_v7, %v400_v8  ;;  %v14388_v24 = vcombine.low %v651_v10, %v655_v11 }
  0xe0   :  { %10306 = vmatpush1.bf16.msra.mxu1 %v14078_v15  ;;  %v14135_v15 = vcombine.high %v396_v7, %v400_v8  ;;  %v663_v21 = vld [vmem:[%s22050_s1 + $0x13a0] sm:$0xff]  ;;  %v448_v7 = vld [vmem:[%s22050_s1 + $0xce8] sm:$0xff] }
  0xe1   :  { %9855 = vmatpush1.bf16.msra.mxu0 %v14332_v16  ;;  %10307 = vmatprep.subr.bf16.mxu1 %v14087_v59  ;;  %v14389_v16 = vcombine.high %v651_v10, %v655_v11  ;;  %v404_v59 = vld [vmem:[%s22050_s1 + $0xb88] sm:$0xff]  ;;  %v667_v29 = vld [vmem:[%s22050_s1 + $0x13c0] sm:$0xff]  ;;  %v14396_v34 = vcombine.low %v659_v20, %v663_v21 }
  0xe2   :  { %9856 = vmatprep.subr.bf16.mxu0 %v14341_v19  ;;  %v408_v19 = vld [vmem:[%s22050_s1 + $0xba8] sm:$0xff]  ;;  %v671_v30 = vld [vmem:[%s22050_s1 + $0x13e0] sm:$0xff] }
  0xe3   :  { %v14142_v33 = vcombine.low %v404_v59, %v408_v19  ;;  %v675_v39 = vld [vmem:[%s22050_s1 + $0x1400] sm:$0xff]  ;;  %v14404_v44 = vcombine.low %v667_v29, %v671_v30 }
  0xe4   :  { %10308 = vmatpush1.bf16.msra.mxu1 %v14086_v26  ;;  %v14143_v26 = vcombine.high %v404_v59, %v408_v19  ;;  %v679_v41 = vld [vmem:[%s22050_s1 + $0x1420] sm:$0xff]  ;;  %v456_v59 = vld [vmem:[%s22050_s1 + $0xd28] sm:$0xff] }
  0xe5   :  { %9857 = vmatpush1.bf16.msra.mxu0 %v14340_v27  ;;  %10309 = vmatprep.subr.bf16.mxu1 %v14095_v28  ;;  %v14397_v27 = vcombine.high %v659_v20, %v663_v21  ;;  %v412_v28 = vld [vmem:[%s22050_s1 + $0xbc8] sm:$0xff]  ;;  %v683_v49 = vld [vmem:[%s22050_s1 + $0x1440] sm:$0xff] }
  0xe6   :  { %9858 = vmatprep.subr.bf16.mxu0 %v14349_v63  ;;  %v416_v63 = vld [vmem:[%s22050_s1 + $0xbe8] sm:$0xff]  ;;  %v687_v50 = vld [vmem:[%s22050_s1 + $0x1460] sm:$0xff] }
  0xe7   :  { %v14150_v42 = vcombine.low %v412_v28, %v416_v63  ;;  %v691_v5 = vld [vmem:[%s22050_s1 + $0x1480] sm:$0xff] }
  0xe8   :  { %10310 = vmatpush1.bf16.msra.mxu1 %v14094_v35  ;;  %v14151_v35 = vcombine.high %v412_v28, %v416_v63  ;;  %v695_v0 = vld [vmem:[%s22050_s1 + $0x14a0] sm:$0xff]  ;;  %v464_v28 = vld [vmem:[%s22050_s1 + $0xd68] sm:$0xff] }
  0xe9   :  { %9859 = vmatpush1.bf16.msra.mxu0 %v14348_v36  ;;  %10311 = vmatprep.subr.bf16.mxu1 %v14103_v37  ;;  %v14405_v36 = vcombine.high %v667_v29, %v671_v30  ;;  %v420_v37 = vld [vmem:[%s22050_s1 + $0xc08] sm:$0xff]  ;;  %v699_v8 = vld [vmem:[%s22050_s1 + $0x14c0] sm:$0xff] }
  0xea   :  { %9860 = vmatprep.subr.bf16.mxu0 %v14357_v38  ;;  %v424_v38 = vld [vmem:[%s22050_s1 + $0xc28] sm:$0xff]  ;;  %v703_v10 = vld [vmem:[%s22050_s1 + $0x14e0] sm:$0xff] }
  0xeb   :  { %v14158_v51 = vcombine.low %v420_v37, %v424_v38  ;;  %v707_v19 = vld [vmem:[%s22050_s1 + $0x1500] sm:$0xff] }
  0xec   :  { %10312 = vmatpush1.bf16.msra.mxu1 %v14102_v45  ;;  %v14159_v45 = vcombine.high %v420_v37, %v424_v38  ;;  %v711_v20 = vld [vmem:[%s22050_s1 + $0x1520] sm:$0xff]  ;;  %v472_v37 = vld [vmem:[%s22050_s1 + $0xda8] sm:$0xff] }
  0xed   :  { %9861 = vmatpush1.bf16.msra.mxu0 %v14356_v46  ;;  %10313 = vmatprep.subr.bf16.mxu1 %v14111_v47  ;;  %v14413_v46 = vcombine.high %v675_v39, %v679_v41  ;;  %v428_v47 = vld [vmem:[%s22050_s1 + $0xc48] sm:$0xff]  ;;  %v715_v63 = vld [vmem:[%s22050_s1 + $0x1540] sm:$0xff] }
  0xee   :  { %9862 = vmatprep.subr.bf16.mxu0 %v14365_v48  ;;  %v432_v48 = vld [vmem:[%s22050_s1 + $0xc68] sm:$0xff]  ;;  %v719_v29 = vld [vmem:[%s22050_s1 + $0x1560] sm:$0xff] }
  0xef   :  { %v14166_v1 = vcombine.low %v428_v47, %v432_v48  ;;  %v723_v38 = vld [vmem:[%s22050_s1 + $0x1580] sm:$0xff] }
  0xf0   :  { %10314 = vmatpush1.bf16.msra.mxu1 %v14110_v55  ;;  %v14412_v55 = vcombine.low %v675_v39, %v679_v41  ;;  %v727_v39 = vld [vmem:[%s22050_s1 + $0x15a0] sm:$0xff] }
  0xf1   :  { %9863 = vmatpush1.bf16.msra.mxu0 %v14364_v56  ;;  %10315 = vmatprep.subr.bf16.mxu1 %v14119_v57  ;;  %v14167_v56 = vcombine.high %v428_v47, %v432_v48  ;;  %v14421_v57 = vcombine.high %v683_v49, %v687_v50  ;;  %v476_v47 = vld [vmem:[%s22050_s1 + $0xdc8] sm:$0xff] }
  0xf2   :  { %9864 = vmatprep.subr.bf16.mxu0 %v14373_v60  ;;  %v436_v60 = vld [vmem:[%s22050_s1 + $0xc88] sm:$0xff] }
  0xf3   :  { %v14174_v11 = vcombine.low %v436_v60, %v440_v61  ;;  %v480_v48 = vld [vmem:[%s22050_s1 + $0xde8] sm:$0xff] }
  0xf4   :  { %10316 = vmatpush1.bf16.msra.mxu1 %v14118_v2  ;;  %v14420_v2 = vcombine.low %v683_v49, %v687_v50  ;;  %v731_v50 = vld [vmem:[%s22050_s1 + $0x15c0] sm:$0xff] }
  0xf5   :  { %9865 = vmatpush1.bf16.msra.mxu0 %v14372_v3  ;;  %10317 = vmatprep.subr.bf16.mxu1 %v14127_v4  ;;  %v14175_v3 = vcombine.high %v436_v60, %v440_v61  ;;  %v14429_v4 = vcombine.high %v691_v5, %v695_v0  ;;  %v14460_v60 = vcombine.low %v723_v38, %v727_v39 }
  0xf6   :  { %9866 = vmatprep.subr.bf16.mxu0 %v14381_v6  ;;  %v444_v6 = vld [vmem:[%s22050_s1 + $0xcc8] sm:$0xff]  ;;  %v14215_v61 = vcombine.high %v476_v47, %v480_v48 }
  0xf7   :  { %v14182_v21 = vcombine.low %v444_v6, %v448_v7 }
  0xf8   :  { %10318 = vmatpush1.bf16.msra.mxu1 %v14126_v12  ;;  %v14428_v12 = vcombine.low %v691_v5, %v695_v0  ;;  %v484_v0 = vld [vmem:[%s22050_s1 + $0xe08] sm:$0xff] }
  0xf9   :  { %9867 = vmatpush1.bf16.msra.mxu0 %v14380_v14  ;;  %10319 = vmatprep.subr.bf16.mxu1 %v14135_v15  ;;  %v14183_v14 = vcombine.high %v444_v6, %v448_v7  ;;  %v14437_v15 = vcombine.high %v699_v8, %v703_v10 }
  0xfa   :  { %9868 = vmatprep.subr.bf16.mxu0 %v14389_v16  ;;  %v452_v16 = vld [vmem:[%s22050_s1 + $0xd08] sm:$0xff] }
  0xfb   :  { %v14190_v30 = vcombine.low %v452_v16, %v456_v59 }
  0xfc   :  { %10320 = vmatpush1.bf16.msra.mxu1 %v14134_v23  ;;  %v14436_v23 = vcombine.low %v699_v8, %v703_v10  ;;  %v492_v10 = vld [vmem:[%s22050_s1 + $0xe48] sm:$0xff] }
  0xfd   :  { %9869 = vmatpush1.bf16.msra.mxu0 %v14388_v24  ;;  %10321 = vmatprep.subr.bf16.mxu1 %v14143_v26  ;;  %v14191_v24 = vcombine.high %v452_v16, %v456_v59  ;;  %v14445_v26 = vcombine.high %v707_v19, %v711_v20 }
  0xfe   :  { %9870 = vmatprep.subr.bf16.mxu0 %v14397_v27  ;;  %v460_v27 = vld [vmem:[%s22050_s1 + $0xd48] sm:$0xff] }
  0xff   :  { %v14198_v41 = vcombine.low %v460_v27, %v464_v28 }
 0x100   :  { %10322 = vmatpush1.bf16.msra.mxu1 %v14142_v33  ;;  %v14444_v33 = vcombine.low %v707_v19, %v711_v20  ;;  %v500_v20 = vld [vmem:[%s22050_s1 + $0xe88] sm:$0xff] }
 0x101   :  { %9871 = vmatpush1.bf16.msra.mxu0 %v14396_v34  ;;  %10323 = vmatprep.subr.bf16.mxu1 %v14151_v35  ;;  %v14199_v34 = vcombine.high %v460_v27, %v464_v28  ;;  %v14453_v35 = vcombine.high %v715_v63, %v719_v29 }
 0x102   :  { %9872 = vmatprep.subr.bf16.mxu0 %v14405_v36  ;;  %v468_v36 = vld [vmem:[%s22050_s1 + $0xd88] sm:$0xff] }
 0x104   :  { %10324 = vmatpush1.bf16.msra.mxu1 %v14150_v42  ;;  %v14452_v42 = vcombine.low %v715_v63, %v719_v29  ;;  %v508_v29 = vld [vmem:[%s22050_s1 + $0xec8] sm:$0xff] }
 0x105   :  { %9873 = vmatpush1.bf16.msra.mxu0 %v14404_v44  ;;  %10334 = vmatprep.subr.bf16.mxu1 %v14159_v45  ;;  %v14207_v44 = vcombine.high %v468_v36, %v472_v37 }
 0x106   :  { %9883 = vmatprep.subr.bf16.mxu0 %v14413_v46  ;;  %v14461_v46 = vcombine.high %v723_v38, %v727_v39  ;;  %v516_v39 = vld [vmem:[%s22050_s1 + $0xf08] sm:$0xff] }
 0x107   :  { %10326 = vmatmul.mubr.bf16.vlgmr.msra.gmra.mrb[4].mxu1 %v16711_v54 }
 0x108   :  { %9875 = vmatmul.mubr.bf16.vlgmr.msra.gmra.mrb[0].mxu0 %v17129_v52  ;;  %10335 = vmatpush1.bf16.msra.mxu1 %v14158_v51  ;;  %v735_v51 = vld [vmem:[%s22050_s1 + $0x15e0] sm:$0xff] }
 0x109   :  { %9884 = vmatpush1.bf16.msra.mxu0 %v14412_v55  ;;  %10336 = vmatprep.subr.bf16.mxu1 %v14167_v56  ;;  %v14206_v56 = vcombine.low %v468_v36, %v472_v37  ;;  %v14469_v5 = vcombine.high %v731_v50, %v735_v51  ;;  %v14468_v6 = vcombine.low %v731_v50, %v735_v51  ;;  %v524_v51 = vld [vmem:[%s22050_s1 + $0xf48] sm:$0xff] }
 0x10a   :  { %9885 = vmatprep.subr.bf16.mxu0 %v14421_v57  ;;  %9915 = vmatprep.mubr.bf16.mxu0 %v17139_v18 }
 0x10b   :  { %10366 = vmatprep.mubr.bf16.mxu1 %v16727_v62 }
 0x10c   :  { %10337 = vmatpush1.bf16.msra.mxu1 %v14166_v1  ;;  %v488_v1 = vld [vmem:[%s22050_s1 + $0xe28] sm:$0xff] }
 0x10d   :  { %9886 = vmatpush1.bf16.msra.mxu0 %v14420_v2  ;;  %10338 = vmatprep.subr.bf16.mxu1 %v14175_v3  ;;  %v739_v2 = vld [vmem:[%s22050_s1 + $0x1600] sm:$0xff]  ;;  %v14223_v7 = vcombine.high %v484_v0, %v488_v1 }
 0x10e   :  { %9887 = vmatprep.subr.bf16.mxu0 %v14429_v4  ;;  %v743_v3 = vld [vmem:[%s22050_s1 + $0x1620] sm:$0xff]  ;;  %v14214_v4 = vcombine.low %v476_v47, %v480_v48 }
 0x10f   :  { %v14477_v8 = vcombine.high %v739_v2, %v743_v3  ;;  %v14476_v16 = vcombine.low %v739_v2, %v743_v3  ;;  %v536_v2 = vld [vmem:[%s22050_s1 + $0xfa8] sm:$0xff]  ;;  %v787_v3 = vld [vmem:[%s22050_s1 + $0x1780] sm:$0xff] }
 0x110   :  { %10339 = vmatpush1.bf16.msra.mxu1 %v14174_v11  ;;  %v496_v11 = vld [vmem:[%s22050_s1 + $0xe68] sm:$0xff] }
 0x111   :  { %9888 = vmatpush1.bf16.msra.mxu0 %v14428_v12  ;;  %10340 = vmatprep.subr.bf16.mxu1 %v14183_v14  ;;  %v747_v12 = vld [vmem:[%s22050_s1 + $0x1640] sm:$0xff]  ;;  %v14231_v59 = vcombine.high %v492_v10, %v496_v11 }
 0x112   :  { %9889 = vmatprep.subr.bf16.mxu0 %v14437_v15  ;;  %v751_v14 = vld [vmem:[%s22050_s1 + $0x1660] sm:$0xff]  ;;  %v14222_v15 = vcombine.low %v484_v0, %v488_v1  ;;  %v532_v1 = vld [vmem:[%s22050_s1 + $0xf88] sm:$0xff] }
 0x113   :  { %v14485_v19 = vcombine.high %v747_v12, %v751_v14  ;;  %v14484_v27 = vcombine.low %v747_v12, %v751_v14  ;;  %v544_v12 = vld [vmem:[%s22050_s1 + $0xfe8] sm:$0xff]  ;;  %v1698_v14 = vcombine.high %v16892_v58, %v16892_v58 }
 0x114   :  { %10341 = vmatpush1.bf16.msra.mxu1 %v14182_v21  ;;  %v504_v21 = vld [vmem:[%s22050_s1 + $0xea8] sm:$0xff] }
 0x115   :  { %9890 = vmatpush1.bf16.msra.mxu0 %v14436_v23  ;;  %10342 = vmatprep.subr.bf16.mxu1 %v14191_v24  ;;  %v755_v23 = vld [vmem:[%s22050_s1 + $0x1680] sm:$0xff]  ;;  %v14239_v28 = vcombine.high %v500_v20, %v504_v21  ;;  %v548_v58 = vld [vmem:[%s22050_s1 + $0x1008] sm:$0xff] }
 0x116   :  { %9891 = vmatprep.subr.bf16.mxu0 %v14445_v26  ;;  %v759_v24 = vld [vmem:[%s22050_s1 + $0x16a0] sm:$0xff]  ;;  %v14230_v26 = vcombine.low %v492_v10, %v496_v11  ;;  %v540_v11 = vld [vmem:[%s22050_s1 + $0xfc8] sm:$0xff] }
 0x117   :  { %v14493_v63 = vcombine.high %v755_v23, %v759_v24  ;;  %v14492_v36 = vcombine.low %v755_v23, %v759_v24  ;;  %v552_v23 = vld [vmem:[%s22050_s1 + $0x1028] sm:$0xff]  ;;  %v17320_v24 = vrot.slane %v1698_v14, %v16335_v53 }
 0x118   :  { %10343 = vmatpush1.bf16.msra.mxu1 %v14190_v30  ;;  %v512_v30 = vld [vmem:[%s22050_s1 + $0xee8] sm:$0xff] }
 0x119   :  { %9892 = vmatpush1.bf16.msra.mxu0 %v14444_v33  ;;  %10344 = vmatprep.subr.bf16.mxu1 %v14199_v34  ;;  %v17199_v45 = vpop.f32.mrb[0].mxu1  ;;  %v763_v33 = vld [vmem:[%s22050_s1 + $0x16c0] sm:$0xff]  ;;  %v14247_v37 = vcombine.high %v508_v29, %v512_v30 }
 0x11a   :  { %9893 = vmatprep.subr.bf16.mxu0 %v14453_v35  ;;  %v17207_v49 = vpop.f32.mrb[1].mxu1  ;;  %v767_v34 = vld [vmem:[%s22050_s1 + $0x16e0] sm:$0xff]  ;;  %v14238_v35 = vcombine.low %v500_v20, %v504_v21  ;;  %v14279_v20 = vcombine.high %v540_v11, %v544_v12 }
 0x11b   :  { %v9716_v55 = vpop.f32.mrb[2].mxu1  ;;  %v14501_v38 = vcombine.high %v763_v33, %v767_v34  ;;  %v14500_v47 = vcombine.low %v763_v33, %v767_v34  ;;  %v556_v33 = vld [vmem:[%s22050_s1 + $0x1048] sm:$0xff] }
 0x11c   :  { %10345 = vmatpush1.bf16.msra.mxu1 %v14198_v41  ;;  %v9717_v57 = vpop.f32.mrb[3].mxu1  ;;  %v520_v41 = vld [vmem:[%s22050_s1 + $0xf28] sm:$0xff] }
 0x11d   :  { %9894 = vmatpush1.bf16.msra.mxu0 %v14452_v42  ;;  %10346 = vmatprep.subr.bf16.mxu1 %v14207_v44  ;;  %v771_v42 = vld [vmem:[%s22050_s1 + $0x1700] sm:$0xff]  ;;  %v14255_v48 = vcombine.high %v516_v39, %v520_v41  ;;  %v528_v55 = vld [vmem:[%s22050_s1 + $0xf68] sm:$0xff] }
 0x11e   :  { %9895 = vmatprep.subr.bf16.mxu0 %v14461_v46  ;;  %v775_v44 = vld [vmem:[%s22050_s1 + $0x1720] sm:$0xff]  ;;  %v14246_v46 = vcombine.low %v508_v29, %v512_v30  ;;  %v14287_v29 = vcombine.high %v548_v58, %v552_v23  ;;  %v560_v34 = vld [vmem:[%s22050_s1 + $0x1068] sm:$0xff] }
 0x11f   :  { %v14509_v50 = vcombine.high %v771_v42, %v775_v44  ;;  %v783_v57 = vld [vmem:[%s22050_s1 + $0x1760] sm:$0xff] }
 0x120   :  { %10347 = vmatpush1.bf16.msra.mxu1 %v14206_v56  ;;  %v779_v56 = vld [vmem:[%s22050_s1 + $0x1740] sm:$0xff] }
 0x121   :  { %9896 = vmatpush1.bf16.msra.mxu0 %v14460_v60  ;;  %10348 = vmatprep.subr.bf16.mxu1 %v14215_v61  ;;  %v14254_v60 = vcombine.low %v516_v39, %v520_v41  ;;  %v14508_v61 = vcombine.low %v771_v42, %v775_v44  ;;  %v14517_v0 = vcombine.high %v779_v56, %v783_v57 }
 0x122   :  { %9897 = vmatprep.subr.bf16.mxu0 %v14469_v5  ;;  %v14263_v5 = vcombine.high %v524_v51, %v528_v55  ;;  %v17344_v39 = vcombine.high %v17129_v52, %v17129_v52  ;;  %v14295_v42 = vcombine.high %v556_v33, %v560_v34 }
 0x124   :  { %10349 = vmatpush1.bf16.msra.mxu1 %v14214_v4  ;;  %v791_v4 = vld [vmem:[%s22050_s1 + $0x17a0] sm:$0xff] }
 0x125   :  { %9898 = vmatpush1.bf16.msra.mxu0 %v14468_v6  ;;  %10350 = vmatprep.subr.bf16.mxu1 %v14223_v7  ;;  %v14262_v6 = vcombine.low %v524_v51, %v528_v55  ;;  %v14516_v7 = vcombine.low %v779_v56, %v783_v57  ;;  %v14525_v10 = vcombine.high %v787_v3, %v791_v4  ;;  %v823_v51 = vld [vmem:[%s22050_s1 + $0x18a0] sm:$0xff] }
 0x126   :  { %9899 = vmatprep.subr.bf16.mxu0 %v14477_v8  ;;  %v14271_v8 = vcombine.high %v532_v1, %v536_v2  ;;  %v14294_v55 = vcombine.low %v556_v33, %v560_v34 }
 0x128   :  { %10351 = vmatpush1.bf16.msra.mxu1 %v14222_v15  ;;  %v795_v15 = vld [vmem:[%s22050_s1 + $0x17c0] sm:$0xff] }
 0x129   :  { %9900 = vmatpush1.bf16.msra.mxu0 %v14476_v16  ;;  %10352 = vmatprep.subr.bf16.mxu1 %v14231_v59  ;;  %v799_v16 = vld [vmem:[%s22050_s1 + $0x17e0] sm:$0xff]  ;;  %v14270_v59 = vcombine.low %v532_v1, %v536_v2 }
 0x12a   :  { %9901 = vmatprep.subr.bf16.mxu0 %v14485_v19  ;;  %v14524_v19 = vcombine.low %v787_v3, %v791_v4  ;;  %v14533_v21 = vcombine.high %v795_v15, %v799_v16  ;;  %v831_v1 = vld [vmem:[%s22050_s1 + $0x18e0] sm:$0xff] }
 0x12c   :  { %10353 = vmatpush1.bf16.msra.mxu1 %v14230_v26  ;;  %v803_v26 = vld [vmem:[%s22050_s1 + $0x1800] sm:$0xff] }
 0x12d   :  { %9902 = vmatpush1.bf16.msra.mxu0 %v14484_v27  ;;  %10354 = vmatprep.subr.bf16.mxu1 %v14239_v28  ;;  %v807_v27 = vld [vmem:[%s22050_s1 + $0x1820] sm:$0xff]  ;;  %v14278_v28 = vcombine.low %v540_v11, %v544_v12 }
 0x12e   :  { %9903 = vmatprep.subr.bf16.mxu0 %v14493_v63  ;;  %v14532_v63 = vcombine.low %v795_v15, %v799_v16  ;;  %v14541_v30 = vcombine.high %v803_v26, %v807_v27  ;;  %v14540_v41 = vcombine.low %v803_v26, %v807_v27  ;;  %v839_v11 = vld [vmem:[%s22050_s1 + $0x1920] sm:$0xff] }
 0x130   :  { %10355 = vmatpush1.bf16.msra.mxu1 %v14238_v35  ;;  %v1714_v35 = vcombine.high %v17320_v24, %v17320_v24 }
 0x131   :  { %9904 = vmatpush1.bf16.msra.mxu0 %v14492_v36  ;;  %10356 = vmatprep.subr.bf16.mxu1 %v14247_v37  ;;  %v811_v36 = vld [vmem:[%s22050_s1 + $0x1840] sm:$0xff] }
 0x132   :  { %9905 = vmatprep.subr.bf16.mxu0 %v14501_v38  ;;  %v815_v37 = vld [vmem:[%s22050_s1 + $0x1860] sm:$0xff]  ;;  %v14286_v38 = vcombine.low %v548_v58, %v552_v23 }
 0x133   :  { %v14549_v44 = vcombine.high %v811_v36, %v815_v37  ;;  %v14548_v56 = vcombine.low %v811_v36, %v815_v37  ;;  %v604_v37 = vld [vmem:[%s22050_s1 + $0x11c8] sm:$0xff] }
 0x134   :  { %10357 = vmatpush1.bf16.msra.mxu1 %v14246_v46  ;;  %v564_v46 = vld [vmem:[%s22050_s1 + $0x1088] sm:$0xff] }
 0x135   :  { %9906 = vmatpush1.bf16.msra.mxu0 %v14500_v47  ;;  %10358 = vmatprep.subr.bf16.mxu1 %v14255_v48  ;;  %v568_v47 = vld [vmem:[%s22050_s1 + $0x10a8] sm:$0xff]  ;;  %v17353_v48 = vrot.slane %v1714_v35, %v16335_v53 }
 0x136   :  { %9907 = vmatprep.subr.bf16.mxu0 %v14509_v50  ;;  %v819_v50 = vld [vmem:[%s22050_s1 + $0x1880] sm:$0xff]  ;;  %v14303_v57 = vcombine.high %v564_v46, %v568_v47  ;;  %v14302_v2 = vcombine.low %v564_v46, %v568_v47 }
 0x137   :  { %v14556_v3 = vcombine.low %v819_v50, %v823_v51 }
 0x138   :  { %10359 = vmatpush1.bf16.msra.mxu1 %v14254_v60  ;;  %v14557_v60 = vcombine.high %v819_v50, %v823_v51  ;;  %v612_v51 = vld [vmem:[%s22050_s1 + $0x1208] sm:$0xff] }
 0x139   :  { %9908 = vmatpush1.bf16.msra.mxu0 %v14508_v61  ;;  %10360 = vmatprep.subr.bf16.mxu1 %v14263_v5  ;;  %v572_v61 = vld [vmem:[%s22050_s1 + $0x10c8] sm:$0xff] }
 0x13a   :  { %9909 = vmatprep.subr.bf16.mxu0 %v14517_v0  ;;  %v576_v5 = vld [vmem:[%s22050_s1 + $0x10e8] sm:$0xff]  ;;  %v827_v0 = vld [vmem:[%s22050_s1 + $0x18c0] sm:$0xff] }
 0x13b   :  { %v14311_v4 = vcombine.high %v572_v61, %v576_v5  ;;  %v14310_v12 = vcombine.low %v572_v61, %v576_v5  ;;  %v14564_v14 = vcombine.low %v827_v0, %v831_v1 }
 0x13c   :  { %10361 = vmatpush1.bf16.msra.mxu1 %v14262_v6  ;;  %v14565_v6 = vcombine.high %v827_v0, %v831_v1  ;;  %v620_v1 = vld [vmem:[%s22050_s1 + $0x1248] sm:$0xff] }
 0x13d   :  { %9910 = vmatpush1.bf16.msra.mxu0 %v14516_v7  ;;  %10362 = vmatprep.subr.bf16.mxu1 %v14271_v8  ;;  %v580_v7 = vld [vmem:[%s22050_s1 + $0x1108] sm:$0xff] }
 0x13e   :  { %9911 = vmatprep.subr.bf16.mxu0 %v14525_v10  ;;  %v584_v8 = vld [vmem:[%s22050_s1 + $0x1128] sm:$0xff]  ;;  %v835_v10 = vld [vmem:[%s22050_s1 + $0x1900] sm:$0xff] }
 0x13f   :  { %v14319_v15 = vcombine.high %v580_v7, %v584_v8  ;;  %v14573_v16 = vcombine.high %v835_v10, %v839_v11  ;;  %v14318_v58 = vcombine.low %v580_v7, %v584_v8  ;;  %v14572_v23 = vcombine.low %v835_v10, %v839_v11  ;;  %v628_v11 = vld [vmem:[%s22050_s1 + $0x1288] sm:$0xff] }
 0x140   :  { %10363 = vmatpush1.bf16.msra.mxu1 %v14270_v59  ;;  %v588_v59 = vld [vmem:[%s22050_s1 + $0x1148] sm:$0xff] }
 0x141   :  { %9912 = vmatpush1.bf16.msra.mxu0 %v14524_v19  ;;  %10364 = vmatprep.subr.bf16.mxu1 %v14279_v20  ;;  %v592_v19 = vld [vmem:[%s22050_s1 + $0x1168] sm:$0xff]  ;;  %v843_v20 = vld [vmem:[%s22050_s1 + $0x1940] sm:$0xff] }
 0x142   :  { %9913 = vmatprep.subr.bf16.mxu0 %v14533_v21  ;;  %v847_v21 = vld [vmem:[%s22050_s1 + $0x1960] sm:$0xff]  ;;  %v14327_v26 = vcombine.high %v588_v59, %v592_v19  ;;  %v14326_v33 = vcombine.low %v588_v59, %v592_v19 }
 0x143   :  { %v14581_v27 = vcombine.high %v843_v20, %v847_v21  ;;  %v14580_v34 = vcombine.low %v843_v20, %v847_v21  ;;  %v636_v21 = vld [vmem:[%s22050_s1 + $0x12c8] sm:$0xff] }
 0x144   :  { %10365 = vmatpush1.bf16.msra.mxu1 %v14278_v28  ;;  %v596_v28 = vld [vmem:[%s22050_s1 + $0x1188] sm:$0xff] }
 0x145   :  { %9914 = vmatpush1.bf16.msra.mxu0 %v14532_v63  ;;  %10375 = vmatprep.subr.bf16.mxu1 %v14287_v29  ;;  %v600_v63 = vld [vmem:[%s22050_s1 + $0x11a8] sm:$0xff]  ;;  %v851_v29 = vld [vmem:[%s22050_s1 + $0x1980] sm:$0xff] }
 0x146   :  { %9924 = vmatprep.subr.bf16.mxu0 %v14541_v30  ;;  %v855_v30 = vld [vmem:[%s22050_s1 + $0x19a0] sm:$0xff]  ;;  %v14335_v35 = vcombine.high %v596_v28, %v600_v63 }
 0x147   :  { %10367 = vmatmul.mubr.bf16.vlgmr.msra.gmra.mrb[4].mxu1 %v16926_v17  ;;  %v14589_v36 = vcombine.high %v851_v29, %v855_v30  ;;  %v14588_v46 = vcombine.low %v851_v29, %v855_v30  ;;  %v644_v30 = vld [vmem:[%s22050_s1 + $0x1308] sm:$0xff] }
 0x148   :  { %9916 = vmatmul.mubr.bf16.vlgmr.msra.gmra.mrb[0].mxu0 %v17344_v39  ;;  %10376 = vmatpush1.bf16.msra.mxu1 %v14286_v38  ;;  %v608_v38 = vld [vmem:[%s22050_s1 + $0x11e8] sm:$0xff] }
 0x149   :  { %9925 = vmatpush1.bf16.msra.mxu0 %v14540_v41  ;;  %10377 = vmatprep.subr.bf16.mxu1 %v14295_v42  ;;  %v859_v41 = vld [vmem:[%s22050_s1 + $0x19c0] sm:$0xff]  ;;  %v14343_v47 = vcombine.high %v604_v37, %v608_v38 }
 0x14a   :  { %9926 = vmatprep.subr.bf16.mxu0 %v14549_v44  ;;  %9956 = vmatprep.mubr.bf16.mxu0 %v17353_v48  ;;  %v863_v42 = vld [vmem:[%s22050_s1 + $0x19e0] sm:$0xff]  ;;  %v14334_v44 = vcombine.low %v596_v28, %v600_v63 }
 0x14b   :  { %10407 = vmatprep.mubr.bf16.mxu1 %v16935_v25  ;;  %v14597_v50 = vcombine.high %v859_v41, %v863_v42  ;;  %v14596_v61 = vcombine.low %v859_v41, %v863_v42  ;;  %v652_v42 = vld [vmem:[%s22050_s1 + $0x1348] sm:$0xff] }
 0x14c   :  { %10378 = vmatpush1.bf16.msra.mxu1 %v14294_v55  ;;  %v616_v55 = vld [vmem:[%s22050_s1 + $0x1228] sm:$0xff] }
 0x14d   :  { %9927 = vmatpush1.bf16.msra.mxu0 %v14548_v56  ;;  %10379 = vmatprep.subr.bf16.mxu1 %v14303_v57  ;;  %v867_v56 = vld [vmem:[%s22050_s1 + $0x1a00] sm:$0xff]  ;;  %v14351_v5 = vcombine.high %v612_v51, %v616_v55 }
 0x14e   :  { %9928 = vmatprep.subr.bf16.mxu0 %v14557_v60  ;;  %v871_v57 = vld [vmem:[%s22050_s1 + $0x1a20] sm:$0xff]  ;;  %v14342_v60 = vcombine.low %v604_v37, %v608_v38 }
 0x14f   :  { %v14605_v0 = vcombine.high %v867_v56, %v871_v57  ;;  %v14604_v7 = vcombine.low %v867_v56, %v871_v57  ;;  %v660_v57 = vld [vmem:[%s22050_s1 + $0x1388] sm:$0xff] }
 0x150   :  { %10380 = vmatpush1.bf16.msra.mxu1 %v14302_v2  ;;  %v624_v2 = vld [vmem:[%s22050_s1 + $0x1268] sm:$0xff] }
 0x151   :  { %9929 = vmatpush1.bf16.msra.mxu0 %v14556_v3  ;;  %10381 = vmatprep.subr.bf16.mxu1 %v14311_v4  ;;  %v875_v3 = vld [vmem:[%s22050_s1 + $0x1a40] sm:$0xff]  ;;  %v14359_v8 = vcombine.high %v620_v1, %v624_v2 }
 0x152   :  { %9930 = vmatprep.subr.bf16.mxu0 %v14565_v6  ;;  %v879_v4 = vld [vmem:[%s22050_s1 + $0x1a60] sm:$0xff]  ;;  %v14350_v6 = vcombine.low %v612_v51, %v616_v55 }
 0x153   :  { %v14613_v10 = vcombine.high %v875_v3, %v879_v4  ;;  %v14612_v59 = vcombine.low %v875_v3, %v879_v4  ;;  %v668_v4 = vld [vmem:[%s22050_s1 + $0x13c8] sm:$0xff] }
 0x154   :  { %10382 = vmatpush1.bf16.msra.mxu1 %v14310_v12  ;;  %v632_v12 = vld [vmem:[%s22050_s1 + $0x12a8] sm:$0xff] }
 0x155   :  { %9931 = vmatpush1.bf16.msra.mxu0 %v14564_v14  ;;  %10383 = vmatprep.subr.bf16.mxu1 %v14319_v15  ;;  %v883_v14 = vld [vmem:[%s22050_s1 + $0x1a80] sm:$0xff]  ;;  %v14367_v19 = vcombine.high %v628_v11, %v632_v12 }
 0x156   :  { %9932 = vmatprep.subr.bf16.mxu0 %v14573_v16  ;;  %v887_v15 = vld [vmem:[%s22050_s1 + $0x1aa0] sm:$0xff]  ;;  %v14358_v16 = vcombine.low %v620_v1, %v624_v2 }
 0x157   :  { %v14621_v20 = vcombine.high %v883_v14, %v887_v15  ;;  %v14620_v28 = vcombine.low %v883_v14, %v887_v15  ;;  %v676_v15 = vld [vmem:[%s22050_s1 + $0x1408] sm:$0xff] }
 0x158   :  { %10384 = vmatpush1.bf16.msra.mxu1 %v14318_v58  ;;  %v640_v58 = vld [vmem:[%s22050_s1 + $0x12e8] sm:$0xff] }
 0x159   :  { %9933 = vmatpush1.bf16.msra.mxu0 %v14572_v23  ;;  %10385 = vmatprep.subr.bf16.mxu1 %v14327_v26  ;;  %v891_v23 = vld [vmem:[%s22050_s1 + $0x1ac0] sm:$0xff]  ;;  %v14375_v63 = vcombine.high %v636_v21, %v640_v58 }
 0x15a   :  { %9934 = vmatprep.subr.bf16.mxu0 %v14581_v27  ;;  %v895_v26 = vld [vmem:[%s22050_s1 + $0x1ae0] sm:$0xff]  ;;  %v14366_v27 = vcombine.low %v628_v11, %v632_v12 }
 0x15b   :  { %v14629_v29 = vcombine.high %v891_v23, %v895_v26  ;;  %v14628_v37 = vcombine.low %v891_v23, %v895_v26  ;;  %v684_v26 = vld [vmem:[%s22050_s1 + $0x1448] sm:$0xff] }
 0x15c   :  { %10386 = vmatpush1.bf16.msra.mxu1 %v14326_v33  ;;  %v648_v33 = vld [vmem:[%s22050_s1 + $0x1328] sm:$0xff] }
 0x15d   :  { %9935 = vmatpush1.bf16.msra.mxu0 %v14580_v34  ;;  %10387 = vmatprep.subr.bf16.mxu1 %v14335_v35  ;;  %v899_v34 = vld [vmem:[%s22050_s1 + $0x1b00] sm:$0xff]  ;;  %v14383_v38 = vcombine.high %v644_v30, %v648_v33 }
 0x15e   :  { %9936 = vmatprep.subr.bf16.mxu0 %v14589_v36  ;;  %v903_v35 = vld [vmem:[%s22050_s1 + $0x1b20] sm:$0xff]  ;;  %v14374_v36 = vcombine.low %v636_v21, %v640_v58 }
 0x15f   :  { %v14637_v41 = vcombine.high %v899_v34, %v903_v35  ;;  %v14636_v51 = vcombine.low %v899_v34, %v903_v35 }
 0x160   :  { %10388 = vmatpush1.bf16.msra.mxu1 %v14334_v44  ;;  %v656_v44 = vld [vmem:[%s22050_s1 + $0x1368] sm:$0xff] }
 0x161   :  { %9937 = vmatpush1.bf16.msra.mxu0 %v14588_v46  ;;  %10389 = vmatprep.subr.bf16.mxu1 %v14343_v47  ;;  %v907_v46 = vld [vmem:[%s22050_s1 + $0x1b40] sm:$0xff]  ;;  %v14391_v55 = vcombine.high %v652_v42, %v656_v44 }
 0x162   :  { %9938 = vmatprep.subr.bf16.mxu0 %v14597_v50  ;;  %v911_v47 = vld [vmem:[%s22050_s1 + $0x1b60] sm:$0xff]  ;;  %v14382_v50 = vcombine.low %v644_v30, %v648_v33  ;;  %v17547_v30 = vrot.slane %v17320_v24, %v16335_v53 }
 0x163   :  { %v14645_v56 = vcombine.high %v907_v46, %v911_v47  ;;  %v14644_v1 = vcombine.low %v907_v46, %v911_v47  ;;  %v947_v24 = vld [vmem:[%s22050_s1 + $0x1c80] sm:$0xff] }
 0x164   :  { %10390 = vmatpush1.bf16.msra.mxu1 %v14342_v60  ;;  %v664_v60 = vld [vmem:[%s22050_s1 + $0x13a8] sm:$0xff] }
 0x165   :  { %9939 = vmatpush1.bf16.msra.mxu0 %v14596_v61  ;;  %10391 = vmatprep.subr.bf16.mxu1 %v14351_v5  ;;  %v915_v61 = vld [vmem:[%s22050_s1 + $0x1b80] sm:$0xff]  ;;  %v14399_v2 = vcombine.high %v660_v57, %v664_v60 }
 0x166   :  { %9940 = vmatprep.subr.bf16.mxu0 %v14605_v0  ;;  %v919_v5 = vld [vmem:[%s22050_s1 + $0x1ba0] sm:$0xff]  ;;  %v14390_v0 = vcombine.low %v652_v42, %v656_v44 }
 0x167   :  { %v14653_v3 = vcombine.high %v915_v61, %v919_v5  ;;  %v14652_v11 = vcombine.low %v915_v61, %v919_v5 }
 0x168   :  { %10392 = vmatpush1.bf16.msra.mxu1 %v14350_v6  ;;  %v672_v6 = vld [vmem:[%s22050_s1 + $0x13e8] sm:$0xff] }
 0x169   :  { %9941 = vmatpush1.bf16.msra.mxu0 %v14604_v7  ;;  %10393 = vmatprep.subr.bf16.mxu1 %v14359_v8  ;;  %v923_v7 = vld [vmem:[%s22050_s1 + $0x1bc0] sm:$0xff]  ;;  %v14407_v12 = vcombine.high %v668_v4, %v672_v6 }
 0x16a   :  { %9942 = vmatprep.subr.bf16.mxu0 %v14613_v10  ;;  %v927_v8 = vld [vmem:[%s22050_s1 + $0x1be0] sm:$0xff]  ;;  %v14398_v10 = vcombine.low %v660_v57, %v664_v60 }
 0x16b   :  { %v14661_v14 = vcombine.high %v923_v7, %v927_v8  ;;  %v14660_v21 = vcombine.low %v923_v7, %v927_v8 }
 0x16c   :  { %10394 = vmatpush1.bf16.msra.mxu1 %v14358_v16  ;;  %v680_v16 = vld [vmem:[%s22050_s1 + $0x1428] sm:$0xff] }
 0x16d   :  { %9943 = vmatpush1.bf16.msra.mxu0 %v14612_v59  ;;  %10395 = vmatprep.subr.bf16.mxu1 %v14367_v19  ;;  %v931_v59 = vld [vmem:[%s22050_s1 + $0x1c00] sm:$0xff]  ;;  %v14415_v58 = vcombine.high %v676_v15, %v680_v16 }
 0x16e   :  { %9944 = vmatprep.subr.bf16.mxu0 %v14621_v20  ;;  %v935_v19 = vld [vmem:[%s22050_s1 + $0x1c20] sm:$0xff]  ;;  %v14406_v20 = vcombine.low %v668_v4, %v672_v6 }
 0x16f   :  { %v14669_v23 = vcombine.high %v931_v59, %v935_v19  ;;  %v14668_v33 = vcombine.low %v931_v59, %v935_v19 }
 0x170   :  { %10396 = vmatpush1.bf16.msra.mxu1 %v14366_v27  ;;  %v688_v27 = vld [vmem:[%s22050_s1 + $0x1468] sm:$0xff] }
 0x171   :  { %9945 = vmatpush1.bf16.msra.mxu0 %v14620_v28  ;;  %10397 = vmatprep.subr.bf16.mxu1 %v14375_v63  ;;  %v939_v28 = vld [vmem:[%s22050_s1 + $0x1c40] sm:$0xff]  ;;  %v14423_v34 = vcombine.high %v684_v26, %v688_v27  ;;  %v14422_v42 = vcombine.low %v684_v26, %v688_v27 }
 0x172   :  { %9946 = vmatprep.subr.bf16.mxu0 %v14629_v29  ;;  %v943_v63 = vld [vmem:[%s22050_s1 + $0x1c60] sm:$0xff]  ;;  %v14414_v29 = vcombine.low %v676_v15, %v680_v16 }
 0x173   :  { %v14677_v35 = vcombine.high %v939_v28, %v943_v63  ;;  %v14676_v44 = vcombine.low %v939_v28, %v943_v63 }
 0x174   :  { %10398 = vmatpush1.bf16.msra.mxu1 %v14374_v36  ;;  %v692_v36 = vld [vmem:[%s22050_s1 + $0x1488] sm:$0xff] }
 0x175   :  { %9947 = vmatpush1.bf16.msra.mxu0 %v14628_v37  ;;  %10399 = vmatprep.subr.bf16.mxu1 %v14383_v38  ;;  %v696_v37 = vld [vmem:[%s22050_s1 + $0x14a8] sm:$0xff]  ;;  %v17557_v38 = vcombine.high %v17353_v48, %v17353_v48 }
 0x176   :  { %9948 = vmatprep.subr.bf16.mxu0 %v14637_v41  ;;  %v951_v41 = vld [vmem:[%s22050_s1 + $0x1ca0] sm:$0xff]  ;;  %v14431_v46 = vcombine.high %v692_v36, %v696_v37  ;;  %v14430_v57 = vcombine.low %v692_v36, %v696_v37 }
 0x177   :  { %v14685_v47 = vcombine.high %v947_v24, %v951_v41  ;;  %v14684_v60 = vcombine.low %v947_v24, %v951_v41 }
 0x178   :  { %10400 = vmatpush1.bf16.msra.mxu1 %v14382_v50  ;;  %v700_v50 = vld [vmem:[%s22050_s1 + $0x14c8] sm:$0xff] }
 0x179   :  { %9949 = vmatpush1.bf16.msra.mxu0 %v14636_v51  ;;  %10401 = vmatprep.subr.bf16.mxu1 %v14391_v55  ;;  %v704_v51 = vld [vmem:[%s22050_s1 + $0x14e8] sm:$0xff]  ;;  %v955_v55 = vld [vmem:[%s22050_s1 + $0x1cc0] sm:$0xff] }
 0x17a   :  { %9950 = vmatprep.subr.bf16.mxu0 %v14645_v56  ;;  %v959_v56 = vld [vmem:[%s22050_s1 + $0x1ce0] sm:$0xff]  ;;  %v14439_v61 = vcombine.high %v700_v50, %v704_v51  ;;  %v14438_v4 = vcombine.low %v700_v50, %v704_v51 }
 0x17b   :  { %v14693_v5 = vcombine.high %v955_v55, %v959_v56  ;;  %v14692_v6 = vcombine.low %v955_v55, %v959_v56 }
 0x17c   :  { %10402 = vmatpush1.bf16.msra.mxu1 %v14390_v0  ;;  %v708_v0 = vld [vmem:[%s22050_s1 + $0x1508] sm:$0xff] }
 0x17d   :  { %9951 = vmatpush1.bf16.msra.mxu0 %v14644_v1  ;;  %10403 = vmatprep.subr.bf16.mxu1 %v14399_v2  ;;  %v712_v1 = vld [vmem:[%s22050_s1 + $0x1528] sm:$0xff]  ;;  %v963_v2 = vld [vmem:[%s22050_s1 + $0x1d00] sm:$0xff] }
 0x17e   :  { %9952 = vmatprep.subr.bf16.mxu0 %v14653_v3  ;;  %v967_v3 = vld [vmem:[%s22050_s1 + $0x1d20] sm:$0xff]  ;;  %v14447_v7 = vcombine.high %v708_v0, %v712_v1  ;;  %v14446_v15 = vcombine.low %v708_v0, %v712_v1 }
 0x17f   :  { %v14701_v8 = vcombine.high %v963_v2, %v967_v3  ;;  %v14700_v16 = vcombine.low %v963_v2, %v967_v3 }
 0x180   :  { %10404 = vmatpush1.bf16.msra.mxu1 %v14398_v10  ;;  %v716_v10 = vld [vmem:[%s22050_s1 + $0x1548] sm:$0xff] }
 0x181   :  { %9953 = vmatpush1.bf16.msra.mxu0 %v14652_v11  ;;  %10405 = vmatprep.subr.bf16.mxu1 %v14407_v12  ;;  %v720_v11 = vld [vmem:[%s22050_s1 + $0x1568] sm:$0xff]  ;;  %v971_v12 = vld [vmem:[%s22050_s1 + $0x1d40] sm:$0xff] }
 0x182   :  { %9954 = vmatprep.subr.bf16.mxu0 %v14661_v14  ;;  %v975_v14 = vld [vmem:[%s22050_s1 + $0x1d60] sm:$0xff]  ;;  %v14455_v59 = vcombine.high %v716_v10, %v720_v11  ;;  %v14454_v26 = vcombine.low %v716_v10, %v720_v11 }
 0x183   :  { %v14709_v19 = vcombine.high %v971_v12, %v975_v14  ;;  %v14708_v27 = vcombine.low %v971_v12, %v975_v14 }
 0x184   :  { %10406 = vmatpush1.bf16.msra.mxu1 %v14406_v20  ;;  %v724_v20 = vld [vmem:[%s22050_s1 + $0x1588] sm:$0xff] }
 0x185   :  { %9955 = vmatpush1.bf16.msra.mxu0 %v14660_v21  ;;  %10416 = vmatprep.subr.bf16.mxu1 %v14415_v58  ;;  %v728_v21 = vld [vmem:[%s22050_s1 + $0x15a8] sm:$0xff]  ;;  %v979_v58 = vld [vmem:[%s22050_s1 + $0x1d80] sm:$0xff] }
 0x186   :  { %9965 = vmatprep.subr.bf16.mxu0 %v14669_v23  ;;  %v983_v23 = vld [vmem:[%s22050_s1 + $0x1da0] sm:$0xff]  ;;  %v14463_v28 = vcombine.high %v724_v20, %v728_v21  ;;  %v14462_v36 = vcombine.low %v724_v20, %v728_v21 }
 0x187   :  { %10408 = vmatmul.mubr.bf16.vlgmr.msra.gmra.mrb[4].mxu1 %v17129_v52  ;;  %v14717_v63 = vcombine.high %v979_v58, %v983_v23  ;;  %v14716_v37 = vcombine.low %v979_v58, %v983_v23 }
 0x188   :  { %9957 = vmatmul.mubr.bf16.vlgmr.msra.gmra.mrb[0].mxu0 %v17547_v30  ;;  %10417 = vmatpush1.bf16.msra.mxu1 %v14414_v29  ;;  %v732_v29 = vld [vmem:[%s22050_s1 + $0x15c8] sm:$0xff] }
 0x189   :  { %9966 = vmatpush1.bf16.msra.mxu0 %v14668_v33  ;;  %10418 = vmatprep.subr.bf16.mxu1 %v14423_v34  ;;  %v736_v33 = vld [vmem:[%s22050_s1 + $0x15e8] sm:$0xff]  ;;  %v987_v34 = vld [vmem:[%s22050_s1 + $0x1dc0] sm:$0xff] }
 0x18a   :  { %9967 = vmatprep.subr.bf16.mxu0 %v14677_v35  ;;  %9997 = vmatprep.mubr.bf16.mxu0 %v17557_v38  ;;  %v991_v35 = vld [vmem:[%s22050_s1 + $0x1de0] sm:$0xff]  ;;  %v14471_v24 = vcombine.high %v732_v29, %v736_v33  ;;  %v14470_v50 = vcombine.low %v732_v29, %v736_v33 }
 0x18b   :  { %10448 = vmatprep.mubr.bf16.mxu1 %v17139_v18  ;;  %v14725_v41 = vcombine.high %v987_v34, %v991_v35  ;;  %v14724_v51 = vcombine.low %v987_v34, %v991_v35 }
 0x18c   :  { %10419 = vmatpush1.bf16.msra.mxu1 %v14422_v42  ;;  %v740_v42 = vld [vmem:[%s22050_s1 + $0x1608] sm:$0xff] }
 0x18d   :  { %9968 = vmatpush1.bf16.msra.mxu0 %v14676_v44  ;;  %10420 = vmatprep.subr.bf16.mxu1 %v14431_v46  ;;  %v744_v44 = vld [vmem:[%s22050_s1 + $0x1628] sm:$0xff]  ;;  %v995_v46 = vld [vmem:[%s22050_s1 + $0x1e00] sm:$0xff] }
 0x18e   :  { %9969 = vmatprep.subr.bf16.mxu0 %v14685_v47  ;;  %v999_v47 = vld [vmem:[%s22050_s1 + $0x1e20] sm:$0xff]  ;;  %v14479_v55 = vcombine.high %v740_v42, %v744_v44  ;;  %v14478_v0 = vcombine.low %v740_v42, %v744_v44 }
 0x18f   :  { %v14733_v56 = vcombine.high %v995_v46, %v999_v47  ;;  %v14732_v1 = vcombine.low %v995_v46, %v999_v47 }
 0x190   :  { %10421 = vmatpush1.bf16.msra.mxu1 %v14430_v57  ;;  %v748_v57 = vld [vmem:[%s22050_s1 + $0x1648] sm:$0xff] }
 0x191   :  { %9970 = vmatpush1.bf16.msra.mxu0 %v14684_v60  ;;  %10422 = vmatprep.subr.bf16.mxu1 %v14439_v61  ;;  %v752_v60 = vld [vmem:[%s22050_s1 + $0x1668] sm:$0xff]  ;;  %v1003_v61 = vld [vmem:[%s22050_s1 + $0x1e40] sm:$0xff] }
 0x192   :  { %9971 = vmatprep.subr.bf16.mxu0 %v14693_v5  ;;  %v1007_v5 = vld [vmem:[%s22050_s1 + $0x1e60] sm:$0xff]  ;;  %v14487_v2 = vcombine.high %v748_v57, %v752_v60  ;;  %v14486_v10 = vcombine.low %v748_v57, %v752_v60 }
 0x193   :  { %v14741_v3 = vcombine.high %v1003_v61, %v1007_v5  ;;  %v14740_v11 = vcombine.low %v1003_v61, %v1007_v5 }
 0x194   :  { %10423 = vmatpush1.bf16.msra.mxu1 %v14438_v4  ;;  %v756_v4 = vld [vmem:[%s22050_s1 + $0x1688] sm:$0xff] }
 0x195   :  { %9972 = vmatpush1.bf16.msra.mxu0 %v14692_v6  ;;  %10424 = vmatprep.subr.bf16.mxu1 %v14447_v7  ;;  %v760_v6 = vld [vmem:[%s22050_s1 + $0x16a8] sm:$0xff]  ;;  %v1011_v7 = vld [vmem:[%s22050_s1 + $0x1e80] sm:$0xff] }
 0x196   :  { %9973 = vmatprep.subr.bf16.mxu0 %v14701_v8  ;;  %v1015_v8 = vld [vmem:[%s22050_s1 + $0x1ea0] sm:$0xff]  ;;  %v14495_v12 = vcombine.high %v756_v4, %v760_v6  ;;  %v14494_v20 = vcombine.low %v756_v4, %v760_v6  ;;  %v17728_v4 = vld [vmem:[%s22049_s0 + $0x10] sm:$0xff] }
 0x197   :  { %v14749_v14 = vcombine.high %v1011_v7, %v1015_v8  ;;  %v14748_v21 = vcombine.low %v1011_v7, %v1015_v8 }
 0x198   :  { %10425 = vmatpush1.bf16.msra.mxu1 %v14446_v15  ;;  %v764_v15 = vld [vmem:[%s22050_s1 + $0x16c8] sm:$0xff] }
 0x199   :  { %9974 = vmatpush1.bf16.msra.mxu0 %v14700_v16  ;;  %10426 = vmatprep.subr.bf16.mxu1 %v14455_v59  ;;  %v768_v16 = vld [vmem:[%s22050_s1 + $0x16e8] sm:$0xff]  ;;  %v1019_v59 = vld [vmem:[%s22050_s1 + $0x1ec0] sm:$0xff] }
 0x19a   :  { %9975 = vmatprep.subr.bf16.mxu0 %v14709_v19  ;;  %v1023_v19 = vld [vmem:[%s22050_s1 + $0x1ee0] sm:$0xff]  ;;  %v14503_v58 = vcombine.high %v764_v15, %v768_v16  ;;  %v14502_v29 = vcombine.low %v764_v15, %v768_v16 }
 0x19b   :  { %v14757_v23 = vcombine.high %v1019_v59, %v1023_v19  ;;  %v14756_v33 = vcombine.low %v1019_v59, %v1023_v19  ;;  %v1059_v15 = vld [vmem:[%s22050_s1 + $0x2000] sm:$0xff] }
 0x19c   :  { %10427 = vmatpush1.bf16.msra.mxu1 %v14454_v26  ;;  %v772_v26 = vld [vmem:[%s22050_s1 + $0x1708] sm:$0xff]  ;;  %v1063_v16 = vld [vmem:[%s22050_s1 + $0x2020] sm:$0xff] }
 0x19d   :  { %9976 = vmatpush1.bf16.msra.mxu0 %v14708_v27  ;;  %10428 = vmatprep.subr.bf16.mxu1 %v14463_v28  ;;  %v776_v27 = vld [vmem:[%s22050_s1 + $0x1728] sm:$0xff]  ;;  %v1027_v28 = vld [vmem:[%s22050_s1 + $0x1f00] sm:$0xff] }
 0x19e   :  { %9977 = vmatprep.subr.bf16.mxu0 %v14717_v63  ;;  %v1031_v63 = vld [vmem:[%s22050_s1 + $0x1f20] sm:$0xff]  ;;  %v14511_v34 = vcombine.high %v772_v26, %v776_v27  ;;  %v14510_v42 = vcombine.low %v772_v26, %v776_v27 }
 0x19f   :  { %v14765_v35 = vcombine.high %v1027_v28, %v1031_v63  ;;  %v14764_v44 = vcombine.low %v1027_v28, %v1031_v63  ;;  %v1067_v27 = vld [vmem:[%s22050_s1 + $0x2040] sm:$0xff] }
 0x1a0   :  { %10429 = vmatpush1.bf16.msra.mxu1 %v14462_v36  ;;  %v780_v36 = vld [vmem:[%s22050_s1 + $0x1748] sm:$0xff]  ;;  %v1071_v28 = vld [vmem:[%s22050_s1 + $0x2060] sm:$0xff] }
 0x1a1   :  { %9978 = vmatpush1.bf16.msra.mxu0 %v14716_v37  ;;  %10430 = vmatprep.subr.bf16.mxu1 %v14471_v24  ;;  %v784_v37 = vld [vmem:[%s22050_s1 + $0x1768] sm:$0xff]  ;;  %v1035_v24 = vld [vmem:[%s22050_s1 + $0x1f40] sm:$0xff] }
 0x1a2   :  { %9979 = vmatprep.subr.bf16.mxu0 %v14725_v41  ;;  %v1039_v41 = vld [vmem:[%s22050_s1 + $0x1f60] sm:$0xff]  ;;  %v14519_v46 = vcombine.high %v780_v36, %v784_v37  ;;  %v14518_v57 = vcombine.low %v780_v36, %v784_v37  ;;  %v820_v36 = vld [vmem:[%s22050_s1 + $0x1888] sm:$0xff] }
 0x1a3   :  { %v14773_v47 = vcombine.high %v1035_v24, %v1039_v41  ;;  %v14772_v60 = vcombine.low %v1035_v24, %v1039_v41  ;;  %v824_v37 = vld [vmem:[%s22050_s1 + $0x18a8] sm:$0xff]  ;;  %v1075_v41 = vld [vmem:[%s22050_s1 + $0x2080] sm:$0xff] }
 0x1a4   :  { %10431 = vmatpush1.bf16.msra.mxu1 %v14470_v50  ;;  %v788_v50 = vld [vmem:[%s22050_s1 + $0x1788] sm:$0xff] }
 0x1a5   :  { %9980 = vmatpush1.bf16.msra.mxu0 %v14724_v51  ;;  %10432 = vmatprep.subr.bf16.mxu1 %v14479_v55  ;;  %v792_v51 = vld [vmem:[%s22050_s1 + $0x17a8] sm:$0xff]  ;;  %v1043_v55 = vld [vmem:[%s22050_s1 + $0x1f80] sm:$0xff] }
 0x1a6   :  { %9981 = vmatprep.subr.bf16.mxu0 %v14733_v56  ;;  %v1047_v56 = vld [vmem:[%s22050_s1 + $0x1fa0] sm:$0xff]  ;;  %v14527_v61 = vcombine.high %v788_v50, %v792_v51  ;;  %v14526_v6 = vcombine.low %v788_v50, %v792_v51  ;;  %v828_v51 = vld [vmem:[%s22050_s1 + $0x18c8] sm:$0xff] }
 0x1a7   :  { %v14781_v5 = vcombine.high %v1043_v55, %v1047_v56  ;;  %v14780_v7 = vcombine.low %v1043_v55, %v1047_v56  ;;  %v832_v55 = vld [vmem:[%s22050_s1 + $0x18e8] sm:$0xff]  ;;  %v1083_v56 = vld [vmem:[%s22050_s1 + $0x20c0] sm:$0xff] }
 0x1a8   :  { %10433 = vmatpush1.bf16.msra.mxu1 %v14478_v0  ;;  %v796_v0 = vld [vmem:[%s22050_s1 + $0x17c8] sm:$0xff] }
 0x1a9   :  { %9982 = vmatpush1.bf16.msra.mxu0 %v14732_v1  ;;  %10434 = vmatprep.subr.bf16.mxu1 %v14487_v2  ;;  %v800_v1 = vld [vmem:[%s22050_s1 + $0x17e8] sm:$0xff]  ;;  %v1051_v2 = vld [vmem:[%s22050_s1 + $0x1fc0] sm:$0xff] }
 0x1aa   :  { %9983 = vmatprep.subr.bf16.mxu0 %v14741_v3  ;;  %v1055_v3 = vld [vmem:[%s22050_s1 + $0x1fe0] sm:$0xff]  ;;  %v14535_v8 = vcombine.high %v796_v0, %v800_v1  ;;  %v14534_v59 = vcombine.low %v796_v0, %v800_v1  ;;  %v836_v1 = vld [vmem:[%s22050_s1 + $0x1908] sm:$0xff] }
 0x1ab   :  { %v14788_v19 = vcombine.low %v1051_v2, %v1055_v3 }
 0x1ac   :  { %10435 = vmatpush1.bf16.msra.mxu1 %v14486_v10  ;;  %v14789_v10 = vcombine.high %v1051_v2, %v1055_v3  ;;  %v840_v2 = vld [vmem:[%s22050_s1 + $0x1928] sm:$0xff]  ;;  %v1091_v3 = vld [vmem:[%s22050_s1 + $0x2100] sm:$0xff] }
 0x1ad   :  { %9984 = vmatpush1.bf16.msra.mxu0 %v14740_v11  ;;  %10436 = vmatprep.subr.bf16.mxu1 %v14495_v12  ;;  %v804_v11 = vld [vmem:[%s22050_s1 + $0x1808] sm:$0xff] }
 0x1ae   :  { %9985 = vmatprep.subr.bf16.mxu0 %v14749_v14  ;;  %v808_v12 = vld [vmem:[%s22050_s1 + $0x1828] sm:$0xff]  ;;  %v17738_v14 = vrot.slane %v17728_v4, %v16335_v53 }
 0x1af   :  { %v14542_v63 = vcombine.low %v804_v11, %v808_v12 }
 0x1b0   :  { %10437 = vmatpush1.bf16.msra.mxu1 %v14494_v20  ;;  %v14543_v20 = vcombine.high %v804_v11, %v808_v12  ;;  %v1762_v26 = vcombine.high %v17738_v14, %v17738_v14  ;;  %v844_v12 = vld [vmem:[%s22050_s1 + $0x1948] sm:$0xff] }
 0x1b1   :  { %9986 = vmatpush1.bf16.msra.mxu0 %v14748_v21  ;;  %10438 = vmatprep.subr.bf16.mxu1 %v14503_v58  ;;  %v14797_v21 = vcombine.high %v1059_v15, %v1063_v16  ;;  %v812_v58 = vld [vmem:[%s22050_s1 + $0x1848] sm:$0xff] }
 0x1b2   :  { %9987 = vmatprep.subr.bf16.mxu0 %v14757_v23  ;;  %v816_v23 = vld [vmem:[%s22050_s1 + $0x1868] sm:$0xff]  ;;  %v17771_v24 = vrot.slane %v1762_v26, %v16335_v53 }
 0x1b3   :  { %v856_v26 = vld [vmem:[%s22050_s1 + $0x19a8] sm:$0xff] }
 0x1b4   :  { %10439 = vmatpush1.bf16.msra.mxu1 %v14502_v29  ;;  %v17762_v29 = vcombine.high %v17547_v30, %v17547_v30 }
 0x1b5   :  { %9988 = vmatpush1.bf16.msra.mxu0 %v14756_v33  ;;  %10440 = vmatprep.subr.bf16.mxu1 %v14511_v34  ;;  %v14796_v33 = vcombine.low %v1059_v15, %v1063_v16  ;;  %v14551_v34 = vcombine.high %v812_v58, %v816_v23  ;;  %v848_v15 = vld [vmem:[%s22050_s1 + $0x1968] sm:$0xff]  ;;  %v1099_v16 = vld [vmem:[%s22050_s1 + $0x2140] sm:$0xff] }
 0x1b6   :  { %9989 = vmatprep.subr.bf16.mxu0 %v14765_v35  ;;  %v14805_v35 = vcombine.high %v1067_v27, %v1071_v28 }
 0x1b8   :  { %10441 = vmatpush1.bf16.msra.mxu1 %v14510_v42  ;;  %v1079_v42 = vld [vmem:[%s22050_s1 + $0x20a0] sm:$0xff] }
 0x1b9   :  { %9990 = vmatpush1.bf16.msra.mxu0 %v14764_v44  ;;  %10442 = vmatprep.subr.bf16.mxu1 %v14519_v46  ;;  %v14550_v44 = vcombine.low %v812_v58, %v816_v23  ;;  %v14804_v46 = vcombine.low %v1067_v27, %v1071_v28  ;;  %v14813_v50 = vcombine.high %v1075_v41, %v1079_v42  ;;  %v852_v23 = vld [vmem:[%s22050_s1 + $0x1988] sm:$0xff]  ;;  %v1107_v27 = vld [vmem:[%s22050_s1 + $0x2180] sm:$0xff] }
 0x1ba   :  { %9991 = vmatprep.subr.bf16.mxu0 %v14773_v47  ;;  %v14559_v47 = vcombine.high %v820_v36, %v824_v37  ;;  %v1111_v28 = vld [vmem:[%s22050_s1 + $0x21a0] sm:$0xff] }
 0x1bc   :  { %10443 = vmatpush1.bf16.msra.mxu1 %v14518_v57  ;;  %v1087_v57 = vld [vmem:[%s22050_s1 + $0x20e0] sm:$0xff] }
 0x1bd   :  { %9992 = vmatpush1.bf16.msra.mxu0 %v14772_v60  ;;  %10444 = vmatprep.subr.bf16.mxu1 %v14527_v61  ;;  %v14558_v60 = vcombine.low %v820_v36, %v824_v37  ;;  %v14812_v61 = vcombine.low %v1075_v41, %v1079_v42  ;;  %v14821_v0 = vcombine.high %v1083_v56, %v1087_v57  ;;  %v860_v36 = vld [vmem:[%s22050_s1 + $0x19c8] sm:$0xff]  ;;  %v1115_v41 = vld [vmem:[%s22050_s1 + $0x21c0] sm:$0xff] }
 0x1be   :  { %9993 = vmatprep.subr.bf16.mxu0 %v14781_v5  ;;  %v14567_v5 = vcombine.high %v828_v51, %v832_v55  ;;  %v864_v37 = vld [vmem:[%s22050_s1 + $0x19e8] sm:$0xff]  ;;  %v1119_v42 = vld [vmem:[%s22050_s1 + $0x21e0] sm:$0xff] }
 0x1c0   :  { %10445 = vmatpush1.bf16.msra.mxu1 %v14526_v6  ;;  %v1095_v6 = vld [vmem:[%s22050_s1 + $0x2120] sm:$0xff] }
 0x1c1   :  { %9994 = vmatpush1.bf16.msra.mxu0 %v14780_v7  ;;  %10446 = vmatprep.subr.bf16.mxu1 %v14535_v8  ;;  %v14566_v7 = vcombine.low %v828_v51, %v832_v55  ;;  %v14820_v8 = vcombine.low %v1083_v56, %v1087_v57  ;;  %v14829_v11 = vcombine.high %v1091_v3, %v1095_v6  ;;  %v868_v51 = vld [vmem:[%s22050_s1 + $0x1a08] sm:$0xff]  ;;  %v1123_v56 = vld [vmem:[%s22050_s1 + $0x2200] sm:$0xff] }
 0x1c2   :  { %9995 = vmatprep.subr.bf16.mxu0 %v14789_v10  ;;  %v14575_v10 = vcombine.high %v836_v1, %v840_v2  ;;  %v872_v55 = vld [vmem:[%s22050_s1 + $0x1a28] sm:$0xff]  ;;  %v1127_v57 = vld [vmem:[%s22050_s1 + $0x2220] sm:$0xff] }
 0x1c4   :  { %10447 = vmatpush1.bf16.msra.mxu1 %v14534_v59  ;;  %v1103_v59 = vld [vmem:[%s22050_s1 + $0x2160] sm:$0xff] }
 0x1c5   :  { %9996 = vmatpush1.bf16.msra.mxu0 %v14788_v19  ;;  %10457 = vmatprep.subr.bf16.mxu1 %v14543_v20  ;;  %v14574_v19 = vcombine.low %v836_v1, %v840_v2  ;;  %v14828_v20 = vcombine.low %v1091_v3, %v1095_v6  ;;  %v14837_v58 = vcombine.high %v1099_v16, %v1103_v59  ;;  %v876_v1 = vld [vmem:[%s22050_s1 + $0x1a48] sm:$0xff]  ;;  %v1131_v3 = vld [vmem:[%s22050_s1 + $0x2240] sm:$0xff] }
 0x1c6   :  { %10006 = vmatprep.subr.bf16.mxu0 %v14797_v21  ;;  %v14583_v21 = vcombine.high %v844_v12, %v848_v15  ;;  %v880_v2 = vld [vmem:[%s22050_s1 + $0x1a68] sm:$0xff]  ;;  %v1135_v6 = vld [vmem:[%s22050_s1 + $0x2260] sm:$0xff] }
 0x1c7   :  { %10449 = vmatmul.mubr.bf16.vlgmr.msra.gmra.mrb[4].mxu1 %v17344_v39 }
 0x1c8   :  { %9998 = vmatmul.mubr.bf16.vlgmr.msra.gmra.mrb[0].mxu0 %v17762_v29  ;;  %10458 = vmatpush1.bf16.msra.mxu1 %v14542_v63  ;;  %v14582_v63 = vcombine.low %v844_v12, %v848_v15  ;;  %v884_v12 = vld [vmem:[%s22050_s1 + $0x1a88] sm:$0xff] }
 0x1c9   :  { %10007 = vmatpush1.bf16.msra.mxu0 %v14796_v33  ;;  %10459 = vmatprep.subr.bf16.mxu1 %v14551_v34  ;;  %v14836_v33 = vcombine.low %v1099_v16, %v1103_v59  ;;  %v14591_v34 = vcombine.high %v852_v23, %v856_v26  ;;  %v888_v15 = vld [vmem:[%s22050_s1 + $0x1aa8] sm:$0xff]  ;;  %v1139_v16 = vld [vmem:[%s22050_s1 + $0x2280] sm:$0xff] }
 0x1ca   :  { %10008 = vmatprep.subr.bf16.mxu0 %v14805_v35  ;;  %10038 = vmatprep.mubr.bf16.mxu0 %v17771_v24  ;;  %v14845_v35 = vcombine.high %v1107_v27, %v1111_v28  ;;  %v1143_v59 = vld [vmem:[%s22050_s1 + $0x22a0] sm:$0xff] }
 0x1cb   :  { %10489 = vmatprep.mubr.bf16.mxu1 %v17353_v48 }
 0x1cc   :  { %10460 = vmatpush1.bf16.msra.mxu1 %v14550_v44  ;;  %v14590_v44 = vcombine.low %v852_v23, %v856_v26  ;;  %v892_v23 = vld [vmem:[%s22050_s1 + $0x1ac8] sm:$0xff] }
 0x1cd   :  { %10009 = vmatpush1.bf16.msra.mxu0 %v14804_v46  ;;  %10461 = vmatprep.subr.bf16.mxu1 %v14559_v47  ;;  %v14844_v46 = vcombine.low %v1107_v27, %v1111_v28  ;;  %v14599_v47 = vcombine.high %v860_v36, %v864_v37  ;;  %v896_v26 = vld [vmem:[%s22050_s1 + $0x1ae8] sm:$0xff]  ;;  %v1147_v27 = vld [vmem:[%s22050_s1 + $0x22c0] sm:$0xff] }
 0x1ce   :  { %10010 = vmatprep.subr.bf16.mxu0 %v14813_v50  ;;  %v14853_v50 = vcombine.high %v1115_v41, %v1119_v42  ;;  %v1151_v28 = vld [vmem:[%s22050_s1 + $0x22e0] sm:$0xff] }
 0x1d0   :  { %10462 = vmatpush1.bf16.msra.mxu1 %v14558_v60  ;;  %v14598_v60 = vcombine.low %v860_v36, %v864_v37  ;;  %v900_v36 = vld [vmem:[%s22050_s1 + $0x1b08] sm:$0xff] }
 0x1d1   :  { %10011 = vmatpush1.bf16.msra.mxu0 %v14812_v61  ;;  %10463 = vmatprep.subr.bf16.mxu1 %v14567_v5  ;;  %v14852_v61 = vcombine.low %v1115_v41, %v1119_v42  ;;  %v14607_v5 = vcombine.high %v868_v51, %v872_v55  ;;  %v904_v37 = vld [vmem:[%s22050_s1 + $0x1b28] sm:$0xff]  ;;  %v1155_v41 = vld [vmem:[%s22050_s1 + $0x2300] sm:$0xff] }
 0x1d2   :  { %10012 = vmatprep.subr.bf16.mxu0 %v14821_v0  ;;  %v14861_v0 = vcombine.high %v1123_v56, %v1127_v57  ;;  %v1159_v42 = vld [vmem:[%s22050_s1 + $0x2320] sm:$0xff] }
 0x1d4   :  { %10464 = vmatpush1.bf16.msra.mxu1 %v14566_v7  ;;  %v14606_v7 = vcombine.low %v868_v51, %v872_v55  ;;  %v908_v51 = vld [vmem:[%s22050_s1 + $0x1b48] sm:$0xff] }
 0x1d5   :  { %10013 = vmatpush1.bf16.msra.mxu0 %v14820_v8  ;;  %10465 = vmatprep.subr.bf16.mxu1 %v14575_v10  ;;  %v14860_v8 = vcombine.low %v1123_v56, %v1127_v57  ;;  %v14615_v10 = vcombine.high %v876_v1, %v880_v2  ;;  %v912_v55 = vld [vmem:[%s22050_s1 + $0x1b68] sm:$0xff]  ;;  %v1163_v56 = vld [vmem:[%s22050_s1 + $0x2340] sm:$0xff] }
 0x1d6   :  { %10014 = vmatprep.subr.bf16.mxu0 %v14829_v11  ;;  %v14869_v11 = vcombine.high %v1131_v3, %v1135_v6  ;;  %v1167_v57 = vld [vmem:[%s22050_s1 + $0x2360] sm:$0xff] }
 0x1d8   :  { %10466 = vmatpush1.bf16.msra.mxu1 %v14574_v19  ;;  %v14614_v19 = vcombine.low %v876_v1, %v880_v2  ;;  %v916_v1 = vld [vmem:[%s22050_s1 + $0x1b88] sm:$0xff] }
 0x1d9   :  { %10015 = vmatpush1.bf16.msra.mxu0 %v14828_v20  ;;  %10467 = vmatprep.subr.bf16.mxu1 %v14583_v21  ;;  %v14868_v20 = vcombine.low %v1131_v3, %v1135_v6  ;;  %v14623_v21 = vcombine.high %v884_v12, %v888_v15  ;;  %v920_v2 = vld [vmem:[%s22050_s1 + $0x1ba8] sm:$0xff]  ;;  %v1171_v3 = vld [vmem:[%s22050_s1 + $0x2380] sm:$0xff] }
 0x1da   :  { %10016 = vmatprep.subr.bf16.mxu0 %v14837_v58  ;;  %v14877_v58 = vcombine.high %v1139_v16, %v1143_v59  ;;  %v1175_v6 = vld [vmem:[%s22050_s1 + $0x23a0] sm:$0xff] }
 0x1dc   :  { %10468 = vmatpush1.bf16.msra.mxu1 %v14582_v63  ;;  %v14622_v63 = vcombine.low %v884_v12, %v888_v15  ;;  %v924_v12 = vld [vmem:[%s22050_s1 + $0x1bc8] sm:$0xff] }
 0x1dd   :  { %10017 = vmatpush1.bf16.msra.mxu0 %v14836_v33  ;;  %10469 = vmatprep.subr.bf16.mxu1 %v14591_v34  ;;  %v14876_v33 = vcombine.low %v1139_v16, %v1143_v59  ;;  %v14631_v34 = vcombine.high %v892_v23, %v896_v26  ;;  %v928_v15 = vld [vmem:[%s22050_s1 + $0x1be8] sm:$0xff]  ;;  %v1179_v16 = vld [vmem:[%s22050_s1 + $0x23c0] sm:$0xff] }
 0x1de   :  { %10018 = vmatprep.subr.bf16.mxu0 %v14845_v35  ;;  %v14885_v35 = vcombine.high %v1147_v27, %v1151_v28  ;;  %v1183_v59 = vld [vmem:[%s22050_s1 + $0x23e0] sm:$0xff] }
 0x1e0   :  { %10470 = vmatpush1.bf16.msra.mxu1 %v14590_v44  ;;  %v14630_v44 = vcombine.low %v892_v23, %v896_v26  ;;  %v932_v23 = vld [vmem:[%s22050_s1 + $0x1c08] sm:$0xff] }
 0x1e1   :  { %10019 = vmatpush1.bf16.msra.mxu0 %v14844_v46  ;;  %10471 = vmatprep.subr.bf16.mxu1 %v14599_v47  ;;  %v14884_v46 = vcombine.low %v1147_v27, %v1151_v28  ;;  %v14639_v47 = vcombine.high %v900_v36, %v904_v37  ;;  %v936_v26 = vld [vmem:[%s22050_s1 + $0x1c28] sm:$0xff]  ;;  %v1187_v27 = vld [vmem:[%s22050_s1 + $0x2400] sm:$0xff] }
 0x1e2   :  { %10020 = vmatprep.subr.bf16.mxu0 %v14853_v50  ;;  %v14893_v50 = vcombine.high %v1155_v41, %v1159_v42  ;;  %v1191_v28 = vld [vmem:[%s22050_s1 + $0x2420] sm:$0xff] }
 0x1e4   :  { %10472 = vmatpush1.bf16.msra.mxu1 %v14598_v60  ;;  %v14638_v60 = vcombine.low %v900_v36, %v904_v37  ;;  %v940_v36 = vld [vmem:[%s22050_s1 + $0x1c48] sm:$0xff] }
 0x1e5   :  { %10021 = vmatpush1.bf16.msra.mxu0 %v14852_v61  ;;  %10473 = vmatprep.subr.bf16.mxu1 %v14607_v5  ;;  %v14892_v61 = vcombine.low %v1155_v41, %v1159_v42  ;;  %v14647_v5 = vcombine.high %v908_v51, %v912_v55  ;;  %v944_v37 = vld [vmem:[%s22050_s1 + $0x1c68] sm:$0xff]  ;;  %v1195_v41 = vld [vmem:[%s22050_s1 + $0x2440] sm:$0xff] }
 0x1e6   :  { %10022 = vmatprep.subr.bf16.mxu0 %v14861_v0  ;;  %v14901_v0 = vcombine.high %v1163_v56, %v1167_v57  ;;  %v1199_v42 = vld [vmem:[%s22050_s1 + $0x2460] sm:$0xff] }
 0x1e8   :  { %10474 = vmatpush1.bf16.msra.mxu1 %v14606_v7  ;;  %v14646_v7 = vcombine.low %v908_v51, %v912_v55  ;;  %v14933_v51 = vcombine.high %v1195_v41, %v1199_v42  ;;  %v948_v55 = vld [vmem:[%s22050_s1 + $0x1c88] sm:$0xff] }
 0x1e9   :  { %10023 = vmatpush1.bf16.msra.mxu0 %v14860_v8  ;;  %10475 = vmatprep.subr.bf16.mxu1 %v14615_v10  ;;  %v14900_v8 = vcombine.low %v1163_v56, %v1167_v57  ;;  %v14655_v10 = vcombine.high %v916_v1, %v920_v2  ;;  %v952_v56 = vld [vmem:[%s22050_s1 + $0x1ca8] sm:$0xff]  ;;  %v17975_v57 = vcombine.high %v17771_v24, %v17771_v24 }
 0x1ea   :  { %10024 = vmatprep.subr.bf16.mxu0 %v14869_v11  ;;  %v14909_v11 = vcombine.high %v1171_v3, %v1175_v6 }
 0x1ec   :  { %10476 = vmatpush1.bf16.msra.mxu1 %v14614_v19  ;;  %v14654_v19 = vcombine.low %v916_v1, %v920_v2  ;;  %v956_v2 = vld [vmem:[%s22050_s1 + $0x1cc8] sm:$0xff] }
 0x1ed   :  { %10025 = vmatpush1.bf16.msra.mxu0 %v14868_v20  ;;  %10477 = vmatprep.subr.bf16.mxu1 %v14623_v21  ;;  %v14908_v20 = vcombine.low %v1171_v3, %v1175_v6  ;;  %v14663_v21 = vcombine.high %v924_v12, %v928_v15  ;;  %v960_v3 = vld [vmem:[%s22050_s1 + $0x1ce8] sm:$0xff]  ;;  %v1211_v6 = vld [vmem:[%s22050_s1 + $0x24c0] sm:$0xff] }
 0x1ee   :  { %10026 = vmatprep.subr.bf16.mxu0 %v14877_v58  ;;  %v14917_v58 = vcombine.high %v1179_v16, %v1183_v59 }
 0x1f0   :  { %10478 = vmatpush1.bf16.msra.mxu1 %v14622_v63  ;;  %v14662_v63 = vcombine.low %v924_v12, %v928_v15  ;;  %v964_v15 = vld [vmem:[%s22050_s1 + $0x1d08] sm:$0xff] }
 0x1f1   :  { %10027 = vmatpush1.bf16.msra.mxu0 %v14876_v33  ;;  %10479 = vmatprep.subr.bf16.mxu1 %v14631_v34  ;;  %v14916_v33 = vcombine.low %v1179_v16, %v1183_v59  ;;  %v14671_v34 = vcombine.high %v932_v23, %v936_v26  ;;  %v968_v16 = vld [vmem:[%s22050_s1 + $0x1d28] sm:$0xff]  ;;  %v1219_v59 = vld [vmem:[%s22050_s1 + $0x2500] sm:$0xff] }
 0x1f2   :  { %10028 = vmatprep.subr.bf16.mxu0 %v14885_v35  ;;  %v14925_v35 = vcombine.high %v1187_v27, %v1191_v28 }
 0x1f4   :  { %10480 = vmatpush1.bf16.msra.mxu1 %v14630_v44  ;;  %v14670_v44 = vcombine.low %v932_v23, %v936_v26  ;;  %v972_v26 = vld [vmem:[%s22050_s1 + $0x1d48] sm:$0xff] }
 0x1f5   :  { %10029 = vmatpush1.bf16.msra.mxu0 %v14884_v46  ;;  %10481 = vmatprep.subr.bf16.mxu1 %v14639_v47  ;;  %v17965_v46 = vrot.slane %v17738_v14, %v16335_v53  ;;  %v14924_v47 = vcombine.low %v1187_v27, %v1191_v28  ;;  %v1203_v14 = vld [vmem:[%s22050_s1 + $0x2480] sm:$0xff]  ;;  %v976_v27 = vld [vmem:[%s22050_s1 + $0x1d68] sm:$0xff] }
 0x1f6   :  { %10030 = vmatprep.subr.bf16.mxu0 %v14893_v50  ;;  %v14679_v50 = vcombine.high %v940_v36, %v944_v37  ;;  %v1227_v28 = vld [vmem:[%s22050_s1 + $0x2540] sm:$0xff] }
 0x1f8   :  { %10482 = vmatpush1.bf16.msra.mxu1 %v14638_v60  ;;  %v1207_v60 = vld [vmem:[%s22050_s1 + $0x24a0] sm:$0xff] }
 0x1f9   :  { %10031 = vmatpush1.bf16.msra.mxu0 %v14892_v61  ;;  %10483 = vmatprep.subr.bf16.mxu1 %v14647_v5  ;;  %v14678_v61 = vcombine.low %v940_v36, %v944_v37  ;;  %v14932_v5 = vcombine.low %v1195_v41, %v1199_v42  ;;  %v14941_v1 = vcombine.high %v1203_v14, %v1207_v60  ;;  %v980_v37 = vld [vmem:[%s22050_s1 + $0x1d88] sm:$0xff]  ;;  %v1235_v42 = vld [vmem:[%s22050_s1 + $0x2580] sm:$0xff] }
 0x1fa   :  { %10032 = vmatprep.subr.bf16.mxu0 %v14901_v0  ;;  %v14687_v0 = vcombine.high %v948_v55, %v952_v56  ;;  %v984_v41 = vld [vmem:[%s22050_s1 + $0x1da8] sm:$0xff] }
 0x1fc   :  { %10484 = vmatpush1.bf16.msra.mxu1 %v14646_v7  ;;  %v1215_v7 = vld [vmem:[%s22050_s1 + $0x24e0] sm:$0xff] }
 0x1fd   :  { %10033 = vmatpush1.bf16.msra.mxu0 %v14900_v8  ;;  %10485 = vmatprep.subr.bf16.mxu1 %v14655_v10  ;;  %v14686_v8 = vcombine.low %v948_v55, %v952_v56  ;;  %v14940_v10 = vcombine.low %v1203_v14, %v1207_v60  ;;  %v14949_v12 = vcombine.high %v1211_v6, %v1215_v7  ;;  %v988_v56 = vld [vmem:[%s22050_s1 + $0x1dc8] sm:$0xff]  ;;  %v1243_v60 = vld [vmem:[%s22050_s1 + $0x25c0] sm:$0xff] }
 0x1fe   :  { %10034 = vmatprep.subr.bf16.mxu0 %v14909_v11  ;;  %v14695_v11 = vcombine.high %v956_v2, %v960_v3  ;;  %v992_v14 = vld [vmem:[%s22050_s1 + $0x1de8] sm:$0xff] }
 0x200   :  { %10486 = vmatpush1.bf16.msra.mxu1 %v14654_v19  ;;  %v1223_v19 = vld [vmem:[%s22050_s1 + $0x2520] sm:$0xff] }
 0x201   :  { %10035 = vmatpush1.bf16.msra.mxu0 %v14908_v20  ;;  %10487 = vmatprep.subr.bf16.mxu1 %v14663_v21  ;;  %v14694_v20 = vcombine.low %v956_v2, %v960_v3  ;;  %v14948_v21 = vcombine.low %v1211_v6, %v1215_v7  ;;  %v14957_v23 = vcombine.high %v1219_v59, %v1223_v19  ;;  %v996_v3 = vld [vmem:[%s22050_s1 + $0x1e08] sm:$0xff]  ;;  %v1251_v7 = vld [vmem:[%s22050_s1 + $0x2600] sm:$0xff] }
 0x202   :  { %10036 = vmatprep.subr.bf16.mxu0 %v14917_v58  ;;  %v14703_v58 = vcombine.high %v964_v15, %v968_v16  ;;  %v1000_v6 = vld [vmem:[%s22050_s1 + $0x1e28] sm:$0xff] }
 0x204   :  { %10488 = vmatpush1.bf16.msra.mxu1 %v14662_v63  ;;  %v1231_v63 = vld [vmem:[%s22050_s1 + $0x2560] sm:$0xff] }
 0x205   :  { %10037 = vmatpush1.bf16.msra.mxu0 %v14916_v33  ;;  %10498 = vmatprep.subr.bf16.mxu1 %v14671_v34  ;;  %v14702_v33 = vcombine.low %v964_v15, %v968_v16  ;;  %v14956_v34 = vcombine.low %v1219_v59, %v1223_v19  ;;  %v14965_v36 = vcombine.high %v1227_v28, %v1231_v63  ;;  %v1004_v16 = vld [vmem:[%s22050_s1 + $0x1e48] sm:$0xff]  ;;  %v1259_v19 = vld [vmem:[%s22050_s1 + $0x2640] sm:$0xff] }
 0x206   :  { %10047 = vmatprep.subr.bf16.mxu0 %v14925_v35  ;;  %v14711_v35 = vcombine.high %v972_v26, %v976_v27  ;;  %v1008_v59 = vld [vmem:[%s22050_s1 + $0x1e68] sm:$0xff] }
 0x207   :  { %10490 = vmatmul.mubr.bf16.vlgmr.msra.gmra.mrb[4].mxu1 %v17547_v30 }
 0x208   :  { %10039 = vmatmul.mubr.bf16.vlgmr.msra.gmra.mrb[0].mxu0 %v17965_v46  ;;  %10499 = vmatpush1.bf16.msra.mxu1 %v14670_v44  ;;  %v1239_v44 = vld [vmem:[%s22050_s1 + $0x25a0] sm:$0xff] }
 0x209   :  { %10048 = vmatpush1.bf16.msra.mxu0 %v14924_v47  ;;  %10500 = vmatprep.subr.bf16.mxu1 %v14679_v50  ;;  %v14710_v47 = vcombine.low %v972_v26, %v976_v27  ;;  %v14964_v50 = vcombine.low %v1227_v28, %v1231_v63  ;;  %v14973_v55 = vcombine.high %v1235_v42, %v1239_v44  ;;  %v1012_v27 = vld [vmem:[%s22050_s1 + $0x1e88] sm:$0xff]  ;;  %v1267_v63 = vld [vmem:[%s22050_s1 + $0x2680] sm:$0xff] }
 0x20a   :  { %10049 = vmatprep.subr.bf16.mxu0 %v14933_v51  ;;  %10079 = vmatprep.mubr.bf16.mxu0 %v17975_v57  ;;  %v14719_v51 = vcombine.high %v980_v37, %v984_v41  ;;  %v1016_v28 = vld [vmem:[%s22050_s1 + $0x1ea8] sm:$0xff] }
 0x20b   :  { %10530 = vmatprep.mubr.bf16.mxu1 %v17557_v38 }
 0x20c   :  { %10501 = vmatpush1.bf16.msra.mxu1 %v14678_v61  ;;  %v1247_v61 = vld [vmem:[%s22050_s1 + $0x25e0] sm:$0xff] }
 0x20d   :  { %10050 = vmatpush1.bf16.msra.mxu0 %v14932_v5  ;;  %10502 = vmatprep.subr.bf16.mxu1 %v14687_v0  ;;  %v14718_v5 = vcombine.low %v980_v37, %v984_v41  ;;  %v14972_v0 = vcombine.low %v1235_v42, %v1239_v44  ;;  %v14981_v2 = vcombine.high %v1243_v60, %v1247_v61  ;;  %v1020_v41 = vld [vmem:[%s22050_s1 + $0x1ec8] sm:$0xff]  ;;  %v1275_v44 = vld [vmem:[%s22050_s1 + $0x26c0] sm:$0xff] }
 0x20e   :  { %10051 = vmatprep.subr.bf16.mxu0 %v14941_v1  ;;  %v14727_v1 = vcombine.high %v988_v56, %v992_v14  ;;  %v1024_v42 = vld [vmem:[%s22050_s1 + $0x1ee8] sm:$0xff] }
 0x210   :  { %10503 = vmatpush1.bf16.msra.mxu1 %v14686_v8  ;;  %v1255_v8 = vld [vmem:[%s22050_s1 + $0x2620] sm:$0xff] }
 0x211   :  { %10052 = vmatpush1.bf16.msra.mxu0 %v14940_v10  ;;  %10504 = vmatprep.subr.bf16.mxu1 %v14695_v11  ;;  %v14726_v10 = vcombine.low %v988_v56, %v992_v14  ;;  %v14980_v11 = vcombine.low %v1243_v60, %v1247_v61  ;;  %v14989_v15 = vcombine.high %v1251_v7, %v1255_v8  ;;  %v1028_v14 = vld [vmem:[%s22050_s1 + $0x1f08] sm:$0xff]  ;;  %v1283_v61 = vld [vmem:[%s22050_s1 + $0x2700] sm:$0xff] }
 0x212   :  { %10053 = vmatprep.subr.bf16.mxu0 %v14949_v12  ;;  %v14735_v12 = vcombine.high %v996_v3, %v1000_v6  ;;  %v1032_v60 = vld [vmem:[%s22050_s1 + $0x1f28] sm:$0xff] }
 0x214   :  { %10505 = vmatpush1.bf16.msra.mxu1 %v14694_v20  ;;  %v1263_v20 = vld [vmem:[%s22050_s1 + $0x2660] sm:$0xff] }
 0x215   :  { %10054 = vmatpush1.bf16.msra.mxu0 %v14948_v21  ;;  %10506 = vmatprep.subr.bf16.mxu1 %v14703_v58  ;;  %v14734_v21 = vcombine.low %v996_v3, %v1000_v6  ;;  %v14988_v58 = vcombine.low %v1251_v7, %v1255_v8  ;;  %v14997_v26 = vcombine.high %v1259_v19, %v1263_v20  ;;  %v1036_v6 = vld [vmem:[%s22050_s1 + $0x1f48] sm:$0xff]  ;;  %v1291_v8 = vld [vmem:[%s22050_s1 + $0x2740] sm:$0xff] }
 0x216   :  { %10055 = vmatprep.subr.bf16.mxu0 %v14957_v23  ;;  %v14743_v23 = vcombine.high %v1004_v16, %v1008_v59  ;;  %v1040_v7 = vld [vmem:[%s22050_s1 + $0x1f68] sm:$0xff] }
 0x218   :  { %10507 = vmatpush1.bf16.msra.mxu1 %v14702_v33  ;;  %v1271_v33 = vld [vmem:[%s22050_s1 + $0x26a0] sm:$0xff] }
 0x219   :  { %10056 = vmatpush1.bf16.msra.mxu0 %v14956_v34  ;;  %10508 = vmatprep.subr.bf16.mxu1 %v14711_v35  ;;  %v14742_v34 = vcombine.low %v1004_v16, %v1008_v59  ;;  %v14996_v35 = vcombine.low %v1259_v19, %v1263_v20  ;;  %v15005_v37 = vcombine.high %v1267_v63, %v1271_v33  ;;  %v1044_v59 = vld [vmem:[%s22050_s1 + $0x1f88] sm:$0xff]  ;;  %v1299_v20 = vld [vmem:[%s22050_s1 + $0x2780] sm:$0xff] }
 0x21a   :  { %10057 = vmatprep.subr.bf16.mxu0 %v14965_v36  ;;  %v14751_v36 = vcombine.high %v1012_v27, %v1016_v28  ;;  %v1048_v19 = vld [vmem:[%s22050_s1 + $0x1fa8] sm:$0xff] }
 0x21c   :  { %10509 = vmatpush1.bf16.msra.mxu1 %v14710_v47  ;;  %v1279_v47 = vld [vmem:[%s22050_s1 + $0x26e0] sm:$0xff] }
 0x21d   :  { %10058 = vmatpush1.bf16.msra.mxu0 %v14964_v50  ;;  %10510 = vmatprep.subr.bf16.mxu1 %v14719_v51  ;;  %v14750_v50 = vcombine.low %v1012_v27, %v1016_v28  ;;  %v15004_v51 = vcombine.low %v1267_v63, %v1271_v33  ;;  %v15013_v56 = vcombine.high %v1275_v44, %v1279_v47  ;;  %v1052_v28 = vld [vmem:[%s22050_s1 + $0x1fc8] sm:$0xff] }
 0x21e   :  { %10059 = vmatprep.subr.bf16.mxu0 %v14973_v55  ;;  %v14759_v55 = vcombine.high %v1020_v41, %v1024_v42  ;;  %v1056_v63 = vld [vmem:[%s22050_s1 + $0x1fe8] sm:$0xff]  ;;  %v1747_v33 = vcombine.high %v17728_v4, %v17728_v4 }
 0x21f   :  { %v1060_v4 = vld [vmem:[%s22050_s1 + $0x2008] sm:$0xff] }
 0x220   :  { %10511 = vmatpush1.bf16.msra.mxu1 %v14718_v5  ;;  %v1287_v5 = vld [vmem:[%s22050_s1 + $0x2720] sm:$0xff] }
 0x221   :  { %10060 = vmatpush1.bf16.msra.mxu0 %v14972_v0  ;;  %10512 = vmatprep.subr.bf16.mxu1 %v14727_v1  ;;  %v14758_v0 = vcombine.low %v1020_v41, %v1024_v42  ;;  %v15012_v1 = vcombine.low %v1275_v44, %v1279_v47  ;;  %v15021_v3 = vcombine.high %v1283_v61, %v1287_v5  ;;  %v1064_v44 = vld [vmem:[%s22050_s1 + $0x2028] sm:$0xff] }
 0x222   :  { %10061 = vmatprep.subr.bf16.mxu0 %v14981_v2  ;;  %v14767_v2 = vcombine.high %v1028_v14, %v1032_v60  ;;  %v14791_v41 = vcombine.high %v1052_v28, %v1056_v63  ;;  %v18152_v47 = vrot.slane %v1747_v33, %v16335_v53 }
 0x224   :  { %10513 = vmatpush1.bf16.msra.mxu1 %v14726_v10  ;;  %v1295_v10 = vld [vmem:[%s22050_s1 + $0x2760] sm:$0xff] }
 0x225   :  { %10062 = vmatpush1.bf16.msra.mxu0 %v14980_v11  ;;  %10514 = vmatprep.subr.bf16.mxu1 %v14735_v12  ;;  %v14766_v11 = vcombine.low %v1028_v14, %v1032_v60  ;;  %v15020_v12 = vcombine.low %v1283_v61, %v1287_v5  ;;  %v15029_v16 = vcombine.high %v1291_v8, %v1295_v10  ;;  %v1068_v61 = vld [vmem:[%s22050_s1 + $0x2048] sm:$0xff] }
 0x226   :  { %10063 = vmatprep.subr.bf16.mxu0 %v14989_v15  ;;  %v14775_v15 = vcombine.high %v1036_v6, %v1040_v7  ;;  %v14799_v14 = vcombine.high %v1060_v4, %v1064_v44  ;;  %v1072_v5 = vld [vmem:[%s22050_s1 + $0x2068] sm:$0xff] }
 0x228   :  { %10515 = vmatpush1.bf16.msra.mxu1 %v14734_v21  ;;  %v1303_v21 = vld [vmem:[%s22050_s1 + $0x27a0] sm:$0xff] }
 0x229   :  { %10064 = vmatpush1.bf16.msra.mxu0 %v14988_v58  ;;  %10516 = vmatprep.subr.bf16.mxu1 %v14743_v23  ;;  %v14774_v58 = vcombine.low %v1036_v6, %v1040_v7  ;;  %v15028_v23 = vcombine.low %v1291_v8, %v1295_v10  ;;  %v15037_v27 = vcombine.high %v1299_v20, %v1303_v21 }
 0x22a   :  { %10065 = vmatprep.subr.bf16.mxu0 %v14997_v26  ;;  %v14783_v26 = vcombine.high %v1044_v59, %v1048_v19  ;;  %v18176_v6 = vcombine.high %v17965_v46, %v17965_v46  ;;  %v14807_v8 = vcombine.high %v1068_v61, %v1072_v5 }
 0x22c   :  { %10517 = vmatpush1.bf16.msra.mxu1 %v14742_v34  ;;  %v1307_v34 = vld [vmem:[%s22050_s1 + $0x27c0] sm:$0xff] }
 0x22d   :  { %10066 = vmatpush1.bf16.msra.mxu0 %v14996_v35  ;;  %10518 = vmatprep.subr.bf16.mxu1 %v14751_v36  ;;  %v1311_v35 = vld [vmem:[%s22050_s1 + $0x27e0] sm:$0xff]  ;;  %v14782_v36 = vcombine.low %v1044_v59, %v1048_v19  ;;  %v14806_v19 = vcombine.low %v1068_v61, %v1072_v5 }
 0x22e   :  { %10067 = vmatprep.subr.bf16.mxu0 %v15005_v37  ;;  %v15036_v37 = vcombine.low %v1299_v20, %v1303_v21  ;;  %v15045_v42 = vcombine.high %v1307_v34, %v1311_v35  ;;  %v1335_v59 = vld [vmem:[%s22050_s1 + $0x28a0] sm:$0xff] }
 0x230   :  { %10519 = vmatpush1.bf16.msra.mxu1 %v14750_v50  ;;  %v1315_v50 = vld [vmem:[%s22050_s1 + $0x2800] sm:$0xff] }
 0x231   :  { %10068 = vmatpush1.bf16.msra.mxu0 %v15004_v51  ;;  %10520 = vmatprep.subr.bf16.mxu1 %v14759_v55  ;;  %v1319_v51 = vld [vmem:[%s22050_s1 + $0x2820] sm:$0xff]  ;;  %v14790_v55 = vcombine.low %v1052_v28, %v1056_v63 }
 0x232   :  { %10069 = vmatprep.subr.bf16.mxu0 %v15013_v56  ;;  %v15044_v56 = vcombine.low %v1307_v34, %v1311_v35  ;;  %v15053_v60 = vcombine.high %v1315_v50, %v1319_v51  ;;  %v15052_v7 = vcombine.low %v1315_v50, %v1319_v51  ;;  %v1343_v28 = vld [vmem:[%s22050_s1 + $0x28e0] sm:$0xff] }
 0x234   :  { %10521 = vmatpush1.bf16.msra.mxu1 %v14758_v0  ;;  %v1763_v0 = vcombine.high %v18152_v47, %v18152_v47 }
 0x235   :  { %10070 = vmatpush1.bf16.msra.mxu0 %v15012_v1  ;;  %10522 = vmatprep.subr.bf16.mxu1 %v14767_v2  ;;  %v1323_v1 = vld [vmem:[%s22050_s1 + $0x2840] sm:$0xff] }
 0x236   :  { %10071 = vmatprep.subr.bf16.mxu0 %v15021_v3  ;;  %v1327_v2 = vld [vmem:[%s22050_s1 + $0x2860] sm:$0xff]  ;;  %v14798_v3 = vcombine.low %v1060_v4, %v1064_v44 }
 0x237   :  { %v15061_v10 = vcombine.high %v1323_v1, %v1327_v2  ;;  %v15060_v20 = vcombine.low %v1323_v1, %v1327_v2  ;;  %v1108_v2 = vld [vmem:[%s22050_s1 + $0x2188] sm:$0xff] }
 0x238   :  { %10523 = vmatpush1.bf16.msra.mxu1 %v14766_v11  ;;  %v1076_v11 = vld [vmem:[%s22050_s1 + $0x2088] sm:$0xff] }
 0x239   :  { %10072 = vmatpush1.bf16.msra.mxu0 %v15020_v12  ;;  %10524 = vmatprep.subr.bf16.mxu1 %v14775_v15  ;;  %v1080_v12 = vld [vmem:[%s22050_s1 + $0x20a8] sm:$0xff]  ;;  %v18185_v15 = vrot.slane %v1763_v0, %v16335_v53 }
 0x23a   :  { %10073 = vmatprep.subr.bf16.mxu0 %v15029_v16  ;;  %v1331_v16 = vld [vmem:[%s22050_s1 + $0x2880] sm:$0xff]  ;;  %v14815_v21 = vcombine.high %v1076_v11, %v1080_v12  ;;  %v14814_v63 = vcombine.low %v1076_v11, %v1080_v12 }
 0x23b   :  { %v15068_v33 = vcombine.low %v1331_v16, %v1335_v59 }
 0x23c   :  { %10525 = vmatpush1.bf16.msra.mxu1 %v14774_v58  ;;  %v15069_v58 = vcombine.high %v1331_v16, %v1335_v59  ;;  %v1116_v59 = vld [vmem:[%s22050_s1 + $0x21c8] sm:$0xff] }
 0x23d   :  { %10074 = vmatpush1.bf16.msra.mxu0 %v15028_v23  ;;  %10526 = vmatprep.subr.bf16.mxu1 %v14783_v26  ;;  %v1084_v23 = vld [vmem:[%s22050_s1 + $0x20c8] sm:$0xff] }
 0x23e   :  { %10075 = vmatprep.subr.bf16.mxu0 %v15037_v27  ;;  %v1088_v26 = vld [vmem:[%s22050_s1 + $0x20e8] sm:$0xff]  ;;  %v1339_v27 = vld [vmem:[%s22050_s1 + $0x28c0] sm:$0xff] }
 0x23f   :  { %v14823_v34 = vcombine.high %v1084_v23, %v1088_v26  ;;  %v15077_v35 = vcombine.high %v1339_v27, %v1343_v28  ;;  %v14822_v4 = vcombine.low %v1084_v23, %v1088_v26  ;;  %v15076_v44 = vcombine.low %v1339_v27, %v1343_v28  ;;  %v1124_v28 = vld [vmem:[%s22050_s1 + $0x2208] sm:$0xff] }
 0x240   :  { %10527 = vmatpush1.bf16.msra.mxu1 %v14782_v36  ;;  %v1092_v36 = vld [vmem:[%s22050_s1 + $0x2108] sm:$0xff] }
 0x241   :  { %10076 = vmatpush1.bf16.msra.mxu0 %v15036_v37  ;;  %10528 = vmatprep.subr.bf16.mxu1 %v14791_v41  ;;  %v1096_v37 = vld [vmem:[%s22050_s1 + $0x2128] sm:$0xff]  ;;  %v1347_v41 = vld [vmem:[%s22050_s1 + $0x2900] sm:$0xff] }
 0x242   :  { %10077 = vmatprep.subr.bf16.mxu0 %v15045_v42  ;;  %v1351_v42 = vld [vmem:[%s22050_s1 + $0x2920] sm:$0xff]  ;;  %v14831_v50 = vcombine.high %v1092_v36, %v1096_v37  ;;  %v14830_v61 = vcombine.low %v1092_v36, %v1096_v37 }
 0x243   :  { %v15085_v51 = vcombine.high %v1347_v41, %v1351_v42  ;;  %v15084_v5 = vcombine.low %v1347_v41, %v1351_v42  ;;  %v1132_v42 = vld [vmem:[%s22050_s1 + $0x2248] sm:$0xff] }
 0x244   :  { %10529 = vmatpush1.bf16.msra.mxu1 %v14790_v55  ;;  %v1100_v55 = vld [vmem:[%s22050_s1 + $0x2148] sm:$0xff] }
 0x245   :  { %10078 = vmatpush1.bf16.msra.mxu0 %v15044_v56  ;;  %10539 = vmatprep.subr.bf16.mxu1 %v14799_v14  ;;  %v1104_v56 = vld [vmem:[%s22050_s1 + $0x2168] sm:$0xff]  ;;  %v1355_v14 = vld [vmem:[%s22050_s1 + $0x2940] sm:$0xff] }
 0x246   :  { %10088 = vmatprep.subr.bf16.mxu0 %v15053_v60  ;;  %v1359_v60 = vld [vmem:[%s22050_s1 + $0x2960] sm:$0xff]  ;;  %v14839_v0 = vcombine.high %v1100_v55, %v1104_v56 }
 0x247   :  { %10531 = vmatmul.mubr.bf16.vlgmr.msra.gmra.mrb[4].mxu1 %v17762_v29  ;;  %v15093_v1 = vcombine.high %v1355_v14, %v1359_v60  ;;  %v15092_v11 = vcombine.low %v1355_v14, %v1359_v60  ;;  %v1140_v60 = vld [vmem:[%s22050_s1 + $0x2288] sm:$0xff] }
 0x248   :  { %10080 = vmatmul.mubr.bf16.vlgmr.msra.gmra.mrb[0].mxu0 %v18176_v6  ;;  %10540 = vmatpush1.bf16.msra.mxu1 %v14798_v3  ;;  %v1112_v3 = vld [vmem:[%s22050_s1 + $0x21a8] sm:$0xff] }
 0x249   :  { %10089 = vmatpush1.bf16.msra.mxu0 %v15052_v7  ;;  %10541 = vmatprep.subr.bf16.mxu1 %v14807_v8  ;;  %v1363_v7 = vld [vmem:[%s22050_s1 + $0x2980] sm:$0xff]  ;;  %v14847_v12 = vcombine.high %v1108_v2, %v1112_v3 }
 0x24a   :  { %10090 = vmatprep.subr.bf16.mxu0 %v15061_v10  ;;  %10120 = vmatprep.mubr.bf16.mxu0 %v18185_v15  ;;  %v1367_v8 = vld [vmem:[%s22050_s1 + $0x29a0] sm:$0xff]  ;;  %v14838_v10 = vcombine.low %v1100_v55, %v1104_v56 }
 0x24b   :  { %10571 = vmatprep.mubr.bf16.mxu1 %v17771_v24  ;;  %v15101_v16 = vcombine.high %v1363_v7, %v1367_v8  ;;  %v15100_v23 = vcombine.low %v1363_v7, %v1367_v8  ;;  %v1148_v8 = vld [vmem:[%s22050_s1 + $0x22c8] sm:$0xff] }
 0x24c   :  { %10542 = vmatpush1.bf16.msra.mxu1 %v14806_v19  ;;  %v1120_v19 = vld [vmem:[%s22050_s1 + $0x21e8] sm:$0xff] }
 0x24d   :  { %10091 = vmatpush1.bf16.msra.mxu0 %v15060_v20  ;;  %10543 = vmatprep.subr.bf16.mxu1 %v14815_v21  ;;  %v1371_v20 = vld [vmem:[%s22050_s1 + $0x29c0] sm:$0xff]  ;;  %v14855_v26 = vcombine.high %v1116_v59, %v1120_v19 }
 0x24e   :  { %10092 = vmatprep.subr.bf16.mxu0 %v15069_v58  ;;  %v1375_v21 = vld [vmem:[%s22050_s1 + $0x29e0] sm:$0xff]  ;;  %v14846_v58 = vcombine.low %v1108_v2, %v1112_v3 }
 0x24f   :  { %v15109_v27 = vcombine.high %v1371_v20, %v1375_v21  ;;  %v15108_v36 = vcombine.low %v1371_v20, %v1375_v21  ;;  %v1156_v21 = vld [vmem:[%s22050_s1 + $0x2308] sm:$0xff] }
 0x250   :  { %10544 = vmatpush1.bf16.msra.mxu1 %v14814_v63  ;;  %v1128_v63 = vld [vmem:[%s22050_s1 + $0x2228] sm:$0xff] }
 0x251   :  { %10093 = vmatpush1.bf16.msra.mxu0 %v15068_v33  ;;  %10545 = vmatprep.subr.bf16.mxu1 %v14823_v34  ;;  %v1379_v33 = vld [vmem:[%s22050_s1 + $0x2a00] sm:$0xff]  ;;  %v14863_v37 = vcombine.high %v1124_v28, %v1128_v63 }
 0x252   :  { %10094 = vmatprep.subr.bf16.mxu0 %v15077_v35  ;;  %v1383_v34 = vld [vmem:[%s22050_s1 + $0x2a20] sm:$0xff]  ;;  %v14854_v35 = vcombine.low %v1116_v59, %v1120_v19 }
 0x253   :  { %v15117_v41 = vcombine.high %v1379_v33, %v1383_v34  ;;  %v15116_v55 = vcombine.low %v1379_v33, %v1383_v34  ;;  %v1164_v34 = vld [vmem:[%s22050_s1 + $0x2348] sm:$0xff] }
 0x254   :  { %10546 = vmatpush1.bf16.msra.mxu1 %v14822_v4  ;;  %v1136_v4 = vld [vmem:[%s22050_s1 + $0x2268] sm:$0xff] }
 0x255   :  { %10095 = vmatpush1.bf16.msra.mxu0 %v15076_v44  ;;  %10547 = vmatprep.subr.bf16.mxu1 %v14831_v50  ;;  %v1387_v44 = vld [vmem:[%s22050_s1 + $0x2a40] sm:$0xff]  ;;  %v14871_v56 = vcombine.high %v1132_v42, %v1136_v4 }
 0x256   :  { %10096 = vmatprep.subr.bf16.mxu0 %v15085_v51  ;;  %v1391_v50 = vld [vmem:[%s22050_s1 + $0x2a60] sm:$0xff]  ;;  %v14862_v51 = vcombine.low %v1124_v28, %v1128_v63 }
 0x257   :  { %v15125_v14 = vcombine.high %v1387_v44, %v1391_v50  ;;  %v15124_v2 = vcombine.low %v1387_v44, %v1391_v50  ;;  %v1172_v50 = vld [vmem:[%s22050_s1 + $0x2388] sm:$0xff] }
 0x258   :  { %10548 = vmatpush1.bf16.msra.mxu1 %v14830_v61  ;;  %v1144_v61 = vld [vmem:[%s22050_s1 + $0x22a8] sm:$0xff] }
 0x259   :  { %10097 = vmatpush1.bf16.msra.mxu0 %v15084_v5  ;;  %10549 = vmatprep.subr.bf16.mxu1 %v14839_v0  ;;  %v1395_v5 = vld [vmem:[%s22050_s1 + $0x2a80] sm:$0xff]  ;;  %v14879_v3 = vcombine.high %v1140_v60, %v1144_v61 }
 0x25a   :  { %10098 = vmatprep.subr.bf16.mxu0 %v15093_v1  ;;  %v1399_v0 = vld [vmem:[%s22050_s1 + $0x2aa0] sm:$0xff]  ;;  %v14870_v1 = vcombine.low %v1132_v42, %v1136_v4 }
 0x25b   :  { %v15133_v7 = vcombine.high %v1395_v5, %v1399_v0  ;;  %v15132_v59 = vcombine.low %v1395_v5, %v1399_v0  ;;  %v1180_v0 = vld [vmem:[%s22050_s1 + $0x23c8] sm:$0xff] }
 0x25c   :  { %10550 = vmatpush1.bf16.msra.mxu1 %v14838_v10  ;;  %v1152_v10 = vld [vmem:[%s22050_s1 + $0x22e8] sm:$0xff] }
 0x25d   :  { %10099 = vmatpush1.bf16.msra.mxu0 %v15092_v11  ;;  %10551 = vmatprep.subr.bf16.mxu1 %v14847_v12  ;;  %v1403_v11 = vld [vmem:[%s22050_s1 + $0x2ac0] sm:$0xff]  ;;  %v14887_v19 = vcombine.high %v1148_v8, %v1152_v10 }
 0x25e   :  { %10100 = vmatprep.subr.bf16.mxu0 %v15101_v16  ;;  %v1407_v12 = vld [vmem:[%s22050_s1 + $0x2ae0] sm:$0xff]  ;;  %v14878_v16 = vcombine.low %v1140_v60, %v1144_v61 }
 0x25f   :  { %v15141_v20 = vcombine.high %v1403_v11, %v1407_v12  ;;  %v15140_v28 = vcombine.low %v1403_v11, %v1407_v12  ;;  %v1188_v12 = vld [vmem:[%s22050_s1 + $0x2408] sm:$0xff] }
 0x260   :  { %10552 = vmatpush1.bf16.msra.mxu1 %v14846_v58  ;;  %v1160_v58 = vld [vmem:[%s22050_s1 + $0x2328] sm:$0xff] }
 0x261   :  { %10101 = vmatpush1.bf16.msra.mxu0 %v15100_v23  ;;  %10553 = vmatprep.subr.bf16.mxu1 %v14855_v26  ;;  %v1411_v23 = vld [vmem:[%s22050_s1 + $0x2b00] sm:$0xff]  ;;  %v14895_v63 = vcombine.high %v1156_v21, %v1160_v58 }
 0x262   :  { %10102 = vmatprep.subr.bf16.mxu0 %v15109_v27  ;;  %v1415_v26 = vld [vmem:[%s22050_s1 + $0x2b20] sm:$0xff]  ;;  %v14886_v27 = vcombine.low %v1148_v8, %v1152_v10 }
 0x263   :  { %v15149_v33 = vcombine.high %v1411_v23, %v1415_v26  ;;  %v15148_v42 = vcombine.low %v1411_v23, %v1415_v26  ;;  %v1196_v26 = vld [vmem:[%s22050_s1 + $0x2448] sm:$0xff] }
 0x264   :  { %10554 = vmatpush1.bf16.msra.mxu1 %v14854_v35  ;;  %v1168_v35 = vld [vmem:[%s22050_s1 + $0x2368] sm:$0xff] }
 0x265   :  { %10103 = vmatpush1.bf16.msra.mxu0 %v15108_v36  ;;  %10555 = vmatprep.subr.bf16.mxu1 %v14863_v37  ;;  %v1419_v36 = vld [vmem:[%s22050_s1 + $0x2b40] sm:$0xff]  ;;  %v14903_v4 = vcombine.high %v1164_v34, %v1168_v35 }
 0x266   :  { %10104 = vmatprep.subr.bf16.mxu0 %v15117_v41  ;;  %v1423_v37 = vld [vmem:[%s22050_s1 + $0x2b60] sm:$0xff]  ;;  %v14894_v41 = vcombine.low %v1156_v21, %v1160_v58 }
 0x267   :  { %v15157_v44 = vcombine.high %v1419_v36, %v1423_v37  ;;  %v15156_v60 = vcombine.low %v1419_v36, %v1423_v37 }
 0x268   :  { %10556 = vmatpush1.bf16.msra.mxu1 %v14862_v51  ;;  %v1176_v51 = vld [vmem:[%s22050_s1 + $0x23a8] sm:$0xff] }
 0x269   :  { %10105 = vmatpush1.bf16.msra.mxu0 %v15116_v55  ;;  %10557 = vmatprep.subr.bf16.mxu1 %v14871_v56  ;;  %v1427_v55 = vld [vmem:[%s22050_s1 + $0x2b80] sm:$0xff]  ;;  %v14911_v61 = vcombine.high %v1172_v50, %v1176_v51 }
 0x26a   :  { %10106 = vmatprep.subr.bf16.mxu0 %v15125_v14  ;;  %v1431_v56 = vld [vmem:[%s22050_s1 + $0x2ba0] sm:$0xff]  ;;  %v14902_v14 = vcombine.low %v1164_v34, %v1168_v35  ;;  %v18379_v34 = vrot.slane %v18152_v47, %v16335_v53 }
 0x26b   :  { %v15165_v5 = vcombine.high %v1427_v55, %v1431_v56  ;;  %v15164_v8 = vcombine.low %v1427_v55, %v1431_v56  ;;  %v1459_v47 = vld [vmem:[%s22050_s1 + $0x2c80] sm:$0xff] }
 0x26c   :  { %10558 = vmatpush1.bf16.msra.mxu1 %v14870_v1  ;;  %v1184_v1 = vld [vmem:[%s22050_s1 + $0x23e8] sm:$0xff] }
 0x26d   :  { %10107 = vmatpush1.bf16.msra.mxu0 %v15124_v2  ;;  %10559 = vmatprep.subr.bf16.mxu1 %v14879_v3  ;;  %v1435_v2 = vld [vmem:[%s22050_s1 + $0x2bc0] sm:$0xff]  ;;  %v14919_v10 = vcombine.high %v1180_v0, %v1184_v1 }
 0x26e   :  { %10108 = vmatprep.subr.bf16.mxu0 %v15133_v7  ;;  %v1439_v3 = vld [vmem:[%s22050_s1 + $0x2be0] sm:$0xff]  ;;  %v14910_v7 = vcombine.low %v1172_v50, %v1176_v51 }
 0x26f   :  { %v15173_v11 = vcombine.high %v1435_v2, %v1439_v3  ;;  %v15172_v21 = vcombine.low %v1435_v2, %v1439_v3 }
 0x270   :  { %10560 = vmatpush1.bf16.msra.mxu1 %v14878_v16  ;;  %v1192_v16 = vld [vmem:[%s22050_s1 + $0x2428] sm:$0xff] }
 0x271   :  { %10109 = vmatpush1.bf16.msra.mxu0 %v15132_v59  ;;  %10561 = vmatprep.subr.bf16.mxu1 %v14887_v19  ;;  %v1443_v59 = vld [vmem:[%s22050_s1 + $0x2c00] sm:$0xff]  ;;  %v14927_v58 = vcombine.high %v1188_v12, %v1192_v16 }
 0x272   :  { %10110 = vmatprep.subr.bf16.mxu0 %v15141_v20  ;;  %v1447_v19 = vld [vmem:[%s22050_s1 + $0x2c20] sm:$0xff]  ;;  %v14918_v20 = vcombine.low %v1180_v0, %v1184_v1 }
 0x273   :  { %v15181_v23 = vcombine.high %v1443_v59, %v1447_v19  ;;  %v15180_v35 = vcombine.low %v1443_v59, %v1447_v19 }
 0x274   :  { %10562 = vmatpush1.bf16.msra.mxu1 %v14886_v27  ;;  %v1200_v27 = vld [vmem:[%s22050_s1 + $0x2468] sm:$0xff] }
 0x275   :  { %10111 = vmatpush1.bf16.msra.mxu0 %v15140_v28  ;;  %10563 = vmatprep.subr.bf16.mxu1 %v14895_v63  ;;  %v1451_v28 = vld [vmem:[%s22050_s1 + $0x2c40] sm:$0xff]  ;;  %v14935_v36 = vcombine.high %v1196_v26, %v1200_v27  ;;  %v14934_v50 = vcombine.low %v1196_v26, %v1200_v27 }
 0x276   :  { %10112 = vmatprep.subr.bf16.mxu0 %v15149_v33  ;;  %v1455_v63 = vld [vmem:[%s22050_s1 + $0x2c60] sm:$0xff]  ;;  %v14926_v33 = vcombine.low %v1188_v12, %v1192_v16 }
 0x277   :  { %v15189_v37 = vcombine.high %v1451_v28, %v1455_v63  ;;  %v15188_v51 = vcombine.low %v1451_v28, %v1455_v63 }
 0x278   :  { %10564 = vmatpush1.bf16.msra.mxu1 %v14894_v41  ;;  %v1204_v41 = vld [vmem:[%s22050_s1 + $0x2488] sm:$0xff] }
 0x279   :  { %10113 = vmatpush1.bf16.msra.mxu0 %v15148_v42  ;;  %10565 = vmatprep.subr.bf16.mxu1 %v14903_v4  ;;  %v1208_v42 = vld [vmem:[%s22050_s1 + $0x24a8] sm:$0xff]  ;;  %v18389_v4 = vcombine.high %v18185_v15, %v18185_v15 }
 0x27a   :  { %10114 = vmatprep.subr.bf16.mxu0 %v15157_v44  ;;  %v1463_v44 = vld [vmem:[%s22050_s1 + $0x2ca0] sm:$0xff]  ;;  %v14943_v55 = vcombine.high %v1204_v41, %v1208_v42  ;;  %v14942_v0 = vcombine.low %v1204_v41, %v1208_v42 }
 0x27b   :  { %v15197_v56 = vcombine.high %v1459_v47, %v1463_v44  ;;  %v15196_v1 = vcombine.low %v1459_v47, %v1463_v44 }
 0x27c   :  { %10566 = vmatpush1.bf16.msra.mxu1 %v14902_v14  ;;  %v1212_v14 = vld [vmem:[%s22050_s1 + $0x24c8] sm:$0xff] }
 0x27d   :  { %10115 = vmatpush1.bf16.msra.mxu0 %v15156_v60  ;;  %10567 = vmatprep.subr.bf16.mxu1 %v14911_v61  ;;  %v1216_v60 = vld [vmem:[%s22050_s1 + $0x24e8] sm:$0xff]  ;;  %v1467_v61 = vld [vmem:[%s22050_s1 + $0x2cc0] sm:$0xff] }
 0x27e   :  { %10116 = vmatprep.subr.bf16.mxu0 %v15165_v5  ;;  %v1471_v5 = vld [vmem:[%s22050_s1 + $0x2ce0] sm:$0xff]  ;;  %v14951_v2 = vcombine.high %v1212_v14, %v1216_v60  ;;  %v14950_v12 = vcombine.low %v1212_v14, %v1216_v60 }
 0x27f   :  { %v15205_v3 = vcombine.high %v1467_v61, %v1471_v5  ;;  %v15204_v16 = vcombine.low %v1467_v61, %v1471_v5 }
 0x280   :  { %10568 = vmatpush1.bf16.msra.mxu1 %v14910_v7  ;;  %v1220_v7 = vld [vmem:[%s22050_s1 + $0x2508] sm:$0xff] }
 0x281   :  { %10117 = vmatpush1.bf16.msra.mxu0 %v15164_v8  ;;  %10569 = vmatprep.subr.bf16.mxu1 %v14919_v10  ;;  %v1224_v8 = vld [vmem:[%s22050_s1 + $0x2528] sm:$0xff]  ;;  %v1475_v10 = vld [vmem:[%s22050_s1 + $0x2d00] sm:$0xff] }
 0x282   :  { %10118 = vmatprep.subr.bf16.mxu0 %v15173_v11  ;;  %v1479_v11 = vld [vmem:[%s22050_s1 + $0x2d20] sm:$0xff]  ;;  %v14959_v59 = vcombine.high %v1220_v7, %v1224_v8  ;;  %v14958_v26 = vcombine.low %v1220_v7, %v1224_v8 }
 0x283   :  { %v15213_v19 = vcombine.high %v1475_v10, %v1479_v11  ;;  %v15212_v27 = vcombine.low %v1475_v10, %v1479_v11 }
 0x284   :  { %10570 = vmatpush1.bf16.msra.mxu1 %v14918_v20  ;;  %v1228_v20 = vld [vmem:[%s22050_s1 + $0x2548] sm:$0xff] }
 0x285   :  { %10119 = vmatpush1.bf16.msra.mxu0 %v15172_v21  ;;  %10580 = vmatprep.subr.bf16.mxu1 %v14927_v58  ;;  %v1232_v21 = vld [vmem:[%s22050_s1 + $0x2568] sm:$0xff]  ;;  %v1483_v58 = vld [vmem:[%s22050_s1 + $0x2d40] sm:$0xff] }
 0x286   :  { %10129 = vmatprep.subr.bf16.mxu0 %v15181_v23  ;;  %v1487_v23 = vld [vmem:[%s22050_s1 + $0x2d60] sm:$0xff]  ;;  %v14967_v28 = vcombine.high %v1228_v20, %v1232_v21  ;;  %v14966_v41 = vcombine.low %v1228_v20, %v1232_v21 }
 0x287   :  { %10572 = vmatmul.mubr.bf16.vlgmr.msra.gmra.mrb[4].mxu1 %v17965_v46  ;;  %v15221_v63 = vcombine.high %v1483_v58, %v1487_v23  ;;  %v15220_v42 = vcombine.low %v1483_v58, %v1487_v23 }
 0x288   :  { %10121 = vmatmul.mubr.bf16.vlgmr.msra.gmra.mrb[0].mxu0 %v18379_v34  ;;  %10581 = vmatpush1.bf16.msra.mxu1 %v14926_v33  ;;  %v1236_v33 = vld [vmem:[%s22050_s1 + $0x2588] sm:$0xff] }
 0x289   :  { %10130 = vmatpush1.bf16.msra.mxu0 %v15180_v35  ;;  %10582 = vmatprep.subr.bf16.mxu1 %v14935_v36  ;;  %v1240_v35 = vld [vmem:[%s22050_s1 + $0x25a8] sm:$0xff]  ;;  %v1491_v36 = vld [vmem:[%s22050_s1 + $0x2d80] sm:$0xff] }
 0x28a   :  { %10131 = vmatprep.subr.bf16.mxu0 %v15189_v37  ;;  %10161 = vmatprep.mubr.bf16.mxu0 %v18389_v4  ;;  %v1495_v37 = vld [vmem:[%s22050_s1 + $0x2da0] sm:$0xff]  ;;  %v14975_v47 = vcombine.high %v1236_v33, %v1240_v35  ;;  %v14974_v14 = vcombine.low %v1236_v33, %v1240_v35 }
 0x28b   :  { %10612 = vmatprep.mubr.bf16.mxu1 %v17975_v57  ;;  %v15229_v44 = vcombine.high %v1491_v36, %v1495_v37  ;;  %v15228_v60 = vcombine.low %v1491_v36, %v1495_v37 }
 0x28c   :  { %10583 = vmatpush1.bf16.msra.mxu1 %v14934_v50  ;;  %v1244_v50 = vld [vmem:[%s22050_s1 + $0x25c8] sm:$0xff] }
 0x28d   :  { %10132 = vmatpush1.bf16.msra.mxu0 %v15188_v51  ;;  %10584 = vmatprep.subr.bf16.mxu1 %v14943_v55  ;;  %v1248_v51 = vld [vmem:[%s22050_s1 + $0x25e8] sm:$0xff]  ;;  %v1499_v55 = vld [vmem:[%s22050_s1 + $0x2dc0] sm:$0xff] }
 0x28e   :  { %10133 = vmatprep.subr.bf16.mxu0 %v15197_v56  ;;  %v1503_v56 = vld [vmem:[%s22050_s1 + $0x2de0] sm:$0xff]  ;;  %v14983_v61 = vcombine.high %v1244_v50, %v1248_v51  ;;  %v14982_v7 = vcombine.low %v1244_v50, %v1248_v51 }
 0x28f   :  { %v15237_v5 = vcombine.high %v1499_v55, %v1503_v56  ;;  %v15236_v8 = vcombine.low %v1499_v55, %v1503_v56 }
 0x290   :  { %10585 = vmatpush1.bf16.msra.mxu1 %v14942_v0  ;;  %v1252_v0 = vld [vmem:[%s22050_s1 + $0x2608] sm:$0xff] }
 0x291   :  { %10134 = vmatpush1.bf16.msra.mxu0 %v15196_v1  ;;  %10586 = vmatprep.subr.bf16.mxu1 %v14951_v2  ;;  %v1256_v1 = vld [vmem:[%s22050_s1 + $0x2628] sm:$0xff]  ;;  %v1507_v2 = vld [vmem:[%s22050_s1 + $0x2e00] sm:$0xff] }
 0x292   :  { %10135 = vmatprep.subr.bf16.mxu0 %v15205_v3  ;;  %v1511_v3 = vld [vmem:[%s22050_s1 + $0x2e20] sm:$0xff]  ;;  %v14991_v10 = vcombine.high %v1252_v0, %v1256_v1  ;;  %v14990_v20 = vcombine.low %v1252_v0, %v1256_v1 }
 0x293   :  { %v15245_v11 = vcombine.high %v1507_v2, %v1511_v3  ;;  %v15244_v21 = vcombine.low %v1507_v2, %v1511_v3 }
 0x294   :  { %10587 = vmatpush1.bf16.msra.mxu1 %v14950_v12  ;;  %v1260_v12 = vld [vmem:[%s22050_s1 + $0x2648] sm:$0xff] }
 0x295   :  { %10136 = vmatpush1.bf16.msra.mxu0 %v15204_v16  ;;  %10588 = vmatprep.subr.bf16.mxu1 %v14959_v59  ;;  %v1264_v16 = vld [vmem:[%s22050_s1 + $0x2668] sm:$0xff]  ;;  %v1515_v59 = vld [vmem:[%s22050_s1 + $0x2e40] sm:$0xff] }
 0x296   :  { %10137 = vmatprep.subr.bf16.mxu0 %v15213_v19  ;;  %v1519_v19 = vld [vmem:[%s22050_s1 + $0x2e60] sm:$0xff]  ;;  %v14999_v58 = vcombine.high %v1260_v12, %v1264_v16  ;;  %v14998_v33 = vcombine.low %v1260_v12, %v1264_v16 }
 0x297   :  { %v15253_v23 = vcombine.high %v1515_v59, %v1519_v19  ;;  %v15252_v35 = vcombine.low %v1515_v59, %v1519_v19 }
 0x298   :  { %10589 = vmatpush1.bf16.msra.mxu1 %v14958_v26  ;;  %v1268_v26 = vld [vmem:[%s22050_s1 + $0x2688] sm:$0xff] }
 0x299   :  { %10138 = vmatpush1.bf16.msra.mxu0 %v15212_v27  ;;  %10590 = vmatprep.subr.bf16.mxu1 %v14967_v28  ;;  %v1272_v27 = vld [vmem:[%s22050_s1 + $0x26a8] sm:$0xff]  ;;  %v1523_v28 = vld [vmem:[%s22050_s1 + $0x2e80] sm:$0xff] }
 0x29a   :  { %10139 = vmatprep.subr.bf16.mxu0 %v15221_v63  ;;  %v1527_v63 = vld [vmem:[%s22050_s1 + $0x2ea0] sm:$0xff]  ;;  %v15007_v36 = vcombine.high %v1268_v26, %v1272_v27  ;;  %v15006_v50 = vcombine.low %v1268_v26, %v1272_v27 }
 0x29b   :  { %v15261_v37 = vcombine.high %v1523_v28, %v1527_v63  ;;  %v15260_v51 = vcombine.low %v1523_v28, %v1527_v63 }
 0x29c   :  { %10591 = vmatpush1.bf16.msra.mxu1 %v14966_v41  ;;  %v1276_v41 = vld [vmem:[%s22050_s1 + $0x26c8] sm:$0xff] }
 0x29d   :  { %10140 = vmatpush1.bf16.msra.mxu0 %v15220_v42  ;;  %10592 = vmatprep.subr.bf16.mxu1 %v14975_v47  ;;  %v1280_v42 = vld [vmem:[%s22050_s1 + $0x26e8] sm:$0xff]  ;;  %v1531_v47 = vld [vmem:[%s22050_s1 + $0x2ec0] sm:$0xff] }
 0x29e   :  { %10141 = vmatprep.subr.bf16.mxu0 %v15229_v44  ;;  %v1535_v44 = vld [vmem:[%s22050_s1 + $0x2ee0] sm:$0xff]  ;;  %v15015_v55 = vcombine.high %v1276_v41, %v1280_v42  ;;  %v15014_v0 = vcombine.low %v1276_v41, %v1280_v42 }
 0x29f   :  { %v15269_v56 = vcombine.high %v1531_v47, %v1535_v44  ;;  %v15268_v1 = vcombine.low %v1531_v47, %v1535_v44 }
 0x2a0   :  { %10593 = vmatpush1.bf16.msra.mxu1 %v14974_v14  ;;  %v1284_v14 = vld [vmem:[%s22050_s1 + $0x2708] sm:$0xff] }
 0x2a1   :  { %10142 = vmatpush1.bf16.msra.mxu0 %v15228_v60  ;;  %10594 = vmatprep.subr.bf16.mxu1 %v14983_v61  ;;  %v1288_v60 = vld [vmem:[%s22050_s1 + $0x2728] sm:$0xff]  ;;  %v1539_v61 = vld [vmem:[%s22050_s1 + $0x2f00] sm:$0xff] }
 0x2a2   :  { %10143 = vmatprep.subr.bf16.mxu0 %v15237_v5  ;;  %v1543_v5 = vld [vmem:[%s22050_s1 + $0x2f20] sm:$0xff]  ;;  %v15023_v2 = vcombine.high %v1284_v14, %v1288_v60  ;;  %v15022_v12 = vcombine.low %v1284_v14, %v1288_v60 }
 0x2a3   :  { %v15277_v3 = vcombine.high %v1539_v61, %v1543_v5  ;;  %v15276_v16 = vcombine.low %v1539_v61, %v1543_v5 }
 0x2a4   :  { %10595 = vmatpush1.bf16.msra.mxu1 %v14982_v7  ;;  %v1292_v7 = vld [vmem:[%s22050_s1 + $0x2748] sm:$0xff] }
 0x2a5   :  { %10144 = vmatpush1.bf16.msra.mxu0 %v15236_v8  ;;  %10596 = vmatprep.subr.bf16.mxu1 %v14991_v10  ;;  %v1296_v8 = vld [vmem:[%s22050_s1 + $0x2768] sm:$0xff]  ;;  %v1547_v10 = vld [vmem:[%s22050_s1 + $0x2f40] sm:$0xff] }
 0x2a6   :  { %10145 = vmatprep.subr.bf16.mxu0 %v15245_v11  ;;  %v1551_v11 = vld [vmem:[%s22050_s1 + $0x2f60] sm:$0xff]  ;;  %v15031_v59 = vcombine.high %v1292_v7, %v1296_v8  ;;  %v15030_v26 = vcombine.low %v1292_v7, %v1296_v8  ;;  %v18583_v8 = vcombine.high %v18379_v34, %v18379_v34 }
 0x2a7   :  { %v15285_v19 = vcombine.high %v1547_v10, %v1551_v11  ;;  %v15284_v27 = vcombine.low %v1547_v10, %v1551_v11 }
 0x2a8   :  { %10597 = vmatpush1.bf16.msra.mxu1 %v14990_v20  ;;  %v1300_v20 = vld [vmem:[%s22050_s1 + $0x2788] sm:$0xff] }
 0x2a9   :  { %10146 = vmatpush1.bf16.msra.mxu0 %v15244_v21  ;;  %10598 = vmatprep.subr.bf16.mxu1 %v14999_v58  ;;  %v1304_v21 = vld [vmem:[%s22050_s1 + $0x27a8] sm:$0xff]  ;;  %v1555_v58 = vld [vmem:[%s22050_s1 + $0x2f80] sm:$0xff] }
 0x2aa   :  { %10147 = vmatprep.subr.bf16.mxu0 %v15253_v23  ;;  %v1559_v23 = vld [vmem:[%s22050_s1 + $0x2fa0] sm:$0xff]  ;;  %v15039_v28 = vcombine.high %v1300_v20, %v1304_v21  ;;  %v15038_v41 = vcombine.low %v1300_v20, %v1304_v21 }
 0x2ab   :  { %v15293_v63 = vcombine.high %v1555_v58, %v1559_v23  ;;  %v15292_v42 = vcombine.low %v1555_v58, %v1559_v23  ;;  %v1591_v20 = vld [vmem:[%s22050_s1 + $0x30a0] sm:$0xff] }
 0x2ac   :  { %10599 = vmatpush1.bf16.msra.mxu1 %v14998_v33  ;;  %v1308_v33 = vld [vmem:[%s22050_s1 + $0x27c8] sm:$0xff] }
 0x2ad   :  { %10148 = vmatpush1.bf16.msra.mxu0 %v15252_v35  ;;  %10600 = vmatprep.subr.bf16.mxu1 %v15007_v36  ;;  %v1312_v35 = vld [vmem:[%s22050_s1 + $0x27e8] sm:$0xff]  ;;  %v1563_v36 = vld [vmem:[%s22050_s1 + $0x2fc0] sm:$0xff] }
 0x2ae   :  { %10149 = vmatprep.subr.bf16.mxu0 %v15261_v37  ;;  %v1567_v37 = vld [vmem:[%s22050_s1 + $0x2fe0] sm:$0xff]  ;;  %v15047_v47 = vcombine.high %v1308_v33, %v1312_v35  ;;  %v15046_v14 = vcombine.low %v1308_v33, %v1312_v35 }
 0x2af   :  { %v15301_v44 = vcombine.high %v1563_v36, %v1567_v37  ;;  %v15300_v60 = vcombine.low %v1563_v36, %v1567_v37  ;;  %v1595_v33 = vld [vmem:[%s22050_s1 + $0x30c0] sm:$0xff] }
 0x2b0   :  { %10601 = vmatpush1.bf16.msra.mxu1 %v15006_v50  ;;  %v1316_v50 = vld [vmem:[%s22050_s1 + $0x2808] sm:$0xff]  ;;  %v1599_v35 = vld [vmem:[%s22050_s1 + $0x30e0] sm:$0xff] }
 0x2b1   :  { %10150 = vmatpush1.bf16.msra.mxu0 %v15260_v51  ;;  %10602 = vmatprep.subr.bf16.mxu1 %v15015_v55  ;;  %v1320_v51 = vld [vmem:[%s22050_s1 + $0x2828] sm:$0xff]  ;;  %v1571_v55 = vld [vmem:[%s22050_s1 + $0x3000] sm:$0xff] }
 0x2b2   :  { %10151 = vmatprep.subr.bf16.mxu0 %v15269_v56  ;;  %v1575_v56 = vld [vmem:[%s22050_s1 + $0x3020] sm:$0xff]  ;;  %v15055_v61 = vcombine.high %v1316_v50, %v1320_v51  ;;  %v15054_v7 = vcombine.low %v1316_v50, %v1320_v51  ;;  %v37_v50 = vld [vmem:[%s22050_s1 + $0x10] sm:$0xff] }
 0x2b3   :  { %v15309_v5 = vcombine.high %v1571_v55, %v1575_v56  ;;  %v15308_v10 = vcombine.low %v1571_v55, %v1575_v56  ;;  %v41_v51 = vld [vmem:[%s22050_s1 + $0x30] sm:$0xff]  ;;  %v15332_v56 = vcombine.low %v1595_v33, %v1599_v35 }
 0x2b4   :  { %10603 = vmatpush1.bf16.msra.mxu1 %v15014_v0  ;;  %v1324_v0 = vld [vmem:[%s22050_s1 + $0x2848] sm:$0xff] }
 0x2b5   :  { %10152 = vmatpush1.bf16.msra.mxu0 %v15268_v1  ;;  %10604 = vmatprep.subr.bf16.mxu1 %v15023_v2  ;;  %v1328_v1 = vld [vmem:[%s22050_s1 + $0x2868] sm:$0xff]  ;;  %v1579_v2 = vld [vmem:[%s22050_s1 + $0x3040] sm:$0xff] }
 0x2b6   :  { %10153 = vmatprep.subr.bf16.mxu0 %v15277_v3  ;;  %v1583_v3 = vld [vmem:[%s22050_s1 + $0x3060] sm:$0xff]  ;;  %v15063_v11 = vcombine.high %v1324_v0, %v1328_v1  ;;  %v15062_v21 = vcombine.low %v1324_v0, %v1328_v1  ;;  %v1360_v0 = vld [vmem:[%s22050_s1 + $0x2968] sm:$0xff]  ;;  %v45_v1 = vld [vmem:[%s22050_s1 + $0x50] sm:$0xff] }
 0x2b7   :  { %v15316_v58 = vcombine.low %v1579_v2, %v1583_v3 }
 0x2b8   :  { %10605 = vmatpush1.bf16.msra.mxu1 %v15022_v12  ;;  %v15317_v12 = vcombine.high %v1579_v2, %v1583_v3  ;;  %v49_v2 = vld [vmem:[%s22050_s1 + $0x70] sm:$0xff] }
 0x2b9   :  { %10154 = vmatpush1.bf16.msra.mxu0 %v15276_v16  ;;  %10606 = vmatprep.subr.bf16.mxu1 %v15031_v59  ;;  %v1332_v16 = vld [vmem:[%s22050_s1 + $0x2888] sm:$0xff] }
 0x2ba   :  { %10155 = vmatprep.subr.bf16.mxu0 %v15285_v19  ;;  %v1336_v59 = vld [vmem:[%s22050_s1 + $0x28a8] sm:$0xff]  ;;  %v1587_v19 = vld [vmem:[%s22050_s1 + $0x3080] sm:$0xff] }
 0x2bb   :  { %v15071_v23 = vcombine.high %v1332_v16, %v1336_v59  ;;  %v15070_v36 = vcombine.low %v1332_v16, %v1336_v59  ;;  %v15324_v37 = vcombine.low %v1587_v19, %v1591_v20  ;;  %v1364_v16 = vld [vmem:[%s22050_s1 + $0x2988] sm:$0xff] }
 0x2bc   :  { %10607 = vmatpush1.bf16.msra.mxu1 %v15030_v26  ;;  %v15325_v26 = vcombine.high %v1587_v19, %v1591_v20  ;;  %v1368_v59 = vld [vmem:[%s22050_s1 + $0x29a8] sm:$0xff]  ;;  %v57_v19 = vld [vmem:[%s22050_s1 + $0xb0] sm:$0xff] }
 0x2bd   :  { %10156 = vmatpush1.bf16.msra.mxu0 %v15284_v27  ;;  %10608 = vmatprep.subr.bf16.mxu1 %v15039_v28  ;;  %v1340_v27 = vld [vmem:[%s22050_s1 + $0x28c8] sm:$0xff] }
 0x2be   :  { %10157 = vmatprep.subr.bf16.mxu0 %v15293_v63  ;;  %v1344_v28 = vld [vmem:[%s22050_s1 + $0x28e8] sm:$0xff]  ;;  %v16206_v63 = vmov 0  }
 0x2bf   :  { %v15078_v55 = vcombine.low %v1340_v27, %v1344_v28 }
 0x2c0   :  { %10609 = vmatpush1.bf16.msra.mxu1 %v15038_v41  ;;  %v15079_v41 = vcombine.high %v1340_v27, %v1344_v28  ;;  %v1376_v27 = vld [vmem:[%s22050_s1 + $0x29e8] sm:$0xff]  ;;  %v61_v28 = vld [vmem:[%s22050_s1 + $0xd0] sm:$0xff] }
 0x2c1   :  { %10158 = vmatpush1.bf16.msra.mxu0 %v15292_v42  ;;  %10610 = vmatprep.subr.bf16.mxu1 %v15047_v47  ;;  %v15333_v42 = vcombine.high %v1595_v33, %v1599_v35  ;;  %v1348_v47 = vld [vmem:[%s22050_s1 + $0x2908] sm:$0xff]  ;;  %v65_v33 = vld [vmem:[%s22050_s1 + $0xf0] sm:$0xff]  ;;  %v15102_v35 = vcombine.low %v1364_v16, %v1368_v59 }
 0x2c2   :  { %10159 = vmatprep.subr.bf16.mxu0 %v15301_v44  ;;  %v1352_v44 = vld [vmem:[%s22050_s1 + $0x2928] sm:$0xff] }
 0x2c4   :  { %10611 = vmatpush1.bf16.msra.mxu1 %v15046_v14  ;;  %v13771_v14 = vld.sshfl [vmem:[%s22049_s0 + $0x18] sm:$0x1 pattern:$0x75316420] }
 0x2c5   :  { %10160 = vmatpush1.bf16.msra.mxu0 %v15300_v60  ;;  %10621 = vmatprep.subr.bf16.mxu1 %v15055_v61  ;;  %v15087_v60 = vcombine.high %v1348_v47, %v1352_v44  ;;  %v13777_v61 = vcombine.high %v37_v50, %v41_v51  ;;  %v18641_v3 = vrot.slane %v13771_v14, %v16335_v53  ;;  %v53_v53 = vld [vmem:[%s22050_s1 + $0x90] sm:$0xff] }
 0x2c6   :  { %10170 = vmatprep.subr.bf16.mxu0 %v15309_v5  ;;  %v1356_v5 = vld [vmem:[%s22050_s1 + $0x2948] sm:$0xff] }
 0x2c7   :  { %10613 = vmatmul.mubr.bf16.vlgmr.msra.gmra.mrb[4].mxu1 %v18176_v6  ;;  %v15094_v20 = vcombine.low %v1356_v5, %v1360_v0 }
 0x2c8   :  { %10162 = vmatmul.mubr.bf16.vlgmr.msra.gmra.mrb[0].mxu0 %v18583_v8  ;;  %10622 = vmatpush1.bf16.msra.mxu1 %v15054_v7  ;;  %v15086_v7 = vcombine.low %v1348_v47, %v1352_v44  ;;  %v1384_v47 = vld [vmem:[%s22050_s1 + $0x2a28] sm:$0xff]  ;;  %v69_v44 = vld [vmem:[%s22050_s1 + $0x110] sm:$0xff] }
 0x2c9   :  { %10171 = vmatpush1.bf16.msra.mxu0 %v15308_v10  ;;  %10623 = vmatprep.subr.bf16.mxu1 %v15063_v11  ;;  %v13776_v10 = vcombine.low %v37_v50, %v41_v51  ;;  %v15095_v11 = vcombine.high %v1356_v5, %v1360_v0  ;;  %v73_v50 = vld [vmem:[%s22050_s1 + $0x130] sm:$0xff] }
 0x2ca   :  { %10172 = vmatprep.subr.bf16.mxu0 %v15317_v12  ;;  %10202 = vmatprep.mubr.bf16.mxu0 %v16206_v63  ;;  %v13785_v12 = vcombine.high %v45_v1, %v49_v2  ;;  %v13809_v14 = vcombine.high %v69_v44, %v73_v50  ;;  %v77_v5 = vld [vmem:[%s22050_s1 + $0x150] sm:$0xff] }
 0x2cb   :  { %10653 = vmatprep.mubr.bf16.mxu1 %v18185_v15  ;;  %v81_v0 = vld [vmem:[%s22050_s1 + $0x170] sm:$0xff] }
 0x2cc   :  { %10624 = vmatpush1.bf16.msra.mxu1 %v15062_v21  ;;  %v13784_v21 = vcombine.low %v45_v1, %v49_v2  ;;  %v13808_v2 = vcombine.low %v69_v44, %v73_v50 }
 0x2cd   :  { %10173 = vmatpush1.bf16.msra.mxu0 %v15316_v58  ;;  %10625 = vmatprep.subr.bf16.mxu1 %v15071_v23  ;;  %v15103_v58 = vcombine.high %v1364_v16, %v1368_v59  ;;  %v13793_v23 = vcombine.high %v53_v53, %v57_v19  ;;  %v85_v16 = vld [vmem:[%s22050_s1 + $0x190] sm:$0xff] }
 0x2ce   :  { %10174 = vmatprep.subr.bf16.mxu0 %v15325_v26  ;;  %v1372_v26 = vld [vmem:[%s22050_s1 + $0x29c8] sm:$0xff]  ;;  %v89_v59 = vld [vmem:[%s22050_s1 + $0x1b0] sm:$0xff] }
 0x2cf   :  { %v15110_v51 = vcombine.low %v1372_v26, %v1376_v27 }
 0x2d0   :  { %10626 = vmatpush1.bf16.msra.mxu1 %v15070_v36  ;;  %v13792_v36 = vcombine.low %v53_v53, %v57_v19  ;;  %v13816_v19 = vcombine.low %v77_v5, %v81_v0 }
 0x2d1   :  { %10175 = vmatpush1.bf16.msra.mxu0 %v15324_v37  ;;  %10627 = vmatprep.subr.bf16.mxu1 %v15079_v41  ;;  %v15111_v37 = vcombine.high %v1372_v26, %v1376_v27  ;;  %v13801_v41 = vcombine.high %v61_v28, %v65_v33  ;;  %v93_v26 = vld [vmem:[%s22050_s1 + $0x1d0] sm:$0xff] }
 0x2d2   :  { %10176 = vmatprep.subr.bf16.mxu0 %v15333_v42  ;;  %v1380_v42 = vld [vmem:[%s22050_s1 + $0x2a08] sm:$0xff]  ;;  %v97_v27 = vld [vmem:[%s22050_s1 + $0x1f0] sm:$0xff] }
 0x2d3   :  { %v15118_v1 = vcombine.low %v1380_v42, %v1384_v47  ;;  %v13832_v50 = vcombine.low %v93_v26, %v97_v27 }
 0x2d4   :  { %10628 = vmatpush1.bf16.msra.mxu1 %v15078_v55  ;;  %v13800_v55 = vcombine.low %v61_v28, %v65_v33  ;;  %v13824_v33 = vcombine.low %v85_v16, %v89_v59 }
 0x2d5   :  { %10177 = vmatpush1.bf16.msra.mxu0 %v15332_v56  ;;  %10629 = vmatprep.subr.bf16.mxu1 %v15087_v60  ;;  %v15119_v56 = vcombine.high %v1380_v42, %v1384_v47  ;;  %v1388_v60 = vld [vmem:[%s22050_s1 + $0x2a48] sm:$0xff]  ;;  %v101_v42 = vld [vmem:[%s22050_s1 + $0x210] sm:$0xff] }
 0x2d6   :  { %10744 = vmatprep.subr.bf16.mxu0 %v13777_v61  ;;  %v1392_v61 = vld [vmem:[%s22050_s1 + $0x2a68] sm:$0xff]  ;;  %v105_v47 = vld [vmem:[%s22050_s1 + $0x230] sm:$0xff] }
 0x2d7   :  { %v15126_v53 = vcombine.low %v1388_v60, %v1392_v61 }
 0x2d8   :  { %15340 = vmatmul.mubr.msk.bf16.vlgmr.msra.gmra.mrb[0].mxu0 %vm9674_vm0, %v18641_v3  ;;  %10630 = vmatpush1.bf16.msra.mxu1 %v15086_v7  ;;  %v15127_v7 = vcombine.high %v1388_v60, %v1392_v61  ;;  %v109_v60 = vld [vmem:[%s22050_s1 + $0x250] sm:$0xff] }
 0x2d9   :  { %10745 = vmatpush1.bf16.msra.mxu0 %v13776_v10  ;;  %10631 = vmatprep.subr.bf16.mxu1 %v15095_v11  ;;  %v13817_v10 = vcombine.high %v77_v5, %v81_v0  ;;  %v1396_v11 = vld [vmem:[%s22050_s1 + $0x2a88] sm:$0xff]  ;;  %v113_v61 = vld [vmem:[%s22050_s1 + $0x270] sm:$0xff]  ;;  %v13840_v0 = vcombine.low %v101_v42, %v105_v47 }
 0x2da   :  { %10746 = vmatprep.subr.bf16.mxu0 %v13785_v12  ;;  %10776 = vmatprep.mubr.bf16.mxu0 %v16373_v9  ;;  %v1400_v12 = vld [vmem:[%s22050_s1 + $0x2aa8] sm:$0xff] }
 0x2db   :  { %v15134_v28 = vcombine.low %v1396_v11, %v1400_v12 }
 0x2dc   :  { %10632 = vmatpush1.bf16.msra.mxu1 %v15094_v20  ;;  %v15135_v20 = vcombine.high %v1396_v11, %v1400_v12  ;;  %v117_v11 = vld [vmem:[%s22050_s1 + $0x290] sm:$0xff] }
 0x2dd   :  { %10747 = vmatpush1.bf16.msra.mxu0 %v13784_v21  ;;  %10633 = vmatprep.subr.bf16.mxu1 %v15103_v58  ;;  %v13825_v21 = vcombine.high %v85_v16, %v89_v59  ;;  %v1404_v58 = vld [vmem:[%s22050_s1 + $0x2ac8] sm:$0xff]  ;;  %v121_v12 = vld [vmem:[%s22050_s1 + $0x2b0] sm:$0xff]  ;;  %v13848_v59 = vcombine.low %v109_v60, %v113_v61 }
 0x2de   :  { %10748 = vmatprep.subr.bf16.mxu0 %v13793_v23  ;;  %v1408_v23 = vld [vmem:[%s22050_s1 + $0x2ae8] sm:$0xff] }
 0x2df   :  { %v15142_v44 = vcombine.low %v1404_v58, %v1408_v23 }
 0x2e0   :  { %10634 = vmatpush1.bf16.msra.mxu1 %v15102_v35  ;;  %v15143_v35 = vcombine.high %v1404_v58, %v1408_v23  ;;  %v125_v58 = vld [vmem:[%s22050_s1 + $0x2d0] sm:$0xff] }
 0x2e1   :  { %10749 = vmatpush1.bf16.msra.mxu0 %v13792_v36  ;;  %10635 = vmatprep.subr.bf16.mxu1 %v15111_v37  ;;  %v13833_v36 = vcombine.high %v93_v26, %v97_v27  ;;  %v1412_v37 = vld [vmem:[%s22050_s1 + $0x2b08] sm:$0xff]  ;;  %v129_v23 = vld [vmem:[%s22050_s1 + $0x2f0] sm:$0xff]  ;;  %v13856_v27 = vcombine.low %v117_v11, %v121_v12 }
 0x2e2   :  { %10750 = vmatprep.subr.bf16.mxu0 %v13801_v41  ;;  %v1416_v41 = vld [vmem:[%s22050_s1 + $0x2b28] sm:$0xff] }
 0x2e3   :  { %v15150_v5 = vcombine.low %v1412_v37, %v1416_v41 }
 0x2e4   :  { %10636 = vmatpush1.bf16.msra.mxu1 %v15110_v51  ;;  %v15151_v51 = vcombine.high %v1412_v37, %v1416_v41  ;;  %v133_v37 = vld [vmem:[%s22050_s1 + $0x310] sm:$0xff] }
 0x2e5   :  { %10751 = vmatpush1.bf16.msra.mxu0 %v13800_v55  ;;  %10637 = vmatprep.subr.bf16.mxu1 %v15119_v56  ;;  %v13841_v55 = vcombine.high %v101_v42, %v105_v47  ;;  %v1420_v56 = vld [vmem:[%s22050_s1 + $0x2b48] sm:$0xff]  ;;  %v137_v41 = vld [vmem:[%s22050_s1 + $0x330] sm:$0xff]  ;;  %v13864_v47 = vcombine.low %v125_v58, %v129_v23 }
 0x2e6   :  { %10752 = vmatprep.subr.bf16.mxu0 %v13809_v14  ;;  %v1424_v14 = vld [vmem:[%s22050_s1 + $0x2b68] sm:$0xff] }
 0x2e7   :  { %v15158_v16 = vcombine.low %v1420_v56, %v1424_v14 }
 0x2e8   :  { %10638 = vmatpush1.bf16.msra.mxu1 %v15118_v1  ;;  %v15159_v1 = vcombine.high %v1420_v56, %v1424_v14  ;;  %v141_v56 = vld [vmem:[%s22050_s1 + $0x350] sm:$0xff] }
 0x2e9   :  { %10753 = vmatpush1.bf16.msra.mxu0 %v13808_v2  ;;  %10639 = vmatprep.subr.bf16.mxu1 %v15127_v7  ;;  %v13849_v2 = vcombine.high %v109_v60, %v113_v61  ;;  %v1428_v7 = vld [vmem:[%s22050_s1 + $0x2b88] sm:$0xff]  ;;  %v145_v14 = vld [vmem:[%s22050_s1 + $0x370] sm:$0xff]  ;;  %v13872_v61 = vcombine.low %v133_v37, %v137_v41 }
 0x2ea   :  { %10754 = vmatprep.subr.bf16.mxu0 %v13817_v10  ;;  %v1432_v10 = vld [vmem:[%s22050_s1 + $0x2ba8] sm:$0xff] }
 0x2eb   :  { %v15166_v26 = vcombine.low %v1428_v7, %v1432_v10 }
 0x2ec   :  { %10640 = vmatpush1.bf16.msra.mxu1 %v15126_v53  ;;  %v15167_v53 = vcombine.high %v1428_v7, %v1432_v10  ;;  %v149_v7 = vld [vmem:[%s22050_s1 + $0x390] sm:$0xff] }
 0x2ed   :  { %10755 = vmatpush1.bf16.msra.mxu0 %v13816_v19  ;;  %10641 = vmatprep.subr.bf16.mxu1 %v15135_v20  ;;  %v13857_v19 = vcombine.high %v117_v11, %v121_v12  ;;  %v1436_v20 = vld [vmem:[%s22050_s1 + $0x2bc8] sm:$0xff]  ;;  %v153_v10 = vld [vmem:[%s22050_s1 + $0x3b0] sm:$0xff]  ;;  %v13880_v12 = vcombine.low %v141_v56, %v145_v14 }
 0x2ee   :  { %10756 = vmatprep.subr.bf16.mxu0 %v13825_v21  ;;  %v1440_v21 = vld [vmem:[%s22050_s1 + $0x2be8] sm:$0xff] }
 0x2ef   :  { %v15174_v42 = vcombine.low %v1436_v20, %v1440_v21 }
 0x2f0   :  { %10642 = vmatpush1.bf16.msra.mxu1 %v15134_v28  ;;  %v15175_v28 = vcombine.high %v1436_v20, %v1440_v21  ;;  %v157_v20 = vld [vmem:[%s22050_s1 + $0x3d0] sm:$0xff] }
 0x2f1   :  { %10757 = vmatpush1.bf16.msra.mxu0 %v13824_v33  ;;  %10643 = vmatprep.subr.bf16.mxu1 %v15143_v35  ;;  %v13865_v33 = vcombine.high %v125_v58, %v129_v23  ;;  %v1444_v35 = vld [vmem:[%s22050_s1 + $0x2c08] sm:$0xff]  ;;  %v161_v21 = vld [vmem:[%s22050_s1 + $0x3f0] sm:$0xff]  ;;  %v13888_v23 = vcombine.low %v149_v7, %v153_v10 }
 0x2f2   :  { %10758 = vmatprep.subr.bf16.mxu0 %v13833_v36  ;;  %v1448_v36 = vld [vmem:[%s22050_s1 + $0x2c28] sm:$0xff] }
 0x2f3   :  { %v15182_v60 = vcombine.low %v1444_v35, %v1448_v36 }
 0x2f4   :  { %10644 = vmatpush1.bf16.msra.mxu1 %v15142_v44  ;;  %v15183_v44 = vcombine.high %v1444_v35, %v1448_v36  ;;  %v165_v35 = vld [vmem:[%s22050_s1 + $0x410] sm:$0xff] }
 0x2f5   :  { %10759 = vmatpush1.bf16.msra.mxu0 %v13832_v50  ;;  %10645 = vmatprep.subr.bf16.mxu1 %v15151_v51  ;;  %v13873_v50 = vcombine.high %v133_v37, %v137_v41  ;;  %v1452_v51 = vld [vmem:[%s22050_s1 + $0x2c48] sm:$0xff]  ;;  %v169_v36 = vld [vmem:[%s22050_s1 + $0x430] sm:$0xff]  ;;  %v13896_v41 = vcombine.low %v157_v20, %v161_v21 }
 0x2f6   :  { %10760 = vmatprep.subr.bf16.mxu0 %v13841_v55  ;;  %v1456_v55 = vld [vmem:[%s22050_s1 + $0x2c68] sm:$0xff] }
 0x2f7   :  { %v15190_v11 = vcombine.low %v1452_v51, %v1456_v55 }
 0x2f8   :  { %10646 = vmatpush1.bf16.msra.mxu1 %v15150_v5  ;;  %v15191_v5 = vcombine.high %v1452_v51, %v1456_v55  ;;  %v173_v51 = vld [vmem:[%s22050_s1 + $0x450] sm:$0xff] }
 0x2f9   :  { %10761 = vmatpush1.bf16.msra.mxu0 %v13840_v0  ;;  %10647 = vmatprep.subr.bf16.mxu1 %v15159_v1  ;;  %v13881_v0 = vcombine.high %v141_v56, %v145_v14  ;;  %v1460_v1 = vld [vmem:[%s22050_s1 + $0x2c88] sm:$0xff]  ;;  %v177_v55 = vld [vmem:[%s22050_s1 + $0x470] sm:$0xff]  ;;  %v13904_v14 = vcombine.low %v165_v35, %v169_v36 }
 0x2fa   :  { %10762 = vmatprep.subr.bf16.mxu0 %v13849_v2  ;;  %v1464_v2 = vld [vmem:[%s22050_s1 + $0x2ca8] sm:$0xff] }
 0x2fb   :  { %v15198_v58 = vcombine.low %v1460_v1, %v1464_v2 }
 0x2fc   :  { %10648 = vmatpush1.bf16.msra.mxu1 %v15158_v16  ;;  %v15199_v16 = vcombine.high %v1460_v1, %v1464_v2  ;;  %v181_v1 = vld [vmem:[%s22050_s1 + $0x490] sm:$0xff] }
 0x2fd   :  { %10763 = vmatpush1.bf16.msra.mxu0 %v13848_v59  ;;  %10649 = vmatprep.subr.bf16.mxu1 %v15167_v53  ;;  %v13889_v59 = vcombine.high %v149_v7, %v153_v10  ;;  %v1468_v53 = vld [vmem:[%s22050_s1 + $0x2cc8] sm:$0xff]  ;;  %v185_v2 = vld [vmem:[%s22050_s1 + $0x4b0] sm:$0xff]  ;;  %v13912_v10 = vcombine.low %v173_v51, %v177_v55 }
 0x2fe   :  { %10764 = vmatprep.subr.bf16.mxu0 %v13857_v19  ;;  %v1472_v19 = vld [vmem:[%s22050_s1 + $0x2ce8] sm:$0xff] }
 0x2ff   :  { %v15206_v37 = vcombine.low %v1468_v53, %v1472_v19 }
 0x300   :  { %10650 = vmatpush1.bf16.msra.mxu1 %v15166_v26  ;;  %v15207_v26 = vcombine.high %v1468_v53, %v1472_v19  ;;  %v189_v53 = vld [vmem:[%s22050_s1 + $0x4d0] sm:$0xff] }
 0x301   :  { %10765 = vmatpush1.bf16.msra.mxu0 %v13856_v27  ;;  %10651 = vmatprep.subr.bf16.mxu1 %v15175_v28  ;;  %v13897_v27 = vcombine.high %v157_v20, %v161_v21  ;;  %v1476_v28 = vld [vmem:[%s22050_s1 + $0x2d08] sm:$0xff]  ;;  %v193_v19 = vld [vmem:[%s22050_s1 + $0x4f0] sm:$0xff]  ;;  %v13920_v21 = vcombine.low %v181_v1, %v185_v2 }
 0x302   :  { %10766 = vmatprep.subr.bf16.mxu0 %v13865_v33  ;;  %v1480_v33 = vld [vmem:[%s22050_s1 + $0x2d28] sm:$0xff] }
 0x303   :  { %v15214_v56 = vcombine.low %v1476_v28, %v1480_v33 }
 0x304   :  { %10652 = vmatpush1.bf16.msra.mxu1 %v15174_v42  ;;  %v15215_v42 = vcombine.high %v1476_v28, %v1480_v33  ;;  %v197_v28 = vld [vmem:[%s22050_s1 + $0x510] sm:$0xff] }
 0x305   :  { %10767 = vmatpush1.bf16.msra.mxu0 %v13864_v47  ;;  %10662 = vmatprep.subr.bf16.mxu1 %v15183_v44  ;;  %v13905_v47 = vcombine.high %v165_v35, %v169_v36  ;;  %v1484_v44 = vld [vmem:[%s22050_s1 + $0x2d48] sm:$0xff]  ;;  %v201_v33 = vld [vmem:[%s22050_s1 + $0x530] sm:$0xff]  ;;  %v13928_v36 = vcombine.low %v189_v53, %v193_v19 }
 0x306   :  { %10768 = vmatprep.subr.bf16.mxu0 %v13873_v50  ;;  %v1488_v50 = vld [vmem:[%s22050_s1 + $0x2d68] sm:$0xff] }
 0x307   :  { %10654 = vmatmul.mubr.bf16.vlgmr.msra.gmra.mrb[4].mxu1 %v18379_v34  ;;  %v15222_v7 = vcombine.low %v1484_v44, %v1488_v50 }
 0x308   :  { %10663 = vmatpush1.bf16.msra.mxu1 %v15182_v60  ;;  %10694 = vmatprep.mubr.bf16.mxu1 %v18389_v4  ;;  %v15223_v60 = vcombine.high %v1484_v44, %v1488_v50  ;;  %v205_v44 = vld [vmem:[%s22050_s1 + $0x550] sm:$0xff] }
 0x309   :  { %10769 = vmatpush1.bf16.msra.mxu0 %v13872_v61  ;;  %10664 = vmatprep.subr.bf16.mxu1 %v15191_v5  ;;  %v13913_v61 = vcombine.high %v173_v51, %v177_v55  ;;  %v1492_v5 = vld [vmem:[%s22050_s1 + $0x2d88] sm:$0xff]  ;;  %v209_v50 = vld [vmem:[%s22050_s1 + $0x570] sm:$0xff]  ;;  %v13936_v55 = vcombine.low %v197_v28, %v201_v33 }
 0x30a   :  { %10770 = vmatprep.subr.bf16.mxu0 %v13881_v0  ;;  %v1496_v0 = vld [vmem:[%s22050_s1 + $0x2da8] sm:$0xff] }
 0x30b   :  { %v15230_v20 = vcombine.low %v1492_v5, %v1496_v0 }
 0x30c   :  { %10665 = vmatpush1.bf16.msra.mxu1 %v15190_v11  ;;  %v15231_v11 = vcombine.high %v1492_v5, %v1496_v0  ;;  %v213_v5 = vld [vmem:[%s22050_s1 + $0x590] sm:$0xff] }
 0x30d   :  { %10771 = vmatpush1.bf16.msra.mxu0 %v13880_v12  ;;  %10666 = vmatprep.subr.bf16.mxu1 %v15199_v16  ;;  %v13921_v12 = vcombine.high %v181_v1, %v185_v2  ;;  %v1500_v16 = vld [vmem:[%s22050_s1 + $0x2dc8] sm:$0xff]  ;;  %v217_v0 = vld [vmem:[%s22050_s1 + $0x5b0] sm:$0xff]  ;;  %v13944_v2 = vcombine.low %v205_v44, %v209_v50 }
 0x30e   :  { %10772 = vmatprep.subr.bf16.mxu0 %v13889_v59  ;;  %v1504_v59 = vld [vmem:[%s22050_s1 + $0x2de8] sm:$0xff] }
 0x30f   :  { %v15238_v35 = vcombine.low %v1500_v16, %v1504_v59 }
 0x310   :  { %10667 = vmatpush1.bf16.msra.mxu1 %v15198_v58  ;;  %v15239_v58 = vcombine.high %v1500_v16, %v1504_v59  ;;  %v221_v16 = vld [vmem:[%s22050_s1 + $0x5d0] sm:$0xff] }
 0x311   :  { %10773 = vmatpush1.bf16.msra.mxu0 %v13888_v23  ;;  %10668 = vmatprep.subr.bf16.mxu1 %v15207_v26  ;;  %v13929_v23 = vcombine.high %v189_v53, %v193_v19  ;;  %v1508_v26 = vld [vmem:[%s22050_s1 + $0x2e08] sm:$0xff]  ;;  %v225_v59 = vld [vmem:[%s22050_s1 + $0x5f0] sm:$0xff]  ;;  %v13952_v19 = vcombine.low %v213_v5, %v217_v0 }
 0x312   :  { %10774 = vmatprep.subr.bf16.mxu0 %v13897_v27  ;;  %v1512_v27 = vld [vmem:[%s22050_s1 + $0x2e28] sm:$0xff] }
 0x313   :  { %v15246_v51 = vcombine.low %v1508_v26, %v1512_v27 }
 0x314   :  { %10669 = vmatpush1.bf16.msra.mxu1 %v15206_v37  ;;  %v15247_v37 = vcombine.high %v1508_v26, %v1512_v27  ;;  %v229_v26 = vld [vmem:[%s22050_s1 + $0x610] sm:$0xff] }
 0x315   :  { %10775 = vmatpush1.bf16.msra.mxu0 %v13896_v41  ;;  %10670 = vmatprep.subr.bf16.mxu1 %v15215_v42  ;;  %v13937_v41 = vcombine.high %v197_v28, %v201_v33  ;;  %v1516_v42 = vld [vmem:[%s22050_s1 + $0x2e48] sm:$0xff]  ;;  %v233_v27 = vld [vmem:[%s22050_s1 + $0x630] sm:$0xff]  ;;  %v13960_v33 = vcombine.low %v221_v16, %v225_v59 }
 0x316   :  { %10785 = vmatprep.subr.bf16.mxu0 %v13905_v47  ;;  %v1520_v47 = vld [vmem:[%s22050_s1 + $0x2e68] sm:$0xff] }
 0x317   :  { %v15254_v1 = vcombine.low %v1516_v42, %v1520_v47 }
 0x318   :  { %10671 = vmatpush1.bf16.msra.mxu1 %v15214_v56  ;;  %10777 = vmatmul.mubr.bf16.vlgmr.msra.gmra.mrb[4].mxu0 %v16490_v22  ;;  %v15255_v56 = vcombine.high %v1516_v42, %v1520_v47  ;;  %v237_v42 = vld [vmem:[%s22050_s1 + $0x650] sm:$0xff] }
 0x319   :  { %10786 = vmatpush1.bf16.msra.mxu0 %v13904_v14  ;;  %10672 = vmatprep.subr.bf16.mxu1 %v15223_v60  ;;  %v13945_v14 = vcombine.high %v205_v44, %v209_v50  ;;  %v1524_v60 = vld [vmem:[%s22050_s1 + $0x2e88] sm:$0xff]  ;;  %v241_v47 = vld [vmem:[%s22050_s1 + $0x670] sm:$0xff]  ;;  %v13968_v50 = vcombine.low %v229_v26, %v233_v27 }
 0x31a   :  { %10787 = vmatprep.subr.bf16.mxu0 %v13913_v61  ;;  %10817 = vmatprep.mubr.bf16.mxu0 %v16384_v13  ;;  %v1528_v61 = vld [vmem:[%s22050_s1 + $0x2ea8] sm:$0xff] }
 0x31b   :  { %v15262_v53 = vcombine.low %v1524_v60, %v1528_v61 }
 0x31c   :  { %10673 = vmatpush1.bf16.msra.mxu1 %v15222_v7  ;;  %v15263_v7 = vcombine.high %v1524_v60, %v1528_v61  ;;  %v245_v60 = vld [vmem:[%s22050_s1 + $0x690] sm:$0xff] }
 0x31d   :  { %10788 = vmatpush1.bf16.msra.mxu0 %v13912_v10  ;;  %10674 = vmatprep.subr.bf16.mxu1 %v15231_v11  ;;  %v13953_v10 = vcombine.high %v213_v5, %v217_v0  ;;  %v1532_v11 = vld [vmem:[%s22050_s1 + $0x2ec8] sm:$0xff]  ;;  %v249_v61 = vld [vmem:[%s22050_s1 + $0x6b0] sm:$0xff]  ;;  %v13976_v0 = vcombine.low %v237_v42, %v241_v47 }
 0x31e   :  { %10789 = vmatprep.subr.bf16.mxu0 %v13921_v12  ;;  %v1536_v12 = vld [vmem:[%s22050_s1 + $0x2ee8] sm:$0xff] }
 0x31f   :  { %v15270_v28 = vcombine.low %v1532_v11, %v1536_v12 }
 0x320   :  { %10675 = vmatpush1.bf16.msra.mxu1 %v15230_v20  ;;  %v15271_v20 = vcombine.high %v1532_v11, %v1536_v12  ;;  %v253_v11 = vld [vmem:[%s22050_s1 + $0x6d0] sm:$0xff] }
 0x321   :  { %10790 = vmatpush1.bf16.msra.mxu0 %v13920_v21  ;;  %10676 = vmatprep.subr.bf16.mxu1 %v15239_v58  ;;  %v13961_v21 = vcombine.high %v221_v16, %v225_v59  ;;  %v1540_v58 = vld [vmem:[%s22050_s1 + $0x2f08] sm:$0xff]  ;;  %v257_v12 = vld [vmem:[%s22050_s1 + $0x6f0] sm:$0xff]  ;;  %v13984_v59 = vcombine.low %v245_v60, %v249_v61 }
 0x322   :  { %10791 = vmatprep.subr.bf16.mxu0 %v13929_v23  ;;  %v1544_v23 = vld [vmem:[%s22050_s1 + $0x2f28] sm:$0xff] }
 0x323   :  { %v15278_v44 = vcombine.low %v1540_v58, %v1544_v23 }
 0x324   :  { %10677 = vmatpush1.bf16.msra.mxu1 %v15238_v35  ;;  %v15279_v35 = vcombine.high %v1540_v58, %v1544_v23  ;;  %v261_v58 = vld [vmem:[%s22050_s1 + $0x710] sm:$0xff] }
 0x325   :  { %10792 = vmatpush1.bf16.msra.mxu0 %v13928_v36  ;;  %10678 = vmatprep.subr.bf16.mxu1 %v15247_v37  ;;  %v13969_v36 = vcombine.high %v229_v26, %v233_v27  ;;  %v1548_v37 = vld [vmem:[%s22050_s1 + $0x2f48] sm:$0xff]  ;;  %v265_v23 = vld [vmem:[%s22050_s1 + $0x730] sm:$0xff]  ;;  %v13992_v27 = vcombine.low %v253_v11, %v257_v12 }
 0x326   :  { %10793 = vmatprep.subr.bf16.mxu0 %v13937_v41  ;;  %v1552_v41 = vld [vmem:[%s22050_s1 + $0x2f68] sm:$0xff] }
 0x327   :  { %v15286_v5 = vcombine.low %v1548_v37, %v1552_v41 }
 0x328   :  { %10679 = vmatpush1.bf16.msra.mxu1 %v15246_v51  ;;  %v15287_v51 = vcombine.high %v1548_v37, %v1552_v41  ;;  %v269_v37 = vld [vmem:[%s22050_s1 + $0x750] sm:$0xff] }
 0x329   :  { %10794 = vmatpush1.bf16.msra.mxu0 %v13936_v55  ;;  %10680 = vmatprep.subr.bf16.mxu1 %v15255_v56  ;;  %v13977_v55 = vcombine.high %v237_v42, %v241_v47  ;;  %v1556_v56 = vld [vmem:[%s22050_s1 + $0x2f88] sm:$0xff]  ;;  %v273_v41 = vld [vmem:[%s22050_s1 + $0x770] sm:$0xff]  ;;  %v14000_v47 = vcombine.low %v261_v58, %v265_v23 }
 0x32a   :  { %10795 = vmatprep.subr.bf16.mxu0 %v13945_v14  ;;  %v1560_v14 = vld [vmem:[%s22050_s1 + $0x2fa8] sm:$0xff] }
 0x32b   :  { %v15294_v16 = vcombine.low %v1556_v56, %v1560_v14 }
 0x32c   :  { %10681 = vmatpush1.bf16.msra.mxu1 %v15254_v1  ;;  %v15295_v1 = vcombine.high %v1556_v56, %v1560_v14  ;;  %v277_v56 = vld [vmem:[%s22050_s1 + $0x790] sm:$0xff] }
 0x32d   :  { %10796 = vmatpush1.bf16.msra.mxu0 %v13944_v2  ;;  %10682 = vmatprep.subr.bf16.mxu1 %v15263_v7  ;;  %v13985_v2 = vcombine.high %v245_v60, %v249_v61  ;;  %v1564_v7 = vld [vmem:[%s22050_s1 + $0x2fc8] sm:$0xff]  ;;  %v281_v14 = vld [vmem:[%s22050_s1 + $0x7b0] sm:$0xff]  ;;  %v14008_v61 = vcombine.low %v269_v37, %v273_v41 }
 0x32e   :  { %10797 = vmatprep.subr.bf16.mxu0 %v13953_v10  ;;  %v1568_v10 = vld [vmem:[%s22050_s1 + $0x2fe8] sm:$0xff] }
 0x32f   :  { %v15302_v26 = vcombine.low %v1564_v7, %v1568_v10 }
 0x330   :  { %10683 = vmatpush1.bf16.msra.mxu1 %v15262_v53  ;;  %v15303_v53 = vcombine.high %v1564_v7, %v1568_v10  ;;  %v285_v7 = vld [vmem:[%s22050_s1 + $0x7d0] sm:$0xff] }
 0x331   :  { %10798 = vmatpush1.bf16.msra.mxu0 %v13952_v19  ;;  %10684 = vmatprep.subr.bf16.mxu1 %v15271_v20  ;;  %v13993_v19 = vcombine.high %v253_v11, %v257_v12  ;;  %v1572_v20 = vld [vmem:[%s22050_s1 + $0x3008] sm:$0xff]  ;;  %v289_v10 = vld [vmem:[%s22050_s1 + $0x7f0] sm:$0xff]  ;;  %v14016_v12 = vcombine.low %v277_v56, %v281_v14 }
 0x332   :  { %10799 = vmatprep.subr.bf16.mxu0 %v13961_v21  ;;  %v1576_v21 = vld [vmem:[%s22050_s1 + $0x3028] sm:$0xff] }
 0x333   :  { %v15310_v42 = vcombine.low %v1572_v20, %v1576_v21 }
 0x334   :  { %10685 = vmatpush1.bf16.msra.mxu1 %v15270_v28  ;;  %v15311_v28 = vcombine.high %v1572_v20, %v1576_v21  ;;  %v293_v20 = vld [vmem:[%s22050_s1 + $0x810] sm:$0xff] }
 0x335   :  { %10800 = vmatpush1.bf16.msra.mxu0 %v13960_v33  ;;  %10686 = vmatprep.subr.bf16.mxu1 %v15279_v35  ;;  %v14001_v33 = vcombine.high %v261_v58, %v265_v23  ;;  %v1580_v35 = vld [vmem:[%s22050_s1 + $0x3048] sm:$0xff]  ;;  %v297_v21 = vld [vmem:[%s22050_s1 + $0x830] sm:$0xff]  ;;  %v14024_v23 = vcombine.low %v285_v7, %v289_v10 }
 0x336   :  { %10801 = vmatprep.subr.bf16.mxu0 %v13969_v36  ;;  %v1584_v36 = vld [vmem:[%s22050_s1 + $0x3068] sm:$0xff] }
 0x337   :  { %v15318_v60 = vcombine.low %v1580_v35, %v1584_v36 }
 0x338   :  { %10687 = vmatpush1.bf16.msra.mxu1 %v15278_v44  ;;  %v15319_v44 = vcombine.high %v1580_v35, %v1584_v36  ;;  %v301_v35 = vld [vmem:[%s22050_s1 + $0x850] sm:$0xff] }
 0x339   :  { %10802 = vmatpush1.bf16.msra.mxu0 %v13968_v50  ;;  %10688 = vmatprep.subr.bf16.mxu1 %v15287_v51  ;;  %v14009_v50 = vcombine.high %v269_v37, %v273_v41  ;;  %v1588_v51 = vld [vmem:[%s22050_s1 + $0x3088] sm:$0xff]  ;;  %v305_v36 = vld [vmem:[%s22050_s1 + $0x870] sm:$0xff]  ;;  %v14032_v41 = vcombine.low %v293_v20, %v297_v21 }
 0x33a   :  { %10803 = vmatprep.subr.bf16.mxu0 %v13977_v55  ;;  %v1592_v55 = vld [vmem:[%s22050_s1 + $0x30a8] sm:$0xff] }
 0x33b   :  { %v15326_v11 = vcombine.low %v1588_v51, %v1592_v55 }
 0x33c   :  { %10689 = vmatpush1.bf16.msra.mxu1 %v15286_v5  ;;  %v15327_v5 = vcombine.high %v1588_v51, %v1592_v55  ;;  %v309_v51 = vld [vmem:[%s22050_s1 + $0x890] sm:$0xff] }
 0x33d   :  { %10804 = vmatpush1.bf16.msra.mxu0 %v13976_v0  ;;  %10690 = vmatprep.subr.bf16.mxu1 %v15295_v1  ;;  %v14017_v0 = vcombine.high %v277_v56, %v281_v14  ;;  %v1596_v1 = vld [vmem:[%s22050_s1 + $0x30c8] sm:$0xff]  ;;  %v313_v55 = vld [vmem:[%s22050_s1 + $0x8b0] sm:$0xff]  ;;  %v14040_v14 = vcombine.low %v301_v35, %v305_v36 }
 0x33e   :  { %10805 = vmatprep.subr.bf16.mxu0 %v13985_v2  ;;  %v1600_v2 = vld [vmem:[%s22050_s1 + $0x30e8] sm:$0xff] }
 0x33f   :  { %v15334_v58 = vcombine.low %v1596_v1, %v1600_v2 }
 0x340   :  { %10691 = vmatpush1.bf16.msra.mxu1 %v15294_v16  ;;  %v15335_v16 = vcombine.high %v1596_v1, %v1600_v2  ;;  %v317_v1 = vld [vmem:[%s22050_s1 + $0x8d0] sm:$0xff] }
 0x341   :  { %10806 = vmatpush1.bf16.msra.mxu0 %v13984_v59  ;;  %10692 = vmatprep.subr.bf16.mxu1 %v15303_v53  ;;  %v14025_v59 = vcombine.high %v285_v7, %v289_v10  ;;  %v38_v53 = vld [vmem:[%s22050_s1 + $0x18] sm:$0xff]  ;;  %v321_v2 = vld [vmem:[%s22050_s1 + $0x8f0] sm:$0xff]  ;;  %v14048_v10 = vcombine.low %v309_v51, %v313_v55 }
 0x342   :  { %10807 = vmatprep.subr.bf16.mxu0 %v13993_v19  ;;  %v42_v19 = vld [vmem:[%s22050_s1 + $0x38] sm:$0xff] }
 0x343   :  { %v13778_v37 = vcombine.low %v38_v53, %v42_v19 }
 0x344   :  { %10693 = vmatpush1.bf16.msra.mxu1 %v15302_v26  ;;  %v13779_v26 = vcombine.high %v38_v53, %v42_v19  ;;  %v329_v53 = vld [vmem:[%s22050_s1 + $0x930] sm:$0xff] }
 0x345   :  { %10808 = vmatpush1.bf16.msra.mxu0 %v13992_v27  ;;  %10703 = vmatprep.subr.bf16.mxu1 %v15311_v28  ;;  %v14033_v27 = vcombine.high %v293_v20, %v297_v21  ;;  %v46_v28 = vld [vmem:[%s22050_s1 + $0x58] sm:$0xff]  ;;  %v14056_v20 = vcombine.low %v317_v1, %v321_v2 }
 0x346   :  { %10809 = vmatprep.subr.bf16.mxu0 %v14001_v33  ;;  %v50_v33 = vld [vmem:[%s22050_s1 + $0x78] sm:$0xff] }
 0x347   :  { %10695 = vmatmul.mubr.bf16.vlgmr.msra.gmra.mrb[4].mxu1 %v18583_v8  ;;  %v13786_v56 = vcombine.low %v46_v28, %v50_v33 }
 0x348   :  { %10704 = vmatpush1.bf16.msra.mxu1 %v15310_v42  ;;  %10735 = vmatprep.mubr.bf16.mxu1 %v16206_v63  ;;  %v13787_v42 = vcombine.high %v46_v28, %v50_v33  ;;  %v337_v28 = vld [vmem:[%s22050_s1 + $0x970] sm:$0xff] }
 0x349   :  { %10810 = vmatpush1.bf16.msra.mxu0 %v14000_v47  ;;  %10705 = vmatprep.subr.bf16.mxu1 %v15319_v44  ;;  %v14041_v47 = vcombine.high %v301_v35, %v305_v36  ;;  %v54_v44 = vld [vmem:[%s22050_s1 + $0x98] sm:$0xff] }
 0x34a   :  { %10811 = vmatprep.subr.bf16.mxu0 %v14009_v50  ;;  %v58_v50 = vld [vmem:[%s22050_s1 + $0xb8] sm:$0xff] }
 0x34b   :  { %v13794_v7 = vcombine.low %v54_v44, %v58_v50 }
 0x34c   :  { %10706 = vmatpush1.bf16.msra.mxu1 %v15318_v60  ;;  %v13795_v60 = vcombine.high %v54_v44, %v58_v50  ;;  %v345_v44 = vld [vmem:[%s22050_s1 + $0x9b0] sm:$0xff] }
 0x34d   :  { %10812 = vmatpush1.bf16.msra.mxu0 %v14008_v61  ;;  %10707 = vmatprep.subr.bf16.mxu1 %v15327_v5  ;;  %v14049_v61 = vcombine.high %v309_v51, %v313_v55  ;;  %v62_v5 = vld [vmem:[%s22050_s1 + $0xd8] sm:$0xff] }
 0x34e   :  { %10813 = vmatprep.subr.bf16.mxu0 %v14017_v0  ;;  %v66_v0 = vld [vmem:[%s22050_s1 + $0xf8] sm:$0xff] }
 0x34f   :  { %v13802_v19 = vcombine.low %v62_v5, %v66_v0 }
 0x350   :  { %10708 = vmatpush1.bf16.msra.mxu1 %v15326_v11  ;;  %v13803_v11 = vcombine.high %v62_v5, %v66_v0  ;;  %v353_v5 = vld [vmem:[%s22050_s1 + $0x9f0] sm:$0xff] }
 0x351   :  { %10814 = vmatpush1.bf16.msra.mxu0 %v14016_v12  ;;  %10709 = vmatprep.subr.bf16.mxu1 %v15335_v16  ;;  %v14057_v12 = vcombine.high %v317_v1, %v321_v2  ;;  %v70_v16 = vld [vmem:[%s22050_s1 + $0x118] sm:$0xff] }
 0x352   :  { %10815 = vmatprep.subr.bf16.mxu0 %v14025_v59  ;;  %v74_v59 = vld [vmem:[%s22050_s1 + $0x138] sm:$0xff] }
 0x353   :  { %v13811_v21 = vcombine.high %v70_v16, %v74_v59  ;;  %v13810_v33 = vcombine.low %v70_v16, %v74_v59  ;;  %v361_v16 = vld [vmem:[%s22050_s1 + $0xa30] sm:$0xff] }
 0x354   :  { %10710 = vmatpush1.bf16.msra.mxu1 %v15334_v58 }
 0x355   :  { %10816 = vmatpush1.bf16.msra.mxu0 %v14024_v23  ;;  %11277 = vmatprep.subr.bf16.mxu1 %v13779_v26  ;;  %v78_v23 = vld [vmem:[%s22050_s1 + $0x158] sm:$0xff] }
 0x356   :  { %10826 = vmatprep.subr.bf16.mxu0 %v14033_v27  ;;  %v82_v26 = vld [vmem:[%s22050_s1 + $0x178] sm:$0xff]  ;;  %v333_v27 = vld [vmem:[%s22050_s1 + $0x950] sm:$0xff] }
 0x357   :  { %15341 = vmatmul.mubr.msk.bf16.vlgmr.msra.gmra.mrb[4].mxu1 %vm9674_vm0, %v18641_v3  ;;  %v13819_v36 = vcombine.high %v78_v23, %v82_v26  ;;  %v13818_v50 = vcombine.low %v78_v23, %v82_v26  ;;  %v14072_v51 = vcombine.low %v333_v27, %v337_v28  ;;  %v369_v23 = vld [vmem:[%s22050_s1 + $0xa70] sm:$0xff] }
 0x358   :  { %10818 = vmatmul.mubr.bf16.vlgmr.msra.gmra.mrb[4].mxu0 %v16508_v31  ;;  %11278 = vmatpush1.bf16.msra.mxu1 %v13778_v37  ;;  %v14073_v37 = vcombine.high %v333_v27, %v337_v28 }
 0x359   :  { %10827 = vmatpush1.bf16.msra.mxu0 %v14032_v41  ;;  %11279 = vmatprep.subr.bf16.mxu1 %v13787_v42  ;;  %v86_v41 = vld [vmem:[%s22050_s1 + $0x198] sm:$0xff] }
 0x35a   :  { %10828 = vmatprep.subr.bf16.mxu0 %v14041_v47  ;;  %10858 = vmatprep.mubr.bf16.mxu0 %v16523_v40  ;;  %v90_v42 = vld [vmem:[%s22050_s1 + $0x1b8] sm:$0xff]  ;;  %v341_v47 = vld [vmem:[%s22050_s1 + $0x990] sm:$0xff] }
 0x35b   :  { %11309 = vmatprep.mubr.bf16.mxu1 %v16373_v9  ;;  %v325_v9 = vld [vmem:[%s22050_s1 + $0x910] sm:$0xff]  ;;  %v13827_v55 = vcombine.high %v86_v41, %v90_v42  ;;  %v13826_v0 = vcombine.low %v86_v41, %v90_v42  ;;  %v14080_v1 = vcombine.low %v341_v47, %v345_v44 }
 0x35c   :  { %11280 = vmatpush1.bf16.msra.mxu1 %v13786_v56  ;;  %v14065_v58 = vcombine.high %v325_v9, %v329_v53  ;;  %v14064_v35 = vcombine.low %v325_v9, %v329_v53  ;;  %v14081_v56 = vcombine.high %v341_v47, %v345_v44  ;;  %v377_v41 = vld [vmem:[%s22050_s1 + $0xab0] sm:$0xff] }
 0x35d   :  { %10829 = vmatpush1.bf16.msra.mxu0 %v14040_v14  ;;  %11281 = vmatprep.subr.bf16.mxu1 %v13795_v60  ;;  %v94_v14 = vld [vmem:[%s22050_s1 + $0x1d8] sm:$0xff] }
 0x35e   :  { %10830 = vmatprep.subr.bf16.mxu0 %v14049_v61  ;;  %v98_v60 = vld [vmem:[%s22050_s1 + $0x1f8] sm:$0xff]  ;;  %v349_v61 = vld [vmem:[%s22050_s1 + $0x9d0] sm:$0xff] }
 0x35f   :  { %v13835_v2 = vcombine.high %v94_v14, %v98_v60  ;;  %v13834_v59 = vcombine.low %v94_v14, %v98_v60  ;;  %v14088_v9 = vcombine.low %v349_v61, %v353_v5  ;;  %v385_v14 = vld [vmem:[%s22050_s1 + $0xaf0] sm:$0xff] }
 0x360   :  { %11282 = vmatpush1.bf16.msra.mxu1 %v13794_v7  ;;  %v14089_v7 = vcombine.high %v349_v61, %v353_v5 }
 0x361   :  { %10831 = vmatpush1.bf16.msra.mxu0 %v14048_v10  ;;  %11283 = vmatprep.subr.bf16.mxu1 %v13803_v11  ;;  %v102_v10 = vld [vmem:[%s22050_s1 + $0x218] sm:$0xff] }
 0x362   :  { %10832 = vmatprep.subr.bf16.mxu0 %v14057_v12  ;;  %v106_v11 = vld [vmem:[%s22050_s1 + $0x238] sm:$0xff]  ;;  %v357_v12 = vld [vmem:[%s22050_s1 + $0xa10] sm:$0xff] }
 0x363   :  { %v13843_v53 = vcombine.high %v102_v10, %v106_v11  ;;  %v13842_v26 = vcombine.low %v102_v10, %v106_v11  ;;  %v14096_v27 = vcombine.low %v357_v12, %v361_v16  ;;  %v393_v10 = vld [vmem:[%s22050_s1 + $0xb30] sm:$0xff] }
 0x364   :  { %11284 = vmatpush1.bf16.msra.mxu1 %v13802_v19  ;;  %v14097_v19 = vcombine.high %v357_v12, %v361_v16 }
 0x365   :  { %10833 = vmatpush1.bf16.msra.mxu0 %v14056_v20  ;;  %11285 = vmatprep.subr.bf16.mxu1 %v13811_v21  ;;  %v110_v20 = vld [vmem:[%s22050_s1 + $0x258] sm:$0xff] }
 0x366   :  { %10834 = vmatprep.subr.bf16.mxu0 %v14065_v58  ;;  %v114_v21 = vld [vmem:[%s22050_s1 + $0x278] sm:$0xff]  ;;  %v365_v58 = vld [vmem:[%s22050_s1 + $0xa50] sm:$0xff] }
 0x367   :  { %v13851_v28 = vcombine.high %v110_v20, %v114_v21  ;;  %v13850_v42 = vcombine.low %v110_v20, %v114_v21  ;;  %v14104_v47 = vcombine.low %v365_v58, %v369_v23  ;;  %v401_v20 = vld [vmem:[%s22050_s1 + $0xb70] sm:$0xff] }
 0x368   :  { %11286 = vmatpush1.bf16.msra.mxu1 %v13810_v33  ;;  %v14105_v33 = vcombine.high %v365_v58, %v369_v23 }
 0x369   :  { %10835 = vmatpush1.bf16.msra.mxu0 %v14064_v35  ;;  %11287 = vmatprep.subr.bf16.mxu1 %v13819_v36  ;;  %v118_v35 = vld [vmem:[%s22050_s1 + $0x298] sm:$0xff] }
 0x36a   :  { %10836 = vmatprep.subr.bf16.mxu0 %v14073_v37  ;;  %v122_v36 = vld [vmem:[%s22050_s1 + $0x2b8] sm:$0xff]  ;;  %v373_v37 = vld [vmem:[%s22050_s1 + $0xa90] sm:$0xff] }
 0x36b   :  { %v13859_v44 = vcombine.high %v118_v35, %v122_v36  ;;  %v13858_v60 = vcombine.low %v118_v35, %v122_v36  ;;  %v14112_v61 = vcombine.low %v373_v37, %v377_v41  ;;  %v409_v35 = vld [vmem:[%s22050_s1 + $0xbb0] sm:$0xff] }
 0x36c   :  { %11288 = vmatpush1.bf16.msra.mxu1 %v13818_v50  ;;  %v14113_v50 = vcombine.high %v373_v37, %v377_v41 }
 0x36d   :  { %10837 = vmatpush1.bf16.msra.mxu0 %v14072_v51  ;;  %11289 = vmatprep.subr.bf16.mxu1 %v13827_v55  ;;  %v126_v51 = vld [vmem:[%s22050_s1 + $0x2d8] sm:$0xff] }
 0x36e   :  { %10838 = vmatprep.subr.bf16.mxu0 %v14081_v56  ;;  %v130_v55 = vld [vmem:[%s22050_s1 + $0x2f8] sm:$0xff]  ;;  %v381_v56 = vld [vmem:[%s22050_s1 + $0xad0] sm:$0xff] }
 0x36f   :  { %v13867_v5 = vcombine.high %v126_v51, %v130_v55  ;;  %v13866_v11 = vcombine.low %v126_v51, %v130_v55  ;;  %v14120_v12 = vcombine.low %v381_v56, %v385_v14  ;;  %v417_v51 = vld [vmem:[%s22050_s1 + $0xbf0] sm:$0xff] }
 0x370   :  { %11290 = vmatpush1.bf16.msra.mxu1 %v13826_v0  ;;  %v14121_v0 = vcombine.high %v381_v56, %v385_v14 }
 0x371   :  { %10839 = vmatpush1.bf16.msra.mxu0 %v14080_v1  ;;  %11291 = vmatprep.subr.bf16.mxu1 %v13835_v2  ;;  %v134_v1 = vld [vmem:[%s22050_s1 + $0x318] sm:$0xff] }
 0x372   :  { %10840 = vmatprep.subr.bf16.mxu0 %v14089_v7  ;;  %v138_v2 = vld [vmem:[%s22050_s1 + $0x338] sm:$0xff]  ;;  %v389_v7 = vld [vmem:[%s22050_s1 + $0xb10] sm:$0xff] }
 0x373   :  { %v13875_v16 = vcombine.high %v134_v1, %v138_v2  ;;  %v13874_v21 = vcombine.low %v134_v1, %v138_v2  ;;  %v14128_v58 = vcombine.low %v389_v7, %v393_v10  ;;  %v425_v1 = vld [vmem:[%s22050_s1 + $0xc30] sm:$0xff] }
 0x374   :  { %11292 = vmatpush1.bf16.msra.mxu1 %v13834_v59  ;;  %v14129_v59 = vcombine.high %v389_v7, %v393_v10 }
 0x375   :  { %10841 = vmatpush1.bf16.msra.mxu0 %v14088_v9  ;;  %11293 = vmatprep.subr.bf16.mxu1 %v13843_v53  ;;  %v142_v9 = vld [vmem:[%s22050_s1 + $0x358] sm:$0xff] }
 0x376   :  { %10842 = vmatprep.subr.bf16.mxu0 %v14097_v19  ;;  %v146_v53 = vld [vmem:[%s22050_s1 + $0x378] sm:$0xff]  ;;  %v397_v19 = vld [vmem:[%s22050_s1 + $0xb50] sm:$0xff] }
 0x377   :  { %v13883_v23 = vcombine.high %v142_v9, %v146_v53  ;;  %v13882_v36 = vcombine.low %v142_v9, %v146_v53  ;;  %v14136_v37 = vcombine.low %v397_v19, %v401_v20  ;;  %v433_v9 = vld [vmem:[%s22050_s1 + $0xc70] sm:$0xff] }
 0x378   :  { %11294 = vmatpush1.bf16.msra.mxu1 %v13842_v26  ;;  %v14137_v26 = vcombine.high %v397_v19, %v401_v20 }
 0x379   :  { %10843 = vmatpush1.bf16.msra.mxu0 %v14096_v27  ;;  %11295 = vmatprep.subr.bf16.mxu1 %v13851_v28  ;;  %v150_v27 = vld [vmem:[%s22050_s1 + $0x398] sm:$0xff] }
 0x37a   :  { %10844 = vmatprep.subr.bf16.mxu0 %v14105_v33  ;;  %v154_v28 = vld [vmem:[%s22050_s1 + $0x3b8] sm:$0xff]  ;;  %v405_v33 = vld [vmem:[%s22050_s1 + $0xb90] sm:$0xff] }
 0x37b   :  { %v13891_v41 = vcombine.high %v150_v27, %v154_v28  ;;  %v13890_v55 = vcombine.low %v150_v27, %v154_v28  ;;  %v14144_v56 = vcombine.low %v405_v33, %v409_v35  ;;  %v441_v27 = vld [vmem:[%s22050_s1 + $0xcb0] sm:$0xff] }
 0x37c   :  { %11296 = vmatpush1.bf16.msra.mxu1 %v13850_v42  ;;  %v14145_v42 = vcombine.high %v405_v33, %v409_v35 }
 0x37d   :  { %10845 = vmatpush1.bf16.msra.mxu0 %v14104_v47  ;;  %11297 = vmatprep.subr.bf16.mxu1 %v13859_v44  ;;  %v158_v47 = vld [vmem:[%s22050_s1 + $0x3d8] sm:$0xff] }
 0x37e   :  { %10846 = vmatprep.subr.bf16.mxu0 %v14113_v50  ;;  %v162_v44 = vld [vmem:[%s22050_s1 + $0x3f8] sm:$0xff]  ;;  %v413_v50 = vld [vmem:[%s22050_s1 + $0xbd0] sm:$0xff] }
 0x37f   :  { %v13899_v14 = vcombine.high %v158_v47, %v162_v44  ;;  %v13898_v2 = vcombine.low %v158_v47, %v162_v44  ;;  %v14152_v7 = vcombine.low %v413_v50, %v417_v51 }
 0x380   :  { %11298 = vmatpush1.bf16.msra.mxu1 %v13858_v60  ;;  %v14153_v60 = vcombine.high %v413_v50, %v417_v51 }
 0x381   :  { %10847 = vmatpush1.bf16.msra.mxu0 %v14112_v61  ;;  %11299 = vmatprep.subr.bf16.mxu1 %v13867_v5  ;;  %v166_v61 = vld [vmem:[%s22050_s1 + $0x418] sm:$0xff] }
 0x382   :  { %10848 = vmatprep.subr.bf16.mxu0 %v14121_v0  ;;  %v170_v5 = vld [vmem:[%s22050_s1 + $0x438] sm:$0xff]  ;;  %v421_v0 = vld [vmem:[%s22050_s1 + $0xc10] sm:$0xff] }
 0x383   :  { %v13907_v10 = vcombine.high %v166_v61, %v170_v5  ;;  %v13906_v53 = vcombine.low %v166_v61, %v170_v5  ;;  %v14160_v19 = vcombine.low %v421_v0, %v425_v1 }
 0x384   :  { %11300 = vmatpush1.bf16.msra.mxu1 %v13866_v11  ;;  %v14161_v11 = vcombine.high %v421_v0, %v425_v1  ;;  %v1607_v0 = vsub.s32 0, %v16320_v43 }
 0x385   :  { %10849 = vmatpush1.bf16.msra.mxu0 %v14120_v12  ;;  %11301 = vmatprep.subr.bf16.mxu1 %v13875_v16  ;;  %v174_v12 = vld [vmem:[%s22050_s1 + $0x458] sm:$0xff] }
 0x386   :  { %10850 = vmatprep.subr.bf16.mxu0 %v14129_v59  ;;  %v178_v16 = vld [vmem:[%s22050_s1 + $0x478] sm:$0xff]  ;;  %v429_v59 = vld [vmem:[%s22050_s1 + $0xc50] sm:$0xff] }
 0x387   :  { %v13915_v20 = vcombine.high %v174_v12, %v178_v16  ;;  %v13914_v28 = vcombine.low %v174_v12, %v178_v16  ;;  %v14168_v33 = vcombine.low %v429_v59, %v433_v9  ;;  %v461_v12 = vld [vmem:[%s22050_s1 + $0xd50] sm:$0xff] }
 0x388   :  { %11302 = vmatpush1.bf16.msra.mxu1 %v13874_v21  ;;  %v14169_v21 = vcombine.high %v429_v59, %v433_v9  ;;  %v465_v16 = vld [vmem:[%s22050_s1 + $0xd70] sm:$0xff] }
 0x389   :  { %10851 = vmatpush1.bf16.msra.mxu0 %v14128_v58  ;;  %11303 = vmatprep.subr.bf16.mxu1 %v13883_v23  ;;  %v182_v58 = vld [vmem:[%s22050_s1 + $0x498] sm:$0xff] }
 0x38a   :  { %10852 = vmatprep.subr.bf16.mxu0 %v14137_v26  ;;  %v186_v23 = vld [vmem:[%s22050_s1 + $0x4b8] sm:$0xff]  ;;  %v437_v26 = vld [vmem:[%s22050_s1 + $0xc90] sm:$0xff] }
 0x38b   :  { %v13923_v35 = vcombine.high %v182_v58, %v186_v23  ;;  %v13922_v47 = vcombine.low %v182_v58, %v186_v23  ;;  %v14176_v44 = vcombine.low %v437_v26, %v441_v27  ;;  %v218_v58 = vld [vmem:[%s22050_s1 + $0x5b8] sm:$0xff] }
 0x38c   :  { %11304 = vmatpush1.bf16.msra.mxu1 %v13882_v36  ;;  %v14177_v36 = vcombine.high %v437_v26, %v441_v27  ;;  %v469_v26 = vld [vmem:[%s22050_s1 + $0xd90] sm:$0xff] }
 0x38d   :  { %10853 = vmatpush1.bf16.msra.mxu0 %v14136_v37  ;;  %11305 = vmatprep.subr.bf16.mxu1 %v13891_v41  ;;  %v194_v37 = vld [vmem:[%s22050_s1 + $0x4f8] sm:$0xff]  ;;  %v445_v41 = vld [vmem:[%s22050_s1 + $0xcd0] sm:$0xff] }
 0x38e   :  { %10854 = vmatprep.subr.bf16.mxu0 %v14145_v42  ;;  %v449_v42 = vld [vmem:[%s22050_s1 + $0xcf0] sm:$0xff] }
 0x38f   :  { %v14185_v51 = vcombine.high %v445_v41, %v449_v42  ;;  %v14184_v61 = vcombine.low %v445_v41, %v449_v42  ;;  %v473_v27 = vld [vmem:[%s22050_s1 + $0xdb0] sm:$0xff]  ;;  %v226_v41 = vld [vmem:[%s22050_s1 + $0x5f8] sm:$0xff] }
 0x390   :  { %11306 = vmatpush1.bf16.msra.mxu1 %v13890_v55  ;;  %v198_v55 = vld [vmem:[%s22050_s1 + $0x518] sm:$0xff] }
 0x391   :  { %10855 = vmatpush1.bf16.msra.mxu0 %v14144_v56  ;;  %11307 = vmatprep.subr.bf16.mxu1 %v13899_v14  ;;  %v202_v56 = vld [vmem:[%s22050_s1 + $0x538] sm:$0xff]  ;;  %v457_v14 = vld [vmem:[%s22050_s1 + $0xd30] sm:$0xff] }
 0x392   :  { %10856 = vmatprep.subr.bf16.mxu0 %v14153_v60  ;;  %v13939_v5 = vcombine.high %v198_v55, %v202_v56  ;;  %v13938_v59 = vcombine.low %v198_v55, %v202_v56 }
 0x394   :  { %11308 = vmatpush1.bf16.msra.mxu1 %v13898_v2  ;;  %v206_v2 = vld [vmem:[%s22050_s1 + $0x558] sm:$0xff] }
 0x395   :  { %10857 = vmatpush1.bf16.msra.mxu0 %v14152_v7  ;;  %11318 = vmatprep.subr.bf16.mxu1 %v13907_v10  ;;  %v210_v7 = vld [vmem:[%s22050_s1 + $0x578] sm:$0xff]  ;;  %v1603_v10 = vld [vmem:[%s22051_s2] sm:$0xff] }
 0x396   :  { %10867 = vmatprep.subr.bf16.mxu0 %v14161_v11  ;;  %v1611_v11 = vsub.s32 1, %v16320_v43 }
 0x397   :  { %11310 = vmatmul.mubr.bf16.vlgmr.msra.gmra.mrb[8].mxu1 %v16490_v22  ;;  %v190_v22 = vld [vmem:[%s22050_s1 + $0x4d8] sm:$0xff] }
 0x398   :  { %10859 = vmatmul.mubr.bf16.vlgmr.msra.gmra.mrb[4].mxu0 %v16711_v54  ;;  %11319 = vmatpush1.bf16.msra.mxu1 %v13906_v53  ;;  %v13931_v50 = vcombine.high %v190_v22, %v194_v37  ;;  %v13930_v60 = vcombine.low %v190_v22, %v194_v37  ;;  %v13947_v53 = vcombine.high %v206_v2, %v210_v7  ;;  %v222_v37 = vld [vmem:[%s22050_s1 + $0x5d8] sm:$0xff] }
 0x399   :  { %10868 = vmatpush1.bf16.msra.mxu0 %v14160_v19  ;;  %11320 = vmatprep.subr.bf16.mxu1 %v13915_v20  ;;  %v1608_v19 = vrot.slane %v1603_v10, %v1607_v0  ;;  %v14201_v20 = vcombine.high %v461_v12, %v465_v16  ;;  %v1612_v23 = vrot.slane %v1603_v10, %v1611_v11 }
 0x39a   :  { %10869 = vmatprep.subr.bf16.mxu0 %v14169_v21  ;;  %10899 = vmatprep.mubr.bf16.mxu0 %v16727_v62  ;;  %v214_v21 = vld [vmem:[%s22050_s1 + $0x598] sm:$0xff]  ;;  %v14209_v22 = vcombine.high %v469_v26, %v473_v27  ;;  %v13962_v10 = vcombine.low %v222_v37, %v226_v41 }
 0x39b   :  { %11350 = vmatprep.mubr.bf16.mxu1 %v16384_v13  ;;  %v453_v13 = vld [vmem:[%s22050_s1 + $0xd10] sm:$0xff]  ;;  %v9715_v42 = vadd.f32 %v17207_v49, %v1612_v23  ;;  %v13954_v55 = vcombine.low %v214_v21, %v218_v58  ;;  %v13963_v49 = vcombine.high %v222_v37, %v226_v41 }
 0x39c   :  { %11321 = vmatpush1.bf16.msra.mxu1 %v13914_v28  ;;  %v14193_v1 = vcombine.high %v453_v13, %v457_v14  ;;  %v14192_v9 = vcombine.low %v453_v13, %v457_v14  ;;  %v13946_v28 = vcombine.low %v206_v2, %v210_v7  ;;  %v14208_v14 = vcombine.low %v469_v26, %v473_v27  ;;  %v485_v2 = vld [vmem:[%s22050_s1 + $0xe10] sm:$0xff]  ;;  %v246_v27 = vld [vmem:[%s22050_s1 + $0x698] sm:$0xff] }
 0x39d   :  { %10870 = vmatpush1.bf16.msra.mxu0 %v14168_v33  ;;  %11322 = vmatprep.subr.bf16.mxu1 %v13923_v35  ;;  %v14200_v33 = vcombine.low %v461_v12, %v465_v16  ;;  %v13955_v35 = vcombine.high %v214_v21, %v218_v58  ;;  %v489_v7 = vld [vmem:[%s22050_s1 + $0xe30] sm:$0xff] }
 0x39e   :  { %10871 = vmatprep.subr.bf16.mxu0 %v14177_v36  ;;  %v9713_v36 = vadd.f32 %v17199_v45, %v1608_v19  ;;  %v481_v45 = vld [vmem:[%s22050_s1 + $0xdf0] sm:$0xff]  ;;  %v14224_v58 = vcombine.low %v485_v2, %v489_v7 }
 0x39f   :  { %v493_v19 = vld [vmem:[%s22050_s1 + $0xe50] sm:$0xff] }
 0x3a0   :  { %11323 = vmatpush1.bf16.msra.mxu1 %v13922_v47 }
 0x3a1   :  { %10872 = vmatpush1.bf16.msra.mxu0 %v14176_v44  ;;  %11324 = vmatprep.subr.bf16.mxu1 %v13931_v50  ;;  %v477_v44 = vld [vmem:[%s22050_s1 + $0xdd0] sm:$0xff] }
 0x3a2   :  { %10873 = vmatprep.subr.bf16.mxu0 %v14185_v51  ;;  %v14216_v12 = vcombine.low %v477_v44, %v481_v45 }
 0x3a4   :  { %11325 = vmatpush1.bf16.msra.mxu1 %v13930_v60 }
 0x3a5   :  { %10874 = vmatpush1.bf16.msra.mxu0 %v14184_v61  ;;  %11326 = vmatprep.subr.bf16.mxu1 %v13939_v5  ;;  %v14217_v61 = vcombine.high %v477_v44, %v481_v45  ;;  %v230_v5 = vld [vmem:[%s22050_s1 + $0x618] sm:$0xff]  ;;  %v509_v44 = vld [vmem:[%s22050_s1 + $0xed0] sm:$0xff] }
 0x3a6   :  { %10875 = vmatprep.subr.bf16.mxu0 %v14193_v1  ;;  %v234_v1 = vld [vmem:[%s22050_s1 + $0x638] sm:$0xff]  ;;  %v513_v45 = vld [vmem:[%s22050_s1 + $0xef0] sm:$0xff] }
 0x3a7   :  { %v13971_v16 = vcombine.high %v230_v5, %v234_v1  ;;  %v13970_v21 = vcombine.low %v230_v5, %v234_v1  ;;  %v521_v5 = vld [vmem:[%s22050_s1 + $0xf30] sm:$0xff] }
 0x3a8   :  { %11327 = vmatpush1.bf16.msra.mxu1 %v13938_v59  ;;  %v14225_v59 = vcombine.high %v485_v2, %v489_v7  ;;  %v14248_v2 = vcombine.low %v509_v44, %v513_v45 }
 0x3a9   :  { %10876 = vmatpush1.bf16.msra.mxu0 %v14192_v9  ;;  %11328 = vmatprep.subr.bf16.mxu1 %v13947_v53  ;;  %v238_v9 = vld [vmem:[%s22050_s1 + $0x658] sm:$0xff] }
 0x3aa   :  { %10877 = vmatprep.subr.bf16.mxu0 %v14201_v20  ;;  %v242_v53 = vld [vmem:[%s22050_s1 + $0x678] sm:$0xff]  ;;  %v497_v20 = vld [vmem:[%s22050_s1 + $0xe70] sm:$0xff] }
 0x3ab   :  { %v10204_v47 = vpop.f32.mrb[0].mxu0  ;;  %v13979_v23 = vcombine.high %v238_v9, %v242_v53  ;;  %v14233_v26 = vcombine.high %v493_v19, %v497_v20 }
 0x3ac   :  { %v19320_v50 = vadd.f32 %v10204_v47, %v9713_v36  ;;  %v10206_v51 = vpop.f32.mrb[1].mxu0  ;;  %11329 = vmatpush1.bf16.msra.mxu1 %v13946_v28  ;;  %v250_v28 = vld [vmem:[%s22050_s1 + $0x6b8] sm:$0xff]  ;;  %v13978_v36 = vcombine.low %v238_v9, %v242_v53  ;;  %v529_v9 = vld [vmem:[%s22050_s1 + $0xf70] sm:$0xff] }
 0x3ad   :  { %v19322_v56 = vadd.f32 %v10206_v51, %v9715_v42  ;;  %v10208_v13 = vpop.f32.mrb[2].mxu0  ;;  %10878 = vmatpush1.bf16.msra.mxu0 %v14200_v33  ;;  %11330 = vmatprep.subr.bf16.mxu1 %v13955_v35  ;;  %v501_v33 = vld [vmem:[%s22050_s1 + $0xe90] sm:$0xff]  ;;  %v13987_v37 = vcombine.high %v246_v27, %v250_v28  ;;  %v254_v42 = vld [vmem:[%s22050_s1 + $0x6d8] sm:$0xff]  ;;  %v13986_v51 = vcombine.low %v246_v27, %v250_v28 }
 0x3ae   :  { %v10209_v60 = vpop.f32.mrb[3].mxu0  ;;  %10879 = vmatprep.subr.bf16.mxu0 %v14209_v22  ;;  %v505_v35 = vld [vmem:[%s22050_s1 + $0xeb0] sm:$0xff]  ;;  %v14232_v22 = vcombine.low %v493_v19, %v497_v20  ;;  %v258_v47 = vld [vmem:[%s22050_s1 + $0x6f8] sm:$0xff] }
 0x3af   :  { %v14241_v41 = vcombine.high %v501_v33, %v505_v35  ;;  %v13995_v13 = vcombine.high %v254_v42, %v258_v47  ;;  %v266_v60 = vld [vmem:[%s22050_s1 + $0x738] sm:$0xff]  ;;  %v13994_v1 = vcombine.low %v254_v42, %v258_v47  ;;  %v537_v27 = vld [vmem:[%s22050_s1 + $0xfb0] sm:$0xff] }
 0x3b0   :  { %11331 = vmatpush1.bf16.msra.mxu1 %v13954_v55  ;;  %v14240_v55 = vcombine.low %v501_v33, %v505_v35  ;;  %v545_v42 = vld [vmem:[%s22050_s1 + $0xff0] sm:$0xff] }
 0x3b1   :  { %10880 = vmatpush1.bf16.msra.mxu0 %v14208_v14  ;;  %11332 = vmatprep.subr.bf16.mxu1 %v13963_v49  ;;  %v14249_v14 = vcombine.high %v509_v44, %v513_v45  ;;  %v262_v49 = vld [vmem:[%s22050_s1 + $0x718] sm:$0xff] }
 0x3b2   :  { %10881 = vmatprep.subr.bf16.mxu0 %v14217_v61  ;;  %v517_v61 = vld [vmem:[%s22050_s1 + $0xf10] sm:$0xff]  ;;  %v14003_v7 = vcombine.high %v262_v49, %v266_v60  ;;  %v14002_v53 = vcombine.low %v262_v49, %v266_v60 }
 0x3b3   :  { %v14256_v19 = vcombine.low %v517_v61, %v521_v5  ;;  %v553_v49 = vld [vmem:[%s22050_s1 + $0x1030] sm:$0xff] }
 0x3b4   :  { %11333 = vmatpush1.bf16.msra.mxu1 %v13962_v10  ;;  %v14257_v10 = vcombine.high %v517_v61, %v521_v5 }
 0x3b5   :  { %10882 = vmatpush1.bf16.msra.mxu0 %v14216_v12  ;;  %11334 = vmatprep.subr.bf16.mxu1 %v13971_v16  ;;  %v270_v12 = vld [vmem:[%s22050_s1 + $0x758] sm:$0xff] }
 0x3b6   :  { %10883 = vmatprep.subr.bf16.mxu0 %v14225_v59  ;;  %v274_v16 = vld [vmem:[%s22050_s1 + $0x778] sm:$0xff]  ;;  %v525_v59 = vld [vmem:[%s22050_s1 + $0xf50] sm:$0xff] }
 0x3b7   :  { %v14011_v20 = vcombine.high %v270_v12, %v274_v16  ;;  %v14010_v28 = vcombine.low %v270_v12, %v274_v16  ;;  %v14264_v33 = vcombine.low %v525_v59, %v529_v9  ;;  %v561_v12 = vld [vmem:[%s22050_s1 + $0x1070] sm:$0xff] }
 0x3b8   :  { %11335 = vmatpush1.bf16.msra.mxu1 %v13970_v21  ;;  %v14265_v21 = vcombine.high %v525_v59, %v529_v9 }
 0x3b9   :  { %10884 = vmatpush1.bf16.msra.mxu0 %v14224_v58  ;;  %11336 = vmatprep.subr.bf16.mxu1 %v13979_v23  ;;  %v278_v58 = vld [vmem:[%s22050_s1 + $0x798] sm:$0xff] }
 0x3ba   :  { %10885 = vmatprep.subr.bf16.mxu0 %v14233_v26  ;;  %v282_v23 = vld [vmem:[%s22050_s1 + $0x7b8] sm:$0xff]  ;;  %v533_v26 = vld [vmem:[%s22050_s1 + $0xf90] sm:$0xff] }
 0x3bb   :  { %v14019_v35 = vcombine.high %v278_v58, %v282_v23  ;;  %v14018_v47 = vcombine.low %v278_v58, %v282_v23  ;;  %v14272_v44 = vcombine.low %v533_v26, %v537_v27  ;;  %v569_v58 = vld [vmem:[%s22050_s1 + $0x10b0] sm:$0xff] }
 0x3bc   :  { %11337 = vmatpush1.bf16.msra.mxu1 %v13978_v36  ;;  %v14273_v36 = vcombine.high %v533_v26, %v537_v27 }
 0x3bd   :  { %10886 = vmatpush1.bf16.msra.mxu0 %v14232_v22  ;;  %11338 = vmatprep.subr.bf16.mxu1 %v13987_v37  ;;  %v286_v22 = vld [vmem:[%s22050_s1 + $0x7d8] sm:$0xff] }
 0x3be   :  { %10887 = vmatprep.subr.bf16.mxu0 %v14241_v41  ;;  %v290_v37 = vld [vmem:[%s22050_s1 + $0x7f8] sm:$0xff]  ;;  %v541_v41 = vld [vmem:[%s22050_s1 + $0xfd0] sm:$0xff] }
 0x3bf   :  { %v14027_v45 = vcombine.high %v286_v22, %v290_v37  ;;  %v14026_v60 = vcombine.low %v286_v22, %v290_v37  ;;  %v14280_v61 = vcombine.low %v541_v41, %v545_v42 }
 0x3c0   :  { %11339 = vmatpush1.bf16.msra.mxu1 %v13986_v51  ;;  %v14281_v51 = vcombine.high %v541_v41, %v545_v42 }
 0x3c1   :  { %10888 = vmatpush1.bf16.msra.mxu0 %v14240_v55  ;;  %11340 = vmatprep.subr.bf16.mxu1 %v13995_v13  ;;  %v294_v55 = vld [vmem:[%s22050_s1 + $0x818] sm:$0xff] }
 0x3c2   :  { %10889 = vmatprep.subr.bf16.mxu0 %v14249_v14  ;;  %v298_v13 = vld [vmem:[%s22050_s1 + $0x838] sm:$0xff]  ;;  %v549_v14 = vld [vmem:[%s22050_s1 + $0x1010] sm:$0xff] }
 0x3c3   :  { %v14035_v5 = vcombine.high %v294_v55, %v298_v13  ;;  %v14034_v16 = vcombine.low %v294_v55, %v298_v13  ;;  %v14288_v59 = vcombine.low %v549_v14, %v553_v49 }
 0x3c4   :  { %11341 = vmatpush1.bf16.msra.mxu1 %v13994_v1  ;;  %v14289_v1 = vcombine.high %v549_v14, %v553_v49  ;;  %v334_v49 = vld [vmem:[%s22050_s1 + $0x958] sm:$0xff] }
 0x3c5   :  { %10890 = vmatpush1.bf16.msra.mxu0 %v14248_v2  ;;  %11342 = vmatprep.subr.bf16.mxu1 %v14003_v7  ;;  %v302_v2 = vld [vmem:[%s22050_s1 + $0x858] sm:$0xff] }
 0x3c6   :  { %10891 = vmatprep.subr.bf16.mxu0 %v14257_v10  ;;  %v306_v7 = vld [vmem:[%s22050_s1 + $0x878] sm:$0xff]  ;;  %v557_v10 = vld [vmem:[%s22050_s1 + $0x1050] sm:$0xff] }
 0x3c7   :  { %v14043_v9 = vcombine.high %v302_v2, %v306_v7  ;;  %v14042_v23 = vcombine.low %v302_v2, %v306_v7  ;;  %v14296_v26 = vcombine.low %v557_v10, %v561_v12 }
 0x3c8   :  { %11343 = vmatpush1.bf16.msra.mxu1 %v14002_v53  ;;  %v14297_v53 = vcombine.high %v557_v10, %v561_v12  ;;  %v342_v12 = vld [vmem:[%s22050_s1 + $0x998] sm:$0xff] }
 0x3c9   :  { %10892 = vmatpush1.bf16.msra.mxu0 %v14256_v19  ;;  %11344 = vmatprep.subr.bf16.mxu1 %v14011_v20  ;;  %v310_v19 = vld [vmem:[%s22050_s1 + $0x898] sm:$0xff] }
 0x3ca   :  { %10893 = vmatprep.subr.bf16.mxu0 %v14265_v21  ;;  %v314_v20 = vld [vmem:[%s22050_s1 + $0x8b8] sm:$0xff]  ;;  %v565_v21 = vld [vmem:[%s22050_s1 + $0x1090] sm:$0xff] }
 0x3cb   :  { %v14051_v27 = vcombine.high %v310_v19, %v314_v20  ;;  %v14050_v22 = vcombine.low %v310_v19, %v314_v20  ;;  %v14304_v37 = vcombine.low %v565_v21, %v569_v58 }
 0x3cc   :  { %11345 = vmatpush1.bf16.msra.mxu1 %v14010_v28  ;;  %v14305_v28 = vcombine.high %v565_v21, %v569_v58  ;;  %v350_v58 = vld [vmem:[%s22050_s1 + $0x9d8] sm:$0xff] }
 0x3cd   :  { %10894 = vmatpush1.bf16.msra.mxu0 %v14264_v33  ;;  %11346 = vmatprep.subr.bf16.mxu1 %v14019_v35  ;;  %v322_v33 = vld [vmem:[%s22050_s1 + $0x8f8] sm:$0xff]  ;;  %v573_v35 = vld [vmem:[%s22050_s1 + $0x10d0] sm:$0xff] }
 0x3ce   :  { %10895 = vmatprep.subr.bf16.mxu0 %v14273_v36  ;;  %v577_v36 = vld [vmem:[%s22050_s1 + $0x10f0] sm:$0xff] }
 0x3cf   :  { %v14313_v42 = vcombine.high %v573_v35, %v577_v36  ;;  %v14312_v55 = vcombine.low %v573_v35, %v577_v36  ;;  %v358_v36 = vld [vmem:[%s22050_s1 + $0xa18] sm:$0xff] }
 0x3d0   :  { %11347 = vmatpush1.bf16.msra.mxu1 %v14018_v47  ;;  %v326_v47 = vld [vmem:[%s22050_s1 + $0x918] sm:$0xff] }
 0x3d1   :  { %10896 = vmatpush1.bf16.msra.mxu0 %v14272_v44  ;;  %11348 = vmatprep.subr.bf16.mxu1 %v14027_v45  ;;  %v330_v44 = vld [vmem:[%s22050_s1 + $0x938] sm:$0xff]  ;;  %v585_v45 = vld [vmem:[%s22050_s1 + $0x1130] sm:$0xff] }
 0x3d2   :  { %10897 = vmatprep.subr.bf16.mxu0 %v14281_v51  ;;  %v14067_v13 = vcombine.high %v326_v47, %v330_v44 }
 0x3d4   :  { %11349 = vmatpush1.bf16.msra.mxu1 %v14026_v60  ;;  %v338_v60 = vld [vmem:[%s22050_s1 + $0x978] sm:$0xff] }
 0x3d5   :  { %10898 = vmatpush1.bf16.msra.mxu0 %v14280_v61  ;;  %11359 = vmatprep.subr.bf16.mxu1 %v14035_v5  ;;  %v589_v61 = vld [vmem:[%s22050_s1 + $0x1150] sm:$0xff]  ;;  %v14075_v7 = vcombine.high %v334_v49, %v338_v60 }
 0x3d6   :  { %10908 = vmatprep.subr.bf16.mxu0 %v14289_v1  ;;  %v593_v5 = vld [vmem:[%s22050_s1 + $0x1170] sm:$0xff]  ;;  %v14066_v1 = vcombine.low %v326_v47, %v330_v44 }
 0x3d7   :  { %11351 = vmatmul.mubr.bf16.vlgmr.msra.gmra.mrb[8].mxu1 %v16508_v31  ;;  %v318_v31 = vld [vmem:[%s22050_s1 + $0x8d8] sm:$0xff]  ;;  %v14329_v10 = vcombine.high %v589_v61, %v593_v5  ;;  %v14328_v19 = vcombine.low %v589_v61, %v593_v5 }
 0x3d8   :  { %10900 = vmatmul.mubr.bf16.vlgmr.msra.gmra.mrb[4].mxu0 %v16926_v17  ;;  %11360 = vmatpush1.bf16.msra.mxu1 %v14034_v16  ;;  %v14059_v41 = vcombine.high %v318_v31, %v322_v33  ;;  %v14058_v51 = vcombine.low %v318_v31, %v322_v33  ;;  %v346_v16 = vld [vmem:[%s22050_s1 + $0x9b8] sm:$0xff] }
 0x3d9   :  { %10909 = vmatpush1.bf16.msra.mxu0 %v14288_v59  ;;  %11361 = vmatprep.subr.bf16.mxu1 %v14043_v9  ;;  %v597_v59 = vld [vmem:[%s22050_s1 + $0x1190] sm:$0xff]  ;;  %v14083_v20 = vcombine.high %v342_v12, %v346_v16  ;;  %v374_v5 = vld [vmem:[%s22050_s1 + $0xa98] sm:$0xff] }
 0x3da   :  { %10910 = vmatprep.subr.bf16.mxu0 %v14297_v53  ;;  %10940 = vmatprep.mubr.bf16.mxu0 %v16935_v25  ;;  %v601_v9 = vld [vmem:[%s22050_s1 + $0x11b0] sm:$0xff]  ;;  %v14074_v53 = vcombine.low %v334_v49, %v338_v60 }
 0x3db   :  { %11391 = vmatprep.mubr.bf16.mxu1 %v16523_v40  ;;  %v581_v40 = vld [vmem:[%s22050_s1 + $0x1110] sm:$0xff]  ;;  %v14337_v21 = vcombine.high %v597_v59, %v601_v9  ;;  %v14336_v31 = vcombine.low %v597_v59, %v601_v9  ;;  %v382_v9 = vld [vmem:[%s22050_s1 + $0xad8] sm:$0xff] }
 0x3dc   :  { %11362 = vmatpush1.bf16.msra.mxu1 %v14042_v23  ;;  %v14321_v14 = vcombine.high %v581_v40, %v585_v45  ;;  %v14320_v2 = vcombine.low %v581_v40, %v585_v45  ;;  %v354_v23 = vld [vmem:[%s22050_s1 + $0x9f8] sm:$0xff] }
 0x3dd   :  { %10911 = vmatpush1.bf16.msra.mxu0 %v14296_v26  ;;  %11363 = vmatprep.subr.bf16.mxu1 %v14051_v27  ;;  %v605_v26 = vld [vmem:[%s22050_s1 + $0x11d0] sm:$0xff]  ;;  %v14091_v33 = vcombine.high %v350_v58, %v354_v23  ;;  %v366_v45 = vld [vmem:[%s22050_s1 + $0xa58] sm:$0xff] }
 0x3de   :  { %10912 = vmatprep.subr.bf16.mxu0 %v14305_v28  ;;  %v609_v27 = vld [vmem:[%s22050_s1 + $0x11f0] sm:$0xff]  ;;  %v14082_v28 = vcombine.low %v342_v12, %v346_v16 }
 0x3df   :  { %v14345_v35 = vcombine.high %v605_v26, %v609_v27  ;;  %v14344_v47 = vcombine.low %v605_v26, %v609_v27  ;;  %v390_v27 = vld [vmem:[%s22050_s1 + $0xb18] sm:$0xff] }
 0x3e0   :  { %11364 = vmatpush1.bf16.msra.mxu1 %v14050_v22  ;;  %v362_v22 = vld [vmem:[%s22050_s1 + $0xa38] sm:$0xff] }
 0x3e1   :  { %10913 = vmatpush1.bf16.msra.mxu0 %v14304_v37  ;;  %11365 = vmatprep.subr.bf16.mxu1 %v14059_v41  ;;  %v613_v37 = vld [vmem:[%s22050_s1 + $0x1210] sm:$0xff]  ;;  %v14099_v44 = vcombine.high %v358_v36, %v362_v22 }
 0x3e2   :  { %10914 = vmatprep.subr.bf16.mxu0 %v14313_v42  ;;  %v617_v41 = vld [vmem:[%s22050_s1 + $0x1230] sm:$0xff]  ;;  %v14090_v42 = vcombine.low %v350_v58, %v354_v23 }
 0x3e3   :  { %v14353_v40 = vcombine.high %v613_v37, %v617_v41  ;;  %v14352_v49 = vcombine.low %v613_v37, %v617_v41  ;;  %v398_v41 = vld [vmem:[%s22050_s1 + $0xb58] sm:$0xff] }
 0x3e4   :  { %11366 = vmatpush1.bf16.msra.mxu1 %v14058_v51  ;;  %v370_v51 = vld [vmem:[%s22050_s1 + $0xa78] sm:$0xff] }
 0x3e5   :  { %10915 = vmatpush1.bf16.msra.mxu0 %v14312_v55  ;;  %11367 = vmatprep.subr.bf16.mxu1 %v14067_v13  ;;  %v621_v55 = vld [vmem:[%s22050_s1 + $0x1250] sm:$0xff]  ;;  %v14107_v60 = vcombine.high %v366_v45, %v370_v51 }
 0x3e6   :  { %10916 = vmatprep.subr.bf16.mxu0 %v14321_v14  ;;  %v625_v13 = vld [vmem:[%s22050_s1 + $0x1270] sm:$0xff]  ;;  %v14098_v14 = vcombine.low %v358_v36, %v362_v22 }
 0x3e7   :  { %v14361_v61 = vcombine.high %v621_v55, %v625_v13  ;;  %v14360_v12 = vcombine.low %v621_v55, %v625_v13  ;;  %v406_v13 = vld [vmem:[%s22050_s1 + $0xb98] sm:$0xff] }
 0x3e8   :  { %11368 = vmatpush1.bf16.msra.mxu1 %v14066_v1  ;;  %v378_v1 = vld [vmem:[%s22050_s1 + $0xab8] sm:$0xff] }
 0x3e9   :  { %10917 = vmatpush1.bf16.msra.mxu0 %v14320_v2  ;;  %11369 = vmatprep.subr.bf16.mxu1 %v14075_v7  ;;  %v629_v2 = vld [vmem:[%s22050_s1 + $0x1290] sm:$0xff]  ;;  %v14115_v16 = vcombine.high %v374_v5, %v378_v1 }
 0x3ea   :  { %10918 = vmatprep.subr.bf16.mxu0 %v14329_v10  ;;  %v633_v7 = vld [vmem:[%s22050_s1 + $0x12b0] sm:$0xff]  ;;  %v14106_v10 = vcombine.low %v366_v45, %v370_v51 }
 0x3eb   :  { %v14369_v59 = vcombine.high %v629_v2, %v633_v7  ;;  %v14368_v58 = vcombine.low %v629_v2, %v633_v7  ;;  %v414_v7 = vld [vmem:[%s22050_s1 + $0xbd8] sm:$0xff] }
 0x3ec   :  { %11370 = vmatpush1.bf16.msra.mxu1 %v14074_v53  ;;  %v386_v53 = vld [vmem:[%s22050_s1 + $0xaf8] sm:$0xff] }
 0x3ed   :  { %10919 = vmatpush1.bf16.msra.mxu0 %v14328_v19  ;;  %11371 = vmatprep.subr.bf16.mxu1 %v14083_v20  ;;  %v637_v19 = vld [vmem:[%s22050_s1 + $0x12d0] sm:$0xff]  ;;  %v14123_v23 = vcombine.high %v382_v9, %v386_v53 }
 0x3ee   :  { %10920 = vmatprep.subr.bf16.mxu0 %v14337_v21  ;;  %v641_v20 = vld [vmem:[%s22050_s1 + $0x12f0] sm:$0xff]  ;;  %v14114_v21 = vcombine.low %v374_v5, %v378_v1 }
 0x3ef   :  { %v14377_v26 = vcombine.high %v637_v19, %v641_v20  ;;  %v14376_v36 = vcombine.low %v637_v19, %v641_v20  ;;  %v422_v20 = vld [vmem:[%s22050_s1 + $0xc18] sm:$0xff] }
 0x3f0   :  { %11372 = vmatpush1.bf16.msra.mxu1 %v14082_v28  ;;  %v394_v28 = vld [vmem:[%s22050_s1 + $0xb38] sm:$0xff] }
 0x3f1   :  { %10921 = vmatpush1.bf16.msra.mxu0 %v14336_v31  ;;  %11373 = vmatprep.subr.bf16.mxu1 %v14091_v33  ;;  %v645_v31 = vld [vmem:[%s22050_s1 + $0x1310] sm:$0xff]  ;;  %v14131_v22 = vcombine.high %v390_v27, %v394_v28 }
 0x3f2   :  { %10922 = vmatprep.subr.bf16.mxu0 %v14345_v35  ;;  %v649_v33 = vld [vmem:[%s22050_s1 + $0x1330] sm:$0xff]  ;;  %v14122_v35 = vcombine.low %v382_v9, %v386_v53 }
 0x3f3   :  { %v14385_v37 = vcombine.high %v645_v31, %v649_v33  ;;  %v14384_v45 = vcombine.low %v645_v31, %v649_v33  ;;  %v430_v33 = vld [vmem:[%s22050_s1 + $0xc58] sm:$0xff] }
 0x3f4   :  { %11374 = vmatpush1.bf16.msra.mxu1 %v14090_v42  ;;  %v402_v42 = vld [vmem:[%s22050_s1 + $0xb78] sm:$0xff] }
 0x3f5   :  { %10923 = vmatpush1.bf16.msra.mxu0 %v14344_v47  ;;  %11375 = vmatprep.subr.bf16.mxu1 %v14099_v44  ;;  %v653_v47 = vld [vmem:[%s22050_s1 + $0x1350] sm:$0xff]  ;;  %v14139_v51 = vcombine.high %v398_v41, %v402_v42 }
 0x3f6   :  { %10924 = vmatprep.subr.bf16.mxu0 %v14353_v40  ;;  %v657_v44 = vld [vmem:[%s22050_s1 + $0x1370] sm:$0xff]  ;;  %v14130_v40 = vcombine.low %v390_v27, %v394_v28 }
 0x3f7   :  { %v14393_v55 = vcombine.high %v653_v47, %v657_v44  ;;  %v14392_v5 = vcombine.low %v653_v47, %v657_v44  ;;  %v438_v44 = vld [vmem:[%s22050_s1 + $0xc98] sm:$0xff] }
 0x3f8   :  { %11376 = vmatpush1.bf16.msra.mxu1 %v14098_v14  ;;  %v410_v14 = vld [vmem:[%s22050_s1 + $0xbb8] sm:$0xff] }
 0x3f9   :  { %10925 = vmatpush1.bf16.msra.mxu0 %v14352_v49  ;;  %11377 = vmatprep.subr.bf16.mxu1 %v14107_v60  ;;  %v661_v49 = vld [vmem:[%s22050_s1 + $0x1390] sm:$0xff]  ;;  %v14147_v1 = vcombine.high %v406_v13, %v410_v14 }
 0x3fa   :  { %10926 = vmatprep.subr.bf16.mxu0 %v14361_v61  ;;  %v665_v60 = vld [vmem:[%s22050_s1 + $0x13b0] sm:$0xff]  ;;  %v14138_v61 = vcombine.low %v398_v41, %v402_v42 }
 0x3fb   :  { %v14401_v2 = vcombine.high %v661_v49, %v665_v60  ;;  %v14400_v9 = vcombine.low %v661_v49, %v665_v60  ;;  %v450_v60 = vld [vmem:[%s22050_s1 + $0xcf8] sm:$0xff] }
 0x3fc   :  { %11378 = vmatpush1.bf16.msra.mxu1 %v14106_v10  ;;  %v418_v10 = vld [vmem:[%s22050_s1 + $0xbf8] sm:$0xff] }
 0x3fd   :  { %10927 = vmatpush1.bf16.msra.mxu0 %v14360_v12  ;;  %11379 = vmatprep.subr.bf16.mxu1 %v14115_v16  ;;  %v669_v12 = vld [vmem:[%s22050_s1 + $0x13d0] sm:$0xff]  ;;  %v14155_v53 = vcombine.high %v414_v7, %v418_v10 }
 0x3fe   :  { %10928 = vmatprep.subr.bf16.mxu0 %v14369_v59  ;;  %v673_v16 = vld [vmem:[%s22050_s1 + $0x13f0] sm:$0xff]  ;;  %v14146_v59 = vcombine.low %v406_v13, %v410_v14 }
 0x3ff   :  { %v14409_v19 = vcombine.high %v669_v12, %v673_v16  ;;  %v14408_v27 = vcombine.low %v669_v12, %v673_v16  ;;  %v454_v12 = vld [vmem:[%s22050_s1 + $0xd18] sm:$0xff] }
 0x400   :  { %11380 = vmatpush1.bf16.msra.mxu1 %v14114_v21  ;;  %v426_v21 = vld [vmem:[%s22050_s1 + $0xc38] sm:$0xff] }
 0x401   :  { %10929 = vmatpush1.bf16.msra.mxu0 %v14368_v58  ;;  %11381 = vmatprep.subr.bf16.mxu1 %v14123_v23  ;;  %v677_v58 = vld [vmem:[%s22050_s1 + $0x1410] sm:$0xff]  ;;  %v14163_v28 = vcombine.high %v422_v20, %v426_v21  ;;  %v458_v16 = vld [vmem:[%s22050_s1 + $0xd38] sm:$0xff] }
 0x402   :  { %10930 = vmatprep.subr.bf16.mxu0 %v14377_v26  ;;  %v681_v23 = vld [vmem:[%s22050_s1 + $0x1430] sm:$0xff]  ;;  %v14154_v26 = vcombine.low %v414_v7, %v418_v10 }
 0x403   :  { %v14417_v31 = vcombine.high %v677_v58, %v681_v23  ;;  %v14416_v41 = vcombine.low %v677_v58, %v681_v23  ;;  %v466_v58 = vld [vmem:[%s22050_s1 + $0xd78] sm:$0xff]  ;;  %v717_v23 = vld [vmem:[%s22050_s1 + $0x1550] sm:$0xff] }
 0x404   :  { %11382 = vmatpush1.bf16.msra.mxu1 %v14122_v35  ;;  %v434_v35 = vld [vmem:[%s22050_s1 + $0xc78] sm:$0xff] }
 0x405   :  { %10931 = vmatpush1.bf16.msra.mxu0 %v14376_v36  ;;  %11383 = vmatprep.subr.bf16.mxu1 %v14131_v22  ;;  %v685_v36 = vld [vmem:[%s22050_s1 + $0x1450] sm:$0xff]  ;;  %v14171_v42 = vcombine.high %v430_v33, %v434_v35 }
 0x406   :  { %10932 = vmatprep.subr.bf16.mxu0 %v14385_v37  ;;  %v689_v22 = vld [vmem:[%s22050_s1 + $0x1470] sm:$0xff]  ;;  %v14162_v37 = vcombine.low %v422_v20, %v426_v21  ;;  %v462_v21 = vld [vmem:[%s22050_s1 + $0xd58] sm:$0xff] }
 0x407   :  { %v14425_v47 = vcombine.high %v685_v36, %v689_v22  ;;  %v14424_v13 = vcombine.low %v685_v36, %v689_v22  ;;  %v474_v36 = vld [vmem:[%s22050_s1 + $0xdb8] sm:$0xff]  ;;  %v725_v22 = vld [vmem:[%s22050_s1 + $0x1590] sm:$0xff] }
 0x408   :  { %11384 = vmatpush1.bf16.msra.mxu1 %v14130_v40  ;;  %v442_v40 = vld [vmem:[%s22050_s1 + $0xcb8] sm:$0xff] }
 0x409   :  { %10933 = vmatpush1.bf16.msra.mxu0 %v14384_v45  ;;  %11385 = vmatprep.subr.bf16.mxu1 %v14139_v51  ;;  %v693_v45 = vld [vmem:[%s22050_s1 + $0x1490] sm:$0xff]  ;;  %v14179_v14 = vcombine.high %v438_v44, %v442_v40 }
 0x40a   :  { %10934 = vmatprep.subr.bf16.mxu0 %v14393_v55  ;;  %v697_v51 = vld [vmem:[%s22050_s1 + $0x14b0] sm:$0xff]  ;;  %v14170_v55 = vcombine.low %v430_v33, %v434_v35  ;;  %v470_v35 = vld [vmem:[%s22050_s1 + $0xd98] sm:$0xff] }
 0x40b   :  { %v14433_v49 = vcombine.high %v693_v45, %v697_v51 }
 0x40c   :  { %11386 = vmatpush1.bf16.msra.mxu1 %v14138_v61  ;;  %v701_v61 = vld [vmem:[%s22050_s1 + $0x14d0] sm:$0xff] }
 0x40d   :  { %10935 = vmatpush1.bf16.msra.mxu0 %v14392_v5  ;;  %11387 = vmatprep.subr.bf16.mxu1 %v14147_v1  ;;  %v705_v5 = vld [vmem:[%s22050_s1 + $0x14f0] sm:$0xff]  ;;  %v14178_v1 = vcombine.low %v438_v44, %v442_v40 }
 0x40e   :  { %10936 = vmatprep.subr.bf16.mxu0 %v14401_v2  ;;  %v14432_v2 = vcombine.low %v693_v45, %v697_v51  ;;  %v14441_v10 = vcombine.high %v701_v61, %v705_v5  ;;  %v478_v45 = vld [vmem:[%s22050_s1 + $0xdd8] sm:$0xff] }
 0x40f   :  { %v482_v51 = vld [vmem:[%s22050_s1 + $0xdf8] sm:$0xff] }
 0x410   :  { %11388 = vmatpush1.bf16.msra.mxu1 %v14146_v59  ;;  %v713_v59 = vld [vmem:[%s22050_s1 + $0x1530] sm:$0xff] }
 0x411   :  { %10937 = vmatpush1.bf16.msra.mxu0 %v14400_v9  ;;  %11389 = vmatprep.subr.bf16.mxu1 %v14155_v53  ;;  %v14440_v53 = vcombine.low %v701_v61, %v705_v5  ;;  %v14219_v5 = vcombine.high %v478_v45, %v482_v51 }
 0x412   :  { %10938 = vmatprep.subr.bf16.mxu0 %v14409_v19  ;;  %v14195_v19 = vcombine.high %v454_v12, %v458_v16 }
 0x414   :  { %11390 = vmatpush1.bf16.msra.mxu1 %v14154_v26  ;;  %v721_v26 = vld [vmem:[%s22050_s1 + $0x1570] sm:$0xff] }
 0x415   :  { %10939 = vmatpush1.bf16.msra.mxu0 %v14408_v27  ;;  %11400 = vmatprep.subr.bf16.mxu1 %v14163_v28  ;;  %v14194_v27 = vcombine.low %v454_v12, %v458_v16  ;;  %v14457_v33 = vcombine.high %v717_v23, %v721_v26  ;;  %v745_v12 = vld [vmem:[%s22050_s1 + $0x1630] sm:$0xff]  ;;  %v14218_v16 = vcombine.low %v478_v45, %v482_v51 }
 0x416   :  { %10949 = vmatprep.subr.bf16.mxu0 %v14417_v31  ;;  %v14203_v31 = vcombine.high %v462_v21, %v466_v58  ;;  %v769_v45 = vld [vmem:[%s22050_s1 + $0x16f0] sm:$0xff] }
 0x417   :  { %11392 = vmatmul.mubr.bf16.vlgmr.msra.gmra.mrb[8].mxu1 %v16711_v54  ;;  %v446_v54 = vld [vmem:[%s22050_s1 + $0xcd8] sm:$0xff] }
 0x418   :  { %10941 = vmatmul.mubr.bf16.vlgmr.msra.gmra.mrb[4].mxu0 %v17129_v52  ;;  %11401 = vmatpush1.bf16.msra.mxu1 %v14162_v37  ;;  %v14187_v7 = vcombine.high %v446_v54, %v450_v60  ;;  %v14186_v9 = vcombine.low %v446_v54, %v450_v60  ;;  %v729_v37 = vld [vmem:[%s22050_s1 + $0x15b0] sm:$0xff]  ;;  %v14210_v54 = vcombine.low %v470_v35, %v474_v36 }
 0x419   :  { %10950 = vmatpush1.bf16.msra.mxu0 %v14416_v41  ;;  %11402 = vmatprep.subr.bf16.mxu1 %v14171_v42  ;;  %v14202_v41 = vcombine.low %v462_v21, %v466_v58  ;;  %v14456_v42 = vcombine.low %v717_v23, %v721_v26  ;;  %v14465_v40 = vcombine.high %v725_v22, %v729_v37  ;;  %v753_v21 = vld [vmem:[%s22050_s1 + $0x1670] sm:$0xff] }
 0x41a   :  { %10951 = vmatprep.subr.bf16.mxu0 %v14425_v47  ;;  %10981 = vmatprep.mubr.bf16.mxu0 %v17139_v18  ;;  %v14211_v47 = vcombine.high %v470_v35, %v474_v36  ;;  %v14464_v61 = vcombine.low %v725_v22, %v729_v37  ;;  %v761_v35 = vld [vmem:[%s22050_s1 + $0x16b0] sm:$0xff] }
 0x41b   :  { %11432 = vmatprep.mubr.bf16.mxu1 %v16727_v62  ;;  %v709_v62 = vld [vmem:[%s22050_s1 + $0x1510] sm:$0xff] }
 0x41c   :  { %11403 = vmatpush1.bf16.msra.mxu1 %v14170_v55  ;;  %v14449_v20 = vcombine.high %v709_v62, %v713_v59  ;;  %v14448_v28 = vcombine.low %v709_v62, %v713_v59 }
 0x41d   :  { %10952 = vmatpush1.bf16.msra.mxu0 %v14424_v13  ;;  %11404 = vmatprep.subr.bf16.mxu1 %v14179_v14  ;;  %v733_v13 = vld [vmem:[%s22050_s1 + $0x15d0] sm:$0xff] }
 0x41e   :  { %10953 = vmatprep.subr.bf16.mxu0 %v14433_v49  ;;  %v737_v14 = vld [vmem:[%s22050_s1 + $0x15f0] sm:$0xff] }
 0x41f   :  { %v14472_v62 = vcombine.low %v733_v13, %v737_v14 }
 0x420   :  { %11405 = vmatpush1.bf16.msra.mxu1 %v14178_v1  ;;  %v14473_v1 = vcombine.high %v733_v13, %v737_v14 }
 0x421   :  { %10954 = vmatpush1.bf16.msra.mxu0 %v14432_v2  ;;  %11406 = vmatprep.subr.bf16.mxu1 %v14187_v7  ;;  %v486_v2 = vld [vmem:[%s22050_s1 + $0xe18] sm:$0xff] }
 0x422   :  { %10955 = vmatprep.subr.bf16.mxu0 %v14441_v10  ;;  %v490_v7 = vld [vmem:[%s22050_s1 + $0xe38] sm:$0xff]  ;;  %v741_v10 = vld [vmem:[%s22050_s1 + $0x1610] sm:$0xff] }
 0x423   :  { %v14227_v59 = vcombine.high %v486_v2, %v490_v7  ;;  %v14226_v58 = vcombine.low %v486_v2, %v490_v7  ;;  %v14480_v23 = vcombine.low %v741_v10, %v745_v12 }
 0x424   :  { %11407 = vmatpush1.bf16.msra.mxu1 %v14186_v9  ;;  %v14481_v9 = vcombine.high %v741_v10, %v745_v12  ;;  %v526_v12 = vld [vmem:[%s22050_s1 + $0xf58] sm:$0xff] }
 0x425   :  { %10956 = vmatpush1.bf16.msra.mxu0 %v14440_v53  ;;  %11408 = vmatprep.subr.bf16.mxu1 %v14195_v19  ;;  %v494_v53 = vld [vmem:[%s22050_s1 + $0xe58] sm:$0xff] }
 0x426   :  { %10957 = vmatprep.subr.bf16.mxu0 %v14449_v20  ;;  %v498_v19 = vld [vmem:[%s22050_s1 + $0xe78] sm:$0xff]  ;;  %v749_v20 = vld [vmem:[%s22050_s1 + $0x1650] sm:$0xff] }
 0x427   :  { %v14235_v26 = vcombine.high %v494_v53, %v498_v19  ;;  %v14234_v36 = vcombine.low %v494_v53, %v498_v19  ;;  %v14488_v22 = vcombine.low %v749_v20, %v753_v21 }
 0x428   :  { %11409 = vmatpush1.bf16.msra.mxu1 %v14194_v27  ;;  %v14489_v27 = vcombine.high %v749_v20, %v753_v21  ;;  %v534_v21 = vld [vmem:[%s22050_s1 + $0xf98] sm:$0xff] }
 0x429   :  { %10958 = vmatpush1.bf16.msra.mxu0 %v14448_v28  ;;  %11410 = vmatprep.subr.bf16.mxu1 %v14203_v31  ;;  %v502_v28 = vld [vmem:[%s22050_s1 + $0xe98] sm:$0xff] }
 0x42a   :  { %v19704_v44 = vpop.f32.mrb[4].mxu1  ;;  %10959 = vmatprep.subr.bf16.mxu0 %v14457_v33  ;;  %v506_v31 = vld [vmem:[%s22050_s1 + $0xeb8] sm:$0xff]  ;;  %v757_v33 = vld [vmem:[%s22050_s1 + $0x1690] sm:$0xff] }
 0x42b   :  { %v19712_v55 = vpop.f32.mrb[5].mxu1  ;;  %v14243_v37 = vcombine.high %v502_v28, %v506_v31  ;;  %v14242_v51 = vcombine.low %v502_v28, %v506_v31  ;;  %v14496_v13 = vcombine.low %v757_v33, %v761_v35 }
 0x42c   :  { %v10741_v49 = vpop.f32.mrb[6].mxu1  ;;  %11411 = vmatpush1.bf16.msra.mxu1 %v14202_v41  ;;  %v14497_v41 = vcombine.high %v757_v33, %v761_v35  ;;  %v542_v35 = vld [vmem:[%s22050_s1 + $0xfd8] sm:$0xff] }
 0x42d   :  { %10960 = vmatpush1.bf16.msra.mxu0 %v14456_v42  ;;  %v10742_v60 = vpop.f32.mrb[7].mxu1  ;;  %11412 = vmatprep.subr.bf16.mxu1 %v14211_v47  ;;  %v510_v42 = vld [vmem:[%s22050_s1 + $0xed8] sm:$0xff] }
 0x42e   :  { %10961 = vmatprep.subr.bf16.mxu0 %v14465_v40  ;;  %v514_v47 = vld [vmem:[%s22050_s1 + $0xef8] sm:$0xff]  ;;  %v765_v40 = vld [vmem:[%s22050_s1 + $0x16d0] sm:$0xff] }
 0x42f   :  { %v14251_v14 = vcombine.high %v510_v42, %v514_v47  ;;  %v14505_v49 = vcombine.high %v765_v40, %v769_v45  ;;  %v522_v60 = vld [vmem:[%s22050_s1 + $0xf38] sm:$0xff]  ;;  %v14504_v2 = vcombine.low %v765_v40, %v769_v45 }
 0x430   :  { %11413 = vmatpush1.bf16.msra.mxu1 %v14210_v54  ;;  %v518_v54 = vld [vmem:[%s22050_s1 + $0xf18] sm:$0xff] }
 0x431   :  { %10962 = vmatpush1.bf16.msra.mxu0 %v14464_v61  ;;  %11414 = vmatprep.subr.bf16.mxu1 %v14219_v5  ;;  %v773_v61 = vld [vmem:[%s22050_s1 + $0x1710] sm:$0xff]  ;;  %v14259_v7 = vcombine.high %v518_v54, %v522_v60  ;;  %v550_v45 = vld [vmem:[%s22050_s1 + $0x1018] sm:$0xff] }
 0x432   :  { %10963 = vmatprep.subr.bf16.mxu0 %v14473_v1  ;;  %v777_v5 = vld [vmem:[%s22050_s1 + $0x1730] sm:$0xff]  ;;  %v14250_v1 = vcombine.low %v510_v42, %v514_v47 }
 0x433   :  { %v14513_v10 = vcombine.high %v773_v61, %v777_v5  ;;  %v14512_v53 = vcombine.low %v773_v61, %v777_v5  ;;  %v558_v5 = vld [vmem:[%s22050_s1 + $0x1058] sm:$0xff] }
 0x434   :  { %11415 = vmatpush1.bf16.msra.mxu1 %v14218_v16  ;;  %v530_v16 = vld [vmem:[%s22050_s1 + $0xf78] sm:$0xff] }
 0x435   :  { %10964 = vmatpush1.bf16.msra.mxu0 %v14472_v62  ;;  %11416 = vmatprep.subr.bf16.mxu1 %v14227_v59  ;;  %v781_v62 = vld [vmem:[%s22050_s1 + $0x1750] sm:$0xff]  ;;  %v14267_v19 = vcombine.high %v526_v12, %v530_v16 }
 0x436   :  { %10965 = vmatprep.subr.bf16.mxu0 %v14481_v9  ;;  %v785_v59 = vld [vmem:[%s22050_s1 + $0x1770] sm:$0xff]  ;;  %v14258_v9 = vcombine.low %v518_v54, %v522_v60 }
 0x437   :  { %v14521_v20 = vcombine.high %v781_v62, %v785_v59  ;;  %v14520_v28 = vcombine.low %v781_v62, %v785_v59  ;;  %v566_v59 = vld [vmem:[%s22050_s1 + $0x1098] sm:$0xff] }
 0x438   :  { %11417 = vmatpush1.bf16.msra.mxu1 %v14226_v58  ;;  %v538_v58 = vld [vmem:[%s22050_s1 + $0xfb8] sm:$0xff] }
 0x439   :  { %10966 = vmatpush1.bf16.msra.mxu0 %v14480_v23  ;;  %11418 = vmatprep.subr.bf16.mxu1 %v14235_v26  ;;  %v789_v23 = vld [vmem:[%s22050_s1 + $0x1790] sm:$0xff]  ;;  %v14275_v31 = vcombine.high %v534_v21, %v538_v58 }
 0x43a   :  { %10967 = vmatprep.subr.bf16.mxu0 %v14489_v27  ;;  %v793_v26 = vld [vmem:[%s22050_s1 + $0x17b0] sm:$0xff]  ;;  %v14266_v27 = vcombine.low %v526_v12, %v530_v16 }
 0x43b   :  { %v14529_v33 = vcombine.high %v789_v23, %v793_v26  ;;  %v14528_v42 = vcombine.low %v789_v23, %v793_v26  ;;  %v578_v26 = vld [vmem:[%s22050_s1 + $0x10f8] sm:$0xff] }
 0x43c   :  { %11419 = vmatpush1.bf16.msra.mxu1 %v14234_v36  ;;  %v546_v36 = vld [vmem:[%s22050_s1 + $0xff8] sm:$0xff] }
 0x43d   :  { %10968 = vmatpush1.bf16.msra.mxu0 %v14488_v22  ;;  %11420 = vmatprep.subr.bf16.mxu1 %v14243_v37  ;;  %v797_v22 = vld [vmem:[%s22050_s1 + $0x17d0] sm:$0xff]  ;;  %v14283_v47 = vcombine.high %v542_v35, %v546_v36 }
 0x43e   :  { %10969 = vmatprep.subr.bf16.mxu0 %v14497_v41  ;;  %v801_v37 = vld [vmem:[%s22050_s1 + $0x17f0] sm:$0xff]  ;;  %v14274_v41 = vcombine.low %v534_v21, %v538_v58 }
 0x43f   :  { %v14537_v40 = vcombine.high %v797_v22, %v801_v37  ;;  %v14536_v54 = vcombine.low %v797_v22, %v801_v37  ;;  %v582_v22 = vld [vmem:[%s22050_s1 + $0x1118] sm:$0xff] }
 0x440   :  { %11421 = vmatpush1.bf16.msra.mxu1 %v14242_v51  ;;  %v554_v51 = vld [vmem:[%s22050_s1 + $0x1038] sm:$0xff] }
 0x441   :  { %10970 = vmatpush1.bf16.msra.mxu0 %v14496_v13  ;;  %11422 = vmatprep.subr.bf16.mxu1 %v14251_v14  ;;  %v805_v13 = vld [vmem:[%s22050_s1 + $0x1810] sm:$0xff]  ;;  %v14291_v60 = vcombine.high %v550_v45, %v554_v51  ;;  %v586_v37 = vld [vmem:[%s22050_s1 + $0x1138] sm:$0xff] }
 0x442   :  { %10971 = vmatprep.subr.bf16.mxu0 %v14505_v49  ;;  %v809_v14 = vld [vmem:[%s22050_s1 + $0x1830] sm:$0xff]  ;;  %v14282_v49 = vcombine.low %v542_v35, %v546_v36 }
 0x443   :  { %v14545_v61 = vcombine.high %v805_v13, %v809_v14  ;;  %v14544_v12 = vcombine.low %v805_v13, %v809_v14  ;;  %v594_v13 = vld [vmem:[%s22050_s1 + $0x1178] sm:$0xff]  ;;  %v845_v14 = vld [vmem:[%s22050_s1 + $0x1950] sm:$0xff] }
 0x444   :  { %11423 = vmatpush1.bf16.msra.mxu1 %v14250_v1  ;;  %v562_v1 = vld [vmem:[%s22050_s1 + $0x1078] sm:$0xff] }
 0x445   :  { %10972 = vmatpush1.bf16.msra.mxu0 %v14504_v2  ;;  %11424 = vmatprep.subr.bf16.mxu1 %v14259_v7  ;;  %v813_v2 = vld [vmem:[%s22050_s1 + $0x1850] sm:$0xff]  ;;  %v14299_v16 = vcombine.high %v558_v5, %v562_v1 }
 0x446   :  { %10973 = vmatprep.subr.bf16.mxu0 %v14513_v10  ;;  %v817_v7 = vld [vmem:[%s22050_s1 + $0x1870] sm:$0xff]  ;;  %v14290_v10 = vcombine.low %v550_v45, %v554_v51  ;;  %v590_v51 = vld [vmem:[%s22050_s1 + $0x1158] sm:$0xff] }
 0x447   :  { %v14553_v62 = vcombine.high %v813_v2, %v817_v7  ;;  %v14552_v21 = vcombine.low %v813_v2, %v817_v7  ;;  %v602_v2 = vld [vmem:[%s22050_s1 + $0x11b8] sm:$0xff]  ;;  %v853_v7 = vld [vmem:[%s22050_s1 + $0x1990] sm:$0xff] }
 0x448   :  { %11425 = vmatpush1.bf16.msra.mxu1 %v14258_v9  ;;  %v570_v9 = vld [vmem:[%s22050_s1 + $0x10b8] sm:$0xff] }
 0x449   :  { %10974 = vmatpush1.bf16.msra.mxu0 %v14512_v53  ;;  %11426 = vmatprep.subr.bf16.mxu1 %v14267_v19  ;;  %v821_v53 = vld [vmem:[%s22050_s1 + $0x1890] sm:$0xff]  ;;  %v14307_v58 = vcombine.high %v566_v59, %v570_v9 }
 0x44a   :  { %10975 = vmatprep.subr.bf16.mxu0 %v14521_v20  ;;  %v825_v19 = vld [vmem:[%s22050_s1 + $0x18b0] sm:$0xff]  ;;  %v14298_v20 = vcombine.low %v558_v5, %v562_v1  ;;  %v598_v1 = vld [vmem:[%s22050_s1 + $0x1198] sm:$0xff] }
 0x44b   :  { %v14561_v23 = vcombine.high %v821_v53, %v825_v19 }
 0x44c   :  { %11427 = vmatpush1.bf16.msra.mxu1 %v14266_v27  ;;  %v829_v27 = vld [vmem:[%s22050_s1 + $0x18d0] sm:$0xff] }
 0x44d   :  { %10976 = vmatpush1.bf16.msra.mxu0 %v14520_v28  ;;  %11428 = vmatprep.subr.bf16.mxu1 %v14275_v31  ;;  %v833_v28 = vld [vmem:[%s22050_s1 + $0x18f0] sm:$0xff]  ;;  %v14306_v31 = vcombine.low %v566_v59, %v570_v9  ;;  %v606_v9 = vld [vmem:[%s22050_s1 + $0x11d8] sm:$0xff] }
 0x44e   :  { %10977 = vmatprep.subr.bf16.mxu0 %v14529_v33  ;;  %v14560_v33 = vcombine.low %v821_v53, %v825_v19  ;;  %v14569_v36 = vcombine.high %v829_v27, %v833_v28  ;;  %v610_v53 = vld [vmem:[%s22050_s1 + $0x11f8] sm:$0xff]  ;;  %v861_v19 = vld [vmem:[%s22050_s1 + $0x19d0] sm:$0xff] }
 0x450   :  { %11429 = vmatpush1.bf16.msra.mxu1 %v14274_v41  ;;  %v841_v41 = vld [vmem:[%s22050_s1 + $0x1930] sm:$0xff] }
 0x451   :  { %10978 = vmatpush1.bf16.msra.mxu0 %v14528_v42  ;;  %11430 = vmatprep.subr.bf16.mxu1 %v14283_v47  ;;  %v14568_v47 = vcombine.low %v829_v27, %v833_v28  ;;  %v618_v27 = vld [vmem:[%s22050_s1 + $0x1238] sm:$0xff]  ;;  %v869_v28 = vld [vmem:[%s22050_s1 + $0x1a10] sm:$0xff] }
 0x452   :  { %10979 = vmatprep.subr.bf16.mxu0 %v14537_v40  ;;  %v14323_v40 = vcombine.high %v582_v22, %v586_v37 }
 0x454   :  { %11431 = vmatpush1.bf16.msra.mxu1 %v14282_v49  ;;  %v849_v49 = vld [vmem:[%s22050_s1 + $0x1970] sm:$0xff] }
 0x455   :  { %10980 = vmatpush1.bf16.msra.mxu0 %v14536_v54  ;;  %11441 = vmatprep.subr.bf16.mxu1 %v14291_v60  ;;  %v14322_v54 = vcombine.low %v582_v22, %v586_v37  ;;  %v14585_v5 = vcombine.high %v845_v14, %v849_v49  ;;  %v622_v37 = vld [vmem:[%s22050_s1 + $0x1258] sm:$0xff] }
 0x456   :  { %10990 = vmatprep.subr.bf16.mxu0 %v14545_v61  ;;  %v14331_v61 = vcombine.high %v590_v51, %v594_v13 }
 0x457   :  { %11433 = vmatmul.mubr.bf16.vlgmr.msra.gmra.mrb[8].mxu1 %v16926_v17  ;;  %v574_v17 = vld [vmem:[%s22050_s1 + $0x10d8] sm:$0xff] }
 0x458   :  { %10982 = vmatmul.mubr.bf16.vlgmr.msra.gmra.mrb[4].mxu0 %v17344_v39  ;;  %11442 = vmatpush1.bf16.msra.mxu1 %v14290_v10  ;;  %v14315_v35 = vcombine.high %v574_v17, %v578_v26  ;;  %v14314_v42 = vcombine.low %v574_v17, %v578_v26  ;;  %v857_v10 = vld [vmem:[%s22050_s1 + $0x19b0] sm:$0xff]  ;;  %v614_v26 = vld [vmem:[%s22050_s1 + $0x1218] sm:$0xff] }
 0x459   :  { %10991 = vmatpush1.bf16.msra.mxu0 %v14544_v12  ;;  %11443 = vmatprep.subr.bf16.mxu1 %v14299_v16  ;;  %v14330_v12 = vcombine.low %v590_v51, %v594_v13  ;;  %v14584_v16 = vcombine.low %v845_v14, %v849_v49  ;;  %v14593_v59 = vcombine.high %v853_v7, %v857_v10  ;;  %v630_v13 = vld [vmem:[%s22050_s1 + $0x1298] sm:$0xff]  ;;  %v885_v49 = vld [vmem:[%s22050_s1 + $0x1a90] sm:$0xff] }
 0x45a   :  { %10992 = vmatprep.subr.bf16.mxu0 %v14553_v62  ;;  %11022 = vmatprep.mubr.bf16.mxu0 %v17353_v48  ;;  %v14339_v62 = vcombine.high %v598_v1, %v602_v2  ;;  %v634_v14 = vld [vmem:[%s22050_s1 + $0x12b8] sm:$0xff] }
 0x45b   :  { %11473 = vmatprep.mubr.bf16.mxu1 %v16935_v25  ;;  %v837_v25 = vld [vmem:[%s22050_s1 + $0x1910] sm:$0xff] }
 0x45c   :  { %11444 = vmatpush1.bf16.msra.mxu1 %v14298_v20  ;;  %v14577_v45 = vcombine.high %v837_v25, %v841_v41  ;;  %v14576_v60 = vcombine.low %v837_v25, %v841_v41  ;;  %v865_v20 = vld [vmem:[%s22050_s1 + $0x19f0] sm:$0xff]  ;;  %v626_v25 = vld [vmem:[%s22050_s1 + $0x1278] sm:$0xff] }
 0x45d   :  { %10993 = vmatpush1.bf16.msra.mxu0 %v14552_v21  ;;  %11445 = vmatprep.subr.bf16.mxu1 %v14307_v58  ;;  %v14338_v21 = vcombine.low %v598_v1, %v602_v2  ;;  %v14592_v58 = vcombine.low %v853_v7, %v857_v10  ;;  %v14601_v17 = vcombine.high %v861_v19, %v865_v20  ;;  %v877_v41 = vld [vmem:[%s22050_s1 + $0x1a50] sm:$0xff]  ;;  %v638_v2 = vld [vmem:[%s22050_s1 + $0x12d8] sm:$0xff] }
 0x45e   :  { %10994 = vmatprep.subr.bf16.mxu0 %v14561_v23  ;;  %v14347_v23 = vcombine.high %v606_v9, %v610_v53  ;;  %v642_v7 = vld [vmem:[%s22050_s1 + $0x12f8] sm:$0xff]  ;;  %v893_v10 = vld [vmem:[%s22050_s1 + $0x1ad0] sm:$0xff] }
 0x460   :  { %11446 = vmatpush1.bf16.msra.mxu1 %v14306_v31  ;;  %v873_v31 = vld [vmem:[%s22050_s1 + $0x1a30] sm:$0xff] }
 0x461   :  { %10995 = vmatpush1.bf16.msra.mxu0 %v14560_v33  ;;  %11447 = vmatprep.subr.bf16.mxu1 %v14315_v35  ;;  %v14346_v33 = vcombine.low %v606_v9, %v610_v53  ;;  %v14600_v35 = vcombine.low %v861_v19, %v865_v20  ;;  %v14609_v22 = vcombine.high %v869_v28, %v873_v31  ;;  %v646_v53 = vld [vmem:[%s22050_s1 + $0x1318] sm:$0xff]  ;;  %v901_v20 = vld [vmem:[%s22050_s1 + $0x1b10] sm:$0xff] }
 0x462   :  { %10996 = vmatprep.subr.bf16.mxu0 %v14569_v36  ;;  %v14355_v36 = vcombine.high %v614_v26, %v618_v27  ;;  %v650_v19 = vld [vmem:[%s22050_s1 + $0x1338] sm:$0xff] }
 0x464   :  { %11448 = vmatpush1.bf16.msra.mxu1 %v14314_v42  ;;  %v881_v42 = vld [vmem:[%s22050_s1 + $0x1a70] sm:$0xff] }
 0x465   :  { %10997 = vmatpush1.bf16.msra.mxu0 %v14568_v47  ;;  %11449 = vmatprep.subr.bf16.mxu1 %v14323_v40  ;;  %v14354_v47 = vcombine.low %v614_v26, %v618_v27  ;;  %v14608_v40 = vcombine.low %v869_v28, %v873_v31  ;;  %v14617_v51 = vcombine.high %v877_v41, %v881_v42  ;;  %v654_v27 = vld [vmem:[%s22050_s1 + $0x1358] sm:$0xff]  ;;  %v909_v31 = vld [vmem:[%s22050_s1 + $0x1b50] sm:$0xff] }
 0x466   :  { %10998 = vmatprep.subr.bf16.mxu0 %v14577_v45  ;;  %v14363_v45 = vcombine.high %v622_v37, %v626_v25  ;;  %v658_v28 = vld [vmem:[%s22050_s1 + $0x1378] sm:$0xff] }
 0x468   :  { %11450 = vmatpush1.bf16.msra.mxu1 %v14322_v54  ;;  %v889_v54 = vld [vmem:[%s22050_s1 + $0x1ab0] sm:$0xff] }
 0x469   :  { %10999 = vmatpush1.bf16.msra.mxu0 %v14576_v60  ;;  %11451 = vmatprep.subr.bf16.mxu1 %v14331_v61  ;;  %v14362_v60 = vcombine.low %v622_v37, %v626_v25  ;;  %v14616_v61 = vcombine.low %v877_v41, %v881_v42  ;;  %v14625_v1 = vcombine.high %v885_v49, %v889_v54  ;;  %v662_v25 = vld [vmem:[%s22050_s1 + $0x1398] sm:$0xff]  ;;  %v917_v42 = vld [vmem:[%s22050_s1 + $0x1b90] sm:$0xff] }
 0x46a   :  { %11000 = vmatprep.subr.bf16.mxu0 %v14585_v5  ;;  %v14371_v5 = vcombine.high %v630_v13, %v634_v14  ;;  %v666_v41 = vld [vmem:[%s22050_s1 + $0x13b8] sm:$0xff] }
 0x46c   :  { %11452 = vmatpush1.bf16.msra.mxu1 %v14330_v12  ;;  %v897_v12 = vld [vmem:[%s22050_s1 + $0x1af0] sm:$0xff] }
 0x46d   :  { %11001 = vmatpush1.bf16.msra.mxu0 %v14584_v16  ;;  %11453 = vmatprep.subr.bf16.mxu1 %v14339_v62  ;;  %v14370_v16 = vcombine.low %v630_v13, %v634_v14  ;;  %v14624_v62 = vcombine.low %v885_v49, %v889_v54  ;;  %v14633_v9 = vcombine.high %v893_v10, %v897_v12  ;;  %v670_v14 = vld [vmem:[%s22050_s1 + $0x13d8] sm:$0xff]  ;;  %v925_v54 = vld [vmem:[%s22050_s1 + $0x1bd0] sm:$0xff] }
 0x46e   :  { %11002 = vmatprep.subr.bf16.mxu0 %v14593_v59  ;;  %v14379_v59 = vcombine.high %v638_v2, %v642_v7  ;;  %v674_v49 = vld [vmem:[%s22050_s1 + $0x13f8] sm:$0xff] }
 0x470   :  { %11454 = vmatpush1.bf16.msra.mxu1 %v14338_v21  ;;  %v905_v21 = vld [vmem:[%s22050_s1 + $0x1b30] sm:$0xff] }
 0x471   :  { %11003 = vmatpush1.bf16.msra.mxu0 %v14592_v58  ;;  %11455 = vmatprep.subr.bf16.mxu1 %v14347_v23  ;;  %v14378_v58 = vcombine.low %v638_v2, %v642_v7  ;;  %v14632_v23 = vcombine.low %v893_v10, %v897_v12  ;;  %v14641_v26 = vcombine.high %v901_v20, %v905_v21  ;;  %v678_v7 = vld [vmem:[%s22050_s1 + $0x1418] sm:$0xff]  ;;  %v933_v12 = vld [vmem:[%s22050_s1 + $0x1c10] sm:$0xff] }
 0x472   :  { %11004 = vmatprep.subr.bf16.mxu0 %v14601_v17  ;;  %v14387_v17 = vcombine.high %v646_v53, %v650_v19  ;;  %v682_v10 = vld [vmem:[%s22050_s1 + $0x1438] sm:$0xff] }
 0x474   :  { %11456 = vmatpush1.bf16.msra.mxu1 %v14346_v33  ;;  %v913_v33 = vld [vmem:[%s22050_s1 + $0x1b70] sm:$0xff] }
 0x475   :  { %11005 = vmatpush1.bf16.msra.mxu0 %v14600_v35  ;;  %11457 = vmatprep.subr.bf16.mxu1 %v14355_v36  ;;  %v14386_v35 = vcombine.low %v646_v53, %v650_v19  ;;  %v14640_v36 = vcombine.low %v901_v20, %v905_v21  ;;  %v14649_v37 = vcombine.high %v909_v31, %v913_v33  ;;  %v686_v19 = vld [vmem:[%s22050_s1 + $0x1458] sm:$0xff]  ;;  %v941_v21 = vld [vmem:[%s22050_s1 + $0x1c50] sm:$0xff] }
 0x476   :  { %11006 = vmatprep.subr.bf16.mxu0 %v14609_v22  ;;  %v14395_v22 = vcombine.high %v654_v27, %v658_v28  ;;  %v690_v20 = vld [vmem:[%s22050_s1 + $0x1478] sm:$0xff] }
 0x478   :  { %11458 = vmatpush1.bf16.msra.mxu1 %v14354_v47  ;;  %v921_v47 = vld [vmem:[%s22050_s1 + $0x1bb0] sm:$0xff] }
 0x479   :  { %11007 = vmatpush1.bf16.msra.mxu0 %v14608_v40  ;;  %11459 = vmatprep.subr.bf16.mxu1 %v14363_v45  ;;  %v14394_v40 = vcombine.low %v654_v27, %v658_v28  ;;  %v14648_v45 = vcombine.low %v909_v31, %v913_v33  ;;  %v14657_v13 = vcombine.high %v917_v42, %v921_v47  ;;  %v694_v28 = vld [vmem:[%s22050_s1 + $0x1498] sm:$0xff]  ;;  %v949_v33 = vld [vmem:[%s22050_s1 + $0x1c90] sm:$0xff] }
 0x47a   :  { %11008 = vmatprep.subr.bf16.mxu0 %v14617_v51  ;;  %v14403_v51 = vcombine.high %v662_v25, %v666_v41  ;;  %v698_v31 = vld [vmem:[%s22050_s1 + $0x14b8] sm:$0xff] }
 0x47c   :  { %11460 = vmatpush1.bf16.msra.mxu1 %v14362_v60  ;;  %v929_v60 = vld [vmem:[%s22050_s1 + $0x1bf0] sm:$0xff] }
 0x47d   :  { %11009 = vmatpush1.bf16.msra.mxu0 %v14616_v61  ;;  %11461 = vmatprep.subr.bf16.mxu1 %v14371_v5  ;;  %v14402_v61 = vcombine.low %v662_v25, %v666_v41  ;;  %v14656_v5 = vcombine.low %v917_v42, %v921_v47  ;;  %v14665_v2 = vcombine.high %v925_v54, %v929_v60  ;;  %v706_v41 = vld [vmem:[%s22050_s1 + $0x14f8] sm:$0xff]  ;;  %v957_v42 = vld [vmem:[%s22050_s1 + $0x1cd0] sm:$0xff] }
 0x47e   :  { %11010 = vmatprep.subr.bf16.mxu0 %v14625_v1  ;;  %v14411_v1 = vcombine.high %v670_v14, %v674_v49  ;;  %v961_v47 = vld [vmem:[%s22050_s1 + $0x1cf0] sm:$0xff] }
 0x480   :  { %11462 = vmatpush1.bf16.msra.mxu1 %v14370_v16  ;;  %v937_v16 = vld [vmem:[%s22050_s1 + $0x1c30] sm:$0xff] }
 0x481   :  { %11011 = vmatpush1.bf16.msra.mxu0 %v14624_v62  ;;  %11463 = vmatprep.subr.bf16.mxu1 %v14379_v59  ;;  %v14410_v62 = vcombine.low %v670_v14, %v674_v49  ;;  %v14664_v59 = vcombine.low %v925_v54, %v929_v60  ;;  %v14673_v53 = vcombine.high %v933_v12, %v937_v16  ;;  %v710_v14 = vld [vmem:[%s22050_s1 + $0x1518] sm:$0xff]  ;;  %v969_v54 = vld [vmem:[%s22050_s1 + $0x1d30] sm:$0xff] }
 0x482   :  { %11012 = vmatprep.subr.bf16.mxu0 %v14633_v9  ;;  %v14419_v9 = vcombine.high %v678_v7, %v682_v10  ;;  %v714_v49 = vld [vmem:[%s22050_s1 + $0x1538] sm:$0xff] }
 0x484   :  { %11464 = vmatpush1.bf16.msra.mxu1 %v14378_v58  ;;  %v945_v58 = vld [vmem:[%s22050_s1 + $0x1c70] sm:$0xff] }
 0x485   :  { %11013 = vmatpush1.bf16.msra.mxu0 %v14632_v23  ;;  %11465 = vmatprep.subr.bf16.mxu1 %v14387_v17  ;;  %v14418_v23 = vcombine.low %v678_v7, %v682_v10  ;;  %v14672_v17 = vcombine.low %v933_v12, %v937_v16  ;;  %v14681_v27 = vcombine.high %v941_v21, %v945_v58  ;;  %v722_v7 = vld [vmem:[%s22050_s1 + $0x1578] sm:$0xff]  ;;  %v973_v10 = vld [vmem:[%s22050_s1 + $0x1d50] sm:$0xff] }
 0x486   :  { %11014 = vmatprep.subr.bf16.mxu0 %v14641_v26  ;;  %v14427_v26 = vcombine.high %v686_v19, %v690_v20  ;;  %v977_v12 = vld [vmem:[%s22050_s1 + $0x1d70] sm:$0xff]  ;;  %v14450_v16 = vcombine.low %v710_v14, %v714_v49 }
 0x488   :  { %11466 = vmatpush1.bf16.msra.mxu1 %v14386_v35  ;;  %v953_v35 = vld [vmem:[%s22050_s1 + $0x1cb0] sm:$0xff] }
 0x489   :  { %11015 = vmatpush1.bf16.msra.mxu0 %v14640_v36  ;;  %11467 = vmatprep.subr.bf16.mxu1 %v14395_v22  ;;  %v14426_v36 = vcombine.low %v686_v19, %v690_v20  ;;  %v14680_v22 = vcombine.low %v941_v21, %v945_v58  ;;  %v14689_v25 = vcombine.high %v949_v33, %v953_v35  ;;  %v730_v19 = vld [vmem:[%s22050_s1 + $0x15b8] sm:$0xff]  ;;  %v981_v20 = vld [vmem:[%s22050_s1 + $0x1d90] sm:$0xff] }
 0x48a   :  { %11016 = vmatprep.subr.bf16.mxu0 %v14649_v37  ;;  %v14435_v37 = vcombine.high %v694_v28, %v698_v31  ;;  %v985_v21 = vld [vmem:[%s22050_s1 + $0x1db0] sm:$0xff] }
 0x48c   :  { %11468 = vmatpush1.bf16.msra.mxu1 %v14394_v40  ;;  %v14434_v40 = vcombine.low %v694_v28, %v698_v31  ;;  %v738_v28 = vld [vmem:[%s22050_s1 + $0x15f8] sm:$0xff]  ;;  %v989_v31 = vld [vmem:[%s22050_s1 + $0x1dd0] sm:$0xff] }
 0x48d   :  { %11017 = vmatpush1.bf16.msra.mxu0 %v14648_v45  ;;  %11469 = vmatprep.subr.bf16.mxu1 %v14403_v51  ;;  %v14688_v45 = vcombine.low %v949_v33, %v953_v35  ;;  %v993_v33 = vld [vmem:[%s22050_s1 + $0x1df0] sm:$0xff] }
 0x48e   :  { %11018 = vmatprep.subr.bf16.mxu0 %v14657_v13  ;;  %v14697_v13 = vcombine.high %v957_v42, %v961_v47 }
 0x490   :  { %11470 = vmatpush1.bf16.msra.mxu1 %v14402_v61  ;;  %v14696_v61 = vcombine.low %v957_v42, %v961_v47  ;;  %v1001_v42 = vld [vmem:[%s22050_s1 + $0x1e30] sm:$0xff] }
 0x491   :  { %11019 = vmatpush1.bf16.msra.mxu0 %v14656_v5  ;;  %11471 = vmatprep.subr.bf16.mxu1 %v14411_v1  ;;  %v14451_v5 = vcombine.high %v710_v14, %v714_v49  ;;  %v754_v14 = vld [vmem:[%s22050_s1 + $0x1678] sm:$0xff]  ;;  %v1005_v49 = vld [vmem:[%s22050_s1 + $0x1e50] sm:$0xff] }
 0x492   :  { %11020 = vmatprep.subr.bf16.mxu0 %v14665_v2  ;;  %v718_v2 = vld [vmem:[%s22050_s1 + $0x1558] sm:$0xff] }
 0x493   :  { %v14458_v58 = vcombine.low %v718_v2, %v722_v7 }
 0x494   :  { %11472 = vmatpush1.bf16.msra.mxu1 %v14410_v62 }
 0x495   :  { %11021 = vmatpush1.bf16.msra.mxu0 %v14664_v59  ;;  %11482 = vmatprep.subr.bf16.mxu1 %v14419_v9  ;;  %v14459_v59 = vcombine.high %v718_v2, %v722_v7  ;;  %v14713_v9 = vcombine.high %v973_v10, %v977_v12  ;;  %v762_v2 = vld [vmem:[%s22050_s1 + $0x16b8] sm:$0xff]  ;;  %v1013_v7 = vld [vmem:[%s22050_s1 + $0x1e90] sm:$0xff] }
 0x496   :  { %11031 = vmatprep.subr.bf16.mxu0 %v14673_v53  ;;  %v726_v53 = vld [vmem:[%s22050_s1 + $0x1598] sm:$0xff] }
 0x497   :  { %11474 = vmatmul.mubr.bf16.vlgmr.msra.gmra.mrb[8].mxu1 %v17129_v52  ;;  %v702_v52 = vld [vmem:[%s22050_s1 + $0x14d8] sm:$0xff]  ;;  %v14466_v35 = vcombine.low %v726_v53, %v730_v19 }
 0x498   :  { %11023 = vmatmul.mubr.bf16.vlgmr.msra.gmra.mrb[4].mxu0 %v17547_v30  ;;  %11483 = vmatpush1.bf16.msra.mxu1 %v14418_v23  ;;  %v14443_v51 = vcombine.high %v702_v52, %v706_v41  ;;  %v14442_v60 = vcombine.low %v702_v52, %v706_v41  ;;  %v14712_v23 = vcombine.low %v973_v10, %v977_v12  ;;  %v746_v52 = vld [vmem:[%s22050_s1 + $0x1638] sm:$0xff]  ;;  %v997_v41 = vld [vmem:[%s22050_s1 + $0x1e10] sm:$0xff] }
 0x499   :  { %11032 = vmatpush1.bf16.msra.mxu0 %v14672_v17  ;;  %11484 = vmatprep.subr.bf16.mxu1 %v14427_v26  ;;  %v14467_v17 = vcombine.high %v726_v53, %v730_v19  ;;  %v14721_v26 = vcombine.high %v981_v20, %v985_v21  ;;  %v1017_v10 = vld [vmem:[%s22050_s1 + $0x1eb0] sm:$0xff]  ;;  %v770_v53 = vld [vmem:[%s22050_s1 + $0x16f8] sm:$0xff] }
 0x49a   :  { %11033 = vmatprep.subr.bf16.mxu0 %v14681_v27  ;;  %11063 = vmatprep.mubr.bf16.mxu0 %v17557_v38  ;;  %v734_v27 = vld [vmem:[%s22050_s1 + $0x15d8] sm:$0xff]  ;;  %v1021_v19 = vld [vmem:[%s22050_s1 + $0x1ed0] sm:$0xff] }
 0x49b   :  { %11514 = vmatprep.mubr.bf16.mxu1 %v17139_v18  ;;  %v965_v18 = vld [vmem:[%s22050_s1 + $0x1d10] sm:$0xff]  ;;  %v14474_v47 = vcombine.low %v734_v27, %v738_v28 }
 0x49c   :  { %11485 = vmatpush1.bf16.msra.mxu1 %v14426_v36  ;;  %v14705_v1 = vcombine.high %v965_v18, %v969_v54  ;;  %v14704_v62 = vcombine.low %v965_v18, %v969_v54  ;;  %v14720_v36 = vcombine.low %v981_v20, %v985_v21  ;;  %v1009_v18 = vld [vmem:[%s22050_s1 + $0x1e70] sm:$0xff] }
 0x49d   :  { %11034 = vmatpush1.bf16.msra.mxu0 %v14680_v22  ;;  %11486 = vmatprep.subr.bf16.mxu1 %v14435_v37  ;;  %v14475_v22 = vcombine.high %v734_v27, %v738_v28  ;;  %v14729_v37 = vcombine.high %v989_v31, %v993_v33  ;;  %v1025_v20 = vld [vmem:[%s22050_s1 + $0x1ef0] sm:$0xff]  ;;  %v778_v27 = vld [vmem:[%s22050_s1 + $0x1738] sm:$0xff] }
 0x49e   :  { %11035 = vmatprep.subr.bf16.mxu0 %v14689_v25  ;;  %v742_v25 = vld [vmem:[%s22050_s1 + $0x1618] sm:$0xff]  ;;  %v1029_v28 = vld [vmem:[%s22050_s1 + $0x1f10] sm:$0xff] }
 0x49f   :  { %v14482_v54 = vcombine.low %v742_v25, %v746_v52 }
 0x4a0   :  { %11487 = vmatpush1.bf16.msra.mxu1 %v14434_v40  ;;  %v14728_v40 = vcombine.low %v989_v31, %v993_v33  ;;  %v1033_v31 = vld [vmem:[%s22050_s1 + $0x1f30] sm:$0xff] }
 0x4a1   :  { %11036 = vmatpush1.bf16.msra.mxu0 %v14688_v45  ;;  %11488 = vmatprep.subr.bf16.mxu1 %v14443_v51  ;;  %v14483_v45 = vcombine.high %v742_v25, %v746_v52  ;;  %v14737_v51 = vcombine.high %v997_v41, %v1001_v42  ;;  %v786_v25 = vld [vmem:[%s22050_s1 + $0x1778] sm:$0xff]  ;;  %v1037_v52 = vld [vmem:[%s22050_s1 + $0x1f50] sm:$0xff] }
 0x4a2   :  { %11037 = vmatprep.subr.bf16.mxu0 %v14697_v13  ;;  %v750_v13 = vld [vmem:[%s22050_s1 + $0x1658] sm:$0xff] }
 0x4a3   :  { %v14490_v12 = vcombine.low %v750_v13, %v754_v14 }
 0x4a4   :  { %11489 = vmatpush1.bf16.msra.mxu1 %v14442_v60  ;;  %v14736_v60 = vcombine.low %v997_v41, %v1001_v42  ;;  %v1041_v41 = vld [vmem:[%s22050_s1 + $0x1f70] sm:$0xff] }
 0x4a5   :  { %11038 = vmatpush1.bf16.msra.mxu0 %v14696_v61  ;;  %11490 = vmatprep.subr.bf16.mxu1 %v14451_v5  ;;  %v14491_v61 = vcombine.high %v750_v13, %v754_v14  ;;  %v14745_v5 = vcombine.high %v1005_v49, %v1009_v18  ;;  %v794_v13 = vld [vmem:[%s22050_s1 + $0x17b8] sm:$0xff]  ;;  %v1045_v14 = vld [vmem:[%s22050_s1 + $0x1f90] sm:$0xff] }
 0x4a6   :  { %11039 = vmatprep.subr.bf16.mxu0 %v14705_v1  ;;  %v758_v1 = vld [vmem:[%s22050_s1 + $0x1698] sm:$0xff] }
 0x4a7   :  { %v14498_v21 = vcombine.low %v758_v1, %v762_v2 }
 0x4a8   :  { %11491 = vmatpush1.bf16.msra.mxu1 %v14450_v16  ;;  %v14744_v16 = vcombine.low %v1005_v49, %v1009_v18  ;;  %v1049_v49 = vld [vmem:[%s22050_s1 + $0x1fb0] sm:$0xff] }
 0x4a9   :  { %11040 = vmatpush1.bf16.msra.mxu0 %v14704_v62  ;;  %11492 = vmatprep.subr.bf16.mxu1 %v14459_v59  ;;  %v14499_v62 = vcombine.high %v758_v1, %v762_v2  ;;  %v14753_v59 = vcombine.high %v1013_v7, %v1017_v10  ;;  %v802_v1 = vld [vmem:[%s22050_s1 + $0x17f8] sm:$0xff]  ;;  %v1053_v2 = vld [vmem:[%s22050_s1 + $0x1fd0] sm:$0xff] }
 0x4aa   :  { %11041 = vmatprep.subr.bf16.mxu0 %v14713_v9  ;;  %v766_v9 = vld [vmem:[%s22050_s1 + $0x16d8] sm:$0xff] }
 0x4ab   :  { %v14506_v33 = vcombine.low %v766_v9, %v770_v53 }
 0x4ac   :  { %11493 = vmatpush1.bf16.msra.mxu1 %v14458_v58  ;;  %v14752_v58 = vcombine.low %v1013_v7, %v1017_v10  ;;  %v1057_v7 = vld [vmem:[%s22050_s1 + $0x1ff0] sm:$0xff] }
 0x4ad   :  { %11042 = vmatpush1.bf16.msra.mxu0 %v14712_v23  ;;  %11494 = vmatprep.subr.bf16.mxu1 %v14467_v17  ;;  %v14507_v23 = vcombine.high %v766_v9, %v770_v53  ;;  %v14761_v17 = vcombine.high %v1021_v19, %v1025_v20  ;;  %v810_v9 = vld [vmem:[%s22050_s1 + $0x1838] sm:$0xff]  ;;  %v1061_v53 = vld [vmem:[%s22050_s1 + $0x2010] sm:$0xff] }
 0x4ae   :  { %11043 = vmatprep.subr.bf16.mxu0 %v14721_v26  ;;  %v774_v26 = vld [vmem:[%s22050_s1 + $0x1718] sm:$0xff] }
 0x4af   :  { %v14514_v42 = vcombine.low %v774_v26, %v778_v27 }
 0x4b0   :  { %11495 = vmatpush1.bf16.msra.mxu1 %v14466_v35  ;;  %v14760_v35 = vcombine.low %v1021_v19, %v1025_v20  ;;  %v1065_v19 = vld [vmem:[%s22050_s1 + $0x2030] sm:$0xff] }
 0x4b1   :  { %11044 = vmatpush1.bf16.msra.mxu0 %v14720_v36  ;;  %11496 = vmatprep.subr.bf16.mxu1 %v14475_v22  ;;  %v14515_v36 = vcombine.high %v774_v26, %v778_v27  ;;  %v14769_v22 = vcombine.high %v1029_v28, %v1033_v31  ;;  %v818_v26 = vld [vmem:[%s22050_s1 + $0x1878] sm:$0xff]  ;;  %v1069_v27 = vld [vmem:[%s22050_s1 + $0x2050] sm:$0xff] }
 0x4b2   :  { %11045 = vmatprep.subr.bf16.mxu0 %v14729_v37  ;;  %v782_v37 = vld [vmem:[%s22050_s1 + $0x1758] sm:$0xff] }
 0x4b3   :  { %v14522_v18 = vcombine.low %v782_v37, %v786_v25 }
 0x4b4   :  { %11497 = vmatpush1.bf16.msra.mxu1 %v14474_v47  ;;  %v14768_v47 = vcombine.low %v1029_v28, %v1033_v31  ;;  %v1073_v28 = vld [vmem:[%s22050_s1 + $0x2070] sm:$0xff] }
 0x4b5   :  { %11046 = vmatpush1.bf16.msra.mxu0 %v14728_v40  ;;  %11498 = vmatprep.subr.bf16.mxu1 %v14483_v45  ;;  %v14523_v40 = vcombine.high %v782_v37, %v786_v25  ;;  %v14777_v45 = vcombine.high %v1037_v52, %v1041_v41  ;;  %v826_v37 = vld [vmem:[%s22050_s1 + $0x18b8] sm:$0xff]  ;;  %v1077_v25 = vld [vmem:[%s22050_s1 + $0x2090] sm:$0xff] }
 0x4b6   :  { %11047 = vmatprep.subr.bf16.mxu0 %v14737_v51  ;;  %v790_v51 = vld [vmem:[%s22050_s1 + $0x1798] sm:$0xff] }
 0x4b7   :  { %v14530_v10 = vcombine.low %v790_v51, %v794_v13 }
 0x4b8   :  { %11499 = vmatpush1.bf16.msra.mxu1 %v14482_v54  ;;  %v14776_v54 = vcombine.low %v1037_v52, %v1041_v41  ;;  %v1081_v52 = vld [vmem:[%s22050_s1 + $0x20b0] sm:$0xff] }
 0x4b9   :  { %11048 = vmatpush1.bf16.msra.mxu0 %v14736_v60  ;;  %11500 = vmatprep.subr.bf16.mxu1 %v14491_v61  ;;  %v14531_v60 = vcombine.high %v790_v51, %v794_v13  ;;  %v14785_v61 = vcombine.high %v1045_v14, %v1049_v49  ;;  %v1085_v51 = vld [vmem:[%s22050_s1 + $0x20d0] sm:$0xff] }
 0x4ba   :  { %11049 = vmatprep.subr.bf16.mxu0 %v14745_v5  ;;  %v798_v5 = vld [vmem:[%s22050_s1 + $0x17d8] sm:$0xff]  ;;  %v1089_v13 = vld [vmem:[%s22050_s1 + $0x20f0] sm:$0xff] }
 0x4bb   :  { %v14538_v20 = vcombine.low %v798_v5, %v802_v1 }
 0x4bc   :  { %11501 = vmatpush1.bf16.msra.mxu1 %v14490_v12  ;;  %v14784_v12 = vcombine.low %v1045_v14, %v1049_v49  ;;  %v14816_v49 = vcombine.low %v1077_v25, %v1081_v52 }
 0x4bd   :  { %11050 = vmatpush1.bf16.msra.mxu0 %v14744_v16  ;;  %11502 = vmatprep.subr.bf16.mxu1 %v14499_v62  ;;  %v14539_v16 = vcombine.high %v798_v5, %v802_v1  ;;  %v14793_v62 = vcombine.high %v1053_v2, %v1057_v7  ;;  %v1097_v5 = vld [vmem:[%s22050_s1 + $0x2130] sm:$0xff] }
 0x4be   :  { %11051 = vmatprep.subr.bf16.mxu0 %v14753_v59  ;;  %v806_v59 = vld [vmem:[%s22050_s1 + $0x1818] sm:$0xff] }
 0x4bf   :  { %v14546_v31 = vcombine.low %v806_v59, %v810_v9 }
 0x4c0   :  { %11503 = vmatpush1.bf16.msra.mxu1 %v14498_v21  ;;  %v14792_v21 = vcombine.low %v1053_v2, %v1057_v7  ;;  %v14824_v2 = vcombine.low %v1085_v51, %v1089_v13 }
 0x4c1   :  { %11052 = vmatpush1.bf16.msra.mxu0 %v14752_v58  ;;  %11504 = vmatprep.subr.bf16.mxu1 %v14507_v23  ;;  %v14547_v58 = vcombine.high %v806_v59, %v810_v9  ;;  %v14801_v23 = vcombine.high %v1061_v53, %v1065_v19  ;;  %v1105_v59 = vld [vmem:[%s22050_s1 + $0x2170] sm:$0xff] }
 0x4c2   :  { %11053 = vmatprep.subr.bf16.mxu0 %v14761_v17  ;;  %v814_v17 = vld [vmem:[%s22050_s1 + $0x1858] sm:$0xff] }
 0x4c3   :  { %v14554_v41 = vcombine.low %v814_v17, %v818_v26 }
 0x4c4   :  { %11505 = vmatpush1.bf16.msra.mxu1 %v14506_v33  ;;  %v14800_v33 = vcombine.low %v1061_v53, %v1065_v19 }
 0x4c5   :  { %11054 = vmatpush1.bf16.msra.mxu0 %v14760_v35  ;;  %11506 = vmatprep.subr.bf16.mxu1 %v14515_v36  ;;  %v14555_v35 = vcombine.high %v814_v17, %v818_v26  ;;  %v14809_v36 = vcombine.high %v1069_v27, %v1073_v28  ;;  %v1113_v17 = vld [vmem:[%s22050_s1 + $0x21b0] sm:$0xff] }
 0x4c6   :  { %11055 = vmatprep.subr.bf16.mxu0 %v14769_v22  ;;  %v822_v22 = vld [vmem:[%s22050_s1 + $0x1898] sm:$0xff] }
 0x4c7   :  { %v14562_v14 = vcombine.low %v822_v22, %v826_v37 }
 0x4c8   :  { %11507 = vmatpush1.bf16.msra.mxu1 %v14514_v42  ;;  %v14808_v42 = vcombine.low %v1069_v27, %v1073_v28 }
 0x4c9   :  { %11056 = vmatpush1.bf16.msra.mxu0 %v14768_v47  ;;  %11508 = vmatprep.subr.bf16.mxu1 %v14523_v40  ;;  %v14563_v47 = vcombine.high %v822_v22, %v826_v37  ;;  %v14817_v40 = vcombine.high %v1077_v25, %v1081_v52  ;;  %v1121_v22 = vld [vmem:[%s22050_s1 + $0x21f0] sm:$0xff] }
 0x4ca   :  { %11057 = vmatprep.subr.bf16.mxu0 %v14777_v45  ;;  %v834_v45 = vld [vmem:[%s22050_s1 + $0x18f8] sm:$0xff] }
 0x4cc   :  { %11509 = vmatpush1.bf16.msra.mxu1 %v14522_v18 }
 0x4cd   :  { %11058 = vmatpush1.bf16.msra.mxu0 %v14776_v54  ;;  %11510 = vmatprep.subr.bf16.mxu1 %v14531_v60  ;;  %v14825_v54 = vcombine.high %v1085_v51, %v1089_v13  ;;  %v838_v60 = vld [vmem:[%s22050_s1 + $0x1918] sm:$0xff] }
 0x4ce   :  { %11059 = vmatprep.subr.bf16.mxu0 %v14785_v61  ;;  %v842_v61 = vld [vmem:[%s22050_s1 + $0x1938] sm:$0xff] }
 0x4cf   :  { %v14579_v7 = vcombine.high %v838_v60, %v842_v61  ;;  %v14578_v9 = vcombine.low %v838_v60, %v842_v61  ;;  %v1137_v60 = vld [vmem:[%s22050_s1 + $0x2270] sm:$0xff] }
 0x4d0   :  { %11511 = vmatpush1.bf16.msra.mxu1 %v14530_v10 }
 0x4d1   :  { %11060 = vmatpush1.bf16.msra.mxu0 %v14784_v12  ;;  %11512 = vmatprep.subr.bf16.mxu1 %v14539_v16  ;;  %v846_v12 = vld [vmem:[%s22050_s1 + $0x1958] sm:$0xff] }
 0x4d2   :  { %11061 = vmatprep.subr.bf16.mxu0 %v14793_v62  ;;  %v850_v16 = vld [vmem:[%s22050_s1 + $0x1978] sm:$0xff]  ;;  %v1101_v62 = vld [vmem:[%s22050_s1 + $0x2150] sm:$0xff] }
 0x4d3   :  { %v14587_v19 = vcombine.high %v846_v12, %v850_v16  ;;  %v14586_v26 = vcombine.low %v846_v12, %v850_v16  ;;  %v14840_v27 = vcombine.low %v1101_v62, %v1105_v59  ;;  %v1145_v12 = vld [vmem:[%s22050_s1 + $0x22b0] sm:$0xff] }
 0x4d4   :  { %11513 = vmatpush1.bf16.msra.mxu1 %v14538_v20  ;;  %v14841_v20 = vcombine.high %v1101_v62, %v1105_v59 }
 0x4d5   :  { %11062 = vmatpush1.bf16.msra.mxu0 %v14792_v21  ;;  %11523 = vmatprep.subr.bf16.mxu1 %v14547_v58  ;;  %v854_v21 = vld [vmem:[%s22050_s1 + $0x1998] sm:$0xff] }
 0x4d6   :  { %11072 = vmatprep.subr.bf16.mxu0 %v14801_v23  ;;  %v858_v58 = vld [vmem:[%s22050_s1 + $0x19b8] sm:$0xff]  ;;  %v1109_v23 = vld [vmem:[%s22050_s1 + $0x2190] sm:$0xff] }
 0x4d7   :  { %11515 = vmatmul.mubr.bf16.vlgmr.msra.gmra.mrb[8].mxu1 %v17344_v39  ;;  %v830_v39 = vld [vmem:[%s22050_s1 + $0x18d8] sm:$0xff]  ;;  %v14595_v28 = vcombine.high %v854_v21, %v858_v58  ;;  %v14594_v37 = vcombine.low %v854_v21, %v858_v58  ;;  %v14848_v25 = vcombine.low %v1109_v23, %v1113_v17  ;;  %v1153_v21 = vld [vmem:[%s22050_s1 + $0x22f0] sm:$0xff] }
 0x4d8   :  { %11064 = vmatmul.mubr.bf16.vlgmr.msra.gmra.mrb[4].mxu0 %v17762_v29  ;;  %11524 = vmatpush1.bf16.msra.mxu1 %v14546_v31  ;;  %v14571_v18 = vcombine.high %v830_v39, %v834_v45  ;;  %v14570_v1 = vcombine.low %v830_v39, %v834_v45  ;;  %v14849_v31 = vcombine.high %v1109_v23, %v1113_v17  ;;  %v1129_v39 = vld [vmem:[%s22050_s1 + $0x2230] sm:$0xff] }
 0x4d9   :  { %11073 = vmatpush1.bf16.msra.mxu0 %v14800_v33  ;;  %11525 = vmatprep.subr.bf16.mxu1 %v14555_v35  ;;  %v862_v33 = vld [vmem:[%s22050_s1 + $0x19d8] sm:$0xff] }
 0x4da   :  { %11074 = vmatprep.subr.bf16.mxu0 %v14809_v36  ;;  %11104 = vmatprep.mubr.bf16.mxu0 %v17771_v24  ;;  %v866_v35 = vld [vmem:[%s22050_s1 + $0x19f8] sm:$0xff]  ;;  %v1117_v36 = vld [vmem:[%s22050_s1 + $0x21d0] sm:$0xff] }
 0x4db   :  { %11555 = vmatprep.mubr.bf16.mxu1 %v17353_v48  ;;  %v1093_v48 = vld [vmem:[%s22050_s1 + $0x2110] sm:$0xff]  ;;  %v14603_v52 = vcombine.high %v862_v33, %v866_v35  ;;  %v14602_v45 = vcombine.low %v862_v33, %v866_v35  ;;  %v14856_v51 = vcombine.low %v1117_v36, %v1121_v22 }
 0x4dc   :  { %11526 = vmatpush1.bf16.msra.mxu1 %v14554_v41  ;;  %v14833_v10 = vcombine.high %v1093_v48, %v1097_v5  ;;  %v14832_v53 = vcombine.low %v1093_v48, %v1097_v5  ;;  %v14857_v41 = vcombine.high %v1117_v36, %v1121_v22  ;;  %v1161_v33 = vld [vmem:[%s22050_s1 + $0x2330] sm:$0xff] }
 0x4dd   :  { %11075 = vmatpush1.bf16.msra.mxu0 %v14808_v42  ;;  %11527 = vmatprep.subr.bf16.mxu1 %v14563_v47  ;;  %v870_v42 = vld [vmem:[%s22050_s1 + $0x1a18] sm:$0xff] }
 0x4de   :  { %11076 = vmatprep.subr.bf16.mxu0 %v14817_v40  ;;  %v874_v47 = vld [vmem:[%s22050_s1 + $0x1a38] sm:$0xff]  ;;  %v1125_v40 = vld [vmem:[%s22050_s1 + $0x2210] sm:$0xff] }
 0x4df   :  { %v14611_v13 = vcombine.high %v870_v42, %v874_v47  ;;  %v14610_v61 = vcombine.low %v870_v42, %v874_v47  ;;  %v14864_v48 = vcombine.low %v1125_v40, %v1129_v39  ;;  %v1169_v42 = vld [vmem:[%s22050_s1 + $0x2370] sm:$0xff] }
 0x4e0   :  { %11528 = vmatpush1.bf16.msra.mxu1 %v14562_v14  ;;  %v14865_v14 = vcombine.high %v1125_v40, %v1129_v39 }
 0x4e1   :  { %11077 = vmatpush1.bf16.msra.mxu0 %v14816_v49  ;;  %11529 = vmatprep.subr.bf16.mxu1 %v14571_v18  ;;  %v878_v49 = vld [vmem:[%s22050_s1 + $0x1a58] sm:$0xff] }
 0x4e2   :  { %11078 = vmatprep.subr.bf16.mxu0 %v14825_v54  ;;  %v882_v18 = vld [vmem:[%s22050_s1 + $0x1a78] sm:$0xff]  ;;  %v1133_v54 = vld [vmem:[%s22050_s1 + $0x2250] sm:$0xff] }
 0x4e3   :  { %v14619_v5 = vcombine.high %v878_v49, %v882_v18  ;;  %v14618_v16 = vcombine.low %v878_v49, %v882_v18  ;;  %v14872_v62 = vcombine.low %v1133_v54, %v1137_v60  ;;  %v1177_v49 = vld [vmem:[%s22050_s1 + $0x23b0] sm:$0xff] }
 0x4e4   :  { %11530 = vmatpush1.bf16.msra.mxu1 %v14570_v1  ;;  %v14873_v1 = vcombine.high %v1133_v54, %v1137_v60 }
 0x4e5   :  { %11079 = vmatpush1.bf16.msra.mxu0 %v14824_v2  ;;  %11531 = vmatprep.subr.bf16.mxu1 %v14579_v7  ;;  %v886_v2 = vld [vmem:[%s22050_s1 + $0x1a98] sm:$0xff] }
 0x4e6   :  { %11080 = vmatprep.subr.bf16.mxu0 %v14833_v10  ;;  %v890_v7 = vld [vmem:[%s22050_s1 + $0x1ab8] sm:$0xff]  ;;  %v1141_v10 = vld [vmem:[%s22050_s1 + $0x2290] sm:$0xff] }
 0x4e7   :  { %v14627_v59 = vcombine.high %v886_v2, %v890_v7  ;;  %v14626_v58 = vcombine.low %v886_v2, %v890_v7  ;;  %v14880_v23 = vcombine.low %v1141_v10, %v1145_v12  ;;  %v1185_v2 = vld [vmem:[%s22050_s1 + $0x23f0] sm:$0xff] }
 0x4e8   :  { %11532 = vmatpush1.bf16.msra.mxu1 %v14578_v9  ;;  %v14881_v9 = vcombine.high %v1141_v10, %v1145_v12 }
 0x4e9   :  { %11081 = vmatpush1.bf16.msra.mxu0 %v14832_v53  ;;  %11533 = vmatprep.subr.bf16.mxu1 %v14587_v19  ;;  %v894_v53 = vld [vmem:[%s22050_s1 + $0x1ad8] sm:$0xff] }
 0x4ea   :  { %11082 = vmatprep.subr.bf16.mxu0 %v14841_v20  ;;  %v898_v19 = vld [vmem:[%s22050_s1 + $0x1af8] sm:$0xff]  ;;  %v1149_v20 = vld [vmem:[%s22050_s1 + $0x22d0] sm:$0xff] }
 0x4eb   :  { %v14635_v17 = vcombine.high %v894_v53, %v898_v19  ;;  %v14634_v35 = vcombine.low %v894_v53, %v898_v19  ;;  %v14888_v36 = vcombine.low %v1149_v20, %v1153_v21  ;;  %v1193_v53 = vld [vmem:[%s22050_s1 + $0x2430] sm:$0xff] }
 0x4ec   :  { %11534 = vmatpush1.bf16.msra.mxu1 %v14586_v26  ;;  %v14889_v26 = vcombine.high %v1149_v20, %v1153_v21 }
 0x4ed   :  { %11083 = vmatpush1.bf16.msra.mxu0 %v14840_v27  ;;  %11535 = vmatprep.subr.bf16.mxu1 %v14595_v28  ;;  %v902_v27 = vld [vmem:[%s22050_s1 + $0x1b18] sm:$0xff] }
 0x4ee   :  { %11084 = vmatprep.subr.bf16.mxu0 %v14849_v31  ;;  %v906_v28 = vld [vmem:[%s22050_s1 + $0x1b38] sm:$0xff]  ;;  %v1157_v31 = vld [vmem:[%s22050_s1 + $0x2310] sm:$0xff] }
 0x4ef   :  { %v14643_v22 = vcombine.high %v902_v27, %v906_v28  ;;  %v14642_v47 = vcombine.low %v902_v27, %v906_v28  ;;  %v14896_v40 = vcombine.low %v1157_v31, %v1161_v33  ;;  %v1201_v27 = vld [vmem:[%s22050_s1 + $0x2470] sm:$0xff] }
 0x4f0   :  { %11536 = vmatpush1.bf16.msra.mxu1 %v14594_v37  ;;  %v14897_v37 = vcombine.high %v1157_v31, %v1161_v33 }
 0x4f1   :  { %11085 = vmatpush1.bf16.msra.mxu0 %v14848_v25  ;;  %11537 = vmatprep.subr.bf16.mxu1 %v14603_v52  ;;  %v910_v25 = vld [vmem:[%s22050_s1 + $0x1b58] sm:$0xff] }
 0x4f2   :  { %11086 = vmatprep.subr.bf16.mxu0 %v14857_v41  ;;  %v914_v52 = vld [vmem:[%s22050_s1 + $0x1b78] sm:$0xff]  ;;  %v1165_v41 = vld [vmem:[%s22050_s1 + $0x2350] sm:$0xff] }
 0x4f3   :  { %v14651_v39 = vcombine.high %v910_v25, %v914_v52  ;;  %v14650_v18 = vcombine.low %v910_v25, %v914_v52  ;;  %v14904_v54 = vcombine.low %v1165_v41, %v1169_v42  ;;  %v1209_v25 = vld [vmem:[%s22050_s1 + $0x24b0] sm:$0xff] }
 0x4f4   :  { %11538 = vmatpush1.bf16.msra.mxu1 %v14602_v45  ;;  %v14905_v45 = vcombine.high %v1165_v41, %v1169_v42 }
 0x4f5   :  { %11087 = vmatpush1.bf16.msra.mxu0 %v14856_v51  ;;  %11539 = vmatprep.subr.bf16.mxu1 %v14611_v13  ;;  %v918_v51 = vld [vmem:[%s22050_s1 + $0x1b98] sm:$0xff] }
 0x4f6   :  { %11088 = vmatprep.subr.bf16.mxu0 %v14865_v14  ;;  %v922_v13 = vld [vmem:[%s22050_s1 + $0x1bb8] sm:$0xff]  ;;  %v1173_v14 = vld [vmem:[%s22050_s1 + $0x2390] sm:$0xff] }
 0x4f7   :  { %v14659_v60 = vcombine.high %v918_v51, %v922_v13  ;;  %v14658_v7 = vcombine.low %v918_v51, %v922_v13  ;;  %v14912_v10 = vcombine.low %v1173_v14, %v1177_v49 }
 0x4f8   :  { %11540 = vmatpush1.bf16.msra.mxu1 %v14610_v61  ;;  %v14913_v61 = vcombine.high %v1173_v14, %v1177_v49 }
 0x4f9   :  { %11089 = vmatpush1.bf16.msra.mxu0 %v14864_v48  ;;  %11541 = vmatprep.subr.bf16.mxu1 %v14619_v5  ;;  %v926_v48 = vld [vmem:[%s22050_s1 + $0x1bd8] sm:$0xff] }
 0x4fa   :  { %11090 = vmatprep.subr.bf16.mxu0 %v14873_v1  ;;  %v930_v5 = vld [vmem:[%s22050_s1 + $0x1bf8] sm:$0xff]  ;;  %v1181_v1 = vld [vmem:[%s22050_s1 + $0x23d0] sm:$0xff] }
 0x4fb   :  { %v14667_v12 = vcombine.high %v926_v48, %v930_v5  ;;  %v14666_v19 = vcombine.low %v926_v48, %v930_v5  ;;  %v14920_v20 = vcombine.low %v1181_v1, %v1185_v2 }
 0x4fc   :  { %11542 = vmatpush1.bf16.msra.mxu1 %v14618_v16  ;;  %v14921_v16 = vcombine.high %v1181_v1, %v1185_v2  ;;  %v974_v2 = vld [vmem:[%s22050_s1 + $0x1d58] sm:$0xff] }
 0x4fd   :  { %11091 = vmatpush1.bf16.msra.mxu0 %v14872_v62  ;;  %11543 = vmatprep.subr.bf16.mxu1 %v14627_v59  ;;  %v934_v62 = vld [vmem:[%s22050_s1 + $0x1c18] sm:$0xff] }
 0x4fe   :  { %11092 = vmatprep.subr.bf16.mxu0 %v14881_v9  ;;  %v938_v59 = vld [vmem:[%s22050_s1 + $0x1c38] sm:$0xff]  ;;  %v1189_v9 = vld [vmem:[%s22050_s1 + $0x2410] sm:$0xff] }
 0x4ff   :  { %v14675_v21 = vcombine.high %v934_v62, %v938_v59  ;;  %v14674_v28 = vcombine.low %v934_v62, %v938_v59  ;;  %v14928_v31 = vcombine.low %v1189_v9, %v1193_v53 }
 0x500   :  { %11544 = vmatpush1.bf16.msra.mxu1 %v14626_v58  ;;  %v14929_v58 = vcombine.high %v1189_v9, %v1193_v53  ;;  %v982_v53 = vld [vmem:[%s22050_s1 + $0x1d98] sm:$0xff] }
 0x501   :  { %11093 = vmatpush1.bf16.msra.mxu0 %v14880_v23  ;;  %11545 = vmatprep.subr.bf16.mxu1 %v14635_v17  ;;  %v942_v23 = vld [vmem:[%s22050_s1 + $0x1c58] sm:$0xff] }
 0x502   :  { %11094 = vmatprep.subr.bf16.mxu0 %v14889_v26  ;;  %v946_v17 = vld [vmem:[%s22050_s1 + $0x1c78] sm:$0xff]  ;;  %v1197_v26 = vld [vmem:[%s22050_s1 + $0x2450] sm:$0xff] }
 0x503   :  { %v14683_v33 = vcombine.high %v942_v23, %v946_v17  ;;  %v14682_v52 = vcombine.low %v942_v23, %v946_v17  ;;  %v14936_v41 = vcombine.low %v1197_v26, %v1201_v27 }
 0x504   :  { %11546 = vmatpush1.bf16.msra.mxu1 %v14634_v35  ;;  %v14937_v35 = vcombine.high %v1197_v26, %v1201_v27  ;;  %v990_v27 = vld [vmem:[%s22050_s1 + $0x1dd8] sm:$0xff] }
 0x505   :  { %11095 = vmatpush1.bf16.msra.mxu0 %v14888_v36  ;;  %11547 = vmatprep.subr.bf16.mxu1 %v14643_v22  ;;  %v950_v36 = vld [vmem:[%s22050_s1 + $0x1c98] sm:$0xff] }
 0x506   :  { %11096 = vmatprep.subr.bf16.mxu0 %v14897_v37  ;;  %v954_v22 = vld [vmem:[%s22050_s1 + $0x1cb8] sm:$0xff]  ;;  %v1205_v37 = vld [vmem:[%s22050_s1 + $0x2490] sm:$0xff] }
 0x507   :  { %v14691_v42 = vcombine.high %v950_v36, %v954_v22  ;;  %v14690_v51 = vcombine.low %v950_v36, %v954_v22  ;;  %v14944_v13 = vcombine.low %v1205_v37, %v1209_v25 }
 0x508   :  { %11548 = vmatpush1.bf16.msra.mxu1 %v14642_v47  ;;  %v14945_v47 = vcombine.high %v1205_v37, %v1209_v25  ;;  %v998_v25 = vld [vmem:[%s22050_s1 + $0x1e18] sm:$0xff] }
 0x509   :  { %11097 = vmatpush1.bf16.msra.mxu0 %v14896_v40  ;;  %11549 = vmatprep.subr.bf16.mxu1 %v14651_v39  ;;  %v962_v40 = vld [vmem:[%s22050_s1 + $0x1cf8] sm:$0xff]  ;;  %v1213_v39 = vld [vmem:[%s22050_s1 + $0x24d0] sm:$0xff] }
 0x50a   :  { %11098 = vmatprep.subr.bf16.mxu0 %v14905_v45  ;;  %v1217_v45 = vld [vmem:[%s22050_s1 + $0x24f0] sm:$0xff] }
 0x50b   :  { %v14953_v49 = vcombine.high %v1213_v39, %v1217_v45  ;;  %v14952_v48 = vcombine.low %v1213_v39, %v1217_v45  ;;  %v1006_v45 = vld [vmem:[%s22050_s1 + $0x1e58] sm:$0xff] }
 0x50c   :  { %11550 = vmatpush1.bf16.msra.mxu1 %v14650_v18  ;;  %v966_v18 = vld [vmem:[%s22050_s1 + $0x1d18] sm:$0xff] }
 0x50d   :  { %11099 = vmatpush1.bf16.msra.mxu0 %v14904_v54  ;;  %11551 = vmatprep.subr.bf16.mxu1 %v14659_v60  ;;  %v970_v54 = vld [vmem:[%s22050_s1 + $0x1d38] sm:$0xff]  ;;  %v1225_v60 = vld [vmem:[%s22050_s1 + $0x2530] sm:$0xff] }
 0x50e   :  { %11100 = vmatprep.subr.bf16.mxu0 %v14913_v61  ;;  %v14707_v5 = vcombine.high %v966_v18, %v970_v54 }
 0x510   :  { %11552 = vmatpush1.bf16.msra.mxu1 %v14658_v7  ;;  %v978_v7 = vld [vmem:[%s22050_s1 + $0x1d78] sm:$0xff] }
 0x511   :  { %11101 = vmatpush1.bf16.msra.mxu0 %v14912_v10  ;;  %11553 = vmatprep.subr.bf16.mxu1 %v14667_v12  ;;  %v1229_v10 = vld [vmem:[%s22050_s1 + $0x2550] sm:$0xff]  ;;  %v14715_v59 = vcombine.high %v974_v2, %v978_v7 }
 0x512   :  { %11102 = vmatprep.subr.bf16.mxu0 %v14921_v16  ;;  %v1233_v12 = vld [vmem:[%s22050_s1 + $0x2570] sm:$0xff]  ;;  %v14706_v16 = vcombine.low %v966_v18, %v970_v54 }
 0x513   :  { %v14969_v9 = vcombine.high %v1229_v10, %v1233_v12  ;;  %v14968_v23 = vcombine.low %v1229_v10, %v1233_v12  ;;  %v1022_v12 = vld [vmem:[%s22050_s1 + $0x1ed8] sm:$0xff] }
 0x514   :  { %11554 = vmatpush1.bf16.msra.mxu1 %v14666_v19  ;;  %v986_v19 = vld [vmem:[%s22050_s1 + $0x1db8] sm:$0xff] }
 0x515   :  { %11103 = vmatpush1.bf16.msra.mxu0 %v14920_v20  ;;  %11564 = vmatprep.subr.bf16.mxu1 %v14675_v21  ;;  %v1237_v20 = vld [vmem:[%s22050_s1 + $0x2590] sm:$0xff]  ;;  %v14723_v17 = vcombine.high %v982_v53, %v986_v19 }
 0x516   :  { %11113 = vmatprep.subr.bf16.mxu0 %v14929_v58  ;;  %v1241_v21 = vld [vmem:[%s22050_s1 + $0x25b0] sm:$0xff]  ;;  %v14714_v58 = vcombine.low %v974_v2, %v978_v7 }
 0x517   :  { %11556 = vmatmul.mubr.bf16.vlgmr.msra.gmra.mrb[8].mxu1 %v17547_v30  ;;  %v958_v30 = vld [vmem:[%s22050_s1 + $0x1cd8] sm:$0xff]  ;;  %v14977_v26 = vcombine.high %v1237_v20, %v1241_v21  ;;  %v14976_v36 = vcombine.low %v1237_v20, %v1241_v21 }
 0x518   :  { %11105 = vmatmul.mubr.bf16.vlgmr.msra.gmra.mrb[4].mxu0 %v17965_v46  ;;  %11565 = vmatpush1.bf16.msra.mxu1 %v14674_v28  ;;  %v14699_v14 = vcombine.high %v958_v30, %v962_v40  ;;  %v14698_v61 = vcombine.low %v958_v30, %v962_v40  ;;  %v994_v28 = vld [vmem:[%s22050_s1 + $0x1df8] sm:$0xff] }
 0x519   :  { %11114 = vmatpush1.bf16.msra.mxu0 %v14928_v31  ;;  %11566 = vmatprep.subr.bf16.mxu1 %v14683_v33  ;;  %v1245_v31 = vld [vmem:[%s22050_s1 + $0x25d0] sm:$0xff]  ;;  %v14731_v22 = vcombine.high %v990_v27, %v994_v28  ;;  %v1030_v21 = vld [vmem:[%s22050_s1 + $0x1f18] sm:$0xff] }
 0x51a   :  { %11115 = vmatprep.subr.bf16.mxu0 %v14937_v35  ;;  %11145 = vmatprep.mubr.bf16.mxu0 %v17975_v57  ;;  %v1249_v33 = vld [vmem:[%s22050_s1 + $0x25f0] sm:$0xff]  ;;  %v14722_v35 = vcombine.low %v982_v53, %v986_v19 }
 0x51b   :  { %11596 = vmatprep.mubr.bf16.mxu1 %v17557_v38  ;;  %v1221_v38 = vld [vmem:[%s22050_s1 + $0x2510] sm:$0xff]  ;;  %v14985_v37 = vcombine.high %v1245_v31, %v1249_v33  ;;  %v14984_v30 = vcombine.low %v1245_v31, %v1249_v33  ;;  %v1038_v33 = vld [vmem:[%s22050_s1 + $0x1f58] sm:$0xff] }
 0x51c   :  { %11567 = vmatpush1.bf16.msra.mxu1 %v14682_v52  ;;  %v14961_v1 = vcombine.high %v1221_v38, %v1225_v60  ;;  %v14960_v62 = vcombine.low %v1221_v38, %v1225_v60  ;;  %v1002_v52 = vld [vmem:[%s22050_s1 + $0x1e38] sm:$0xff] }
 0x51d   :  { %11116 = vmatpush1.bf16.msra.mxu0 %v14936_v41  ;;  %11568 = vmatprep.subr.bf16.mxu1 %v14691_v42  ;;  %v1253_v41 = vld [vmem:[%s22050_s1 + $0x2610] sm:$0xff]  ;;  %v14739_v40 = vcombine.high %v998_v25, %v1002_v52  ;;  %v1014_v60 = vld [vmem:[%s22050_s1 + $0x1e98] sm:$0xff] }
 0x51e   :  { %11117 = vmatprep.subr.bf16.mxu0 %v14945_v47  ;;  %v1257_v42 = vld [vmem:[%s22050_s1 + $0x2630] sm:$0xff]  ;;  %v14730_v47 = vcombine.low %v990_v27, %v994_v28 }
 0x51f   :  { %v14993_v39 = vcombine.high %v1253_v41, %v1257_v42  ;;  %v14992_v18 = vcombine.low %v1253_v41, %v1257_v42  ;;  %v1046_v42 = vld [vmem:[%s22050_s1 + $0x1f98] sm:$0xff] }
 0x520   :  { %11569 = vmatpush1.bf16.msra.mxu1 %v14690_v51  ;;  %v1010_v51 = vld [vmem:[%s22050_s1 + $0x1e78] sm:$0xff] }
 0x521   :  { %11118 = vmatpush1.bf16.msra.mxu0 %v14944_v13  ;;  %11570 = vmatprep.subr.bf16.mxu1 %v14699_v14  ;;  %v1261_v13 = vld [vmem:[%s22050_s1 + $0x2650] sm:$0xff]  ;;  %v14747_v54 = vcombine.high %v1006_v45, %v1010_v51 }
 0x522   :  { %11119 = vmatprep.subr.bf16.mxu0 %v14953_v49  ;;  %v1265_v14 = vld [vmem:[%s22050_s1 + $0x2670] sm:$0xff]  ;;  %v14738_v49 = vcombine.low %v998_v25, %v1002_v52 }
 0x523   :  { %v15001_v38 = vcombine.high %v1261_v13, %v1265_v14  ;;  %v15000_v2 = vcombine.low %v1261_v13, %v1265_v14  ;;  %v1054_v14 = vld [vmem:[%s22050_s1 + $0x1fd8] sm:$0xff] }
 0x524   :  { %11571 = vmatpush1.bf16.msra.mxu1 %v14698_v61  ;;  %v1018_v61 = vld [vmem:[%s22050_s1 + $0x1eb8] sm:$0xff] }
 0x525   :  { %11120 = vmatpush1.bf16.msra.mxu0 %v14952_v48  ;;  %11572 = vmatprep.subr.bf16.mxu1 %v14707_v5  ;;  %v1269_v48 = vld [vmem:[%s22050_s1 + $0x2690] sm:$0xff]  ;;  %v14755_v7 = vcombine.high %v1014_v60, %v1018_v61 }
 0x526   :  { %11121 = vmatprep.subr.bf16.mxu0 %v14961_v1  ;;  %v1273_v5 = vld [vmem:[%s22050_s1 + $0x26b0] sm:$0xff]  ;;  %v14746_v1 = vcombine.low %v1006_v45, %v1010_v51 }
 0x527   :  { %v15009_v10 = vcombine.high %v1269_v48, %v1273_v5  ;;  %v15008_v53 = vcombine.low %v1269_v48, %v1273_v5  ;;  %v1062_v5 = vld [vmem:[%s22050_s1 + $0x2018] sm:$0xff] }
 0x528   :  { %11573 = vmatpush1.bf16.msra.mxu1 %v14706_v16  ;;  %v1026_v16 = vld [vmem:[%s22050_s1 + $0x1ef8] sm:$0xff] }
 0x529   :  { %11122 = vmatpush1.bf16.msra.mxu0 %v14960_v62  ;;  %11574 = vmatprep.subr.bf16.mxu1 %v14715_v59  ;;  %v1277_v62 = vld [vmem:[%s22050_s1 + $0x26d0] sm:$0xff]  ;;  %v14763_v19 = vcombine.high %v1022_v12, %v1026_v16 }
 0x52a   :  { %11123 = vmatprep.subr.bf16.mxu0 %v14969_v9  ;;  %v1281_v59 = vld [vmem:[%s22050_s1 + $0x26f0] sm:$0xff]  ;;  %v14754_v9 = vcombine.low %v1014_v60, %v1018_v61 }
 0x52b   :  { %v15017_v20 = vcombine.high %v1277_v62, %v1281_v59  ;;  %v15016_v27 = vcombine.low %v1277_v62, %v1281_v59  ;;  %v1070_v59 = vld [vmem:[%s22050_s1 + $0x2058] sm:$0xff] }
 0x52c   :  { %11575 = vmatpush1.bf16.msra.mxu1 %v14714_v58  ;;  %v1034_v58 = vld [vmem:[%s22050_s1 + $0x1f38] sm:$0xff] }
 0x52d   :  { %11124 = vmatpush1.bf16.msra.mxu0 %v14968_v23  ;;  %11576 = vmatprep.subr.bf16.mxu1 %v14723_v17  ;;  %v1285_v23 = vld [vmem:[%s22050_s1 + $0x2710] sm:$0xff]  ;;  %v14771_v28 = vcombine.high %v1030_v21, %v1034_v58 }
 0x52e   :  { %11125 = vmatprep.subr.bf16.mxu0 %v14977_v26  ;;  %v1289_v17 = vld [vmem:[%s22050_s1 + $0x2730] sm:$0xff]  ;;  %v14762_v26 = vcombine.low %v1022_v12, %v1026_v16 }
 0x52f   :  { %v15025_v31 = vcombine.high %v1285_v23, %v1289_v17  ;;  %v15024_v25 = vcombine.low %v1285_v23, %v1289_v17  ;;  %v1078_v17 = vld [vmem:[%s22050_s1 + $0x2098] sm:$0xff] }
 0x530   :  { %11577 = vmatpush1.bf16.msra.mxu1 %v14722_v35  ;;  %v1042_v35 = vld [vmem:[%s22050_s1 + $0x1f78] sm:$0xff] }
 0x531   :  { %11126 = vmatpush1.bf16.msra.mxu0 %v14976_v36  ;;  %11578 = vmatprep.subr.bf16.mxu1 %v14731_v22  ;;  %v1293_v36 = vld [vmem:[%s22050_s1 + $0x2750] sm:$0xff]  ;;  %v14779_v52 = vcombine.high %v1038_v33, %v1042_v35 }
 0x532   :  { %11127 = vmatprep.subr.bf16.mxu0 %v14985_v37  ;;  %v1297_v22 = vld [vmem:[%s22050_s1 + $0x2770] sm:$0xff]  ;;  %v14770_v37 = vcombine.low %v1030_v21, %v1034_v58 }
 0x533   :  { %v15033_v41 = vcombine.high %v1293_v36, %v1297_v22  ;;  %v15032_v45 = vcombine.low %v1293_v36, %v1297_v22  ;;  %v1090_v22 = vld [vmem:[%s22050_s1 + $0x20f8] sm:$0xff] }
 0x534   :  { %11579 = vmatpush1.bf16.msra.mxu1 %v14730_v47  ;;  %v1050_v47 = vld [vmem:[%s22050_s1 + $0x1fb8] sm:$0xff] }
 0x535   :  { %11128 = vmatpush1.bf16.msra.mxu0 %v14984_v30  ;;  %11580 = vmatprep.subr.bf16.mxu1 %v14739_v40  ;;  %v1301_v30 = vld [vmem:[%s22050_s1 + $0x2790] sm:$0xff]  ;;  %v14787_v51 = vcombine.high %v1046_v42, %v1050_v47 }
 0x536   :  { %11129 = vmatprep.subr.bf16.mxu0 %v14993_v39  ;;  %v1305_v40 = vld [vmem:[%s22050_s1 + $0x27b0] sm:$0xff]  ;;  %v14778_v39 = vcombine.low %v1038_v33, %v1042_v35 }
 0x537   :  { %v15041_v13 = vcombine.high %v1301_v30, %v1305_v40  ;;  %v15040_v60 = vcombine.low %v1301_v30, %v1305_v40  ;;  %v1094_v30 = vld [vmem:[%s22050_s1 + $0x2118] sm:$0xff] }
 0x538   :  { %11581 = vmatpush1.bf16.msra.mxu1 %v14738_v49  ;;  %v1058_v49 = vld [vmem:[%s22050_s1 + $0x1ff8] sm:$0xff] }
 0x539   :  { %11130 = vmatpush1.bf16.msra.mxu0 %v14992_v18  ;;  %11582 = vmatprep.subr.bf16.mxu1 %v14747_v54  ;;  %v1309_v18 = vld [vmem:[%s22050_s1 + $0x27d0] sm:$0xff]  ;;  %v14795_v61 = vcombine.high %v1054_v14, %v1058_v49  ;;  %v1098_v40 = vld [vmem:[%s22050_s1 + $0x2138] sm:$0xff] }
 0x53a   :  { %11131 = vmatprep.subr.bf16.mxu0 %v15001_v38  ;;  %v1313_v54 = vld [vmem:[%s22050_s1 + $0x27f0] sm:$0xff]  ;;  %v14786_v38 = vcombine.low %v1046_v42, %v1050_v47 }
 0x53b   :  { %v15049_v48 = vcombine.high %v1309_v18, %v1313_v54  ;;  %v15048_v12 = vcombine.low %v1309_v18, %v1313_v54  ;;  %v1106_v18 = vld [vmem:[%s22050_s1 + $0x2178] sm:$0xff]  ;;  %v1357_v54 = vld [vmem:[%s22050_s1 + $0x2950] sm:$0xff] }
 0x53c   :  { %11583 = vmatpush1.bf16.msra.mxu1 %v14746_v1  ;;  %v1066_v1 = vld [vmem:[%s22050_s1 + $0x2038] sm:$0xff] }
 0x53d   :  { %11132 = vmatpush1.bf16.msra.mxu0 %v15000_v2  ;;  %11584 = vmatprep.subr.bf16.mxu1 %v14755_v7  ;;  %v1317_v2 = vld [vmem:[%s22050_s1 + $0x2810] sm:$0xff]  ;;  %v14803_v16 = vcombine.high %v1062_v5, %v1066_v1 }
 0x53e   :  { %11133 = vmatprep.subr.bf16.mxu0 %v15009_v10  ;;  %v1321_v7 = vld [vmem:[%s22050_s1 + $0x2830] sm:$0xff]  ;;  %v14794_v10 = vcombine.low %v1054_v14, %v1058_v49  ;;  %v1102_v49 = vld [vmem:[%s22050_s1 + $0x2158] sm:$0xff] }
 0x53f   :  { %v15057_v62 = vcombine.high %v1317_v2, %v1321_v7  ;;  %v15056_v21 = vcombine.low %v1317_v2, %v1321_v7  ;;  %v1114_v2 = vld [vmem:[%s22050_s1 + $0x21b8] sm:$0xff]  ;;  %v1365_v7 = vld [vmem:[%s22050_s1 + $0x2990] sm:$0xff] }
 0x540   :  { %11585 = vmatpush1.bf16.msra.mxu1 %v14754_v9  ;;  %v1074_v9 = vld [vmem:[%s22050_s1 + $0x2078] sm:$0xff] }
 0x541   :  { %11134 = vmatpush1.bf16.msra.mxu0 %v15008_v53  ;;  %11586 = vmatprep.subr.bf16.mxu1 %v14763_v19  ;;  %v1325_v53 = vld [vmem:[%s22050_s1 + $0x2850] sm:$0xff]  ;;  %v14811_v58 = vcombine.high %v1070_v59, %v1074_v9 }
 0x542   :  { %11135 = vmatprep.subr.bf16.mxu0 %v15017_v20  ;;  %v1329_v19 = vld [vmem:[%s22050_s1 + $0x2870] sm:$0xff]  ;;  %v14802_v20 = vcombine.low %v1062_v5, %v1066_v1  ;;  %v1110_v1 = vld [vmem:[%s22050_s1 + $0x2198] sm:$0xff] }
 0x543   :  { %v15065_v23 = vcombine.high %v1325_v53, %v1329_v19  ;;  %v15064_v33 = vcombine.low %v1325_v53, %v1329_v19  ;;  %v1122_v53 = vld [vmem:[%s22050_s1 + $0x21f8] sm:$0xff]  ;;  %v1373_v19 = vld [vmem:[%s22050_s1 + $0x29d0] sm:$0xff] }
 0x544   :  { %11587 = vmatpush1.bf16.msra.mxu1 %v14762_v26  ;;  %v1082_v26 = vld [vmem:[%s22050_s1 + $0x20b8] sm:$0xff] }
 0x545   :  { %11136 = vmatpush1.bf16.msra.mxu0 %v15016_v27  ;;  %11588 = vmatprep.subr.bf16.mxu1 %v14771_v28  ;;  %v1333_v27 = vld [vmem:[%s22050_s1 + $0x2890] sm:$0xff]  ;;  %v14819_v35 = vcombine.high %v1078_v17, %v1082_v26 }
 0x546   :  { %11137 = vmatprep.subr.bf16.mxu0 %v15025_v31  ;;  %v1337_v28 = vld [vmem:[%s22050_s1 + $0x28b0] sm:$0xff]  ;;  %v14810_v31 = vcombine.low %v1070_v59, %v1074_v9  ;;  %v1118_v9 = vld [vmem:[%s22050_s1 + $0x21d8] sm:$0xff] }
 0x547   :  { %v15073_v36 = vcombine.high %v1333_v27, %v1337_v28 }
 0x548   :  { %11589 = vmatpush1.bf16.msra.mxu1 %v14770_v37  ;;  %v1341_v37 = vld [vmem:[%s22050_s1 + $0x28d0] sm:$0xff] }
 0x549   :  { %11138 = vmatpush1.bf16.msra.mxu0 %v15024_v25  ;;  %11590 = vmatprep.subr.bf16.mxu1 %v14779_v52  ;;  %v1345_v25 = vld [vmem:[%s22050_s1 + $0x28f0] sm:$0xff]  ;;  %v14818_v52 = vcombine.low %v1078_v17, %v1082_v26  ;;  %v1126_v26 = vld [vmem:[%s22050_s1 + $0x2218] sm:$0xff] }
 0x54a   :  { %11139 = vmatprep.subr.bf16.mxu0 %v15033_v41  ;;  %v15072_v41 = vcombine.low %v1333_v27, %v1337_v28  ;;  %v15081_v47 = vcombine.high %v1341_v37, %v1345_v25  ;;  %v1130_v27 = vld [vmem:[%s22050_s1 + $0x2238] sm:$0xff]  ;;  %v1381_v28 = vld [vmem:[%s22050_s1 + $0x2a10] sm:$0xff] }
 0x54c   :  { %11591 = vmatpush1.bf16.msra.mxu1 %v14778_v39  ;;  %v1353_v39 = vld [vmem:[%s22050_s1 + $0x2930] sm:$0xff] }
 0x54d   :  { %11140 = vmatpush1.bf16.msra.mxu0 %v15032_v45  ;;  %11592 = vmatprep.subr.bf16.mxu1 %v14787_v51  ;;  %v15080_v51 = vcombine.low %v1341_v37, %v1345_v25  ;;  %v1138_v37 = vld [vmem:[%s22050_s1 + $0x2278] sm:$0xff]  ;;  %v1389_v25 = vld [vmem:[%s22050_s1 + $0x2a50] sm:$0xff] }
 0x54e   :  { %11141 = vmatprep.subr.bf16.mxu0 %v15041_v13  ;;  %v14835_v13 = vcombine.high %v1094_v30, %v1098_v40 }
 0x550   :  { %11593 = vmatpush1.bf16.msra.mxu1 %v14786_v38  ;;  %v1361_v38 = vld [vmem:[%s22050_s1 + $0x2970] sm:$0xff] }
 0x551   :  { %11142 = vmatpush1.bf16.msra.mxu0 %v15040_v60  ;;  %11594 = vmatprep.subr.bf16.mxu1 %v14795_v61  ;;  %v14834_v60 = vcombine.low %v1094_v30, %v1098_v40  ;;  %v15097_v5 = vcombine.high %v1357_v54, %v1361_v38  ;;  %v1142_v40 = vld [vmem:[%s22050_s1 + $0x2298] sm:$0xff] }
 0x552   :  { %11143 = vmatprep.subr.bf16.mxu0 %v15049_v48  ;;  %v14843_v48 = vcombine.high %v1102_v49, %v1106_v18 }
 0x554   :  { %11595 = vmatpush1.bf16.msra.mxu1 %v14794_v10  ;;  %v1369_v10 = vld [vmem:[%s22050_s1 + $0x29b0] sm:$0xff] }
 0x555   :  { %11144 = vmatpush1.bf16.msra.mxu0 %v15048_v12  ;;  %11605 = vmatprep.subr.bf16.mxu1 %v14803_v16  ;;  %v14842_v12 = vcombine.low %v1102_v49, %v1106_v18  ;;  %v15096_v16 = vcombine.low %v1357_v54, %v1361_v38  ;;  %v15105_v59 = vcombine.high %v1365_v7, %v1369_v10  ;;  %v1150_v18 = vld [vmem:[%s22050_s1 + $0x22d8] sm:$0xff]  ;;  %v1405_v38 = vld [vmem:[%s22050_s1 + $0x2ad0] sm:$0xff] }
 0x556   :  { %11154 = vmatprep.subr.bf16.mxu0 %v15057_v62  ;;  %v14851_v62 = vcombine.high %v1110_v1, %v1114_v2  ;;  %v1154_v54 = vld [vmem:[%s22050_s1 + $0x22f8] sm:$0xff] }
 0x557   :  { %11597 = vmatmul.mubr.bf16.vlgmr.msra.gmra.mrb[8].mxu1 %v17762_v29  ;;  %v1086_v29 = vld [vmem:[%s22050_s1 + $0x20d8] sm:$0xff] }
 0x558   :  { %11146 = vmatmul.mubr.bf16.vlgmr.msra.gmra.mrb[4].mxu0 %v18176_v6  ;;  %11606 = vmatpush1.bf16.msra.mxu1 %v14802_v20  ;;  %v14827_v42 = vcombine.high %v1086_v29, %v1090_v22  ;;  %v14826_v45 = vcombine.low %v1086_v29, %v1090_v22  ;;  %v1377_v20 = vld [vmem:[%s22050_s1 + $0x29f0] sm:$0xff]  ;;  %v1134_v22 = vld [vmem:[%s22050_s1 + $0x2258] sm:$0xff] }
 0x559   :  { %11155 = vmatpush1.bf16.msra.mxu0 %v15056_v21  ;;  %11607 = vmatprep.subr.bf16.mxu1 %v14811_v58  ;;  %v14850_v21 = vcombine.low %v1110_v1, %v1114_v2  ;;  %v15104_v58 = vcombine.low %v1365_v7, %v1369_v10  ;;  %v15113_v17 = vcombine.high %v1373_v19, %v1377_v20  ;;  %v1158_v2 = vld [vmem:[%s22050_s1 + $0x2318] sm:$0xff]  ;;  %v1413_v10 = vld [vmem:[%s22050_s1 + $0x2b10] sm:$0xff] }
 0x55a   :  { %11156 = vmatprep.subr.bf16.mxu0 %v15065_v23  ;;  %11186 = vmatprep.mubr.bf16.mxu0 %v18185_v15  ;;  %v14859_v23 = vcombine.high %v1118_v9, %v1122_v53  ;;  %v1162_v7 = vld [vmem:[%s22050_s1 + $0x2338] sm:$0xff] }
 0x55b   :  { %11637 = vmatprep.mubr.bf16.mxu1 %v17771_v24  ;;  %v1349_v24 = vld [vmem:[%s22050_s1 + $0x2910] sm:$0xff] }
 0x55c   :  { %11608 = vmatpush1.bf16.msra.mxu1 %v14810_v31  ;;  %v15089_v14 = vcombine.high %v1349_v24, %v1353_v39  ;;  %v15088_v61 = vcombine.low %v1349_v24, %v1353_v39  ;;  %v1385_v31 = vld [vmem:[%s22050_s1 + $0x2a30] sm:$0xff]  ;;  %v1146_v24 = vld [vmem:[%s22050_s1 + $0x22b8] sm:$0xff] }
 0x55d   :  { %11157 = vmatpush1.bf16.msra.mxu0 %v15064_v33  ;;  %11609 = vmatprep.subr.bf16.mxu1 %v14819_v35  ;;  %v14858_v33 = vcombine.low %v1118_v9, %v1122_v53  ;;  %v15112_v35 = vcombine.low %v1373_v19, %v1377_v20  ;;  %v15121_v29 = vcombine.high %v1381_v28, %v1385_v31  ;;  %v1397_v39 = vld [vmem:[%s22050_s1 + $0x2a90] sm:$0xff]  ;;  %v1166_v53 = vld [vmem:[%s22050_s1 + $0x2358] sm:$0xff] }
 0x55e   :  { %11158 = vmatprep.subr.bf16.mxu0 %v15073_v36  ;;  %v14867_v36 = vcombine.high %v1126_v26, %v1130_v27  ;;  %v1170_v19 = vld [vmem:[%s22050_s1 + $0x2378] sm:$0xff]  ;;  %v1421_v20 = vld [vmem:[%s22050_s1 + $0x2b50] sm:$0xff] }
 0x560   :  { %11610 = vmatpush1.bf16.msra.mxu1 %v14818_v52  ;;  %v1393_v52 = vld [vmem:[%s22050_s1 + $0x2a70] sm:$0xff] }
 0x561   :  { %11159 = vmatpush1.bf16.msra.mxu0 %v15072_v41  ;;  %11611 = vmatprep.subr.bf16.mxu1 %v14827_v42  ;;  %v14866_v41 = vcombine.low %v1126_v26, %v1130_v27  ;;  %v15120_v42 = vcombine.low %v1381_v28, %v1385_v31  ;;  %v15129_v30 = vcombine.high %v1389_v25, %v1393_v52  ;;  %v1174_v27 = vld [vmem:[%s22050_s1 + $0x2398] sm:$0xff]  ;;  %v1429_v31 = vld [vmem:[%s22050_s1 + $0x2b90] sm:$0xff] }
 0x562   :  { %11160 = vmatprep.subr.bf16.mxu0 %v15081_v47  ;;  %v14875_v47 = vcombine.high %v1134_v22, %v1138_v37  ;;  %v1178_v28 = vld [vmem:[%s22050_s1 + $0x23b8] sm:$0xff] }
 0x564   :  { %11612 = vmatpush1.bf16.msra.mxu1 %v14826_v45  ;;  %v1401_v45 = vld [vmem:[%s22050_s1 + $0x2ab0] sm:$0xff] }
 0x565   :  { %11161 = vmatpush1.bf16.msra.mxu0 %v15080_v51  ;;  %11613 = vmatprep.subr.bf16.mxu1 %v14835_v13  ;;  %v14874_v51 = vcombine.low %v1134_v22, %v1138_v37  ;;  %v15128_v13 = vcombine.low %v1389_v25, %v1393_v52  ;;  %v15137_v49 = vcombine.high %v1397_v39, %v1401_v45  ;;  %v1182_v37 = vld [vmem:[%s22050_s1 + $0x23d8] sm:$0xff]  ;;  %v1437_v52 = vld [vmem:[%s22050_s1 + $0x2bd0] sm:$0xff] }
 0x566   :  { %11162 = vmatprep.subr.bf16.mxu0 %v15089_v14  ;;  %v14883_v14 = vcombine.high %v1142_v40, %v1146_v24  ;;  %v1186_v25 = vld [vmem:[%s22050_s1 + $0x23f8] sm:$0xff] }
 0x568   :  { %11614 = vmatpush1.bf16.msra.mxu1 %v14834_v60  ;;  %v1409_v60 = vld [vmem:[%s22050_s1 + $0x2af0] sm:$0xff] }
 0x569   :  { %11163 = vmatpush1.bf16.msra.mxu0 %v15088_v61  ;;  %11615 = vmatprep.subr.bf16.mxu1 %v14843_v48  ;;  %v14882_v61 = vcombine.low %v1142_v40, %v1146_v24  ;;  %v15136_v48 = vcombine.low %v1397_v39, %v1401_v45  ;;  %v15145_v1 = vcombine.high %v1405_v38, %v1409_v60  ;;  %v1190_v24 = vld [vmem:[%s22050_s1 + $0x2418] sm:$0xff]  ;;  %v1445_v45 = vld [vmem:[%s22050_s1 + $0x2c10] sm:$0xff] }
 0x56a   :  { %11164 = vmatprep.subr.bf16.mxu0 %v15097_v5  ;;  %v14891_v5 = vcombine.high %v1150_v18, %v1154_v54  ;;  %v1194_v39 = vld [vmem:[%s22050_s1 + $0x2438] sm:$0xff] }
 0x56c   :  { %11616 = vmatpush1.bf16.msra.mxu1 %v14842_v12  ;;  %v1417_v12 = vld [vmem:[%s22050_s1 + $0x2b30] sm:$0xff] }
 0x56d   :  { %11165 = vmatpush1.bf16.msra.mxu0 %v15096_v16  ;;  %11617 = vmatprep.subr.bf16.mxu1 %v14851_v62  ;;  %v14890_v16 = vcombine.low %v1150_v18, %v1154_v54  ;;  %v15144_v62 = vcombine.low %v1405_v38, %v1409_v60  ;;  %v15153_v9 = vcombine.high %v1413_v10, %v1417_v12  ;;  %v1198_v54 = vld [vmem:[%s22050_s1 + $0x2458] sm:$0xff]  ;;  %v1453_v60 = vld [vmem:[%s22050_s1 + $0x2c50] sm:$0xff] }
 0x56e   :  { %11166 = vmatprep.subr.bf16.mxu0 %v15105_v59  ;;  %v14899_v59 = vcombine.high %v1158_v2, %v1162_v7  ;;  %v1202_v38 = vld [vmem:[%s22050_s1 + $0x2478] sm:$0xff] }
 0x570   :  { %11618 = vmatpush1.bf16.msra.mxu1 %v14850_v21  ;;  %v1425_v21 = vld [vmem:[%s22050_s1 + $0x2b70] sm:$0xff] }
 0x571   :  { %11167 = vmatpush1.bf16.msra.mxu0 %v15104_v58  ;;  %11619 = vmatprep.subr.bf16.mxu1 %v14859_v23  ;;  %v14898_v58 = vcombine.low %v1158_v2, %v1162_v7  ;;  %v15152_v23 = vcombine.low %v1413_v10, %v1417_v12  ;;  %v15161_v26 = vcombine.high %v1421_v20, %v1425_v21  ;;  %v1206_v7 = vld [vmem:[%s22050_s1 + $0x2498] sm:$0xff]  ;;  %v1461_v12 = vld [vmem:[%s22050_s1 + $0x2c90] sm:$0xff] }
 0x572   :  { %11168 = vmatprep.subr.bf16.mxu0 %v15113_v17  ;;  %v14907_v17 = vcombine.high %v1166_v53, %v1170_v19  ;;  %v1210_v10 = vld [vmem:[%s22050_s1 + $0x24b8] sm:$0xff] }
 0x574   :  { %11620 = vmatpush1.bf16.msra.mxu1 %v14858_v33  ;;  %v1433_v33 = vld [vmem:[%s22050_s1 + $0x2bb0] sm:$0xff] }
 0x575   :  { %11169 = vmatpush1.bf16.msra.mxu0 %v15112_v35  ;;  %11621 = vmatprep.subr.bf16.mxu1 %v14867_v36  ;;  %v14906_v35 = vcombine.low %v1166_v53, %v1170_v19  ;;  %v15160_v36 = vcombine.low %v1421_v20, %v1425_v21  ;;  %v15169_v22 = vcombine.high %v1429_v31, %v1433_v33  ;;  %v1218_v19 = vld [vmem:[%s22050_s1 + $0x24f8] sm:$0xff]  ;;  %v1469_v20 = vld [vmem:[%s22050_s1 + $0x2cd0] sm:$0xff] }
 0x576   :  { %11170 = vmatprep.subr.bf16.mxu0 %v15121_v29  ;;  %v14915_v29 = vcombine.high %v1174_v27, %v1178_v28  ;;  %v1473_v21 = vld [vmem:[%s22050_s1 + $0x2cf0] sm:$0xff] }
 0x578   :  { %11622 = vmatpush1.bf16.msra.mxu1 %v14866_v41  ;;  %v1441_v41 = vld [vmem:[%s22050_s1 + $0x2bf0] sm:$0xff] }
 0x579   :  { %11171 = vmatpush1.bf16.msra.mxu0 %v15120_v42  ;;  %11623 = vmatprep.subr.bf16.mxu1 %v14875_v47  ;;  %v14914_v42 = vcombine.low %v1174_v27, %v1178_v28  ;;  %v15168_v47 = vcombine.low %v1429_v31, %v1433_v33  ;;  %v15177_v40 = vcombine.high %v1437_v52, %v1441_v41  ;;  %v1222_v27 = vld [vmem:[%s22050_s1 + $0x2518] sm:$0xff]  ;;  %v1481_v31 = vld [vmem:[%s22050_s1 + $0x2d30] sm:$0xff] }
 0x57a   :  { %11172 = vmatprep.subr.bf16.mxu0 %v15129_v30  ;;  %v14923_v30 = vcombine.high %v1182_v37, %v1186_v25  ;;  %v1226_v28 = vld [vmem:[%s22050_s1 + $0x2538] sm:$0xff] }
 0x57c   :  { %11624 = vmatpush1.bf16.msra.mxu1 %v14874_v51  ;;  %v1449_v51 = vld [vmem:[%s22050_s1 + $0x2c30] sm:$0xff] }
 0x57d   :  { %11173 = vmatpush1.bf16.msra.mxu0 %v15128_v13  ;;  %11625 = vmatprep.subr.bf16.mxu1 %v14883_v14  ;;  %v14922_v13 = vcombine.low %v1182_v37, %v1186_v25  ;;  %v15176_v14 = vcombine.low %v1437_v52, %v1441_v41  ;;  %v15185_v18 = vcombine.high %v1445_v45, %v1449_v51  ;;  %v1234_v37 = vld [vmem:[%s22050_s1 + $0x2578] sm:$0xff]  ;;  %v1485_v25 = vld [vmem:[%s22050_s1 + $0x2d50] sm:$0xff] }
 0x57e   :  { %11174 = vmatprep.subr.bf16.mxu0 %v15137_v49  ;;  %v14931_v49 = vcombine.high %v1190_v24, %v1194_v39  ;;  %v1489_v52 = vld [vmem:[%s22050_s1 + $0x2d70] sm:$0xff]  ;;  %v14962_v41 = vcombine.low %v1222_v27, %v1226_v28 }
 0x580   :  { %11626 = vmatpush1.bf16.msra.mxu1 %v14882_v61  ;;  %v1457_v61 = vld [vmem:[%s22050_s1 + $0x2c70] sm:$0xff] }
 0x581   :  { %11175 = vmatpush1.bf16.msra.mxu0 %v15136_v48  ;;  %11627 = vmatprep.subr.bf16.mxu1 %v14891_v5  ;;  %v14930_v48 = vcombine.low %v1190_v24, %v1194_v39  ;;  %v15184_v5 = vcombine.low %v1445_v45, %v1449_v51  ;;  %v15193_v2 = vcombine.high %v1453_v60, %v1457_v61  ;;  %v1242_v24 = vld [vmem:[%s22050_s1 + $0x25b8] sm:$0xff]  ;;  %v1493_v39 = vld [vmem:[%s22050_s1 + $0x2d90] sm:$0xff] }
 0x582   :  { %11176 = vmatprep.subr.bf16.mxu0 %v15145_v1  ;;  %v14939_v1 = vcombine.high %v1198_v54, %v1202_v38  ;;  %v1497_v45 = vld [vmem:[%s22050_s1 + $0x2db0] sm:$0xff] }
 0x584   :  { %11628 = vmatpush1.bf16.msra.mxu1 %v14890_v16  ;;  %v1465_v16 = vld [vmem:[%s22050_s1 + $0x2cb0] sm:$0xff] }
 0x585   :  { %11177 = vmatpush1.bf16.msra.mxu0 %v15144_v62  ;;  %11629 = vmatprep.subr.bf16.mxu1 %v14899_v59  ;;  %v14938_v62 = vcombine.low %v1198_v54, %v1202_v38  ;;  %v15192_v59 = vcombine.low %v1453_v60, %v1457_v61  ;;  %v15201_v53 = vcombine.high %v1461_v12, %v1465_v16  ;;  %v1250_v54 = vld [vmem:[%s22050_s1 + $0x25f8] sm:$0xff]  ;;  %v1501_v38 = vld [vmem:[%s22050_s1 + $0x2dd0] sm:$0xff] }
 0x586   :  { %11178 = vmatprep.subr.bf16.mxu0 %v15153_v9  ;;  %v14947_v9 = vcombine.high %v1206_v7, %v1210_v10  ;;  %v1505_v60 = vld [vmem:[%s22050_s1 + $0x2df0] sm:$0xff] }
 0x588   :  { %11630 = vmatpush1.bf16.msra.mxu1 %v14898_v58  ;;  %v14946_v58 = vcombine.low %v1206_v7, %v1210_v10  ;;  %v1258_v7 = vld [vmem:[%s22050_s1 + $0x2638] sm:$0xff]  ;;  %v1509_v10 = vld [vmem:[%s22050_s1 + $0x2e10] sm:$0xff] }
 0x589   :  { %11179 = vmatpush1.bf16.msra.mxu0 %v15152_v23  ;;  %11631 = vmatprep.subr.bf16.mxu1 %v14907_v17  ;;  %v15200_v23 = vcombine.low %v1461_v12, %v1465_v16  ;;  %v1513_v12 = vld [vmem:[%s22050_s1 + $0x2e30] sm:$0xff] }
 0x58a   :  { %11180 = vmatprep.subr.bf16.mxu0 %v15161_v26  ;;  %v15209_v26 = vcombine.high %v1469_v20, %v1473_v21 }
 0x58c   :  { %11632 = vmatpush1.bf16.msra.mxu1 %v14906_v35  ;;  %v15208_v35 = vcombine.low %v1469_v20, %v1473_v21  ;;  %v1521_v20 = vld [vmem:[%s22050_s1 + $0x2e70] sm:$0xff] }
 0x58d   :  { %11181 = vmatpush1.bf16.msra.mxu0 %v15160_v36  ;;  %11633 = vmatprep.subr.bf16.mxu1 %v14915_v29  ;;  %v14963_v36 = vcombine.high %v1222_v27, %v1226_v28  ;;  %v1274_v27 = vld [vmem:[%s22050_s1 + $0x26b8] sm:$0xff]  ;;  %v1525_v28 = vld [vmem:[%s22050_s1 + $0x2e90] sm:$0xff] }
 0x58e   :  { %11182 = vmatprep.subr.bf16.mxu0 %v15169_v22  ;;  %v1230_v22 = vld [vmem:[%s22050_s1 + $0x2558] sm:$0xff] }
 0x58f   :  { %v14970_v51 = vcombine.low %v1230_v22, %v1234_v37 }
 0x590   :  { %11634 = vmatpush1.bf16.msra.mxu1 %v14914_v42 }
 0x591   :  { %11183 = vmatpush1.bf16.msra.mxu0 %v15168_v47  ;;  %11635 = vmatprep.subr.bf16.mxu1 %v14923_v30  ;;  %v14971_v47 = vcombine.high %v1230_v22, %v1234_v37  ;;  %v15225_v30 = vcombine.high %v1485_v25, %v1489_v52  ;;  %v1282_v22 = vld [vmem:[%s22050_s1 + $0x26f8] sm:$0xff]  ;;  %v1533_v37 = vld [vmem:[%s22050_s1 + $0x2ed0] sm:$0xff] }
 0x592   :  { %11184 = vmatprep.subr.bf16.mxu0 %v15177_v40  ;;  %v1238_v40 = vld [vmem:[%s22050_s1 + $0x2598] sm:$0xff] }
 0x593   :  { %v14978_v61 = vcombine.low %v1238_v40, %v1242_v24 }
 0x594   :  { %11636 = vmatpush1.bf16.msra.mxu1 %v14922_v13  ;;  %v15224_v13 = vcombine.low %v1485_v25, %v1489_v52  ;;  %v1537_v25 = vld [vmem:[%s22050_s1 + $0x2ef0] sm:$0xff] }
 0x595   :  { %11185 = vmatpush1.bf16.msra.mxu0 %v15176_v14  ;;  %11646 = vmatprep.subr.bf16.mxu1 %v14931_v49  ;;  %v14979_v14 = vcombine.high %v1238_v40, %v1242_v24  ;;  %v15233_v49 = vcombine.high %v1493_v39, %v1497_v45  ;;  %v1290_v40 = vld [vmem:[%s22050_s1 + $0x2738] sm:$0xff]  ;;  %v1541_v24 = vld [vmem:[%s22050_s1 + $0x2f10] sm:$0xff] }
 0x596   :  { %11195 = vmatprep.subr.bf16.mxu0 %v15185_v18  ;;  %v1246_v18 = vld [vmem:[%s22050_s1 + $0x25d8] sm:$0xff] }
 0x597   :  { %11638 = vmatmul.mubr.bf16.vlgmr.msra.gmra.mrb[8].mxu1 %v17965_v46  ;;  %v1214_v46 = vld [vmem:[%s22050_s1 + $0x24d8] sm:$0xff]  ;;  %v14986_v16 = vcombine.low %v1246_v18, %v1250_v54 }
 0x598   :  { %11187 = vmatmul.mubr.bf16.vlgmr.msra.gmra.mrb[4].mxu0 %v18379_v34  ;;  %11647 = vmatpush1.bf16.msra.mxu1 %v14930_v48  ;;  %v14955_v17 = vcombine.high %v1214_v46, %v1218_v19  ;;  %v14954_v33 = vcombine.low %v1214_v46, %v1218_v19  ;;  %v15232_v48 = vcombine.low %v1493_v39, %v1497_v45  ;;  %v1266_v46 = vld [vmem:[%s22050_s1 + $0x2678] sm:$0xff]  ;;  %v1517_v19 = vld [vmem:[%s22050_s1 + $0x2e50] sm:$0xff] }
 0x599   :  { %11196 = vmatpush1.bf16.msra.mxu0 %v15184_v5  ;;  %11648 = vmatprep.subr.bf16.mxu1 %v14939_v1  ;;  %v14987_v5 = vcombine.high %v1246_v18, %v1250_v54  ;;  %v15241_v1 = vcombine.high %v1501_v38, %v1505_v60  ;;  %v1545_v39 = vld [vmem:[%s22050_s1 + $0x2f30] sm:$0xff]  ;;  %v1298_v18 = vld [vmem:[%s22050_s1 + $0x2778] sm:$0xff] }
 0x59a   :  { %11197 = vmatprep.subr.bf16.mxu0 %v15193_v2  ;;  %11227 = vmatprep.mubr.bf16.mxu0 %v18389_v4  ;;  %v1254_v2 = vld [vmem:[%s22050_s1 + $0x2618] sm:$0xff]  ;;  %v1549_v54 = vld [vmem:[%s22050_s1 + $0x2f50] sm:$0xff] }
 0x59b   :  { %11678 = vmatprep.mubr.bf16.mxu1 %v17975_v57  ;;  %v1477_v57 = vld [vmem:[%s22050_s1 + $0x2d10] sm:$0xff]  ;;  %v14994_v21 = vcombine.low %v1254_v2, %v1258_v7 }
 0x59c   :  { %11649 = vmatpush1.bf16.msra.mxu1 %v14938_v62  ;;  %v15217_v29 = vcombine.high %v1477_v57, %v1481_v31  ;;  %v15216_v42 = vcombine.low %v1477_v57, %v1481_v31  ;;  %v15240_v62 = vcombine.low %v1501_v38, %v1505_v60  ;;  %v1529_v57 = vld [vmem:[%s22050_s1 + $0x2eb0] sm:$0xff] }
 0x59d   :  { %11198 = vmatpush1.bf16.msra.mxu0 %v15192_v59  ;;  %11650 = vmatprep.subr.bf16.mxu1 %v14947_v9  ;;  %v14995_v59 = vcombine.high %v1254_v2, %v1258_v7  ;;  %v15249_v9 = vcombine.high %v1509_v10, %v1513_v12  ;;  %v1553_v38 = vld [vmem:[%s22050_s1 + $0x2f70] sm:$0xff]  ;;  %v1306_v2 = vld [vmem:[%s22050_s1 + $0x27b8] sm:$0xff] }
 0x59e   :  { %11199 = vmatprep.subr.bf16.mxu0 %v15201_v53  ;;  %v1262_v53 = vld [vmem:[%s22050_s1 + $0x2658] sm:$0xff]  ;;  %v1557_v7 = vld [vmem:[%s22050_s1 + $0x2f90] sm:$0xff] }
 0x59f   :  { %v15002_v31 = vcombine.low %v1262_v53, %v1266_v46 }
 0x5a0   :  { %11651 = vmatpush1.bf16.msra.mxu1 %v14946_v58  ;;  %v15248_v58 = vcombine.low %v1509_v10, %v1513_v12  ;;  %v1561_v10 = vld [vmem:[%s22050_s1 + $0x2fb0] sm:$0xff] }
 0x5a1   :  { %11200 = vmatpush1.bf16.msra.mxu0 %v15200_v23  ;;  %11652 = vmatprep.subr.bf16.mxu1 %v14955_v17  ;;  %v15003_v23 = vcombine.high %v1262_v53, %v1266_v46  ;;  %v15257_v17 = vcombine.high %v1517_v19, %v1521_v20  ;;  %v1314_v53 = vld [vmem:[%s22050_s1 + $0x27f8] sm:$0xff]  ;;  %v1565_v46 = vld [vmem:[%s22050_s1 + $0x2fd0] sm:$0xff] }
 0x5a2   :  { %11201 = vmatprep.subr.bf16.mxu0 %v15209_v26  ;;  %v1270_v26 = vld [vmem:[%s22050_s1 + $0x2698] sm:$0xff] }
 0x5a3   :  { %v15010_v52 = vcombine.low %v1270_v26, %v1274_v27 }
 0x5a4   :  { %11653 = vmatpush1.bf16.msra.mxu1 %v14954_v33  ;;  %v15256_v33 = vcombine.low %v1517_v19, %v1521_v20  ;;  %v1569_v19 = vld [vmem:[%s22050_s1 + $0x2ff0] sm:$0xff] }
 0x5a5   :  { %11202 = vmatpush1.bf16.msra.mxu0 %v15208_v35  ;;  %11654 = vmatprep.subr.bf16.mxu1 %v14963_v36  ;;  %v15011_v35 = vcombine.high %v1270_v26, %v1274_v27  ;;  %v15265_v36 = vcombine.high %v1525_v28, %v1529_v57  ;;  %v1322_v26 = vld [vmem:[%s22050_s1 + $0x2838] sm:$0xff]  ;;  %v1573_v27 = vld [vmem:[%s22050_s1 + $0x3010] sm:$0xff] }
 0x5a6   :  { %11203 = vmatprep.subr.bf16.mxu0 %v15217_v29  ;;  %v1278_v29 = vld [vmem:[%s22050_s1 + $0x26d8] sm:$0xff] }
 0x5a7   :  { %v15018_v45 = vcombine.low %v1278_v29, %v1282_v22 }
 0x5a8   :  { %11655 = vmatpush1.bf16.msra.mxu1 %v14962_v41  ;;  %v15264_v41 = vcombine.low %v1525_v28, %v1529_v57  ;;  %v1577_v28 = vld [vmem:[%s22050_s1 + $0x3030] sm:$0xff] }
 0x5a9   :  { %11204 = vmatpush1.bf16.msra.mxu0 %v15216_v42  ;;  %11656 = vmatprep.subr.bf16.mxu1 %v14971_v47  ;;  %v15019_v42 = vcombine.high %v1278_v29, %v1282_v22  ;;  %v15273_v47 = vcombine.high %v1533_v37, %v1537_v25  ;;  %v1330_v29 = vld [vmem:[%s22050_s1 + $0x2878] sm:$0xff]  ;;  %v1581_v22 = vld [vmem:[%s22050_s1 + $0x3050] sm:$0xff] }
 0x5aa   :  { %11205 = vmatprep.subr.bf16.mxu0 %v15225_v30  ;;  %v1286_v30 = vld [vmem:[%s22050_s1 + $0x2718] sm:$0xff] }
 0x5ab   :  { %v15026_v60 = vcombine.low %v1286_v30, %v1290_v40 }
 0x5ac   :  { %11657 = vmatpush1.bf16.msra.mxu1 %v14970_v51  ;;  %v15272_v51 = vcombine.low %v1533_v37, %v1537_v25  ;;  %v1585_v37 = vld [vmem:[%s22050_s1 + $0x3070] sm:$0xff] }
 0x5ad   :  { %11206 = vmatpush1.bf16.msra.mxu0 %v15224_v13  ;;  %11658 = vmatprep.subr.bf16.mxu1 %v14979_v14  ;;  %v15027_v13 = vcombine.high %v1286_v30, %v1290_v40  ;;  %v15281_v14 = vcombine.high %v1541_v24, %v1545_v39  ;;  %v1338_v30 = vld [vmem:[%s22050_s1 + $0x28b8] sm:$0xff]  ;;  %v1589_v40 = vld [vmem:[%s22050_s1 + $0x3090] sm:$0xff] }
 0x5ae   :  { %11207 = vmatprep.subr.bf16.mxu0 %v15233_v49  ;;  %v1294_v49 = vld [vmem:[%s22050_s1 + $0x2758] sm:$0xff] }
 0x5af   :  { %v15034_v12 = vcombine.low %v1294_v49, %v1298_v18 }
 0x5b0   :  { %11659 = vmatpush1.bf16.msra.mxu1 %v14978_v61  ;;  %v15280_v61 = vcombine.low %v1541_v24, %v1545_v39  ;;  %v1593_v24 = vld [vmem:[%s22050_s1 + $0x30b0] sm:$0xff] }
 0x5b1   :  { %11208 = vmatpush1.bf16.msra.mxu0 %v15232_v48  ;;  %11660 = vmatprep.subr.bf16.mxu1 %v14987_v5  ;;  %v15035_v48 = vcombine.high %v1294_v49, %v1298_v18  ;;  %v15289_v5 = vcombine.high %v1549_v54, %v1553_v38  ;;  %v1597_v49 = vld [vmem:[%s22050_s1 + $0x30d0] sm:$0xff] }
 0x5b2   :  { %11209 = vmatprep.subr.bf16.mxu0 %v15241_v1  ;;  %v1302_v1 = vld [vmem:[%s22050_s1 + $0x2798] sm:$0xff]  ;;  %v1601_v18 = vld [vmem:[%s22050_s1 + $0x30f0] sm:$0xff] }
 0x5b3   :  { %v15042_v20 = vcombine.low %v1302_v1, %v1306_v2 }
 0x5b4   :  { %11661 = vmatpush1.bf16.msra.mxu1 %v14986_v16  ;;  %v15288_v16 = vcombine.low %v1549_v54, %v1553_v38  ;;  %v15328_v38 = vcombine.low %v1589_v40, %v1593_v24 }
 0x5b5   :  { %11210 = vmatpush1.bf16.msra.mxu0 %v15240_v62  ;;  %11662 = vmatprep.subr.bf16.mxu1 %v14995_v59  ;;  %v15043_v62 = vcombine.high %v1302_v1, %v1306_v2  ;;  %v15297_v59 = vcombine.high %v1557_v7, %v1561_v10 }
 0x5b6   :  { %11211 = vmatprep.subr.bf16.mxu0 %v15249_v9  ;;  %v1310_v9 = vld [vmem:[%s22050_s1 + $0x27d8] sm:$0xff] }
 0x5b7   :  { %v15050_v57 = vcombine.low %v1310_v9, %v1314_v53 }
 0x5b8   :  { %11663 = vmatpush1.bf16.msra.mxu1 %v14994_v21  ;;  %v15296_v21 = vcombine.low %v1557_v7, %v1561_v10  ;;  %v15836_v7 = vld [vmem:[%s22052_s3 + $0x40] sm:$0xff]   ;;  %v11811_v10 = vmax.f32 %v19322_v56, 0.0  ;;  %v15838_v56 = vld [vmem:[%s22052_s3 + $0x48] sm:$0xff]  }
 0x5b9   :  { %11212 = vmatpush1.bf16.msra.mxu0 %v15248_v58  ;;  %11664 = vmatprep.subr.bf16.mxu1 %v15003_v23  ;;  %v15051_v58 = vcombine.high %v1310_v9, %v1314_v53  ;;  %v15305_v23 = vcombine.high %v1565_v46, %v1569_v19  ;;  %v1366_v53 = vld [vmem:[%s22050_s1 + $0x2998] sm:$0xff] }
 0x5ba   :  { %11213 = vmatprep.subr.bf16.mxu0 %v15257_v17  ;;  %v1318_v17 = vld [vmem:[%s22050_s1 + $0x2818] sm:$0xff] }
 0x5bb   :  { %v15058_v25 = vcombine.low %v1318_v17, %v1322_v26 }
 0x5bc   :  { %11665 = vmatpush1.bf16.msra.mxu1 %v15002_v31  ;;  %v15304_v31 = vcombine.low %v1565_v46, %v1569_v19  ;;  %v1370_v46 = vld [vmem:[%s22050_s1 + $0x29b8] sm:$0xff]  ;;  %v11819_v19 = vpack.c.bf16 %v11811_v10, %v11811_v10 }
 0x5bd   :  { %11214 = vmatpush1.bf16.msra.mxu0 %v15256_v33  ;;  %11666 = vmatprep.subr.bf16.mxu1 %v15011_v35  ;;  %v15059_v33 = vcombine.high %v1318_v17, %v1322_v26  ;;  %v15313_v35 = vcombine.high %v1573_v27, %v1577_v28  ;;  %v1374_v17 = vld [vmem:[%s22050_s1 + $0x29d8] sm:$0xff] }
 0x5be   :  { %11215 = vmatprep.subr.bf16.mxu0 %v15265_v36  ;;  %v1326_v36 = vld [vmem:[%s22050_s1 + $0x2858] sm:$0xff] }
 0x5bf   :  { %v15066_v39 = vcombine.low %v1326_v36, %v1330_v29  ;;  %v1378_v26 = vld [vmem:[%s22050_s1 + $0x29f8] sm:$0xff] }
 0x5c0   :  { %11667 = vmatpush1.bf16.msra.mxu1 %v15010_v52  ;;  %v15312_v52 = vcombine.low %v1573_v27, %v1577_v28  ;;  %v15106_v27 = vcombine.low %v1366_v53, %v1370_v46  ;;  %v15841_v28 = vld [vmem:[%s22052_s3 + $0x10] sm:$0xff]   ;;  %v15869_v10 = vld [vmem:[%s22054_s5 + $0x4] ss:$24 sps:$4 sm:$0xff]  }
 0x5c1   :  { %11216 = vmatpush1.bf16.msra.mxu0 %v15264_v41  ;;  %11668 = vmatprep.subr.bf16.mxu1 %v15019_v42  ;;  %v15067_v41 = vcombine.high %v1326_v36, %v1330_v29  ;;  %v15321_v42 = vcombine.high %v1581_v22, %v1585_v37  ;;  %v15114_v36 = vcombine.low %v1374_v17, %v1378_v26  ;;  %v15843_v29 = vld [vmem:[%s22052_s3 + $0x18] sm:$0xff]  }
 0x5c2   :  { %11217 = vmatprep.subr.bf16.mxu0 %v15273_v47  ;;  %v1334_v47 = vld [vmem:[%s22050_s1 + $0x2898] sm:$0xff] }
 0x5c3   :  { %v15074_v54 = vcombine.low %v1334_v47, %v1338_v30 }
 0x5c4   :  { %11669 = vmatpush1.bf16.msra.mxu1 %v15018_v45  ;;  %v15320_v45 = vcombine.low %v1581_v22, %v1585_v37  ;;  %v15844_v37 = vld [vmem:[%s22052_s3 + $0x60] sm:$0xff]  }
 0x5c5   :  { %11218 = vmatpush1.bf16.msra.mxu0 %v15272_v51  ;;  %11670 = vmatprep.subr.bf16.mxu1 %v15027_v13  ;;  %v15075_v51 = vcombine.high %v1334_v47, %v1338_v30  ;;  %v15329_v13 = vcombine.high %v1589_v40, %v1593_v24  ;;  %v15846_v30 = vld [vmem:[%s22052_s3 + $0x68] sm:$0xff]   ;;  %v1398_v40 = vld [vmem:[%s22050_s1 + $0x2a98] sm:$0xff] }
 0x5c6   :  { %11219 = vmatprep.subr.bf16.mxu0 %v15281_v14  ;;  %v1346_v14 = vld [vmem:[%s22050_s1 + $0x28f8] sm:$0xff] }
 0x5c7   :  { %v1402_v24 = vld [vmem:[%s22050_s1 + $0x2ab8] sm:$0xff] }
 0x5c8   :  { %11671 = vmatpush1.bf16.msra.mxu1 %v15026_v60 }
 0x5c9   :  { %11220 = vmatpush1.bf16.msra.mxu0 %v15280_v61  ;;  %11672 = vmatprep.subr.bf16.mxu1 %v15035_v48  ;;  %v15337_v61 = vcombine.high %v1597_v49, %v1601_v18  ;;  %v1350_v48 = vld [vmem:[%s22050_s1 + $0x2918] sm:$0xff] }
 0x5ca   :  { %11221 = vmatprep.subr.bf16.mxu0 %v15289_v5  ;;  %v1354_v5 = vld [vmem:[%s22050_s1 + $0x2938] sm:$0xff] }
 0x5cb   :  { %v15091_v2 = vcombine.high %v1350_v48, %v1354_v5 }
 0x5cc   :  { %11673 = vmatpush1.bf16.msra.mxu1 %v15034_v12  ;;  %v1358_v12 = vld [vmem:[%s22050_s1 + $0x2958] sm:$0xff] }
 0x5cd   :  { %11222 = vmatpush1.bf16.msra.mxu0 %v15288_v16  ;;  %11674 = vmatprep.subr.bf16.mxu1 %v15043_v62  ;;  %v1362_v16 = vld [vmem:[%s22050_s1 + $0x2978] sm:$0xff]  ;;  %v15090_v62 = vcombine.low %v1350_v48, %v1354_v5 }
 0x5ce   :  { %11223 = vmatprep.subr.bf16.mxu0 %v15297_v59  ;;  %v15837_v59 = vld [vmem:[%s22052_s3] sm:$0xff]   ;;  %v15099_v9 = vcombine.high %v1358_v12, %v1362_v16  ;;  %v15851_v5 = vld [vmem:[%s22052_s3 + $0x38] sm:$0xff]  }
 0x5d0   :  { %11675 = vmatpush1.bf16.msra.mxu1 %v15042_v20  ;;  %v15098_v20 = vcombine.low %v1358_v12, %v1362_v16 }
 0x5d1   :  { %11224 = vmatpush1.bf16.msra.mxu0 %v15296_v21  ;;  %11676 = vmatprep.subr.bf16.mxu1 %v15051_v58  ;;  %v15839_v21 = vld [vmem:[%s22052_s3 + $0x8] sm:$0xff]   ;;  %v15107_v58 = vcombine.high %v1366_v53, %v1370_v46 }
 0x5d2   :  { %11225 = vmatprep.subr.bf16.mxu0 %v15305_v23  ;;  %v15840_v23 = vld [vmem:[%s22052_s3 + $0x50] sm:$0xff]  }
 0x5d4   :  { %11677 = vmatpush1.bf16.msra.mxu1 %v15050_v57  ;;  %v15115_v57 = vcombine.high %v1374_v17, %v1378_v26  ;;  %v15877_v26 = vld [vmem:[%s22054_s5 + $0x60] ss:$24 sps:$4 sm:$0xff]  }
 0x5d5   :  { %11226 = vmatpush1.bf16.msra.mxu0 %v15304_v31  ;;  %11687 = vmatprep.subr.bf16.mxu1 %v15059_v33  ;;  %v15842_v31 = vld [vmem:[%s22052_s3 + $0x58] sm:$0xff]  }
 0x5d6   :  { %11236 = vmatprep.subr.bf16.mxu0 %v15313_v35  ;;  %v1382_v33 = vld [vmem:[%s22050_s1 + $0x2a18] sm:$0xff] }
 0x5d7   :  { %11679 = vmatmul.mubr.bf16.vlgmr.msra.gmra.mrb[8].mxu1 %v18176_v6  ;;  %v1342_v6 = vld [vmem:[%s22050_s1 + $0x28d8] sm:$0xff] }
 0x5d8   :  { %11228 = vmatmul.mubr.bf16.vlgmr.msra.gmra.mrb[4].mxu0 %v18583_v8  ;;  %11688 = vmatpush1.bf16.msra.mxu1 %v15058_v25  ;;  %v15083_v60 = vcombine.high %v1342_v6, %v1346_v14  ;;  %v15082_v1 = vcombine.low %v1342_v6, %v1346_v14  ;;  %v1386_v35 = vld [vmem:[%s22050_s1 + $0x2a38] sm:$0xff] }
 0x5d9   :  { %11237 = vmatpush1.bf16.msra.mxu0 %v15312_v52  ;;  %11689 = vmatprep.subr.bf16.mxu1 %v15067_v41  ;;  %v15123_v22 = vcombine.high %v1382_v33, %v1386_v35  ;;  %v1390_v25 = vld [vmem:[%s22050_s1 + $0x2a58] sm:$0xff]  ;;  %v15122_v41 = vcombine.low %v1382_v33, %v1386_v35  ;;  %v15883_v35 = vld [vmem:[%s22054_s5 + $0x90] ss:$24 sps:$4 sm:$0xff]  }
 0x5da   :  { %11238 = vmatprep.subr.bf16.mxu0 %v15321_v42  ;;  %11268 = vmatprep.mubr.bf16.mxu0 %v16206_v63  ;;  %v1394_v52 = vld [vmem:[%s22050_s1 + $0x2a78] sm:$0xff]  ;;  %v15845_v42 = vld [vmem:[%s22052_s3 + $0x20] sm:$0xff]  }
 0x5db   :  { %11719 = vmatprep.mubr.bf16.mxu1 %v18185_v15  ;;  %v15336_v15 = vcombine.low %v1597_v49, %v1601_v18  ;;  %v15131_v47 = vcombine.high %v1390_v25, %v1394_v52  ;;  %v1406_v6 = vld [vmem:[%s22050_s1 + $0x2ad8] sm:$0xff]  ;;  %v15138_v49 = vcombine.low %v1398_v40, %v1402_v24  ;;  %v15849_v18 = vld [vmem:[%s22052_s3 + $0x30] sm:$0xff]  }
 0x5dc   :  { %11690 = vmatpush1.bf16.msra.mxu1 %v15066_v39  ;;  %v15130_v39 = vcombine.low %v1390_v25, %v1394_v52  ;;  %v1410_v14 = vld [vmem:[%s22050_s1 + $0x2af8] sm:$0xff] }
 0x5dd   :  { %11239 = vmatpush1.bf16.msra.mxu0 %v15320_v45  ;;  %11691 = vmatprep.subr.bf16.mxu1 %v15075_v51  ;;  %v15847_v45 = vld [vmem:[%s22052_s3 + $0x28] sm:$0xff]   ;;  %v15139_v51 = vcombine.high %v1398_v40, %v1402_v24  ;;  %v15146_v48 = vcombine.low %v1406_v6, %v1410_v14  ;;  %v15889_v52 = vld [vmem:[%s22054_s5 + $0xc0] ss:$24 sps:$4 sm:$0xff]  }
 0x5de   :  { %11240 = vmatprep.subr.bf16.mxu0 %v15329_v13  ;;  %v15848_v13 = vld [vmem:[%s22052_s3 + $0x70] sm:$0xff]  }
 0x5df   :  { %v15895_v24 = vld [vmem:[%s22054_s5 + $0xf0] ss:$24 sps:$4 sm:$0xff]  }
 0x5e0   :  { %11692 = vmatpush1.bf16.msra.mxu1 %v15074_v54  ;;  %v15147_v54 = vcombine.high %v1406_v6, %v1410_v14  ;;  %v1478_v6 = vld [vmem:[%s22050_s1 + $0x2d18] sm:$0xff] }
 0x5e1   :  { %11241 = vmatpush1.bf16.msra.mxu0 %v15328_v38  ;;  %11693 = vmatprep.subr.bf16.mxu1 %v15083_v60  ;;  %v15850_v38 = vld [vmem:[%s22052_s3 + $0x78] sm:$0xff]  }
 0x5e2   :  { %11242 = vmatprep.subr.bf16.mxu0 %v15337_v61  ;;  %v1414_v60 = vld [vmem:[%s22050_s1 + $0x2b18] sm:$0xff] }
 0x5e3   :  { %v1418_v61 = vld [vmem:[%s22050_s1 + $0x2b38] sm:$0xff] }
 0x5e4   :  { %11694 = vmatpush1.bf16.msra.mxu1 %v15082_v1  ;;  %v15155_v1 = vcombine.high %v1414_v60, %v1418_v61  ;;  %v15154_v12 = vcombine.low %v1414_v60, %v1418_v61  ;;  %v1482_v14 = vld [vmem:[%s22050_s1 + $0x2d38] sm:$0xff] }
 0x5e5   :  { %11243 = vmatpush1.bf16.msra.mxu0 %v15336_v15  ;;  %11695 = vmatprep.subr.bf16.mxu1 %v15091_v2  ;;  %v11810_v15 = vmax.f32 %v19320_v50, 0.0  ;;  %v1422_v2 = vld [vmem:[%s22050_s1 + $0x2b58] sm:$0xff] }
 0x5e6   :  { %15570 = vmatprep.subr.bf16.mxu0 %v15836_v7  ;;  %v1426_v7 = vld [vmem:[%s22050_s1 + $0x2b78] sm:$0xff] }
 0x5e7   :  { %v15163_v16 = vcombine.high %v1422_v2, %v1426_v7  ;;  %v15867_v50 = vld [vmem:[%s22054_s5] ss:$24 sps:$4 sm:$0xff]   ;;  %v15162_v53 = vcombine.low %v1422_v2, %v1426_v7 }
 0x5e8   :  { %15342 = vmatmul.mubr.msk.bf16.vlgmr.msra.gmra.mrb[4].mxu0 %vm9674_vm0, %v18641_v3  ;;  %11696 = vmatpush1.bf16.msra.mxu1 %v15090_v62  ;;  %v11818_v62 = vpack.c.bf16 %v11810_v15, %v11810_v15  ;;  %v1486_v60 = vld [vmem:[%s22050_s1 + $0x2d58] sm:$0xff] }
 0x5e9   :  { %15571 = vmatpush3.bf16.msra.mxu0 %v15837_v59  ;;  %12121 = vmatprep.mubr.bf16.mxu0 %v11819_v19  ;;  %v1430_v59 = vld [vmem:[%s22050_s1 + $0x2b98] sm:$0xff]  ;;  %v15871_v19 = vld [vmem:[%s22054_s5 + $0x30] ss:$24 sps:$4 sm:$0xff]  }
 0x5ea   :  { %11697 = vmatprep.subr.bf16.mxu1 %v15099_v9  ;;  %15572 = vmatprep.subr.bf16.mxu0 %v15838_v56  ;;  %v1434_v9 = vld [vmem:[%s22050_s1 + $0x2bb8] sm:$0xff]  ;;  %v15873_v56 = vld [vmem:[%s22054_s5 + $0x34] ss:$24 sps:$4 sm:$0xff]  }
 0x5eb   :  { %v15171_v46 = vcombine.high %v1430_v59, %v1434_v9  ;;  %v1490_v61 = vld [vmem:[%s22050_s1 + $0x2d78] sm:$0xff] }
 0x5ec   :  { %11698 = vmatpush1.bf16.msra.mxu1 %v15098_v20  ;;  %v1438_v20 = vld [vmem:[%s22050_s1 + $0x2bd8] sm:$0xff] }
 0x5ed   :  { %15573 = vmatpush3.bf16.msra.mxu0 %v15839_v21  ;;  %11699 = vmatprep.subr.bf16.mxu1 %v15107_v58  ;;  %v1442_v21 = vld [vmem:[%s22050_s1 + $0x2bf8] sm:$0xff] }
 0x5ee   :  { %15574 = vmatprep.subr.bf16.mxu0 %v15840_v23  ;;  %v15879_v58 = vld [vmem:[%s22054_s5 + $0x64] ss:$24 sps:$4 sm:$0xff]   ;;  %v15170_v23 = vcombine.low %v1430_v59, %v1434_v9  ;;  %v15179_v17 = vcombine.high %v1438_v20, %v1442_v21  ;;  %v15913_v15 = vld [vmem:[%s22054_s5 + $0x180] ss:$24 sps:$4 sm:$0xff]  }
 0x5ef   :  { %v1494_v2 = vld [vmem:[%s22050_s1 + $0x2d98] sm:$0xff] }
 0x5f0   :  { %11700 = vmatpush1.bf16.msra.mxu1 %v15106_v27  ;;  %v1446_v27 = vld [vmem:[%s22050_s1 + $0x2c18] sm:$0xff] }
 0x5f1   :  { %15575 = vmatpush3.bf16.msra.mxu0 %v15841_v28  ;;  %11701 = vmatprep.subr.bf16.mxu1 %v15115_v57  ;;  %v1450_v28 = vld [vmem:[%s22050_s1 + $0x2c38] sm:$0xff]  ;;  %v15885_v57 = vld [vmem:[%s22054_s5 + $0x94] ss:$24 sps:$4 sm:$0xff]  }
 0x5f2   :  { %15576 = vmatprep.subr.bf16.mxu0 %v15842_v31  ;;  %v15178_v31 = vcombine.low %v1438_v20, %v1442_v21  ;;  %v15187_v33 = vcombine.high %v1446_v27, %v1450_v28  ;;  %v1498_v7 = vld [vmem:[%s22050_s1 + $0x2db8] sm:$0xff]  ;;  %v15933_v21 = vld [vmem:[%s22054_s5 + $0x214] ss:$24 sps:$4 sm:$0xff]  }
 0x5f3   :  { %v1506_v59 = vld [vmem:[%s22050_s1 + $0x2df8] sm:$0xff] }
 0x5f4   :  { %11702 = vmatpush1.bf16.msra.mxu1 %v15114_v36  ;;  %v1454_v36 = vld [vmem:[%s22050_s1 + $0x2c58] sm:$0xff] }
 0x5f5   :  { %15577 = vmatpush3.bf16.msra.mxu0 %v15843_v29  ;;  %11703 = vmatprep.subr.bf16.mxu1 %v15123_v22  ;;  %v1458_v29 = vld [vmem:[%s22050_s1 + $0x2c78] sm:$0xff] }
 0x5f6   :  { %15578 = vmatprep.subr.bf16.mxu0 %v15844_v37  ;;  %v15891_v22 = vld [vmem:[%s22054_s5 + $0xc4] ss:$24 sps:$4 sm:$0xff]   ;;  %v15186_v37 = vcombine.low %v1446_v27, %v1450_v28  ;;  %v15195_v25 = vcombine.high %v1454_v36, %v1458_v29 }
 0x5f7   :  { %v15927_v9 = vld [vmem:[%s22054_s5 + $0x1e4] ss:$24 sps:$4 sm:$0xff]  }
 0x5f8   :  { %11704 = vmatpush1.bf16.msra.mxu1 %v15122_v41  ;;  %v1462_v41 = vld [vmem:[%s22050_s1 + $0x2c98] sm:$0xff] }
 0x5f9   :  { %15579 = vmatpush3.bf16.msra.mxu0 %v15845_v42  ;;  %11705 = vmatprep.subr.bf16.mxu1 %v15131_v47  ;;  %v1466_v42 = vld [vmem:[%s22050_s1 + $0x2cb8] sm:$0xff]  ;;  %v15897_v47 = vld [vmem:[%s22054_s5 + $0xf4] ss:$24 sps:$4 sm:$0xff]  }
 0x5fa   :  { %15580 = vmatprep.subr.bf16.mxu0 %v15846_v30  ;;  %v15194_v30 = vcombine.low %v1454_v36, %v1458_v29  ;;  %v15203_v40 = vcombine.high %v1462_v41, %v1466_v42  ;;  %v1514_v20 = vld [vmem:[%s22050_s1 + $0x2e38] sm:$0xff]  ;;  %v15945_v29 = vld [vmem:[%s22054_s5 + $0x274] ss:$24 sps:$4 sm:$0xff]  }
 0x5fb   :  { %v1522_v27 = vld [vmem:[%s22050_s1 + $0x2e78] sm:$0xff] }
 0x5fc   :  { %11706 = vmatpush1.bf16.msra.mxu1 %v15130_v39  ;;  %v1470_v39 = vld [vmem:[%s22050_s1 + $0x2cd8] sm:$0xff] }
 0x5fd   :  { %15581 = vmatpush3.bf16.msra.mxu0 %v15847_v45  ;;  %11707 = vmatprep.subr.bf16.mxu1 %v15139_v51  ;;  %v1474_v45 = vld [vmem:[%s22050_s1 + $0x2cf8] sm:$0xff] }
 0x5fe   :  { %15582 = vmatprep.subr.bf16.mxu0 %v15848_v13  ;;  %v15211_v51 = vcombine.high %v1470_v39, %v1474_v45  ;;  %v15901_v13 = vld [vmem:[%s22054_s5 + $0x120] ss:$24 sps:$4 sm:$0xff]   ;;  %v15939_v28 = vld [vmem:[%s22054_s5 + $0x244] ss:$24 sps:$4 sm:$0xff]  }
 0x5ff   :  { %v1530_v36 = vld [vmem:[%s22050_s1 + $0x2eb8] sm:$0xff] }
 0x600   :  { %11708 = vmatpush1.bf16.msra.mxu1 %v15138_v49  ;;  %v15909_v49 = vld [vmem:[%s22054_s5 + $0x154] ss:$24 sps:$4 sm:$0xff]  }
 0x601   :  { %15583 = vmatpush3.bf16.msra.mxu0 %v15849_v18  ;;  %11709 = vmatprep.subr.bf16.mxu1 %v15147_v54  ;;  %v15210_v18 = vcombine.low %v1470_v39, %v1474_v45  ;;  %v15219_v54 = vcombine.high %v1478_v6, %v1482_v14  ;;  %v1546_v39 = vld [vmem:[%s22050_s1 + $0x2f38] sm:$0xff]  ;;  %v15957_v45 = vld [vmem:[%s22054_s5 + $0x2d4] ss:$24 sps:$4 sm:$0xff]  }
 0x602   :  { %15584 = vmatprep.subr.bf16.mxu0 %v15850_v38  ;;  %v15907_v38 = vld [vmem:[%s22054_s5 + $0x150] ss:$24 sps:$4 sm:$0xff]  }
 0x604   :  { %11710 = vmatpush1.bf16.msra.mxu1 %v15146_v48  ;;  %v15915_v48 = vld [vmem:[%s22054_s5 + $0x184] ss:$24 sps:$4 sm:$0xff]  }
 0x605   :  { %15585 = vmatpush3.bf16.msra.mxu0 %v15851_v5  ;;  %11711 = vmatprep.subr.bf16.mxu1 %v15155_v1  ;;  %v15218_v5 = vcombine.low %v1478_v6, %v1482_v14  ;;  %v15227_v1 = vcombine.high %v1486_v60, %v1490_v61  ;;  %v1554_v6 = vld [vmem:[%s22050_s1 + $0x2f78] sm:$0xff] }
 0x606   :  { %13353 = vmatprep.subr.bf16.mxu0 %v15869_v10  ;;  %v15921_v10 = vld [vmem:[%s22054_s5 + $0x1b4] ss:$24 sps:$4 sm:$0xff]  }
 0x608   :  { %12122 = vmatmul.mubr.bf16.vlgmr.msra.gmra.mrb[8].mxu0 %v11818_v62  ;;  %11712 = vmatpush1.bf16.msra.mxu1 %v15154_v12  ;;  %v15226_v12 = vcombine.low %v1486_v60, %v1490_v61  ;;  %v1502_v62 = vld [vmem:[%s22050_s1 + $0x2dd8] sm:$0xff] }
 0x609   :  { %11713 = vmatprep.subr.bf16.mxu1 %v15163_v16  ;;  %13354 = vmatpush1.bf16.msra.mxu0 %v15867_v50  ;;  %v15235_v16 = vcombine.high %v1494_v2, %v1498_v7  ;;  %v15919_v50 = vld [vmem:[%s22054_s5 + $0x1b0] ss:$24 sps:$4 sm:$0xff]   ;;  %v1566_v61 = vld [vmem:[%s22050_s1 + $0x2fd8] sm:$0xff] }
 0x60a   :  { %13355 = vmatprep.subr.bf16.mxu0 %v15873_v56  ;;  %v15234_v56 = vcombine.low %v1494_v2, %v1498_v7  ;;  %v1578_v2 = vld [vmem:[%s22050_s1 + $0x3038] sm:$0xff] }
 0x60c   :  { %11714 = vmatpush1.bf16.msra.mxu1 %v15162_v53  ;;  %v15243_v53 = vcombine.high %v1502_v62, %v1506_v59 }
 0x60d   :  { %11715 = vmatprep.subr.bf16.mxu1 %v15171_v46  ;;  %13356 = vmatpush1.bf16.msra.mxu0 %v15871_v19  ;;  %v15925_v46 = vld [vmem:[%s22054_s5 + $0x1e0] ss:$24 sps:$4 sm:$0xff]  }
 0x60e   :  { %13357 = vmatprep.subr.bf16.mxu0 %v15879_v58  ;;  %v1510_v19 = vld [vmem:[%s22050_s1 + $0x2e18] sm:$0xff]  ;;  %v15242_v58 = vcombine.low %v1502_v62, %v1506_v59  ;;  %v1619_v59 = vsub.s32 3, %v16320_v43 }
 0x610   :  { %11716 = vmatpush1.bf16.msra.mxu1 %v15170_v23  ;;  %v15251_v23 = vcombine.high %v1510_v19, %v1514_v20 }
 0x611   :  { %11717 = vmatprep.subr.bf16.mxu1 %v15179_v17  ;;  %13358 = vmatpush1.bf16.msra.mxu0 %v15877_v26  ;;  %v15931_v17 = vld [vmem:[%s22054_s5 + $0x210] ss:$24 sps:$4 sm:$0xff]   ;;  %v1518_v26 = vld [vmem:[%s22050_s1 + $0x2e58] sm:$0xff] }
 0x612   :  { %13359 = vmatprep.subr.bf16.mxu0 %v15885_v57  ;;  %v15250_v57 = vcombine.low %v1510_v19, %v1514_v20  ;;  %v21386_v19 = vld [vmem:[%s22051_s2] sm:$0xff] }
 0x613   :  { %v1620_v20 = vrot.slane %v21386_v19, %v1619_v59 }
 0x614   :  { %11718 = vmatpush1.bf16.msra.mxu1 %v15178_v31  ;;  %v15259_v31 = vcombine.high %v1518_v26, %v1522_v27 }
 0x615   :  { %11728 = vmatprep.subr.bf16.mxu1 %v15187_v33  ;;  %13360 = vmatpush1.bf16.msra.mxu0 %v15883_v35  ;;  %v15937_v33 = vld [vmem:[%s22054_s5 + $0x240] ss:$24 sps:$4 sm:$0xff]  }
 0x616   :  { %13361 = vmatprep.subr.bf16.mxu0 %v15891_v22  ;;  %v1526_v35 = vld [vmem:[%s22050_s1 + $0x2e98] sm:$0xff]  ;;  %v15258_v22 = vcombine.low %v1518_v26, %v1522_v27  ;;  %v15852_v27 = vld [vmem:[%s22052_s3 + $0xc0] sm:$0xff]  }
 0x617   :  { %11720 = vmatmul.mubr.bf16.vlgmr.msra.gmra.mrb[8].mxu1 %v18379_v34  ;;  %v15903_v34 = vld [vmem:[%s22054_s5 + $0x124] ss:$24 sps:$4 sm:$0xff]  }
 0x618   :  { %11729 = vmatpush1.bf16.msra.mxu1 %v15186_v37  ;;  %11760 = vmatprep.mubr.bf16.mxu1 %v18389_v4  ;;  %v15202_v4 = vcombine.low %v1462_v41, %v1466_v42  ;;  %v15267_v37 = vcombine.high %v1526_v35, %v1530_v36  ;;  %v1538_v41 = vld [vmem:[%s22050_s1 + $0x2ef8] sm:$0xff] }
 0x619   :  { %11730 = vmatprep.subr.bf16.mxu1 %v15195_v25  ;;  %13362 = vmatpush1.bf16.msra.mxu0 %v15889_v52  ;;  %v15943_v25 = vld [vmem:[%s22054_s5 + $0x270] ss:$24 sps:$4 sm:$0xff]   ;;  %v1534_v52 = vld [vmem:[%s22050_s1 + $0x2ed8] sm:$0xff] }
 0x61a   :  { %13363 = vmatprep.subr.bf16.mxu0 %v15897_v47  ;;  %v15951_v42 = vld [vmem:[%s22054_s5 + $0x2a4] ss:$24 sps:$4 sm:$0xff]   ;;  %v15266_v47 = vcombine.low %v1526_v35, %v1530_v36  ;;  %v15856_v35 = vld [vmem:[%s22052_s3 + $0xd0] sm:$0xff]  }
 0x61b   :  { %v15857_v36 = vld [vmem:[%s22052_s3 + $0x90] sm:$0xff]  }
 0x61c   :  { %11731 = vmatpush1.bf16.msra.mxu1 %v15194_v30  ;;  %v15275_v30 = vcombine.high %v1534_v52, %v1538_v41 }
 0x61d   :  { %11732 = vmatprep.subr.bf16.mxu1 %v15203_v40  ;;  %13364 = vmatpush1.bf16.msra.mxu0 %v15895_v24  ;;  %v15949_v40 = vld [vmem:[%s22054_s5 + $0x2a0] ss:$24 sps:$4 sm:$0xff]  }
 0x61e   :  { %13365 = vmatprep.subr.bf16.mxu0 %v15903_v34  ;;  %v1542_v24 = vld [vmem:[%s22050_s1 + $0x2f18] sm:$0xff]  ;;  %v15274_v34 = vcombine.low %v1534_v52, %v1538_v41  ;;  %v15862_v52 = vld [vmem:[%s22052_s3 + $0xe8] sm:$0xff]  }
 0x61f   :  { %v15282_v14 = vcombine.low %v1542_v24, %v1546_v39  ;;  %v15863_v41 = vld [vmem:[%s22052_s3 + $0xa8] sm:$0xff]  }
 0x620   :  { %11733 = vmatpush1.bf16.msra.mxu1 %v15202_v4  ;;  %v15283_v4 = vcombine.high %v1542_v24, %v1546_v39  ;;  %v15866_v24 = vld [vmem:[%s22052_s3 + $0xf8] sm:$0xff]  }
 0x621   :  { %11734 = vmatprep.subr.bf16.mxu1 %v15211_v51  ;;  %13366 = vmatpush1.bf16.msra.mxu0 %v15901_v13  ;;  %v15955_v51 = vld [vmem:[%s22054_s5 + $0x2d0] ss:$24 sps:$4 sm:$0xff]   ;;  %v1550_v13 = vld [vmem:[%s22050_s1 + $0x2f58] sm:$0xff] }
 0x622   :  { %13367 = vmatprep.subr.bf16.mxu0 %v15909_v49  ;;  %v15291_v49 = vcombine.high %v1550_v13, %v1554_v6  ;;  %v15870_v39 = vld [vmem:[%s22052_s3 + $0xb8] sm:$0xff]  }
 0x624   :  { %11735 = vmatpush1.bf16.msra.mxu1 %v15210_v18  ;;  %v1558_v18 = vld [vmem:[%s22050_s1 + $0x2f98] sm:$0xff] }
 0x625   :  { %11736 = vmatprep.subr.bf16.mxu1 %v15219_v54  ;;  %13368 = vmatpush1.bf16.msra.mxu0 %v15907_v38  ;;  %v1562_v54 = vld [vmem:[%s22050_s1 + $0x2fb8] sm:$0xff]  ;;  %v15290_v38 = vcombine.low %v1550_v13, %v1554_v6  ;;  %v15888_v6 = vld [vmem:[%s22054_s5 + $0x6c] ss:$24 sps:$4 sm:$0xff]  }
 0x626   :  { %13369 = vmatprep.subr.bf16.mxu0 %v15915_v48  ;;  %v15299_v60 = vcombine.high %v1558_v18, %v1562_v54  ;;  %v1570_v48 = vld [vmem:[%s22050_s1 + $0x2ff8] sm:$0xff] }
 0x627   :  { %v15306_v7 = vcombine.low %v1566_v61, %v1570_v48  ;;  %v15880_v13 = vld [vmem:[%s22054_s5 + $0x38] ss:$24 sps:$4 sm:$0xff]  }
 0x628   :  { %11737 = vmatpush1.bf16.msra.mxu1 %v15218_v5  ;;  %v15298_v5 = vcombine.low %v1558_v18, %v1562_v54  ;;  %v15892_v18 = vld [vmem:[%s22054_s5 + $0x98] ss:$24 sps:$4 sm:$0xff]   ;;  %v15900_v54 = vld [vmem:[%s22054_s5 + $0xcc] ss:$24 sps:$4 sm:$0xff]  }
 0x629   :  { %11738 = vmatprep.subr.bf16.mxu1 %v15227_v1  ;;  %13370 = vmatpush1.bf16.msra.mxu0 %v15913_v15  ;;  %v15307_v1 = vcombine.high %v1566_v61, %v1570_v48  ;;  %v1574_v15 = vld [vmem:[%s22050_s1 + $0x3018] sm:$0xff]  ;;  %v15912_v48 = vld [vmem:[%s22054_s5 + $0x12c] ss:$24 sps:$4 sm:$0xff]  }
 0x62a   :  { %13371 = vmatprep.subr.bf16.mxu0 %v15921_v10  ;;  %v15315_v10 = vcombine.high %v1574_v15, %v1578_v2  ;;  %v15904_v61 = vld [vmem:[%s22054_s5 + $0xf8] ss:$24 sps:$4 sm:$0xff]  }
 0x62c   :  { %11739 = vmatpush1.bf16.msra.mxu1 %v15226_v12  ;;  %v1582_v12 = vld [vmem:[%s22050_s1 + $0x3058] sm:$0xff] }
 0x62d   :  { %11740 = vmatprep.subr.bf16.mxu1 %v15235_v16  ;;  %13372 = vmatpush1.bf16.msra.mxu0 %v15919_v50  ;;  %v1586_v16 = vld [vmem:[%s22050_s1 + $0x3078] sm:$0xff]  ;;  %v15314_v50 = vcombine.low %v1574_v15, %v1578_v2  ;;  %v15924_v2 = vld [vmem:[%s22054_s5 + $0x18c] ss:$24 sps:$4 sm:$0xff]  }
 0x62e   :  { %13373 = vmatprep.subr.bf16.mxu0 %v15927_v9  ;;  %v15323_v62 = vcombine.high %v1582_v12, %v1586_v16  ;;  %v1590_v9 = vld [vmem:[%s22050_s1 + $0x3098] sm:$0xff] }
 0x62f   :  { %v15916_v15 = vld [vmem:[%s22054_s5 + $0x158] ss:$24 sps:$4 sm:$0xff]  }
 0x630   :  { %11741 = vmatpush1.bf16.msra.mxu1 %v15234_v56  ;;  %v1594_v56 = vld [vmem:[%s22050_s1 + $0x30b8] sm:$0xff] }
 0x631   :  { %11742 = vmatprep.subr.bf16.mxu1 %v15243_v53  ;;  %13374 = vmatpush1.bf16.msra.mxu0 %v15925_v46  ;;  %v15322_v53 = vcombine.low %v1582_v12, %v1586_v16  ;;  %v15331_v46 = vcombine.high %v1590_v9, %v1594_v56  ;;  %v15928_v12 = vld [vmem:[%s22054_s5 + $0x1b8] ss:$24 sps:$4 sm:$0xff]   ;;  %v15936_v16 = vld [vmem:[%s22054_s5 + $0x1ec] ss:$24 sps:$4 sm:$0xff]  }
 0x632   :  { %13375 = vmatprep.subr.bf16.mxu0 %v15933_v21  ;;  %v1598_v21 = vld [vmem:[%s22050_s1 + $0x30d8] sm:$0xff] }
 0x634   :  { %11743 = vmatpush1.bf16.msra.mxu1 %v15242_v58 }
 0x635   :  { %11744 = vmatprep.subr.bf16.mxu1 %v15251_v23  ;;  %13376 = vmatpush1.bf16.msra.mxu0 %v15931_v17  ;;  %v15619_v23 = vadd.f32 %v19712_v55, %v1620_v20  ;;  %v15966_v17 = vld [vmem:[%s22054_s5 + $0x304] ss:$24 sps:$4 sm:$0xff]   ;;  %v15854_v55 = vld [vmem:[%s22052_s3 + $0xc8] sm:$0xff]   ;;  %v1627_v20 = vsub.s32 5, %v16320_v43 }
 0x636   :  { %13377 = vmatprep.subr.bf16.mxu0 %v15939_v28 }
 0x637   :  { %v11813_v28 = vmax.f32 %v15619_v23, 0.0  ;;  %v15960_v23 = vld [vmem:[%s22054_s5 + $0x2ac] ss:$24 sps:$4 sm:$0xff]  }
 0x638   :  { %11745 = vmatpush1.bf16.msra.mxu1 %v15250_v57  ;;  %v15853_v57 = vld [vmem:[%s22052_s3 + $0x80] sm:$0xff]  }
 0x639   :  { %11746 = vmatprep.subr.bf16.mxu1 %v15259_v31  ;;  %13378 = vmatpush1.bf16.msra.mxu0 %v15937_v33  ;;  %v11821_v31 = vpack.c.bf16 %v11813_v28, %v11813_v28  ;;  %v15855_v33 = vld [vmem:[%s22052_s3 + $0x88] sm:$0xff]  }
 0x63a   :  { %13379 = vmatprep.subr.bf16.mxu0 %v15945_v29  ;;  %v15859_v29 = vld [vmem:[%s22052_s3 + $0x98] sm:$0xff]   ;;  %v15958_v28 = vld [vmem:[%s22054_s5 + $0x2a8] ss:$24 sps:$4 sm:$0xff]  }
 0x63c   :  { %11747 = vmatpush1.bf16.msra.mxu1 %v15258_v22  ;;  %v15860_v22 = vld [vmem:[%s22052_s3 + $0xe0] sm:$0xff]  }
 0x63d   :  { %11748 = vmatprep.subr.bf16.mxu1 %v15267_v37  ;;  %13380 = vmatpush1.bf16.msra.mxu0 %v15943_v25  ;;  %v15861_v37 = vld [vmem:[%s22052_s3 + $0xa0] sm:$0xff]   ;;  %v1615_v25 = vsub.s32 2, %v16320_v43 }
 0x63e   :  { %13381 = vmatprep.subr.bf16.mxu0 %v15951_v42 }
 0x63f   :  { %v1616_v42 = vrot.slane %v21386_v19, %v1615_v25 }
 0x640   :  { %11749 = vmatpush1.bf16.msra.mxu1 %v15266_v47  ;;  %v15864_v47 = vld [vmem:[%s22052_s3 + $0xf0] sm:$0xff]  }
 0x641   :  { %11750 = vmatprep.subr.bf16.mxu1 %v15275_v30  ;;  %13382 = vmatpush1.bf16.msra.mxu0 %v15949_v40  ;;  %v15865_v30 = vld [vmem:[%s22052_s3 + $0xb0] sm:$0xff]   ;;  %v15618_v40 = vadd.f32 %v19704_v44, %v1616_v42  ;;  %v15874_v44 = vld [vmem:[%s22054_s5 + $0x8] ss:$24 sps:$4 sm:$0xff]  }
 0x642   :  { %13383 = vmatprep.subr.bf16.mxu0 %v15957_v45  ;;  %v15967_v42 = vld [vmem:[%s22054_s5 + $0x308] ss:$24 sps:$4 sm:$0xff]  }
 0x643   :  { %v11812_v45 = vmax.f32 %v15618_v40, 0.0  ;;  %v15978_v40 = vld [vmem:[%s22054_s5 + $0x364] ss:$24 sps:$4 sm:$0xff]  }
 0x644   :  { %11751 = vmatpush1.bf16.msra.mxu1 %v15274_v34  ;;  %v15876_v34 = vld [vmem:[%s22054_s5 + $0xc] ss:$24 sps:$4 sm:$0xff]  }
 0x645   :  { %11752 = vmatprep.subr.bf16.mxu1 %v15283_v4  ;;  %13384 = vmatpush1.bf16.msra.mxu0 %v15955_v51  ;;  %v11820_v4 = vpack.c.bf16 %v11812_v45, %v11812_v45  ;;  %v15882_v51 = vld [vmem:[%s22054_s5 + $0x3c] ss:$24 sps:$4 sm:$0xff]   ;;  %v15981_v45 = vld [vmem:[%s22054_s5 + $0x36c] ss:$24 sps:$4 sm:$0xff]  }
 0x646   :  { %13394 = vmatprep.subr.bf16.mxu0 %v15966_v17 }
 0x648   :  { %11753 = vmatpush1.bf16.msra.mxu1 %v15282_v14  ;;  %v15886_v14 = vld [vmem:[%s22054_s5 + $0x68] ss:$24 sps:$4 sm:$0xff]  }
 0x649   :  { %11754 = vmatprep.subr.bf16.mxu1 %v15291_v49  ;;  %v15894_v49 = vld [vmem:[%s22054_s5 + $0x9c] ss:$24 sps:$4 sm:$0xff]  }
 0x64c   :  { %11755 = vmatpush1.bf16.msra.mxu1 %v15290_v38  ;;  %v15898_v38 = vld [vmem:[%s22054_s5 + $0xc8] ss:$24 sps:$4 sm:$0xff]  }
 0x64d   :  { %11756 = vmatprep.subr.bf16.mxu1 %v15299_v60  ;;  %v15906_v60 = vld [vmem:[%s22054_s5 + $0xfc] ss:$24 sps:$4 sm:$0xff]  }
 0x650   :  { %11757 = vmatpush1.bf16.msra.mxu1 %v15298_v5  ;;  %v15910_v5 = vld [vmem:[%s22054_s5 + $0x128] ss:$24 sps:$4 sm:$0xff]  }
 0x651   :  { %11758 = vmatprep.subr.bf16.mxu1 %v15307_v1  ;;  %v15918_v1 = vld [vmem:[%s22054_s5 + $0x15c] ss:$24 sps:$4 sm:$0xff]  }
 0x654   :  { %11759 = vmatpush1.bf16.msra.mxu1 %v15306_v7  ;;  %v15922_v7 = vld [vmem:[%s22054_s5 + $0x188] ss:$24 sps:$4 sm:$0xff]  }
 0x655   :  { %11769 = vmatprep.subr.bf16.mxu1 %v15315_v10  ;;  %v15930_v10 = vld [vmem:[%s22054_s5 + $0x1bc] ss:$24 sps:$4 sm:$0xff]  }
 0x657   :  { %11761 = vmatmul.mubr.bf16.vlgmr.msra.gmra.mrb[8].mxu1 %v18583_v8  ;;  %v1602_v8 = vld [vmem:[%s22050_s1 + $0x30f8] sm:$0xff] }
 0x658   :  { %11770 = vmatpush1.bf16.msra.mxu1 %v15314_v50  ;;  %11801 = vmatprep.mubr.bf16.mxu1 %v16206_v63  ;;  %v15330_v63 = vcombine.low %v1590_v9, %v1594_v56  ;;  %v15339_v58 = vcombine.high %v1598_v21, %v1602_v8  ;;  %v15338_v26 = vcombine.low %v1598_v21, %v1602_v8  ;;  %v15934_v50 = vld [vmem:[%s22054_s5 + $0x1e8] ss:$24 sps:$4 sm:$0xff]   ;;  %v15940_v9 = vld [vmem:[%s22054_s5 + $0x218] ss:$24 sps:$4 sm:$0xff]   ;;  %v15948_v56 = vld [vmem:[%s22054_s5 + $0x24c] ss:$24 sps:$4 sm:$0xff]  }
 0x659   :  { %11771 = vmatprep.subr.bf16.mxu1 %v15323_v62  ;;  %v15942_v62 = vld [vmem:[%s22054_s5 + $0x21c] ss:$24 sps:$4 sm:$0xff]  }
 0x65a   :  { %v15954_v21 = vld [vmem:[%s22054_s5 + $0x27c] ss:$24 sps:$4 sm:$0xff]  }
 0x65c   :  { %11772 = vmatpush1.bf16.msra.mxu1 %v15322_v53  ;;  %v15946_v53 = vld [vmem:[%s22054_s5 + $0x248] ss:$24 sps:$4 sm:$0xff]  }
 0x65d   :  { %11773 = vmatprep.subr.bf16.mxu1 %v15331_v46  ;;  %v1623_v46 = vsub.s32 4, %v16320_v43 }
 0x65f   :  { %v1624_v8 = vrot.slane %v21386_v19, %v1623_v46 }
 0x660   :  { %11774 = vmatpush1.bf16.msra.mxu1 %v15330_v63  ;;  %v15952_v63 = vld [vmem:[%s22054_s5 + $0x278] ss:$24 sps:$4 sm:$0xff]  }
 0x661   :  { %11775 = vmatprep.subr.bf16.mxu1 %v15339_v58  ;;  %v1628_v58 = vrot.slane %v21386_v19, %v1627_v20 }
 0x664   :  { %11776 = vmatpush1.bf16.msra.mxu1 %v15338_v26 }
 0x665   :  { %15592 = vmatprep.subr.bf16.mxu1 %v15852_v27 }
 0x667   :  { %15343 = vmatmul.mubr.msk.bf16.vlgmr.msra.gmra.mrb[8].mxu1 %vm9674_vm0, %v18641_v3  ;;  %v15858_v3 = vld [vmem:[%s22052_s3 + $0xd8] sm:$0xff]  }
 0x668   :  { %15593 = vmatpush3.bf16.msra.mxu1 %v15853_v57  ;;  %12161 = vmatprep.mubr.bf16.mxu1 %v11821_v31  ;;  %v15963_v31 = vld [vmem:[%s22054_s5 + $0x2dc] ss:$24 sps:$4 sm:$0xff]  }
 0x669   :  { %15594 = vmatprep.subr.bf16.mxu1 %v15854_v55 }
 0x66c   :  { %15595 = vmatpush3.bf16.msra.mxu1 %v15855_v33 }
 0x66d   :  { %15596 = vmatprep.subr.bf16.mxu1 %v15856_v35 }
 0x670   :  { %15597 = vmatpush3.bf16.msra.mxu1 %v15857_v36 }
 0x671   :  { %15598 = vmatprep.subr.bf16.mxu1 %v15858_v3  ;;  %v15961_v3 = vld [vmem:[%s22054_s5 + $0x2d8] ss:$24 sps:$4 sm:$0xff]  }
 0x674   :  { %15599 = vmatpush3.bf16.msra.mxu1 %v15859_v29 }
 0x675   :  { %15600 = vmatprep.subr.bf16.mxu1 %v15860_v22  ;;  %v15964_v22 = vld [vmem:[%s22054_s5 + $0x300] ss:$24 sps:$4 sm:$0xff]  }
 0x678   :  { %15601 = vmatpush3.bf16.msra.mxu1 %v15861_v37  ;;  %v15969_v37 = vld [vmem:[%s22054_s5 + $0x30c] ss:$24 sps:$4 sm:$0xff]  }
 0x679   :  { %15602 = vmatprep.subr.bf16.mxu1 %v15862_v52 }
 0x67c   :  { %15603 = vmatpush3.bf16.msra.mxu1 %v15863_v41  ;;  %v15972_v41 = vld [vmem:[%s22054_s5 + $0x334] ss:$24 sps:$4 sm:$0xff]  }
 0x67d   :  { %15604 = vmatprep.subr.bf16.mxu1 %v15864_v47  ;;  %v15970_v47 = vld [vmem:[%s22054_s5 + $0x330] ss:$24 sps:$4 sm:$0xff]  }
 0x680   :  { %15605 = vmatpush3.bf16.msra.mxu1 %v15865_v30  ;;  %v15975_v30 = vld [vmem:[%s22054_s5 + $0x33c] ss:$24 sps:$4 sm:$0xff]  }
 0x681   :  { %15606 = vmatprep.subr.bf16.mxu1 %v15866_v24  ;;  %v15973_v24 = vld [vmem:[%s22054_s5 + $0x338] ss:$24 sps:$4 sm:$0xff]  }
 0x684   :  { %15607 = vmatpush3.bf16.msra.mxu1 %v15870_v39  ;;  %v15976_v39 = vld [vmem:[%s22054_s5 + $0x360] ss:$24 sps:$4 sm:$0xff]  }
 0x685   :  { %13435 = vmatprep.subr.bf16.mxu1 %v15876_v34  ;;  %v15984_v34 = vld [vmem:[%s22054_s5 + $0x394] ss:$24 sps:$4 sm:$0xff]  }
 0x687   :  { %12162 = vmatmul.mubr.bf16.vlgmr.msra.gmra.mrb[12].mxu1 %v11820_v4  ;;  %v15982_v4 = vld [vmem:[%s22054_s5 + $0x390] ss:$24 sps:$4 sm:$0xff]  }
 0x688   :  { %13436 = vmatpush1.bf16.msra.mxu1 %v15874_v44  ;;  %v15979_v44 = vld [vmem:[%s22054_s5 + $0x368] ss:$24 sps:$4 sm:$0xff]  }
 0x689   :  { %13437 = vmatprep.subr.bf16.mxu1 %v15882_v51  ;;  %v15987_v51 = vld [vmem:[%s22054_s5 + $0x39c] ss:$24 sps:$4 sm:$0xff]  }
 0x68c   :  { %13438 = vmatpush1.bf16.msra.mxu1 %v15880_v13  ;;  %v15990_v13 = vld [vmem:[%s22054_s5 + $0x3c4] ss:$24 sps:$4 sm:$0xff]  }
 0x68d   :  { %13439 = vmatprep.subr.bf16.mxu1 %v15888_v6  ;;  %v15985_v6 = vld [vmem:[%s22054_s5 + $0x398] ss:$24 sps:$4 sm:$0xff]  }
 0x690   :  { %13440 = vmatpush1.bf16.msra.mxu1 %v15886_v14  ;;  %v15988_v14 = vld [vmem:[%s22054_s5 + $0x3c0] ss:$24 sps:$4 sm:$0xff]  }
 0x691   :  { %13441 = vmatprep.subr.bf16.mxu1 %v15894_v49  ;;  %v15993_v49 = vld [vmem:[%s22054_s5 + $0x3cc] ss:$24 sps:$4 sm:$0xff]  }
 0x694   :  { %13442 = vmatpush1.bf16.msra.mxu1 %v15892_v18  ;;  %v15996_v18 = vld [vmem:[%s22054_s5 + $0x3f4] ss:$24 sps:$4 sm:$0xff]  }
 0x695   :  { %13443 = vmatprep.subr.bf16.mxu1 %v15900_v54  ;;  %v15991_v54 = vld [vmem:[%s22054_s5 + $0x3c8] ss:$24 sps:$4 sm:$0xff]  }
 0x698   :  { %13444 = vmatpush1.bf16.msra.mxu1 %v15898_v38  ;;  %v15994_v38 = vld [vmem:[%s22054_s5 + $0x3f0] ss:$24 sps:$4 sm:$0xff]  }
 0x699   :  { %13445 = vmatprep.subr.bf16.mxu1 %v15906_v60  ;;  %v15999_v60 = vld [vmem:[%s22054_s5 + $0x3fc] ss:$24 sps:$4 sm:$0xff]  }
 0x69c   :  { %13446 = vmatpush1.bf16.msra.mxu1 %v15904_v61  ;;  %v16002_v61 = vld [vmem:[%s22054_s5 + $0x424] ss:$24 sps:$4 sm:$0xff]  }
 0x69d   :  { %13447 = vmatprep.subr.bf16.mxu1 %v15912_v48  ;;  %v15997_v48 = vld [vmem:[%s22054_s5 + $0x3f8] ss:$24 sps:$4 sm:$0xff]  }
 0x6a0   :  { %13448 = vmatpush1.bf16.msra.mxu1 %v15910_v5  ;;  %v16000_v5 = vld [vmem:[%s22054_s5 + $0x420] ss:$24 sps:$4 sm:$0xff]  }
 0x6a1   :  { %13449 = vmatprep.subr.bf16.mxu1 %v15918_v1  ;;  %v16005_v1 = vld [vmem:[%s22054_s5 + $0x42c] ss:$24 sps:$4 sm:$0xff]  }
 0x6a4   :  { %13450 = vmatpush1.bf16.msra.mxu1 %v15916_v15  ;;  %v16008_v15 = vld [vmem:[%s22054_s5 + $0x454] ss:$24 sps:$4 sm:$0xff]  }
 0x6a5   :  { %13451 = vmatprep.subr.bf16.mxu1 %v15924_v2 }
 0x6a8   :  { %13452 = vmatpush1.bf16.msra.mxu1 %v15922_v7 }
 0x6a9   :  { %13453 = vmatprep.subr.bf16.mxu1 %v15930_v10  ;;  %v16003_v10 = vld [vmem:[%s22054_s5 + $0x428] ss:$24 sps:$4 sm:$0xff]  }
 0x6ac   :  { %13454 = vmatpush1.bf16.msra.mxu1 %v15928_v12 }
 0x6ad   :  { %13455 = vmatprep.subr.bf16.mxu1 %v15936_v16 }
 0x6b0   :  { %13456 = vmatpush1.bf16.msra.mxu1 %v15934_v50  ;;  %v16006_v50 = vld [vmem:[%s22054_s5 + $0x450] ss:$24 sps:$4 sm:$0xff]  }
 0x6b1   :  { %13457 = vmatprep.subr.bf16.mxu1 %v15942_v62  ;;  %v16011_v62 = vld [vmem:[%s22054_s5 + $0x45c] ss:$24 sps:$4 sm:$0xff]  }
 0x6b4   :  { %13458 = vmatpush1.bf16.msra.mxu1 %v15940_v9 }
 0x6b5   :  { %13459 = vmatprep.subr.bf16.mxu1 %v15948_v56  ;;  %v16014_v56 = vld [vmem:[%s22054_s5 + $0x484] ss:$24 sps:$4 sm:$0xff]  }
 0x6b8   :  { %13460 = vmatpush1.bf16.msra.mxu1 %v15946_v53  ;;  %v16009_v53 = vld [vmem:[%s22054_s5 + $0x458] ss:$24 sps:$4 sm:$0xff]  }
 0x6b9   :  { %13461 = vmatprep.subr.bf16.mxu1 %v15954_v21  ;;  %v16012_v21 = vld [vmem:[%s22054_s5 + $0x480] ss:$24 sps:$4 sm:$0xff]  }
 0x6bb   :  { %v11270_v17 = vpop.f32.mrb[4].mxu0 }
 0x6bc   :  { %v15620_v26 = vadd.f32 %v11270_v17, %v1624_v8  ;;  %v11272_v27 = vpop.f32.mrb[5].mxu0  ;;  %13462 = vmatpush1.bf16.msra.mxu1 %v15952_v63  ;;  %v16017_v8 = vld [vmem:[%s22054_s5 + $0x48c] ss:$24 sps:$4 sm:$0xff]   ;;  %v16023_v17 = vld [vmem:[%s22054_s5 + $0x4bc] ss:$24 sps:$4 sm:$0xff]  }
 0x6bd   :  { %v15621_v57 = vadd.f32 %v11272_v27, %v1628_v58  ;;  %v11274_v55 = vpop.f32.mrb[6].mxu0  ;;  %13463 = vmatprep.subr.bf16.mxu1 %v15960_v23  ;;  %v16020_v63 = vld [vmem:[%s22054_s5 + $0x4b4] ss:$24 sps:$4 sm:$0xff]   ;;  %v16015_v58 = vld [vmem:[%s22054_s5 + $0x488] ss:$24 sps:$4 sm:$0xff]  }
 0x6be   :  { %v11814_v33 = vmax.f32 %v15620_v26, 0.0  ;;  %v11275_v35 = vpop.f32.mrb[7].mxu0  ;;  %v16018_v23 = vld [vmem:[%s22054_s5 + $0x4b0] ss:$24 sps:$4 sm:$0xff]   ;;  %v16026_v26 = vld [vmem:[%s22054_s5 + $0x4e4] ss:$24 sps:$4 sm:$0xff]  }
 0x6bf   :  { %v11815_v36 = vmax.f32 %v15621_v57, 0.0  ;;  %v16021_v27 = vld [vmem:[%s22054_s5 + $0x4b8] ss:$24 sps:$4 sm:$0xff]   ;;  %v16029_v57 = vld [vmem:[%s22054_s5 + $0x4ec] ss:$24 sps:$4 sm:$0xff]  }
 0x6c0   :  { %13464 = vmatpush1.bf16.msra.mxu1 %v15958_v28  ;;  %v21568_v52 = vpack.c.bf16 %v11814_v33, %v11814_v33  ;;  %v16024_v28 = vld [vmem:[%s22054_s5 + $0x4e0] ss:$24 sps:$4 sm:$0xff]   ;;  %v16032_v55 = vld [vmem:[%s22054_s5 + $0x514] ss:$24 sps:$4 sm:$0xff]   ;;  %v16030_v33 = vld [vmem:[%s22054_s5 + $0x510] ss:$24 sps:$4 sm:$0xff]  }
 0x6c1   :  { %v21560_v29 = vpack.c.bf16 %v11815_v36, %v11815_v36  ;;  %13465 = vmatprep.subr.bf16.mxu1 %v15963_v31  ;;  %v16027_v31 = vld [vmem:[%s22054_s5 + $0x4e8] ss:$24 sps:$4 sm:$0xff]   ;;  %v16035_v35 = vld [vmem:[%s22054_s5 + $0x51c] ss:$24 sps:$4 sm:$0xff]  }
 0x6c2   :  { %v16038_v36 = vld [vmem:[%s22054_s5 + $0x544] ss:$24 sps:$4 sm:$0xff]  }
 0x6c3   :  { %13385 = vmatprep.mubr.bf16.mxu0 %v21560_v29  ;;  %13467 = vmatprep.mubr.bf16.mxu1 %v21560_v29 }
 0x6c4   :  { %13386 = vmatmul.mubr.bf16.vlgmr.msra.gmra.mrb[12].mxu0 %v21568_v52  ;;  %13466 = vmatpush1.bf16.msra.mxu1 %v15961_v3  ;;  %v16033_v3 = vld [vmem:[%s22054_s5 + $0x518] ss:$24 sps:$4 sm:$0xff]  }
 0x6c5   :  { %13395 = vmatpush1.bf16.msra.mxu0 %v15964_v22  ;;  %13476 = vmatprep.subr.bf16.mxu1 %v15969_v37  ;;  %v16036_v22 = vld [vmem:[%s22054_s5 + $0x540] ss:$24 sps:$4 sm:$0xff]   ;;  %v16041_v37 = vld [vmem:[%s22054_s5 + $0x54c] ss:$24 sps:$4 sm:$0xff]  }
 0x6c6   :  { %13396 = vmatprep.subr.bf16.mxu0 %v15972_v41  ;;  %v16044_v41 = vld [vmem:[%s22054_s5 + $0x574] ss:$24 sps:$4 sm:$0xff]  }
 0x6c7   :  { %13468 = vmatmul.mubr.bf16.vlgmr.msra.gmra.mrb[16].mxu1 %v21568_v52 }
 0x6c8   :  { %13477 = vmatpush1.bf16.msra.mxu1 %v15967_v42  ;;  %v16039_v42 = vld [vmem:[%s22054_s5 + $0x548] ss:$24 sps:$4 sm:$0xff]  }
 0x6c9   :  { %13397 = vmatpush1.bf16.msra.mxu0 %v15970_v47  ;;  %13478 = vmatprep.subr.bf16.mxu1 %v15975_v30  ;;  %v16042_v47 = vld [vmem:[%s22054_s5 + $0x570] ss:$24 sps:$4 sm:$0xff]   ;;  %v16047_v30 = vld [vmem:[%s22054_s5 + $0x57c] ss:$24 sps:$4 sm:$0xff]  }
 0x6ca   :  { %13398 = vmatprep.subr.bf16.mxu0 %v15978_v40  ;;  %v16050_v40 = vld [vmem:[%s22054_s5 + $0x5a4] ss:$24 sps:$4 sm:$0xff]  }
 0x6cc   :  { %13479 = vmatpush1.bf16.msra.mxu1 %v15973_v24  ;;  %v16045_v24 = vld [vmem:[%s22054_s5 + $0x578] ss:$24 sps:$4 sm:$0xff]  }
 0x6cd   :  { %13399 = vmatpush1.bf16.msra.mxu0 %v15976_v39  ;;  %13480 = vmatprep.subr.bf16.mxu1 %v15981_v45  ;;  %v16048_v39 = vld [vmem:[%s22054_s5 + $0x5a0] ss:$24 sps:$4 sm:$0xff]   ;;  %v16053_v45 = vld [vmem:[%s22054_s5 + $0x5ac] ss:$24 sps:$4 sm:$0xff]  }
 0x6ce   :  { %13400 = vmatprep.subr.bf16.mxu0 %v15984_v34  ;;  %v16056_v34 = vld [vmem:[%s22054_s5 + $0x5d4] ss:$24 sps:$4 sm:$0xff]  }
 0x6d0   :  { %13481 = vmatpush1.bf16.msra.mxu1 %v15979_v44  ;;  %v16051_v44 = vld [vmem:[%s22054_s5 + $0x5a8] ss:$24 sps:$4 sm:$0xff]  }
 0x6d1   :  { %13401 = vmatpush1.bf16.msra.mxu0 %v15982_v4  ;;  %13482 = vmatprep.subr.bf16.mxu1 %v15987_v51  ;;  %v16054_v4 = vld [vmem:[%s22054_s5 + $0x5d0] ss:$24 sps:$4 sm:$0xff]   ;;  %v16059_v51 = vld [vmem:[%s22054_s5 + $0x5dc] ss:$24 sps:$4 sm:$0xff]  }
 0x6d2   :  { %13402 = vmatprep.subr.bf16.mxu0 %v15990_v13  ;;  %v16062_v13 = vld [vmem:[%s22054_s5 + $0x14] ss:$24 sps:$4 sm:$0xff]  }
 0x6d4   :  { %13483 = vmatpush1.bf16.msra.mxu1 %v15985_v6  ;;  %v16057_v6 = vld [vmem:[%s22054_s5 + $0x5d8] ss:$24 sps:$4 sm:$0xff]  }
 0x6d5   :  { %13403 = vmatpush1.bf16.msra.mxu0 %v15988_v14  ;;  %13484 = vmatprep.subr.bf16.mxu1 %v15993_v49  ;;  %v1631_v14 = vsub.s32 6, %v16320_v43  ;;  %v1635_v49 = vsub.s32 7, %v16320_v43 }
 0x6d6   :  { %13404 = vmatprep.subr.bf16.mxu0 %v15996_v18 }
 0x6d7   :  { %v1632_v18 = vrot.slane %v21386_v19, %v1631_v14  ;;  %v16113_v14 = vld [vmem:[%s22054_s5 + $0x344] ss:$24 sps:$4 sm:$0xff]  }
 0x6d8   :  { %13485 = vmatpush1.bf16.msra.mxu1 %v15991_v54  ;;  %v1636_v54 = vrot.slane %v21386_v19, %v1635_v49  ;;  %v16065_v19 = vld [vmem:[%s22054_s5 + $0x44] ss:$24 sps:$4 sm:$0xff]   ;;  %v16111_v49 = vld [vmem:[%s22054_s5 + $0x340] ss:$24 sps:$4 sm:$0xff]  }
 0x6d9   :  { %13405 = vmatpush1.bf16.msra.mxu0 %v15994_v38  ;;  %13486 = vmatprep.subr.bf16.mxu1 %v15999_v60 }
 0x6da   :  { %13406 = vmatprep.subr.bf16.mxu0 %v16002_v61 }
 0x6db   :  { %v15586_v2 = vpop.f32.mrb[8].mxu0 }
 0x6dc   :  { %v15587_v7 = vpop.f32.mrb[9].mxu0  ;;  %13487 = vmatpush1.bf16.msra.mxu1 %v15997_v48 }
 0x6dd   :  { %v21652_v12 = vadd.f32 %v15587_v7, %v15586_v2  ;;  %v15589_v16 = vpop.f32.mrb[10].mxu0  ;;  %13407 = vmatpush1.bf16.msra.mxu0 %v16000_v5  ;;  %13488 = vmatprep.subr.bf16.mxu1 %v16005_v1 }
 0x6de   :  { %v15590_v9 = vpop.f32.mrb[11].mxu0  ;;  %13408 = vmatprep.subr.bf16.mxu0 %v16008_v15 }
 0x6df   :  { %v16066_v9 = vld [vmem:[%s22054_s5 + $0x70] ss:$24 sps:$4 sm:$0xff]  }
 0x6e0   :  { %13489 = vmatpush1.bf16.msra.mxu1 %v16003_v10  ;;  %v16060_v10 = vld [vmem:[%s22054_s5 + $0x10] ss:$24 sps:$4 sm:$0xff]  }
 0x6e1   :  { %13409 = vmatpush1.bf16.msra.mxu0 %v16006_v50  ;;  %13490 = vmatprep.subr.bf16.mxu1 %v16011_v62  ;;  %v16063_v50 = vld [vmem:[%s22054_s5 + $0x40] ss:$24 sps:$4 sm:$0xff]   ;;  %v16068_v62 = vld [vmem:[%s22054_s5 + $0x74] ss:$24 sps:$4 sm:$0xff]  }
 0x6e2   :  { %13410 = vmatprep.subr.bf16.mxu0 %v16014_v56  ;;  %v16071_v56 = vld [vmem:[%s22054_s5 + $0xa4] ss:$24 sps:$4 sm:$0xff]  }
 0x6e4   :  { %13491 = vmatpush1.bf16.msra.mxu1 %v16009_v53  ;;  %v16074_v53 = vld [vmem:[%s22054_s5 + $0xd4] ss:$24 sps:$4 sm:$0xff]  }
 0x6e5   :  { %13411 = vmatpush1.bf16.msra.mxu0 %v16012_v21  ;;  %13492 = vmatprep.subr.bf16.mxu1 %v16017_v8  ;;  %v16072_v21 = vld [vmem:[%s22054_s5 + $0xd0] ss:$24 sps:$4 sm:$0xff]   ;;  %v16077_v8 = vld [vmem:[%s22054_s5 + $0x104] ss:$24 sps:$4 sm:$0xff]  }
 0x6e6   :  { %13412 = vmatprep.subr.bf16.mxu0 %v16020_v63  ;;  %v16075_v63 = vld [vmem:[%s22054_s5 + $0x100] ss:$24 sps:$4 sm:$0xff]  }
 0x6e8   :  { %13493 = vmatpush1.bf16.msra.mxu1 %v16015_v58  ;;  %v16080_v58 = vld [vmem:[%s22054_s5 + $0x134] ss:$24 sps:$4 sm:$0xff]  }
 0x6e9   :  { %13413 = vmatpush1.bf16.msra.mxu0 %v16018_v23  ;;  %13494 = vmatprep.subr.bf16.mxu1 %v16023_v17  ;;  %v16078_v23 = vld [vmem:[%s22054_s5 + $0x130] ss:$24 sps:$4 sm:$0xff]   ;;  %v15344_v17 = vld [vmem:[%s22053_s4] ss:$0 sm:$0xff] }
 0x6ea   :  { %13414 = vmatprep.subr.bf16.mxu0 %v16026_v26  ;;  %v16083_v26 = vld [vmem:[%s22054_s5 + $0x164] ss:$24 sps:$4 sm:$0xff]  }
 0x6ec   :  { %13495 = vmatpush1.bf16.msra.mxu1 %v16021_v27 }
 0x6ed   :  { %13415 = vmatpush1.bf16.msra.mxu0 %v16024_v28  ;;  %13496 = vmatprep.subr.bf16.mxu1 %v16029_v57  ;;  %v12124_v57 = vadd.f32 %v21652_v12, %v15344_v17  ;;  %v16084_v12 = vld [vmem:[%s22054_s5 + $0x190] ss:$24 sps:$4 sm:$0xff]  }
 0x6ee   :  { %13416 = vmatprep.subr.bf16.mxu0 %v16032_v55  ;;  %v16150_v17 = vld [vmem:[%s22054_s5 + $0x5b0] ss:$24 sps:$4 sm:$0xff]  }
 0x6f0   :  { %13497 = vmatpush1.bf16.msra.mxu1 %v16027_v31 }
 0x6f1   :  { %13417 = vmatpush1.bf16.msra.mxu0 %v16030_v33  ;;  %13498 = vmatprep.subr.bf16.mxu1 %v16035_v35  ;;  %v16081_v33 = vld [vmem:[%s22054_s5 + $0x160] ss:$24 sps:$4 sm:$0xff]  }
 0x6f2   :  { %13418 = vmatprep.subr.bf16.mxu0 %v16038_v36  ;;  %v16086_v36 = vld [vmem:[%s22054_s5 + $0x194] ss:$24 sps:$4 sm:$0xff]  }
 0x6f4   :  { %13499 = vmatpush1.bf16.msra.mxu1 %v16033_v3 }
 0x6f5   :  { %13419 = vmatpush1.bf16.msra.mxu0 %v16036_v22  ;;  %13500 = vmatprep.subr.bf16.mxu1 %v16041_v37  ;;  %v16089_v22 = vld [vmem:[%s22054_s5 + $0x1c4] ss:$24 sps:$4 sm:$0xff]   ;;  %v16087_v37 = vld [vmem:[%s22054_s5 + $0x1c0] ss:$24 sps:$4 sm:$0xff]  }
 0x6f6   :  { %13420 = vmatprep.subr.bf16.mxu0 %v16044_v41  ;;  %v16092_v41 = vld [vmem:[%s22054_s5 + $0x1f4] ss:$24 sps:$4 sm:$0xff]  }
 0x6f8   :  { %13501 = vmatpush1.bf16.msra.mxu1 %v16039_v42  ;;  %v16090_v42 = vld [vmem:[%s22054_s5 + $0x1f0] ss:$24 sps:$4 sm:$0xff]  }
 0x6f9   :  { %13421 = vmatpush1.bf16.msra.mxu0 %v16042_v47  ;;  %13502 = vmatprep.subr.bf16.mxu1 %v16047_v30  ;;  %v16095_v47 = vld [vmem:[%s22054_s5 + $0x224] ss:$24 sps:$4 sm:$0xff]   ;;  %v16093_v30 = vld [vmem:[%s22054_s5 + $0x220] ss:$24 sps:$4 sm:$0xff]  }
 0x6fa   :  { %13422 = vmatprep.subr.bf16.mxu0 %v16050_v40  ;;  %v16098_v40 = vld [vmem:[%s22054_s5 + $0x254] ss:$24 sps:$4 sm:$0xff]  }
 0x6fc   :  { %13503 = vmatpush1.bf16.msra.mxu1 %v16045_v24  ;;  %v16096_v24 = vld [vmem:[%s22054_s5 + $0x250] ss:$24 sps:$4 sm:$0xff]  }
 0x6fd   :  { %13423 = vmatpush1.bf16.msra.mxu0 %v16048_v39  ;;  %13504 = vmatprep.subr.bf16.mxu1 %v16053_v45  ;;  %v16101_v39 = vld [vmem:[%s22054_s5 + $0x284] ss:$24 sps:$4 sm:$0xff]   ;;  %v16099_v45 = vld [vmem:[%s22054_s5 + $0x280] ss:$24 sps:$4 sm:$0xff]  }
 0x6fe   :  { %13424 = vmatprep.subr.bf16.mxu0 %v16056_v34  ;;  %v16104_v34 = vld [vmem:[%s22054_s5 + $0x2b4] ss:$24 sps:$4 sm:$0xff]  }
 0x700   :  { %13505 = vmatpush1.bf16.msra.mxu1 %v16051_v44  ;;  %v16102_v44 = vld [vmem:[%s22054_s5 + $0x2b0] ss:$24 sps:$4 sm:$0xff]  }
 0x701   :  { %13425 = vmatpush1.bf16.msra.mxu0 %v16054_v4  ;;  %13506 = vmatprep.subr.bf16.mxu1 %v16059_v51  ;;  %v16107_v4 = vld [vmem:[%s22054_s5 + $0x2e4] ss:$24 sps:$4 sm:$0xff]   ;;  %v16105_v51 = vld [vmem:[%s22054_s5 + $0x2e0] ss:$24 sps:$4 sm:$0xff]  }
 0x702   :  { %13517 = vmatprep.subr.bf16.mxu0 %v16062_v13  ;;  %v16110_v13 = vld [vmem:[%s22054_s5 + $0x314] ss:$24 sps:$4 sm:$0xff]  }
 0x704   :  { %13507 = vmatpush1.bf16.msra.mxu1 %v16057_v6  ;;  %v16108_v6 = vld [vmem:[%s22054_s5 + $0x310] ss:$24 sps:$4 sm:$0xff]  }
 0x73a   :  { %v11803_v38 = vpop.f32.mrb[8].mxu1 }
 0x73b   :  { %v15622_v60 = vadd.f32 %v11803_v38, %v1632_v18  ;;  %v11805_v61 = vpop.f32.mrb[9].mxu1  ;;  %v16116_v18 = vld [vmem:[%s22054_s5 + $0x374] ss:$24 sps:$4 sm:$0xff]   ;;  %v16117_v38 = vld [vmem:[%s22054_s5 + $0x3a0] ss:$24 sps:$4 sm:$0xff]  }
 0x73c   :  { %v15623_v48 = vadd.f32 %v11805_v61, %v1636_v54  ;;  %v11807_v5 = vpop.f32.mrb[10].mxu1  ;;  %v16114_v54 = vld [vmem:[%s22054_s5 + $0x370] ss:$24 sps:$4 sm:$0xff]  }
 0x73d   :  { %v11816_v1 = vmax.f32 %v15622_v60, 0.0  ;;  %v11808_v15 = vpop.f32.mrb[11].mxu1  ;;  %v16122_v60 = vld [vmem:[%s22054_s5 + $0x3d4] ss:$24 sps:$4 sm:$0xff]   ;;  %v16120_v61 = vld [vmem:[%s22054_s5 + $0x3d0] ss:$24 sps:$4 sm:$0xff]  }
 0x73e   :  { %v11817_v2 = vmax.f32 %v15623_v48, 0.0  ;;  %v16125_v48 = vld [vmem:[%s22054_s5 + $0x404] ss:$24 sps:$4 sm:$0xff]   ;;  %v16123_v5 = vld [vmem:[%s22054_s5 + $0x400] ss:$24 sps:$4 sm:$0xff]  }
 0x73f   :  { %v21771_v16 = vpack.c.bf16 %v11816_v1, %v11816_v1  ;;  %v16128_v1 = vld [vmem:[%s22054_s5 + $0x434] ss:$24 sps:$4 sm:$0xff]   ;;  %v16126_v15 = vld [vmem:[%s22054_s5 + $0x430] ss:$24 sps:$4 sm:$0xff]  }
 0x740   :  { %v21766_v7 = vpack.c.bf16 %v11817_v2, %v11817_v2  ;;  %v16131_v2 = vld [vmem:[%s22054_s5 + $0x464] ss:$24 sps:$4 sm:$0xff]  }
 0x742   :  { %13426 = vmatprep.mubr.bf16.mxu0 %v21766_v7  ;;  %13508 = vmatprep.mubr.bf16.mxu1 %v21766_v7 }
 0x743   :  { %13427 = vmatmul.mubr.bf16.vlgmr.msra.gmra.mrb[12].mxu0 %v21771_v16  ;;  %13509 = vmatmul.mubr.bf16.vlgmr.msra.gmra.mrb[16].mxu1 %v21771_v16 }
 0x744   :  { %13518 = vmatpush1.bf16.msra.mxu0 %v16060_v10  ;;  %13549 = vmatprep.mubr.bf16.mxu0 %v21560_v29  ;;  %v16069_v29 = vld [vmem:[%s22054_s5 + $0xa0] ss:$24 sps:$4 sm:$0xff]   ;;  %v16134_v10 = vld [vmem:[%s22054_s5 + $0x494] ss:$24 sps:$4 sm:$0xff]  }
 0x745   :  { %13519 = vmatprep.subr.bf16.mxu0 %v16065_v19  ;;  %v16132_v19 = vld [vmem:[%s22054_s5 + $0x490] ss:$24 sps:$4 sm:$0xff]  }
 0x748   :  { %13520 = vmatpush1.bf16.msra.mxu0 %v16063_v50  ;;  %v16137_v50 = vld [vmem:[%s22054_s5 + $0x4c4] ss:$24 sps:$4 sm:$0xff]  }
 0x749   :  { %13521 = vmatprep.subr.bf16.mxu0 %v16068_v62  ;;  %v16135_v62 = vld [vmem:[%s22054_s5 + $0x4c0] ss:$24 sps:$4 sm:$0xff]  }
 0x74c   :  { %13522 = vmatpush1.bf16.msra.mxu0 %v16066_v9  ;;  %v16140_v9 = vld [vmem:[%s22054_s5 + $0x4f4] ss:$24 sps:$4 sm:$0xff]  }
 0x74d   :  { %13523 = vmatprep.subr.bf16.mxu0 %v16071_v56  ;;  %v16138_v56 = vld [vmem:[%s22054_s5 + $0x4f0] ss:$24 sps:$4 sm:$0xff]  }
 0x750   :  { %13524 = vmatpush1.bf16.msra.mxu0 %v16069_v29  ;;  %v16143_v29 = vld [vmem:[%s22054_s5 + $0x524] ss:$24 sps:$4 sm:$0xff]  }
 0x751   :  { %13525 = vmatprep.subr.bf16.mxu0 %v16074_v53  ;;  %v16141_v53 = vld [vmem:[%s22054_s5 + $0x520] ss:$24 sps:$4 sm:$0xff]  }
 0x754   :  { %13526 = vmatpush1.bf16.msra.mxu0 %v16072_v21  ;;  %v16146_v21 = vld [vmem:[%s22054_s5 + $0x554] ss:$24 sps:$4 sm:$0xff]  }
 0x755   :  { %13527 = vmatprep.subr.bf16.mxu0 %v16077_v8  ;;  %v16144_v8 = vld [vmem:[%s22054_s5 + $0x550] ss:$24 sps:$4 sm:$0xff]  }
 0x758   :  { %13528 = vmatpush1.bf16.msra.mxu0 %v16075_v63  ;;  %v16149_v63 = vld [vmem:[%s22054_s5 + $0x584] ss:$24 sps:$4 sm:$0xff]  }
 0x759   :  { %13529 = vmatprep.subr.bf16.mxu0 %v16080_v58  ;;  %v16147_v58 = vld [vmem:[%s22054_s5 + $0x580] ss:$24 sps:$4 sm:$0xff]  }
 0x75a   :  { %v15608_v27 = vpop.f32.mrb[12].mxu1 }
 0x75b   :  { %v15609_v28 = vpop.f32.mrb[13].mxu1 }
 0x75c   :  { %v15610_v55 = vadd.f32 %v15609_v28, %v15608_v27  ;;  %13530 = vmatpush1.bf16.msra.mxu0 %v16078_v23  ;;  %v15611_v31 = vpop.f32.mrb[14].mxu1  ;;  %v16152_v23 = vld [vmem:[%s22054_s5 + $0x5b4] ss:$24 sps:$4 sm:$0xff]   ;;  %v16153_v27 = vld [vmem:[%s22054_s5 + $0x5e0] ss:$24 sps:$4 sm:$0xff]  }
 0x75d   :  { %v15612_v35 = vpop.f32.mrb[15].mxu1  ;;  %13531 = vmatprep.subr.bf16.mxu0 %v16083_v26  ;;  %v16155_v26 = vld [vmem:[%s22054_s5 + $0x5e4] ss:$24 sps:$4 sm:$0xff]  }
 0x75e   :  { %v21827_v3 = vadd.f32 %v15610_v55, %v12124_v57  ;;  %v12361_v28 = vld [vmem:[%s22055_s6] sm:$0x3f] }
 0x75f   :  { %v12366_v57 = vrot.slane %v12361_v28, %v1607_v0  ;;  %v12374_v55 = vrot.slane %v12361_v28, %v1615_v25  ;;  %v12370_v31 = vrot.slane %v12361_v28, %v1611_v11 }
 0x760   :  { %13532 = vmatpush1.bf16.msra.mxu0 %v16081_v33  ;;  %v12378_v33 = vrot.slane %v12361_v28, %v1619_v59 }
 0x761   :  { %13533 = vmatprep.subr.bf16.mxu0 %v16086_v36 }
 0x764   :  { %13534 = vmatpush1.bf16.msra.mxu0 %v16084_v12 }
 0x765   :  { %13535 = vmatprep.subr.bf16.mxu0 %v16089_v22 }
 0x768   :  { %13536 = vmatpush1.bf16.msra.mxu0 %v16087_v37 }
 0x769   :  { %13537 = vmatprep.subr.bf16.mxu0 %v16092_v41 }
 0x76c   :  { %13538 = vmatpush1.bf16.msra.mxu0 %v16090_v42 }
 0x76d   :  { %13539 = vmatprep.subr.bf16.mxu0 %v16095_v47 }
 0x770   :  { %13540 = vmatpush1.bf16.msra.mxu0 %v16093_v30 }
 0x771   :  { %13541 = vmatprep.subr.bf16.mxu0 %v16098_v40 }
 0x774   :  { %13542 = vmatpush1.bf16.msra.mxu0 %v16096_v24 }
 0x775   :  { %13543 = vmatprep.subr.bf16.mxu0 %v16101_v39 }
 0x778   :  { %13544 = vmatpush1.bf16.msra.mxu0 %v16099_v45 }
 0x779   :  { %13545 = vmatprep.subr.bf16.mxu0 %v16104_v34 }
 0x77c   :  { %13546 = vmatpush1.bf16.msra.mxu0 %v16102_v44  ;;  %v12382_v44 = vrot.slane %v12361_v28, %v1623_v46 }
 0x77d   :  { %13547 = vmatprep.subr.bf16.mxu0 %v16107_v4  ;;  %v12386_v4 = vrot.slane %v12361_v28, %v1627_v20 }
 0x780   :  { %13548 = vmatpush1.bf16.msra.mxu0 %v16105_v51 }
 0x781   :  { %13558 = vmatprep.subr.bf16.mxu0 %v16110_v13 }
 0x783   :  { %13550 = vmatmul.mubr.bf16.vlgmr.msra.gmra.mrb[16].mxu0 %v21568_v52  ;;  %v16119_v52 = vld [vmem:[%s22054_s5 + $0x3a4] ss:$24 sps:$4 sm:$0xff]  }
 0x784   :  { %13559 = vmatpush1.bf16.msra.mxu0 %v16108_v6  ;;  %13590 = vmatprep.mubr.bf16.mxu0 %v21766_v7  ;;  %v16129_v7 = vld [vmem:[%s22054_s5 + $0x460] ss:$24 sps:$4 sm:$0xff]  }
 0x785   :  { %13560 = vmatprep.subr.bf16.mxu0 %v16113_v14 }
 0x788   :  { %13561 = vmatpush1.bf16.msra.mxu0 %v16111_v49 }
 0x789   :  { %13562 = vmatprep.subr.bf16.mxu0 %v16116_v18 }
 0x78c   :  { %13563 = vmatpush1.bf16.msra.mxu0 %v16114_v54 }
 0x78d   :  { %13564 = vmatprep.subr.bf16.mxu0 %v16119_v52 }
 0x790   :  { %13565 = vmatpush1.bf16.msra.mxu0 %v16117_v38 }
 0x791   :  { %13566 = vmatprep.subr.bf16.mxu0 %v16122_v60  ;;  %v21995_v60 = vand.u32 127, %v1605_v32 }
 0x793   :  { %vm13607_vm1 = vcmp.lt.s32.totalorder %v21995_v60, 51  ;;  %vm13636_vm3 = vcmp.eq.s32.totalorder %v21995_v60, 0  ;;  %vm13658_vm4 = vcmp.eq.s32.totalorder %v21995_v60, 1  ;;  %vm13681_vm5 = vcmp.eq.s32.totalorder %v21995_v60, 2 }
 0x794   :  { %13567 = vmatpush1.bf16.msra.mxu0 %v16120_v61  ;;  %vm13704_vm6 = vcmp.eq.s32.totalorder %v21995_v60, 3  ;;  %vm13727_vm7 = vcmp.eq.s32.totalorder %v21995_v60, 4  ;;  %vm13750_vm8 = vcmp.eq.s32.totalorder %v21995_v60, 5 }
 0x795   :  { %13568 = vmatprep.subr.bf16.mxu0 %v16125_v48 }
 0x798   :  { %13569 = vmatpush1.bf16.msra.mxu0 %v16123_v5 }
 0x799   :  { %13570 = vmatprep.subr.bf16.mxu0 %v16128_v1 }
 0x79c   :  { %13571 = vmatpush1.bf16.msra.mxu0 %v16126_v15 }
 0x79d   :  { %13572 = vmatprep.subr.bf16.mxu0 %v16131_v2 }
 0x7a0   :  { %13573 = vmatpush1.bf16.msra.mxu0 %v16129_v7 }
 0x7a1   :  { %13574 = vmatprep.subr.bf16.mxu0 %v16134_v10 }
 0x7a4   :  { %13575 = vmatpush1.bf16.msra.mxu0 %v16132_v19 }
 0x7a5   :  { %13576 = vmatprep.subr.bf16.mxu0 %v16137_v50 }
 0x7a8   :  { %13577 = vmatpush1.bf16.msra.mxu0 %v16135_v62 }
 0x7a9   :  { %13578 = vmatprep.subr.bf16.mxu0 %v16140_v9 }
 0x7ac   :  { %13579 = vmatpush1.bf16.msra.mxu0 %v16138_v56 }
 0x7ad   :  { %13580 = vmatprep.subr.bf16.mxu0 %v16143_v29 }
 0x7b0   :  { %13581 = vmatpush1.bf16.msra.mxu0 %v16141_v53 }
 0x7b1   :  { %13582 = vmatprep.subr.bf16.mxu0 %v16146_v21 }
 0x7b4   :  { %13583 = vmatpush1.bf16.msra.mxu0 %v16144_v8 }
 0x7b5   :  { %13584 = vmatprep.subr.bf16.mxu0 %v16149_v63 }
 0x7b8   :  { %13585 = vmatpush1.bf16.msra.mxu0 %v16147_v58 }
 0x7b9   :  { %13586 = vmatprep.subr.bf16.mxu0 %v16152_v23 }
 0x7bc   :  { %13587 = vmatpush1.bf16.msra.mxu0 %v16150_v17 }
 0x7bd   :  { %13588 = vmatprep.subr.bf16.mxu0 %v16155_v26 }
 0x7c0   :  { %13589 = vmatpush1.bf16.msra.mxu0 %v16153_v27 }
 0x7c3   :  { %13591 = vmatmul.mubr.bf16.vlgmr.msra.gmra.mrb[16].mxu0 %v21771_v16 }
 0x816   :  { %v13428_v35 = vpop.f32.mrb[12].mxu0  ;;  %v13510_v36 = vpop.f32.mrb[16].mxu1 }
 0x817   :  { %v15624_v12 = vadd.f32 %v13428_v35, %v12366_v57  ;;  %v15626_v16 = vadd.f32 %v13510_v36, %v12374_v55  ;;  %v13430_v22 = vpop.f32.mrb[13].mxu0  ;;  %v13512_v37 = vpop.f32.mrb[17].mxu1 }
 0x818   :  { %v15625_v41 = vadd.f32 %v13430_v22, %v12370_v31  ;;  %v15627_v42 = vadd.f32 %v13512_v37, %v12378_v33  ;;  %v13432_v47 = vpop.f32.mrb[14].mxu0  ;;  %v13514_v30 = vpop.f32.mrb[18].mxu1 }
 0x819   :  { %v13609_v0 = vadd.f32 %v15624_v12, %v21827_v3  ;;  %v13663_v25 = vadd.f32 %v15626_v16, %v21827_v3  ;;  %v13433_v40 = vpop.f32.mrb[15].mxu0  ;;  %v13515_v24 = vpop.f32.mrb[19].mxu1 }
 0x81a   :  { %v13599_v11 = vadd.f32 %v15625_v41, %v15624_v12  ;;  %v13640_v39 = vadd.f32 %v15625_v41, %v21827_v3  ;;  %v13686_v59 = vadd.f32 %v15627_v42, %v21827_v3  ;;  %v15569_v40 = vld [vmem:[%s22056_s7] ss:$0 sm:$0xff]  ;;  %s16207_s7 = smov [#allocation2]  }
 0x81b   :  { %s13763_s3 = sshll.u32 %s16207_s7, 4  ;;  %s13764_s3 = int_to_ptr.vmem [resolvable:$true] %s13763_s3 }
 0x81c   :  { %v13600_v45 = vadd.f32 %v15626_v16, %v13599_v11  ;;  %s16181_s16 = scalar_lea.vmem %s13764_s3, 32  ;;  %p16186_p1 = scmp.lt.s32.totalorder %s13764_s3, %s13764_s3 }
 0x81d   :  { %p16182_p0 = scmp.ne.s32.totalorder %s13764_s3, %s16181_s16  ;;  %p16187_p2 = scmp.lt.s32.totalorder %s16181_s16, %s16181_s16 }
 0x81e   :  { %v13601_v34 = vadd.f32 %v15627_v42, %v13600_v45 }
 0x81f   :  { %p16188_p3 = por %p16187_p2, %p16186_p1 }
 0x821   :  { %p16189_p4 = pnand %p16188_p3, %p16182_p0 }
 0x896   :  { %v13592_v51 = vpop.f32.mrb[16].mxu0 }
 0x897   :  { %v15628_v13 = vadd.f32 %v13592_v51, %v12382_v44  ;;  %v13594_v6 = vpop.f32.mrb[17].mxu0 }
 0x898   :  { %v15629_v14 = vadd.f32 %v13594_v6, %v12386_v4  ;;  %v13596_v49 = vpop.f32.mrb[18].mxu0 }
 0x899   :  { %v13602_v18 = vadd.f32 %v15628_v13, %v13601_v34  ;;  %v13709_v54 = vadd.f32 %v15628_v13, %v21827_v3  ;;  %v13597_v52 = vpop.f32.mrb[19].mxu0 }
 0x89a   :  { %v13732_v38 = vadd.f32 %v15629_v14, %v21827_v3 }
 0x89b   :  { %v13603_v61 = vadd.f32 %v15629_v14, %v13602_v18 }
 0x89d   :  { %v13604_v48 = vmul.f32 0.16666667, %v13603_v61 }
 0x89f   :  { %v13664_v43 = vsub.f32 %v13663_v25, %v13604_v48  ;;  %v13610_v46 = vsub.f32 %v13609_v0, %v13604_v48  ;;  %v13687_v20 = vsub.f32 %v13686_v59, %v13604_v48  ;;  %v13641_v5 = vsub.f32 %v13640_v39, %v13604_v48 }
 0x8a0   :  { %v13733_v1 = vsub.f32 %v13732_v38, %v13604_v48  ;;  %v13710_v15 = vsub.f32 %v13709_v54, %v13604_v48 }
 0x8a1   :  { %v13665_v2 = vsel %vm13607_vm1, %v13664_v43, -1e+30  ;;  %v13613_v3 = vsel %vm13607_vm1, %v13610_v46, -1e+30  ;;  %v13688_v10 = vsel %vm13607_vm1, %v13687_v20, -1e+30 }
 0x8a2   :  { %v13666_v32 = vsel %vm13614_vm2, %v13665_v2, -inf  ;;  %v13615_v7 = vsel %vm13614_vm2, %v13613_v3, -inf  ;;  %v13642_v19 = vsel %vm13607_vm1, %v13641_v5, -1e+30  ;;  %v13689_v50 = vsel %vm13614_vm2, %v13688_v10, -inf }
 0x8a3   :  { %13667 = vmax.xlane.f32.xlu1 %v13666_v32  ;;  %13616 = vmax.xlane.f32.xlu0 %v13615_v7  ;;  %v13643_v62 = vsel %vm13614_vm2, %v13642_v19, -inf  ;;  %v13734_v9 = vsel %vm13607_vm1, %v13733_v1, -1e+30  ;;  %v13711_v56 = vsel %vm13607_vm1, %v13710_v15, -1e+30 }
 0x8a4   :  { %v13735_v29 = vsel %vm13614_vm2, %v13734_v9, -inf  ;;  %v13712_v53 = vsel %vm13614_vm2, %v13711_v56, -inf }
 0x8a7   :  { %13690 = vmax.xlane.f32.xlu1 %v13689_v50  ;;  %13644 = vmax.xlane.f32.xlu0 %v13643_v62 }
 0x8ab   :  { %13736 = vmax.xlane.f32.xlu1 %v13735_v29  ;;  %13713 = vmax.xlane.f32.xlu0 %v13712_v53 }
 0x930   :  { %v13668_v21 = vpop.xlane.xlu1 %13667  ;;  %v13617_v8 = vpop.xlane.xlu0 %13616 }
 0x931   :  { %v13669_v63 = vsub.f32 %v13665_v2, %v13668_v21  ;;  %v13618_v58 = vsub.f32 %v13613_v3, %v13617_v8 }
 0x933   :  { %v13619_v23 = vmul.f32 1.442695, %v13618_v58  ;;  %v13670_v17 = vmul.f32 1.442695, %v13669_v63 }
 0x934   :  { %v13691_v26 = vpop.xlane.xlu1 %13690  ;;  %v13645_v27 = vpop.xlane.xlu0 %13644 }
 0x935   :  { %v13692_v28 = vsub.f32 %v13688_v10, %v13691_v26  ;;  %v13646_v57 = vsub.f32 %v13642_v19, %v13645_v27  ;;  %16156 = vpow2.f32 %v13619_v23 }
 0x936   :  { %16158 = vpow2.f32 %v13670_v17 }
 0x937   :  { %v13647_v55 = vmul.f32 1.442695, %v13646_v57  ;;  %v13693_v31 = vmul.f32 1.442695, %v13692_v28 }
 0x938   :  { %v13737_v33 = vpop.xlane.xlu1 %13736  ;;  %v13714_v35 = vpop.xlane.xlu0 %13713 }
 0x939   :  { %v13738_v36 = vsub.f32 %v13734_v9, %v13737_v33  ;;  %v13715_v12 = vsub.f32 %v13711_v56, %v13714_v35  ;;  %16160 = vpow2.f32 %v13647_v55 }
 0x93a   :  { %16162 = vpow2.f32 %v13693_v31 }
 0x93b   :  { %v13716_v16 = vmul.f32 1.442695, %v13715_v12  ;;  %v13739_v22 = vmul.f32 1.442695, %v13738_v36 }
 0x93d   :  { %16164 = vpow2.f32 %v13716_v16 }
 0x93e   :  { %16166 = vpow2.f32 %v13739_v22 }
 0x93f   :  { %v16157_v37 = vpop.eup %16156 }
 0x940   :  { %v13631_v41 = vsel %vm13614_vm2, %v16157_v37, 0.0  ;;  %v16159_v42 = vpop.eup %16158  ;;  %v13627_v59 = vmul.f32 %v16157_v37, %v15569_v40 }
 0x941   :  { %13632 = vadd.xlane.f32.xlu0 %v13631_v41  ;;  %v13676_v30 = vsel %vm13614_vm2, %v16159_v42, 0.0  ;;  %v13672_v51 = vmul.f32 %v16159_v42, %v15569_v40 }
 0x942   :  { %v13628_v44 = vsel %vm13614_vm2, %v13627_v59, 0.0 }
 0x943   :  { %v16161_v47 = vpop.eup %16160  ;;  %v13673_v6 = vsel %vm13614_vm2, %v13672_v51, 0.0 }
 0x944   :  { %v13653_v0 = vsel %vm13614_vm2, %v16161_v47, 0.0  ;;  %v16163_v25 = vpop.eup %16162  ;;  %v13649_v4 = vmul.f32 %v16161_v47, %v15569_v40 }
 0x945   :  { %13677 = vadd.xlane.f32.xlu0 %v13676_v30  ;;  %13654 = vadd.xlane.f32.xlu1 %v13653_v0  ;;  %v13699_v11 = vsel %vm13614_vm2, %v16163_v25, 0.0  ;;  %v13695_v14 = vmul.f32 %v16163_v25, %v15569_v40 }
 0x946   :  { %v13650_v13 = vsel %vm13614_vm2, %v13649_v4, 0.0 }
 0x947   :  { %v16165_v24 = vpop.eup %16164  ;;  %v13696_v18 = vsel %vm13614_vm2, %v13695_v14, 0.0 }
 0x948   :  { %v13722_v39 = vsel %vm13614_vm2, %v16165_v24, 0.0  ;;  %v16167_v45 = vpop.eup %16166  ;;  %v13718_v49 = vmul.f32 %v16165_v24, %v15569_v40 }
 0x949   :  { %13700 = vadd.xlane.f32.xlu1 %v13699_v11  ;;  %13723 = vadd.xlane.f32.xlu0 %v13722_v39  ;;  %v13745_v34 = vsel %vm13614_vm2, %v16167_v45, 0.0  ;;  %v13741_v52 = vmul.f32 %v16167_v45, %v15569_v40 }
 0x94a   :  { %v13719_v54 = vsel %vm13614_vm2, %v13718_v49, 0.0 }
 0x94b   :  { %v13742_v38 = vsel %vm13614_vm2, %v13741_v52, 0.0 }
 0x94d   :  { %13746 = vadd.xlane.f32.xlu1 %v13745_v34  ;;  %13629 = vadd.xlane.f32.xlu0 %v13628_v44 }
 0x951   :  { %13651 = vadd.xlane.f32.xlu1 %v13650_v13  ;;  %13674 = vadd.xlane.f32.xlu0 %v13673_v6 }
 0x955   :  { %13697 = vadd.xlane.f32.xlu1 %v13696_v18  ;;  %13720 = vadd.xlane.f32.xlu0 %v13719_v54 }
 0x959   :  { %13743 = vadd.xlane.f32.xlu1 %v13742_v38 }
 0x9ce   :  { %v13633_v61 = vpop.xlane.xlu0 %13632 }
 0x9cf   :  { %16168 = vrcp.f32 %v13633_v61 }
 0x9d2   :  { %v13655_v48 = vpop.xlane.xlu1 %13654  ;;  %v13678_v43 = vpop.xlane.xlu0 %13677 }
 0x9d3   :  { %16170 = vrcp.f32 %v13655_v48 }
 0x9d4   :  { %16172 = vrcp.f32 %v13678_v43 }
 0x9d6   :  { %v13701_v46 = vpop.xlane.xlu1 %13700  ;;  %v13724_v20 = vpop.xlane.xlu0 %13723 }
 0x9d7   :  { %16174 = vrcp.f32 %v13701_v46 }
 0x9d8   :  { %16176 = vrcp.f32 %v13724_v20 }
 0x9d9   :  { %v16169_v5 = vpop.eup %16168 }
 0x9da   :  { %v13747_v1 = vpop.xlane.xlu1 %13746  ;;  %v13630_v15 = vpop.xlane.xlu0 %13629 }
 0x9db   :  { %16178 = vrcp.f32 %v13747_v1  ;;  %v13635_v3 = vmul.f32 %v16169_v5, %v13630_v15 }
 0x9dd   :  { %v16171_v2 = vpop.eup %16170  ;;  %v13639_v9 = vsel %vm13636_vm3, %v13635_v3, 0.0 }
 0x9de   :  { %v16173_v32 = vpop.eup %16172  ;;  %v13652_v7 = vpop.xlane.xlu1 %13651 }
 0x9df   :  { %v13675_v10 = vpop.xlane.xlu0 %13674  ;;  %v13657_v19 = vmul.f32 %v16171_v2, %v13652_v7 }
 0x9e0   :  { %v13680_v50 = vmul.f32 %v16173_v32, %v13675_v10 }
 0x9e1   :  { %v16175_v62 = vpop.eup %16174  ;;  %v13661_v56 = vsel %vm13658_vm4, %v13657_v19, 0.0 }
 0x9e2   :  { %v16177_v29 = vpop.eup %16176  ;;  %v13662_v53 = vadd.f32 %v13661_v56, %v13639_v9  ;;  %v13698_v21 = vpop.xlane.xlu1 %13697  ;;  %v13684_v63 = vsel %vm13681_vm5, %v13680_v50, 0.0 }
 0x9e3   :  { %v13721_v8 = vpop.xlane.xlu0 %13720  ;;  %v13703_v58 = vmul.f32 %v16175_v62, %v13698_v21 }
 0x9e4   :  { %v13726_v23 = vmul.f32 %v16177_v29, %v13721_v8  ;;  %v13685_v17 = vadd.f32 %v13684_v63, %v13662_v53 }
 0x9e5   :  { %v16179_v26 = vpop.eup %16178  ;;  %v13707_v27 = vsel %vm13704_vm6, %v13703_v58, 0.0 }
 0x9e6   :  { %v13708_v28 = vadd.f32 %v13707_v27, %v13685_v17  ;;  %v13744_v57 = vpop.xlane.xlu1 %13743  ;;  %v13730_v55 = vsel %vm13727_vm7, %v13726_v23, 0.0 }
 0x9e7   :  { %v13749_v31 = vmul.f32 %v16179_v26, %v13744_v57 }
 0x9e8   :  { %v13731_v33 = vadd.f32 %v13730_v55, %v13708_v28 }
 0x9e9   :  { %v13753_v35 = vsel %vm13750_vm8, %v13749_v31, 0.0 }
 0x9ea   :  { %v13754_v36 = vadd.f32 %v13753_v35, %v13731_v33 }
 0x9ec   :  { %13756 = vst.msk [vmem:[#allocation2] sm:$0x3] %vm13755_vm9, %v13754_v36 }
 0x9ed   :  { %16192 = shalt.err (!%p16189_p4)
}
 0x9ee   :  { %s16193_s18 = scalar_lea.hbm %s22057_s8, 32 }
 0x9ef   :  { %p16194_p5 = scmp.ne.s32.totalorder %s22057_s8, %s16193_s18  ;;  %p16197_p6 = scmp.lt.u32.totalorder %s16193_s18, %s22057_s8 }
 0x9f1   :  { %p16199_p7 = pnand %p16197_p6, %p16194_p5 }
 0x9f3   :  { %16202 = shalt.err (!%p16199_p7)
}
 0x9f4   :  { %13766 = dma.vmem_to_hbm [thread:$0]  %s13764_s3, 32, %s22057_s8, [#allocation3]  }
 0x9f5   :  { %16203 = dma.done.wait [#allocation3], 32  }
 0x9f6   :  { %16204 = vsyncadd [#allocation3], 4294967264 }
 0x9f7   :  { %13770 = vsyncpa [#allocation3], 1 }

</bundles_post_ra>
